<compile_context>
chip_gen: v7x
topology: tpu7x:2x2x1
jax: 0.10.0
libtpu: 0.0.40
codegen_flags: <defaults>
</compile_context>

<pallas_src>
import numpy as np

import jax
import jax.numpy as jnp
from jax.experimental import pallas as pl
from jax.experimental.pallas import tpu as pltpu


# Static model geometry: fc1 = Linear(784, 10) with 16 channels after two stride-2 convs
# and a 3x3/3 maxpool implies an 84x84 single-channel input (16 * 7 * 7 = 784).
_H0 = 84            # input spatial
_H1, _C1 = 42, 8    # conv1 output spatial / channels
_H2, _C2 = 21, 16   # conv2 output spatial / channels
_HP = 7             # pooled spatial
_NCLS = 10
_NPAD = 128         # lane-dense padded class dim

_BBLK = 8           # images per grid step (stacked along sublanes)


# ---------------------------------------------------------------------------
# Fused per-batch-block kernel
# ---------------------------------------------------------------------------
def _cnn_tmnist_kernel(x_ref, r1_ref, w1s_ref, b1_ref, r2_ref, w2s_ref, b2_ref,
                       rp_ref, wp_ref, bfc_ref, o_ref):
    f32, bf16 = jnp.float32, jnp.bfloat16
    x = x_ref[...].astype(bf16)                                        # [B*84, 84]

    # ---- conv1 (1 -> 8, k=3, s=2, p=1) + relu; lane-dense [B*42, 42*8] ---------------
    y1 = b1_ref[...]                                                   # [1, 336] f32
    for kh in range(3):
        rows = jnp.dot(r1_ref[kh], x, preferred_element_type=f32)      # row gather [B*42, 84]
        y1 = y1 + jnp.dot(rows.astype(bf16), w1s_ref[kh],
                          preferred_element_type=f32)                  # [B*42, 336]
    y1 = jnp.maximum(y1, 0.0).astype(bf16)

    # ---- conv2 (8 -> 16, k=3, s=2, p=1) + relu; lane-dense [B*21, 21*16] -------------
    y2 = b2_ref[...]                                                   # [1, 336] f32
    for kh in range(3):
        rows = jnp.dot(r2_ref[kh], y1, preferred_element_type=f32)     # [B*21, 336]
        y2 = y2 + jnp.dot(rows.astype(bf16), w2s_ref[kh],
                          preferred_element_type=f32)                  # [B*21, 336]
    y2 = jnp.maximum(y2, 0.0)                                          # f32

    # ---- maxpool 3x3 / 3: VPU max tree + one precomputed row-selection matmul --------
    n = _BBLK * _H2
    rowmax = jnp.maximum(jnp.maximum(y2[0:n - 2], y2[1:n - 1]), y2[2:n])   # [B*21-2, 336]
    prow = jnp.dot(rp_ref[...], rowmax.astype(bf16),
                   preferred_element_type=f32)                         # [7*B, 336]  (hp-major)
    winmax = jnp.maximum(jnp.maximum(prow[:, 0:304], prow[:, 16:320]),
                         prow[:, 32:336])                              # [7*B, 304]
    wm = winmax.astype(bf16)

    # ---- fc1 (784 -> 10, padded to 128 lanes) + softmax ------------------------------
    # wp_ref[hp] fuses the pool column selection with the fc weight; padded class lanes
    # have zero weight and a -1e30 bias, so softmax assigns them exactly 0.
    logits = bfc_ref[...]                                              # [1, 128] f32
    for hp in range(_HP):
        logits = logits + jnp.dot(wm[hp * _BBLK:(hp + 1) * _BBLK, :], wp_ref[hp],
                                  preferred_element_type=f32)          # [B, 128]
    mx = jnp.max(logits, axis=-1, keepdims=True)
    e = jnp.exp(logits - mx)
    probs = e * pl.reciprocal(jnp.sum(e, axis=-1, keepdims=True), approx=True)
    o_ref[...] = probs


# ---------------------------------------------------------------------------
# One-time weight / selection-matrix preprocessing (hoisted out of the forward)
# ---------------------------------------------------------------------------
def prepare_params(params):
    """Builds (host-side, once):
      * structured conv column-weights folding kw taps, column stride-2, padding and the
        Cin->Cout mixing,
      * block-diagonal 0/1 row selectors for the batched (stacked-sublane) layout,
      * the pool row selector (hp-major) and the fused pool-column-select + fc weight,
      * tiled / padded biases.
    Everything that feeds the MXU is cast to bf16 (0/1 selectors are exact)."""
    B = _BBLK
    w1 = np.asarray(params["conv1_w"], np.float32)   # [8, 1, 3, 3]
    b1 = np.asarray(params["conv1_b"], np.float32)   # [8]
    w2 = np.asarray(params["conv2_w"], np.float32)   # [16, 8, 3, 3]
    b2 = np.asarray(params["conv2_b"], np.float32)   # [16]
    wf = np.asarray(params["fc1_w"], np.float32)     # [10, 784]
    bf = np.asarray(params["fc1_b"], np.float32)     # [10]

    # conv1: W1s[kh][j, w*8 + c] = w1[c, 0, kh, kw]  where  j = 2*w + kw - 1 in [0, 84)
    kh, kw, c, w = np.meshgrid(np.arange(3), np.arange(3), np.arange(_C1),
                               np.arange(_H1), indexing="ij")
    j = 2 * w + kw - 1
    ok = (j >= 0) & (j < _H0)
    w1s = np.zeros((3, _H0, _H1 * _C1), np.float32)
    w1s[kh[ok], j[ok], (w * _C1 + c)[ok]] = w1[c[ok], 0, kh[ok], kw[ok]]

    # conv2: W2s[kh][wi*8 + ci, wo*16 + co] = w2[co, ci, kh, kw]  where  wi = 2*wo + kw - 1
    kh, kw, ci, co, wo = np.meshgrid(np.arange(3), np.arange(3), np.arange(_C1),
                                     np.arange(_C2), np.arange(_H2), indexing="ij")
    wi = 2 * wo + kw - 1
    ok = (wi >= 0) & (wi < _H1)
    w2s = np.zeros((3, _H1 * _C1, _H2 * _C2), np.float32)
    w2s[kh[ok], (wi * _C1 + ci)[ok], (wo * _C2 + co)[ok]] = w2[co[ok], ci[ok], kh[ok], kw[ok]]

    # Block-diagonal row selectors for the stride-2 convs (zero rows implement h padding).
    r1 = np.zeros((3, B * _H1, B * _H0), np.float32)
    r2 = np.zeros((3, B * _H2, B * _H1), np.float32)
    for k in range(3):
        for b in range(B):
            for h in range(_H1):
                src = 2 * h + k - 1
                if 0 <= src < _H0:
                    r1[k, b * _H1 + h, b * _H0 + src] = 1.0
            for h in range(_H2):
                src = 2 * h + k - 1
                if 0 <= src < _H1:
                    r2[k, b * _H2 + h, b * _H1 + src] = 1.0

    # Pool row selector: rowmax row (b*21 + 3*hp) -> output row (hp*B + b); hp-major so the
    # fc stage uses aligned static 8-row slices.
    rp = np.zeros((_HP * B, B * _H2 - 2), np.float32)
    for hp in range(_HP):
        for b in range(B):
            rp[hp * B + b, b * _H2 + 3 * hp] = 1.0

    # Fused pool-column-select + fc weight (torch NCHW flatten order c*49 + hp*7 + wp),
    # padded to 128 output lanes.
    wp = np.zeros((_HP, 19 * _C2, _NPAD), np.float32)
    for hp in range(_HP):
        for wpx in range(_HP):
            for cc in range(_C2):
                wp[hp, 48 * wpx + cc, :_NCLS] = wf[:, cc * _HP * _HP + hp * _HP + wpx]

    bfc = np.full((1, _NPAD), -1e30, np.float32)     # padded classes -> softmax prob 0
    bfc[0, :_NCLS] = bf

    bf16 = jnp.bfloat16
    return {
        "r1": jnp.asarray(r1, bf16),
        "w1s": jnp.asarray(w1s, bf16),
        "b1": jnp.asarray(np.tile(b1, _H1)[None, :], jnp.float32),
        "r2": jnp.asarray(r2, bf16),
        "w2s": jnp.asarray(w2s, bf16),
        "b2": jnp.asarray(np.tile(b2, _H2)[None, :], jnp.float32),
        "rp": jnp.asarray(rp, bf16),
        "wp": jnp.asarray(wp, bf16),
        "bfc": jnp.asarray(bfc, jnp.float32),
    }


# ---------------------------------------------------------------------------
# Forward pass: single fused pallas_call, grid over batch blocks of 8 images
# ---------------------------------------------------------------------------
@jax.jit
def cnn_tmnist_forward(x_nchw, prep):
    """x_nchw: [B, 1, 84, 84] float32 -> class probabilities [B, 10]."""
    B = x_nchw.shape[0]
    Bp = pl.cdiv(B, _BBLK) * _BBLK
    x = x_nchw.reshape(B, _H0, _H0)
    if Bp != B:                                       # zero-pad the batch (static shapes)
        x = jnp.concatenate([x, jnp.zeros((Bp - B, _H0, _H0), x.dtype)], axis=0)
    xs = x.reshape(Bp * _H0, _H0)                     # images stacked along sublanes

    out = pl.pallas_call(
        _cnn_tmnist_kernel,
        out_shape=jax.ShapeDtypeStruct((Bp, _NPAD), jnp.float32),
        grid=(Bp // _BBLK,),
        in_specs=[
            pl.BlockSpec((_BBLK * _H0, _H0), lambda b: (b, 0)),                 # image block
            pl.BlockSpec((3, _BBLK * _H1, _BBLK * _H0), lambda b: (0, 0, 0)),   # conv1 row sel
            pl.BlockSpec((3, _H0, _H1 * _C1), lambda b: (0, 0, 0)),             # conv1 col W
            pl.BlockSpec((1, _H1 * _C1), lambda b: (0, 0)),                     # conv1 bias
            pl.BlockSpec((3, _BBLK * _H2, _BBLK * _H1), lambda b: (0, 0, 0)),   # conv2 row sel
            pl.BlockSpec((3, _H1 * _C1, _H2 * _C2), lambda b: (0, 0, 0)),       # conv2 col W
            pl.BlockSpec((1, _H2 * _C2), lambda b: (0, 0)),                     # conv2 bias
            pl.BlockSpec((_HP * _BBLK, _BBLK * _H2 - 2), lambda b: (0, 0)),     # pool row sel
            pl.BlockSpec((_HP, 19 * _C2, _NPAD), lambda b: (0, 0, 0)),          # pool∘fc W
            pl.BlockSpec((1, _NPAD), lambda b: (0, 0)),                         # fc bias (pad)
        ],
        out_specs=pl.BlockSpec((_BBLK, _NPAD), lambda b: (b, 0)),
        compiler_params=pltpu.CompilerParams(
            dimension_semantics=("parallel",),        # v7x: two TCs split the batch blocks
            vmem_limit_bytes=48 * 1024 * 1024),
    )(xs, prep["r1"], prep["w1s"], prep["b1"], prep["r2"], prep["w2s"], prep["b2"],
      prep["rp"], prep["wp"], prep["bfc"])
    return out[:B, :_NCLS]


# ---------------------------------------------------------------------------
# Params + pure-XLA reference (for the self-check in __main__)
# ---------------------------------------------------------------------------
def init_params(key):
    k1, k2, k3, k4, k5, k6 = jax.random.split(key, 6)
    return {
        "conv1_w": 0.10 * jax.random.normal(k1, (8, 1, 3, 3), jnp.float32),
        "conv1_b": 0.10 * jax.random.normal(k2, (8,), jnp.float32),
        "conv2_w": 0.05 * jax.random.normal(k3, (16, 8, 3, 3), jnp.float32),
        "conv2_b": 0.05 * jax.random.normal(k4, (16,), jnp.float32),
        "fc1_w": 0.02 * jax.random.normal(k5, (10, 784), jnp.float32),
        "fc1_b": 0.02 * jax.random.normal(k6, (10,), jnp.float32),
    }


def _reference_forward(x_nchw, params):
    dn = ("NCHW", "OIHW", "NCHW")
    hi = jax.lax.Precision.HIGHEST
    y = jax.lax.conv_general_dilated(x_nchw, params["conv1_w"], (2, 2), [(1, 1), (1, 1)],
                                     dimension_numbers=dn, precision=hi)
    y = jax.nn.relu(y + params["conv1_b"].reshape(1, _C1, 1, 1))
    y = jax.lax.conv_general_dilated(y, params["conv2_w"], (2, 2), [(1, 1), (1, 1)],
                                     dimension_numbers=dn, precision=hi)
    y = jax.nn.relu(y + params["conv2_b"].reshape(1, _C2, 1, 1))
    y = jax.lax.reduce_window(y, -jnp.inf, jax.lax.max,
                              (1, 1, 3, 3), (1, 1, 3, 3), "VALID")
    feat = y.reshape(y.shape[0], -1)                                  # torch NCHW flatten
    logits = jnp.dot(feat, params["fc1_w"].T, precision=hi) + params["fc1_b"]
    return jax.nn.softmax(logits, axis=-1)


if __name__ == "__main__":
    key = jax.random.PRNGKey(0)
    kx, kp = jax.random.split(key)
    B = 13                                              # pads to 16 -> 2 grid steps
    x = jax.random.normal(kx, (B, 1, _H0, _H0), jnp.float32)
    params = init_params(kp)

    prep = prepare_params(params)                       # one-time weight restructuring
    out = jax.block_until_ready(cnn_tmnist_forward(x, prep))

    assert out.shape == (B, _NCLS)
    assert bool(jnp.all(jnp.isfinite(out)))
    assert bool(jnp.allclose(jnp.sum(out, axis=-1), 1.0, atol=5e-3))   # approx reciprocal

    ref = _reference_forward(x, params)
    err = float(jnp.max(jnp.abs(out - ref)))
    assert err < 1e-2, err                              # bf16 MXU operands, f32 accumulate
    print("KERNEL_OK")
</pallas_src>

<mosaic_0001>
module attributes {stable_mosaic.version = 11 : i64} {
  func.func @_cnn_tmnist_kernel(%arg0: i32, %arg1: memref<672x84xf32, #tpu.memory_space<vmem>>, %arg2: memref<3x336x672xbf16, #tpu.memory_space<vmem>>, %arg3: memref<3x84x336xbf16, #tpu.memory_space<vmem>>, %arg4: memref<1x336xf32, #tpu.memory_space<vmem>>, %arg5: memref<3x168x336xbf16, #tpu.memory_space<vmem>>, %arg6: memref<3x336x336xbf16, #tpu.memory_space<vmem>>, %arg7: memref<1x336xf32, #tpu.memory_space<vmem>>, %arg8: memref<56x166xbf16, #tpu.memory_space<vmem>>, %arg9: memref<7x304x128xbf16, #tpu.memory_space<vmem>>, %arg10: memref<1x128xf32, #tpu.memory_space<vmem>>, %arg11: memref<8x128xf32, #tpu.memory_space<vmem>>) attributes {dimension_semantics = [#tpu.dimension_semantics<parallel>], iteration_bounds = array<i64: 2>, scalar_prefetch = 0 : i64, scratch_operands = 0 : i64, tpu.core_type = #tpu.core_type<tc>, window_params = [{transform_indices = @transform_0, window_bounds = array<i64: 672, 84>}, {pipeline_mode = #tpu.pipeline_mode<synchronous>, transform_indices = @transform_1, window_bounds = array<i64: 3, 336, 672>}, {pipeline_mode = #tpu.pipeline_mode<synchronous>, transform_indices = @transform_2, window_bounds = array<i64: 3, 84, 336>}, {pipeline_mode = #tpu.pipeline_mode<synchronous>, transform_indices = @transform_3, window_bounds = array<i64: 1, 336>}, {pipeline_mode = #tpu.pipeline_mode<synchronous>, transform_indices = @transform_4, window_bounds = array<i64: 3, 168, 336>}, {pipeline_mode = #tpu.pipeline_mode<synchronous>, transform_indices = @transform_5, window_bounds = array<i64: 3, 336, 336>}, {pipeline_mode = #tpu.pipeline_mode<synchronous>, transform_indices = @transform_6, window_bounds = array<i64: 1, 336>}, {pipeline_mode = #tpu.pipeline_mode<synchronous>, transform_indices = @transform_7, window_bounds = array<i64: 56, 166>}, {pipeline_mode = #tpu.pipeline_mode<synchronous>, transform_indices = @transform_8, window_bounds = array<i64: 7, 304, 128>}, {pipeline_mode = #tpu.pipeline_mode<synchronous>, transform_indices = @transform_9, window_bounds = array<i64: 1, 128>}, {transform_indices = @transform_10, window_bounds = array<i64: 8, 128>}]} {
    %c0 = arith.constant 0 : index
    %c0_0 = arith.constant 0 : index
    %0 = vector.load %arg1[%c0, %c0_0] : memref<672x84xf32, #tpu.memory_space<vmem>>, vector<672x84xf32>
    %1 = arith.truncf %0 : vector<672x84xf32> to vector<672x84xbf16>
    %c0_1 = arith.constant 0 : index
    %c0_2 = arith.constant 0 : index
    %2 = vector.load %arg4[%c0_1, %c0_2] : memref<1x336xf32, #tpu.memory_space<vmem>>, vector<1x336xf32>
    %c0_3 = arith.constant 0 : index
    %c0_4 = arith.constant 0 : index
    %c0_5 = arith.constant 0 : index
    %3 = vector.load %arg2[%c0_3, %c0_4, %c0_5] : memref<3x336x672xbf16, #tpu.memory_space<vmem>>, vector<1x336x672xbf16>
    %4 = vector.shape_cast %3 : vector<1x336x672xbf16> to vector<336x672xbf16>
    %cst = arith.constant dense<0.000000e+00> : vector<336x84xf32>
    %5 = tpu.matmul %4, %1, %cst {dimension_numbers = #tpu.dot_dimension_numbers<[1], [0], [0], [1], [0, 0, 1, 1], [], []>} : vector<336x672xbf16>, vector<672x84xbf16>, vector<336x84xf32> -> vector<336x84xf32>
    %6 = arith.truncf %5 : vector<336x84xf32> to vector<336x84xbf16>
    %c0_6 = arith.constant 0 : index
    %c0_7 = arith.constant 0 : index
    %c0_8 = arith.constant 0 : index
    %7 = vector.load %arg3[%c0_6, %c0_7, %c0_8] : memref<3x84x336xbf16, #tpu.memory_space<vmem>>, vector<1x84x336xbf16>
    %8 = vector.shape_cast %7 : vector<1x84x336xbf16> to vector<84x336xbf16>
    %cst_9 = arith.constant dense<0.000000e+00> : vector<336x336xf32>
    %9 = tpu.matmul %6, %8, %cst_9 {dimension_numbers = #tpu.dot_dimension_numbers<[1], [0], [0], [1], [0, 0, 1, 1], [], []>} : vector<336x84xbf16>, vector<84x336xbf16>, vector<336x336xf32> -> vector<336x336xf32>
    %10 = vector.broadcast %2 : vector<1x336xf32> to vector<336x336xf32>
    %11 = arith.addf %10, %9 : vector<336x336xf32>
    %c1 = arith.constant 1 : index
    %c0_10 = arith.constant 0 : index
    %c0_11 = arith.constant 0 : index
    %12 = vector.load %arg2[%c1, %c0_10, %c0_11] : memref<3x336x672xbf16, #tpu.memory_space<vmem>>, vector<1x336x672xbf16>
    %13 = vector.shape_cast %12 : vector<1x336x672xbf16> to vector<336x672xbf16>
    %cst_12 = arith.constant dense<0.000000e+00> : vector<336x84xf32>
    %14 = tpu.matmul %13, %1, %cst_12 {dimension_numbers = #tpu.dot_dimension_numbers<[1], [0], [0], [1], [0, 0, 1, 1], [], []>} : vector<336x672xbf16>, vector<672x84xbf16>, vector<336x84xf32> -> vector<336x84xf32>
    %15 = arith.truncf %14 : vector<336x84xf32> to vector<336x84xbf16>
    %c1_13 = arith.constant 1 : index
    %c0_14 = arith.constant 0 : index
    %c0_15 = arith.constant 0 : index
    %16 = vector.load %arg3[%c1_13, %c0_14, %c0_15] : memref<3x84x336xbf16, #tpu.memory_space<vmem>>, vector<1x84x336xbf16>
    %17 = vector.shape_cast %16 : vector<1x84x336xbf16> to vector<84x336xbf16>
    %cst_16 = arith.constant dense<0.000000e+00> : vector<336x336xf32>
    %18 = tpu.matmul %15, %17, %cst_16 {dimension_numbers = #tpu.dot_dimension_numbers<[1], [0], [0], [1], [0, 0, 1, 1], [], []>} : vector<336x84xbf16>, vector<84x336xbf16>, vector<336x336xf32> -> vector<336x336xf32>
    %19 = arith.addf %11, %18 : vector<336x336xf32>
    %c2 = arith.constant 2 : index
    %c0_17 = arith.constant 0 : index
    %c0_18 = arith.constant 0 : index
    %20 = vector.load %arg2[%c2, %c0_17, %c0_18] : memref<3x336x672xbf16, #tpu.memory_space<vmem>>, vector<1x336x672xbf16>
    %21 = vector.shape_cast %20 : vector<1x336x672xbf16> to vector<336x672xbf16>
    %cst_19 = arith.constant dense<0.000000e+00> : vector<336x84xf32>
    %22 = tpu.matmul %21, %1, %cst_19 {dimension_numbers = #tpu.dot_dimension_numbers<[1], [0], [0], [1], [0, 0, 1, 1], [], []>} : vector<336x672xbf16>, vector<672x84xbf16>, vector<336x84xf32> -> vector<336x84xf32>
    %23 = arith.truncf %22 : vector<336x84xf32> to vector<336x84xbf16>
    %c2_20 = arith.constant 2 : index
    %c0_21 = arith.constant 0 : index
    %c0_22 = arith.constant 0 : index
    %24 = vector.load %arg3[%c2_20, %c0_21, %c0_22] : memref<3x84x336xbf16, #tpu.memory_space<vmem>>, vector<1x84x336xbf16>
    %25 = vector.shape_cast %24 : vector<1x84x336xbf16> to vector<84x336xbf16>
    %cst_23 = arith.constant dense<0.000000e+00> : vector<336x336xf32>
    %26 = tpu.matmul %23, %25, %cst_23 {dimension_numbers = #tpu.dot_dimension_numbers<[1], [0], [0], [1], [0, 0, 1, 1], [], []>} : vector<336x84xbf16>, vector<84x336xbf16>, vector<336x336xf32> -> vector<336x336xf32>
    %27 = arith.addf %19, %26 : vector<336x336xf32>
    %cst_24 = arith.constant 0.000000e+00 : f32
    %28 = vector.broadcast %cst_24 : f32 to vector<336x336xf32>
    %29 = arith.maximumf %27, %28 : vector<336x336xf32>
    %30 = arith.truncf %29 : vector<336x336xf32> to vector<336x336xbf16>
    %c0_25 = arith.constant 0 : index
    %c0_26 = arith.constant 0 : index
    %31 = vector.load %arg7[%c0_25, %c0_26] : memref<1x336xf32, #tpu.memory_space<vmem>>, vector<1x336xf32>
    %c0_27 = arith.constant 0 : index
    %c0_28 = arith.constant 0 : index
    %c0_29 = arith.constant 0 : index
    %32 = vector.load %arg5[%c0_27, %c0_28, %c0_29] : memref<3x168x336xbf16, #tpu.memory_space<vmem>>, vector<1x168x336xbf16>
    %33 = vector.shape_cast %32 : vector<1x168x336xbf16> to vector<168x336xbf16>
    %cst_30 = arith.constant dense<0.000000e+00> : vector<168x336xf32>
    %34 = tpu.matmul %33, %30, %cst_30 {dimension_numbers = #tpu.dot_dimension_numbers<[1], [0], [0], [1], [0, 0, 1, 1], [], []>} : vector<168x336xbf16>, vector<336x336xbf16>, vector<168x336xf32> -> vector<168x336xf32>
    %35 = arith.truncf %34 : vector<168x336xf32> to vector<168x336xbf16>
    %c0_31 = arith.constant 0 : index
    %c0_32 = arith.constant 0 : index
    %c0_33 = arith.constant 0 : index
    %36 = vector.load %arg6[%c0_31, %c0_32, %c0_33] : memref<3x336x336xbf16, #tpu.memory_space<vmem>>, vector<1x336x336xbf16>
    %37 = vector.shape_cast %36 : vector<1x336x336xbf16> to vector<336x336xbf16>
    %cst_34 = arith.constant dense<0.000000e+00> : vector<168x336xf32>
    %38 = tpu.matmul %35, %37, %cst_34 {dimension_numbers = #tpu.dot_dimension_numbers<[1], [0], [0], [1], [0, 0, 1, 1], [], []>} : vector<168x336xbf16>, vector<336x336xbf16>, vector<168x336xf32> -> vector<168x336xf32>
    %39 = vector.broadcast %31 : vector<1x336xf32> to vector<168x336xf32>
    %40 = arith.addf %39, %38 : vector<168x336xf32>
    %c1_35 = arith.constant 1 : index
    %c0_36 = arith.constant 0 : index
    %c0_37 = arith.constant 0 : index
    %41 = vector.load %arg5[%c1_35, %c0_36, %c0_37] : memref<3x168x336xbf16, #tpu.memory_space<vmem>>, vector<1x168x336xbf16>
    %42 = vector.shape_cast %41 : vector<1x168x336xbf16> to vector<168x336xbf16>
    %cst_38 = arith.constant dense<0.000000e+00> : vector<168x336xf32>
    %43 = tpu.matmul %42, %30, %cst_38 {dimension_numbers = #tpu.dot_dimension_numbers<[1], [0], [0], [1], [0, 0, 1, 1], [], []>} : vector<168x336xbf16>, vector<336x336xbf16>, vector<168x336xf32> -> vector<168x336xf32>
    %44 = arith.truncf %43 : vector<168x336xf32> to vector<168x336xbf16>
    %c1_39 = arith.constant 1 : index
    %c0_40 = arith.constant 0 : index
    %c0_41 = arith.constant 0 : index
    %45 = vector.load %arg6[%c1_39, %c0_40, %c0_41] : memref<3x336x336xbf16, #tpu.memory_space<vmem>>, vector<1x336x336xbf16>
    %46 = vector.shape_cast %45 : vector<1x336x336xbf16> to vector<336x336xbf16>
    %cst_42 = arith.constant dense<0.000000e+00> : vector<168x336xf32>
    %47 = tpu.matmul %44, %46, %cst_42 {dimension_numbers = #tpu.dot_dimension_numbers<[1], [0], [0], [1], [0, 0, 1, 1], [], []>} : vector<168x336xbf16>, vector<336x336xbf16>, vector<168x336xf32> -> vector<168x336xf32>
    %48 = arith.addf %40, %47 : vector<168x336xf32>
    %c2_43 = arith.constant 2 : index
    %c0_44 = arith.constant 0 : index
    %c0_45 = arith.constant 0 : index
    %49 = vector.load %arg5[%c2_43, %c0_44, %c0_45] : memref<3x168x336xbf16, #tpu.memory_space<vmem>>, vector<1x168x336xbf16>
    %50 = vector.shape_cast %49 : vector<1x168x336xbf16> to vector<168x336xbf16>
    %cst_46 = arith.constant dense<0.000000e+00> : vector<168x336xf32>
    %51 = tpu.matmul %50, %30, %cst_46 {dimension_numbers = #tpu.dot_dimension_numbers<[1], [0], [0], [1], [0, 0, 1, 1], [], []>} : vector<168x336xbf16>, vector<336x336xbf16>, vector<168x336xf32> -> vector<168x336xf32>
    %52 = arith.truncf %51 : vector<168x336xf32> to vector<168x336xbf16>
    %c2_47 = arith.constant 2 : index
    %c0_48 = arith.constant 0 : index
    %c0_49 = arith.constant 0 : index
    %53 = vector.load %arg6[%c2_47, %c0_48, %c0_49] : memref<3x336x336xbf16, #tpu.memory_space<vmem>>, vector<1x336x336xbf16>
    %54 = vector.shape_cast %53 : vector<1x336x336xbf16> to vector<336x336xbf16>
    %cst_50 = arith.constant dense<0.000000e+00> : vector<168x336xf32>
    %55 = tpu.matmul %52, %54, %cst_50 {dimension_numbers = #tpu.dot_dimension_numbers<[1], [0], [0], [1], [0, 0, 1, 1], [], []>} : vector<168x336xbf16>, vector<336x336xbf16>, vector<168x336xf32> -> vector<168x336xf32>
    %56 = arith.addf %48, %55 : vector<168x336xf32>
    %cst_51 = arith.constant 0.000000e+00 : f32
    %57 = vector.broadcast %cst_51 : f32 to vector<168x336xf32>
    %58 = arith.maximumf %56, %57 : vector<168x336xf32>
    %59 = vector.extract_strided_slice %58 {offsets = [0, 0], sizes = [166, 336], strides = [1, 1]} : vector<168x336xf32> to vector<166x336xf32>
    %60 = vector.extract_strided_slice %58 {offsets = [1, 0], sizes = [166, 336], strides = [1, 1]} : vector<168x336xf32> to vector<166x336xf32>
    %61 = arith.maximumf %59, %60 : vector<166x336xf32>
    %62 = vector.extract_strided_slice %58 {offsets = [2, 0], sizes = [166, 336], strides = [1, 1]} : vector<168x336xf32> to vector<166x336xf32>
    %63 = arith.maximumf %61, %62 : vector<166x336xf32>
    %c0_52 = arith.constant 0 : index
    %c0_53 = arith.constant 0 : index
    %64 = vector.load %arg8[%c0_52, %c0_53] : memref<56x166xbf16, #tpu.memory_space<vmem>>, vector<56x166xbf16>
    %65 = arith.truncf %63 : vector<166x336xf32> to vector<166x336xbf16>
    %cst_54 = arith.constant dense<0.000000e+00> : vector<56x336xf32>
    %66 = tpu.matmul %64, %65, %cst_54 {dimension_numbers = #tpu.dot_dimension_numbers<[1], [0], [0], [1], [0, 0, 1, 1], [], []>} : vector<56x166xbf16>, vector<166x336xbf16>, vector<56x336xf32> -> vector<56x336xf32>
    %67 = vector.extract_strided_slice %66 {offsets = [0, 0], sizes = [56, 304], strides = [1, 1]} : vector<56x336xf32> to vector<56x304xf32>
    %68 = vector.extract_strided_slice %66 {offsets = [0, 16], sizes = [56, 304], strides = [1, 1]} : vector<56x336xf32> to vector<56x304xf32>
    %69 = arith.maximumf %67, %68 : vector<56x304xf32>
    %70 = vector.extract_strided_slice %66 {offsets = [0, 32], sizes = [56, 304], strides = [1, 1]} : vector<56x336xf32> to vector<56x304xf32>
    %71 = arith.maximumf %69, %70 : vector<56x304xf32>
    %72 = arith.truncf %71 : vector<56x304xf32> to vector<56x304xbf16>
    %c0_55 = arith.constant 0 : index
    %c0_56 = arith.constant 0 : index
    %73 = vector.load %arg10[%c0_55, %c0_56] : memref<1x128xf32, #tpu.memory_space<vmem>>, vector<1x128xf32>
    %74 = vector.extract_strided_slice %72 {offsets = [0, 0], sizes = [8, 304], strides = [1, 1]} : vector<56x304xbf16> to vector<8x304xbf16>
    %c0_57 = arith.constant 0 : index
    %c0_58 = arith.constant 0 : index
    %c0_59 = arith.constant 0 : index
    %75 = vector.load %arg9[%c0_57, %c0_58, %c0_59] : memref<7x304x128xbf16, #tpu.memory_space<vmem>>, vector<1x304x128xbf16>
    %76 = vector.shape_cast %75 : vector<1x304x128xbf16> to vector<304x128xbf16>
    %cst_60 = arith.constant dense<0.000000e+00> : vector<8x128xf32>
    %77 = tpu.matmul %74, %76, %cst_60 {dimension_numbers = #tpu.dot_dimension_numbers<[1], [0], [0], [1], [0, 0, 1, 1], [], []>} : vector<8x304xbf16>, vector<304x128xbf16>, vector<8x128xf32> -> vector<8x128xf32>
    %78 = vector.broadcast %73 : vector<1x128xf32> to vector<8x128xf32>
    %79 = arith.addf %78, %77 : vector<8x128xf32>
    %80 = vector.extract_strided_slice %72 {offsets = [8, 0], sizes = [8, 304], strides = [1, 1]} : vector<56x304xbf16> to vector<8x304xbf16>
    %c1_61 = arith.constant 1 : index
    %c0_62 = arith.constant 0 : index
    %c0_63 = arith.constant 0 : index
    %81 = vector.load %arg9[%c1_61, %c0_62, %c0_63] : memref<7x304x128xbf16, #tpu.memory_space<vmem>>, vector<1x304x128xbf16>
    %82 = vector.shape_cast %81 : vector<1x304x128xbf16> to vector<304x128xbf16>
    %cst_64 = arith.constant dense<0.000000e+00> : vector<8x128xf32>
    %83 = tpu.matmul %80, %82, %cst_64 {dimension_numbers = #tpu.dot_dimension_numbers<[1], [0], [0], [1], [0, 0, 1, 1], [], []>} : vector<8x304xbf16>, vector<304x128xbf16>, vector<8x128xf32> -> vector<8x128xf32>
    %84 = arith.addf %79, %83 : vector<8x128xf32>
    %85 = vector.extract_strided_slice %72 {offsets = [16, 0], sizes = [8, 304], strides = [1, 1]} : vector<56x304xbf16> to vector<8x304xbf16>
    %c2_65 = arith.constant 2 : index
    %c0_66 = arith.constant 0 : index
    %c0_67 = arith.constant 0 : index
    %86 = vector.load %arg9[%c2_65, %c0_66, %c0_67] : memref<7x304x128xbf16, #tpu.memory_space<vmem>>, vector<1x304x128xbf16>
    %87 = vector.shape_cast %86 : vector<1x304x128xbf16> to vector<304x128xbf16>
    %cst_68 = arith.constant dense<0.000000e+00> : vector<8x128xf32>
    %88 = tpu.matmul %85, %87, %cst_68 {dimension_numbers = #tpu.dot_dimension_numbers<[1], [0], [0], [1], [0, 0, 1, 1], [], []>} : vector<8x304xbf16>, vector<304x128xbf16>, vector<8x128xf32> -> vector<8x128xf32>
    %89 = arith.addf %84, %88 : vector<8x128xf32>
    %90 = vector.extract_strided_slice %72 {offsets = [24, 0], sizes = [8, 304], strides = [1, 1]} : vector<56x304xbf16> to vector<8x304xbf16>
    %c3 = arith.constant 3 : index
    %c0_69 = arith.constant 0 : index
    %c0_70 = arith.constant 0 : index
    %91 = vector.load %arg9[%c3, %c0_69, %c0_70] : memref<7x304x128xbf16, #tpu.memory_space<vmem>>, vector<1x304x128xbf16>
    %92 = vector.shape_cast %91 : vector<1x304x128xbf16> to vector<304x128xbf16>
    %cst_71 = arith.constant dense<0.000000e+00> : vector<8x128xf32>
    %93 = tpu.matmul %90, %92, %cst_71 {dimension_numbers = #tpu.dot_dimension_numbers<[1], [0], [0], [1], [0, 0, 1, 1], [], []>} : vector<8x304xbf16>, vector<304x128xbf16>, vector<8x128xf32> -> vector<8x128xf32>
    %94 = arith.addf %89, %93 : vector<8x128xf32>
    %95 = vector.extract_strided_slice %72 {offsets = [32, 0], sizes = [8, 304], strides = [1, 1]} : vector<56x304xbf16> to vector<8x304xbf16>
    %c4 = arith.constant 4 : index
    %c0_72 = arith.constant 0 : index
    %c0_73 = arith.constant 0 : index
    %96 = vector.load %arg9[%c4, %c0_72, %c0_73] : memref<7x304x128xbf16, #tpu.memory_space<vmem>>, vector<1x304x128xbf16>
    %97 = vector.shape_cast %96 : vector<1x304x128xbf16> to vector<304x128xbf16>
    %cst_74 = arith.constant dense<0.000000e+00> : vector<8x128xf32>
    %98 = tpu.matmul %95, %97, %cst_74 {dimension_numbers = #tpu.dot_dimension_numbers<[1], [0], [0], [1], [0, 0, 1, 1], [], []>} : vector<8x304xbf16>, vector<304x128xbf16>, vector<8x128xf32> -> vector<8x128xf32>
    %99 = arith.addf %94, %98 : vector<8x128xf32>
    %100 = vector.extract_strided_slice %72 {offsets = [40, 0], sizes = [8, 304], strides = [1, 1]} : vector<56x304xbf16> to vector<8x304xbf16>
    %c5 = arith.constant 5 : index
    %c0_75 = arith.constant 0 : index
    %c0_76 = arith.constant 0 : index
    %101 = vector.load %arg9[%c5, %c0_75, %c0_76] : memref<7x304x128xbf16, #tpu.memory_space<vmem>>, vector<1x304x128xbf16>
    %102 = vector.shape_cast %101 : vector<1x304x128xbf16> to vector<304x128xbf16>
    %cst_77 = arith.constant dense<0.000000e+00> : vector<8x128xf32>
    %103 = tpu.matmul %100, %102, %cst_77 {dimension_numbers = #tpu.dot_dimension_numbers<[1], [0], [0], [1], [0, 0, 1, 1], [], []>} : vector<8x304xbf16>, vector<304x128xbf16>, vector<8x128xf32> -> vector<8x128xf32>
    %104 = arith.addf %99, %103 : vector<8x128xf32>
    %105 = vector.extract_strided_slice %72 {offsets = [48, 0], sizes = [8, 304], strides = [1, 1]} : vector<56x304xbf16> to vector<8x304xbf16>
    %c6 = arith.constant 6 : index
    %c0_78 = arith.constant 0 : index
    %c0_79 = arith.constant 0 : index
    %106 = vector.load %arg9[%c6, %c0_78, %c0_79] : memref<7x304x128xbf16, #tpu.memory_space<vmem>>, vector<1x304x128xbf16>
    %107 = vector.shape_cast %106 : vector<1x304x128xbf16> to vector<304x128xbf16>
    %cst_80 = arith.constant dense<0.000000e+00> : vector<8x128xf32>
    %108 = tpu.matmul %105, %107, %cst_80 {dimension_numbers = #tpu.dot_dimension_numbers<[1], [0], [0], [1], [0, 0, 1, 1], [], []>} : vector<8x304xbf16>, vector<304x128xbf16>, vector<8x128xf32> -> vector<8x128xf32>
    %109 = arith.addf %104, %108 : vector<8x128xf32>
    %cst_81 = arith.constant dense<0xFF800000> : vector<8xf32>
    %110 = vector.multi_reduction <maximumf>, %109, %cst_81 [1] : vector<8x128xf32> to vector<8xf32>
    %111 = vector.shape_cast %110 : vector<8xf32> to vector<8x1xf32>
    %112 = vector.broadcast %111 : vector<8x1xf32> to vector<8x128xf32>
    %113 = arith.subf %109, %112 : vector<8x128xf32>
    %114 = math.exp %113 : vector<8x128xf32>
    %cst_82 = arith.constant dense<0.000000e+00> : vector<8xf32>
    %115 = vector.multi_reduction <add>, %114, %cst_82 [1] : vector<8x128xf32> to vector<8xf32>
    %116 = vector.shape_cast %115 : vector<8xf32> to vector<8x1xf32>
    %117 = tpu.reciprocal %116 {approx = true} : vector<8x1xf32> -> vector<8x1xf32>
    %118 = vector.broadcast %117 : vector<8x1xf32> to vector<8x128xf32>
    %119 = arith.mulf %114, %118 : vector<8x128xf32>
    %c0_83 = arith.constant 0 : index
    %c0_84 = arith.constant 0 : index
    %120 = vector.load %arg11[%c0_83, %c0_84] : memref<8x128xf32, #tpu.memory_space<vmem>>, vector<8x128xf32>
    tpu.vector_store %arg11[%c0_83, %c0_84], %119 {strides = array<i32>} : memref<8x128xf32, #tpu.memory_space<vmem>>, vector<8x128xf32>,
    return
  }
  func.func @transform_0(%arg0: i32) -> (i32, i32) {
    %c0_i32 = arith.constant 0 : i32
    %c0_i32_0 = arith.constant 0 : i32
    return %arg0, %c0_i32 : i32, i32
  }
  func.func @transform_1(%arg0: i32) -> (i32, i32, i32) {
    %c0_i32 = arith.constant 0 : i32
    %c0_i32_0 = arith.constant 0 : i32
    %c0_i32_1 = arith.constant 0 : i32
    %c0_i32_2 = arith.constant 0 : i32
    return %c0_i32, %c0_i32_0, %c0_i32_1 : i32, i32, i32
  }
  func.func @transform_2(%arg0: i32) -> (i32, i32, i32) {
    %c0_i32 = arith.constant 0 : i32
    %c0_i32_0 = arith.constant 0 : i32
    %c0_i32_1 = arith.constant 0 : i32
    %c0_i32_2 = arith.constant 0 : i32
    return %c0_i32, %c0_i32_0, %c0_i32_1 : i32, i32, i32
  }
  func.func @transform_3(%arg0: i32) -> (i32, i32) {
    %c0_i32 = arith.constant 0 : i32
    %c0_i32_0 = arith.constant 0 : i32
    %c0_i32_1 = arith.constant 0 : i32
    return %c0_i32, %c0_i32_0 : i32, i32
  }
  func.func @transform_4(%arg0: i32) -> (i32, i32, i32) {
    %c0_i32 = arith.constant 0 : i32
    %c0_i32_0 = arith.constant 0 : i32
    %c0_i32_1 = arith.constant 0 : i32
    %c0_i32_2 = arith.constant 0 : i32
    return %c0_i32, %c0_i32_0, %c0_i32_1 : i32, i32, i32
  }
  func.func @transform_5(%arg0: i32) -> (i32, i32, i32) {
    %c0_i32 = arith.constant 0 : i32
    %c0_i32_0 = arith.constant 0 : i32
    %c0_i32_1 = arith.constant 0 : i32
    %c0_i32_2 = arith.constant 0 : i32
    return %c0_i32, %c0_i32_0, %c0_i32_1 : i32, i32, i32
  }
  func.func @transform_6(%arg0: i32) -> (i32, i32) {
    %c0_i32 = arith.constant 0 : i32
    %c0_i32_0 = arith.constant 0 : i32
    %c0_i32_1 = arith.constant 0 : i32
    return %c0_i32, %c0_i32_0 : i32, i32
  }
  func.func @transform_7(%arg0: i32) -> (i32, i32) {
    %c0_i32 = arith.constant 0 : i32
    %c0_i32_0 = arith.constant 0 : i32
    %c0_i32_1 = arith.constant 0 : i32
    return %c0_i32, %c0_i32_0 : i32, i32
  }
  func.func @transform_8(%arg0: i32) -> (i32, i32, i32) {
    %c0_i32 = arith.constant 0 : i32
    %c0_i32_0 = arith.constant 0 : i32
    %c0_i32_1 = arith.constant 0 : i32
    %c0_i32_2 = arith.constant 0 : i32
    return %c0_i32, %c0_i32_0, %c0_i32_1 : i32, i32, i32
  }
  func.func @transform_9(%arg0: i32) -> (i32, i32) {
    %c0_i32 = arith.constant 0 : i32
    %c0_i32_0 = arith.constant 0 : i32
    %c0_i32_1 = arith.constant 0 : i32
    return %c0_i32, %c0_i32_0 : i32, i32
  }
  func.func @transform_10(%arg0: i32) -> (i32, i32) {
    %c0_i32 = arith.constant 0 : i32
    %c0_i32_0 = arith.constant 0 : i32
    return %arg0, %c0_i32 : i32, i32
  }
}

</mosaic_0001>

<bundles_post_ra>
// kernel: cnn_tmnist_forward.1
= control target key start
LH: loop header
LB: loop body
LE: loop exit
PB: predicated region body
PF: predicated region fallthrough
CT: control target
= control target key end

     0   :  { %15 = vsyncpa [#allocation3], 0  ;;  %s28603_s0 = inlined_call_operand.vmem [shape: f32[1344,84], index: 0, kind: input, shape index: {}]   ;;  %s28604_s1 = inlined_call_operand.vmem [shape: bf16[3,336,672], index: 1, kind: input, shape index: {}]   ;;  %s28605_s2 = inlined_call_operand.vmem [shape: bf16[3,84,336], index: 2, kind: input, shape index: {}]   ;;  %s28606_s3 = inlined_call_operand.vmem [shape: f32[1,336], index: 3, kind: input, shape index: {}]   ;;  %s28607_s4 = inlined_call_operand.vmem [shape: bf16[3,168,336], index: 4, kind: input, shape index: {}]   ;;  %s28608_s5 = inlined_call_operand.vmem [shape: bf16[3,336,336], index: 5, kind: input, shape index: {}]   ;;  %s28609_s6 = inlined_call_operand.vmem [shape: f32[1,336], index: 6, kind: input, shape index: {}]   ;;  %s28610_s7 = inlined_call_operand.vmem [shape: bf16[56,166], index: 7, kind: input, shape index: {}]   ;;  %s28611_s8 = inlined_call_operand.vmem [shape: bf16[7,304,128], index: 8, kind: input, shape index: {}]   ;;  %s28612_s9 = inlined_call_operand.vmem [shape: f32[1,128], index: 9, kind: input, shape index: {}]   ;;  %s28613_s10 = inlined_call_operand.hbm [shape: f32[16,128], index: 10, kind: output, shape index: {}]  }
   0x1   :  { %17 = vsyncpa [#allocation3 + $0x1], 0  ;;  %s22105_s13 = smov 0   ;;  %s22107_s14 = smov 0  }
   0x2   :  { %s22109_s15 = smov 0   ;;  %s22111_s16 = smov 0  }
   0x3 LB: > { %s22126_s17 = sadd.s32 4294967295, %s22042_s16   ;;  %s15589_s18 = sadd.s32 4294967294, %s22042_s16   ;;  %s22042_s16 = sphi %s22111_s16, %s29057_s16   ;;  %s22038_s15 = sphi %s22109_s15, %s29056_s15   ;;  %s22034_s14 = sphi %s22107_s14, %s29055_s14   ;;  %s22030_s13 = sphi %s22105_s13, %s29054_s13  }
   0x4   : > { %s22130_s19 = sadd.s32 1, %s22042_s16   ;;  %s245_s20 = sadd.s32 1, %s22038_s15 }
   0x5   : > { %s242_s21 = ssub.s32 %s22042_s16, %s22130_s19  ;;  %p255_p0 = scmp.ne.s32.totalorder %s22038_s15, %s22034_s14 }
   0x6   : > { %p243_p1 = scmp.eq.s32.totalorder %s242_s21, 0  ;;  %p256_p2 = scmp.eq.s32.totalorder %s22126_s17, 1 }
   0x7   : > { %p261_p3 = scmp.ne.s32.totalorder %s22034_s14, %s22030_s13  ;;  %p262_p4 = scmp.eq.s32.totalorder %s15589_s18, 1 }
   0x8   : > { %s22141_s22 = scalar_select %p243_p1, %s22038_s15, %s245_s20  }
   0x9   : > { %p22143_p5 = por %p256_p2, %p255_p0  ;;  %p22147_p6 = por %p262_p4, %p261_p3 }
   0xa   : > { %p15592_p7 = scmp.ge.s32.totalorder %s22042_s16, 1  ;;  %p316_p8 = scmp.lt.s32.totalorder %s22042_s16, 3 }
   0xc   : > { %p317_p9 = pnand %p15592_p7, %p316_p8 }
   0xe   : > { %320 = sbr.rel (%p317_p9) target bundleno = 5058 (0x13c2), region = 60 }
  0x15   : > { %s354_s25 = smul.u32 84, %s22126_s17  ;;  %v28634_v0 = vmov 0   ;;  %v20814_v1 = vld [vmem:[%s28604_s1 + $0x4] ss:$24 sps:$4 sm:$0xff]   ;;  %v20812_v52 = vld [vmem:[%s28604_s1] ss:$24 sps:$4 sm:$0xff]  }
  0x16   : > { %1287 = vmatprep.subr.bf16.mxu0 %v28634_v0  ;;  %2127 = vmatprep.mubr.bf16.mxu1 %v28634_v0  ;;  %v20815_v53 = vld [vmem:[%s28604_s1 + $0x34] ss:$24 sps:$4 sm:$0xff]   ;;  %v20817_v60 = vld [vmem:[%s28604_s1 + $0x30] ss:$24 sps:$4 sm:$0xff]   ;;  %v20818_v61 = vld [vmem:[%s28604_s1 + $0x64] ss:$24 sps:$4 sm:$0xff]  }
  0x17   : > { %p355_p10 = scmp.lt.s32.totalorder %s354_s25, 167  ;;  %1319 = vmatprep.mubr.bf16.mxu0 %v20814_v1  ;;  %vm1223_vm0 = vcmask 261120   ;;  %vm2085_vm1 = vcmask 1041408   ;;  %vm2021_vm2 = vcmask 687104   ;;  %vm22046_vm3 = vmmov 0   ;;  %s22048_s26 = smov 96  }
  0x18   : > { %vm7425_vm4 = vcmask 654336   ;;  %vm13427_vm5 = vcmask 310272   ;;  %vm12854_vm6 = vcmask 1046528   ;;  %vm13104_vm7 = vcmask 1045504   ;;  %s351_s12 = sand.u32 1, %s22034_s14   ;;  %s17574_s20 = sshll.u32 %s22126_s17, 7 }
  0x19   : > { %s29059_s25 = smov (!%p355_p10, %s354_s25), 167  ;;  %vm13440_vm8 = vcmask 1042432   ;;  %vm13648_vm9 = vcmask 916480   ;;  %vm13747_vm10 = vcmask 785408   ;;  %vm13969_vm11 = vcmask 392192   ;;  %s15593_s18 = sshll.u32 %s351_s12, 3 }
  0x1a   : > { %s15594_s28 = sshll.u32 %s29059_s25, 3  ;;  %s353_s21 = scalar_lea.vmem [#allocation2], %s15593_s18 }
  0x1b   : > { %s22162_s11 = scalar_lea.vmem %s28603_s0, %s15594_s28  ;;  %s22047_s28 = smov 112  }
  0x1c   : > { %v361_v2 = vld [vmem:[%s22162_s11] sm:$0xff]  ;;  %v362_v3 = vld [vmem:[%s22162_s11 + $0x8] sm:$0xff]  ;;  %v363_v4 = vld [vmem:[%s22162_s11 + $0x10] sm:$0xff]  ;;  %s15530_s25 = sshll.u32 %s353_s21, 4  ;;  %s28561_s27 = scalar_lea.hbm %s28613_s10, %s17574_s20  ;;  %s28563_s25 = int_to_ptr.vmem [resolvable:$true] %s15530_s25 }
  0x1d   : > { %v22167_v5 = vpack.c.bf16 %v362_v3, %v361_v2  ;;  %v364_v6 = vld [vmem:[%s22162_s11 + $0x18] sm:$0xff]  ;;  %v365_v8 = vld [vmem:[%s22162_s11 + $0x20] sm:$0xff]  ;;  %v366_v9 = vld [vmem:[%s22162_s11 + $0x28] sm:$0xff]  ;;  %s21980_s29 = scalar_lea.vmem %s28563_s25, 128  ;;  %s22049_s17 = smov [#allocation2]  }
  0x1e   : > { %v22171_v7 = vpack.c.bf16 %v364_v6, %v363_v4  ;;  %v22177_v10 = vpack.c.bf16 %v366_v9, %v365_v8  ;;  %v367_v11 = vld [vmem:[%s22162_s11 + $0x30] sm:$0xff]  ;;  %v368_v12 = vld [vmem:[%s22162_s11 + $0x38] sm:$0xff]  ;;  %v369_v14 = vld [vmem:[%s22162_s11 + $0x40] sm:$0xff]  ;;  %p21981_p11 = scmp.ne.s32.totalorder %s28563_s25, %s21980_s29  ;;  %s21984_s30 = sshll.u32 %s22049_s17, 4  ;;  %s21985_s30 = int_to_ptr.vmem [resolvable:$false] %s21984_s30 }
  0x1f   : > { %1288 = vmatpush1.bf16.msra.mxu0 %v22167_v5  ;;  %v22183_v13 = vpack.c.bf16 %v368_v12, %v367_v11  ;;  %v370_v15 = vld [vmem:[%s22162_s11 + $0x48] sm:$0xff]  ;;  %v371_v17 = vld [vmem:[%s22162_s11 + $0x50] sm:$0xff]  ;;  %v372_v18 = vld [vmem:[%s22162_s11 + $0x58] sm:$0xff]  ;;  %s21986_s18 = scalar_lea.vmem %s21985_s30, 256  ;;  %p21987_p0 = scmp.lt.s32.totalorder %s28563_s25, %s21985_s30 }
  0x20   : > { %1289 = vmatprep.subr.bf16.mxu0 %v28634_v0  ;;  %v22189_v16 = vpack.c.bf16 %v370_v15, %v369_v14  ;;  %v22195_v19 = vpack.c.bf16 %v372_v18, %v371_v17  ;;  %v373_v20 = vld [vmem:[%s22162_s11 + $0x60] sm:$0xff]  ;;  %v374_v21 = vld [vmem:[%s22162_s11 + $0x68] sm:$0xff]  ;;  %v375_v22 = vld [vmem:[%s22162_s11 + $0x70] sm:$0xff]  ;;  %p21982_p12 = pnand %p21981_p11, %p22143_p5  ;;  %p21988_p1 = scmp.lt.s32.totalorder %s21986_s18, %s21980_s29 }
  0x21   : > { %v376_v23 = vld [vmem:[%s22162_s11 + $0x78] sm:$0xff]  ;;  %v22203_v24 = vpack.c.bf16 %v374_v21, %v373_v20  ;;  %v377_v25 = vld [vmem:[%s22162_s11 + $0x80] sm:$0xff]  ;;  %v378_v27 = vld [vmem:[%s22162_s11 + $0x88] sm:$0xff] }
  0x22   : > { %v22208_v26 = vpack.c.bf16 %v376_v23, %v375_v22  ;;  %v379_v28 = vld [vmem:[%s22162_s11 + $0x90] sm:$0xff]  ;;  %v380_v29 = vld [vmem:[%s22162_s11 + $0x98] sm:$0xff]  ;;  %v22215_v30 = vpack.c.bf16 %v378_v27, %v377_v25  ;;  %v381_v31 = vld [vmem:[%s22162_s11 + $0xa0] sm:$0xff]  ;;  %p21983_p13 = pneg %p21982_p12  ;;  %p21989_p2 = por %p21988_p1, %p21987_p0 }
  0x23   : > { %1290 = vmatpush1.bf16.msra.mxu0 %v22171_v7  ;;  %v22220_v32 = vpack.c.bf16 %v380_v29, %v379_v28  ;;  %v382_v33 = vld [vmem:[%s22162_s11 + $0xa8] sm:$0xff]  ;;  %v383_v34 = vld [vmem:[%s22162_s11 + $0xb0] sm:$0xff]  ;;  %v384_v35 = vld [vmem:[%s22162_s11 + $0xb8] sm:$0xff] }
  0x24   : > { %1291 = vmatprep.subr.bf16.mxu0 %v28634_v0  ;;  %v22227_v36 = vpack.c.bf16 %v382_v33, %v381_v31  ;;  %v385_v37 = vld [vmem:[%s22162_s11 + $0xc0] sm:$0xff]  ;;  %v22232_v38 = vpack.c.bf16 %v384_v35, %v383_v34  ;;  %v386_v39 = vld [vmem:[%s22162_s11 + $0xc8] sm:$0xff]  ;;  %v387_v40 = vld [vmem:[%s22162_s11 + $0xd0] sm:$0xff]  ;;  %p21990_p3 = pnand %p21989_p2, %p21983_p13 }
  0x25   : > { %v388_v41 = vld [vmem:[%s22162_s11 + $0xd8] sm:$0xff]  ;;  %v22239_v42 = vpack.c.bf16 %v386_v39, %v385_v37  ;;  %v389_v44 = vld [vmem:[%s22162_s11 + $0xe0] sm:$0xff]  ;;  %v390_v45 = vld [vmem:[%s22162_s11 + $0xe8] sm:$0xff] }
  0x26   : > { %v22243_v43 = vpack.c.bf16 %v388_v41, %v387_v40  ;;  %v391_v46 = vld [vmem:[%s22162_s11 + $0xf0] sm:$0xff]  ;;  %v392_v47 = vld [vmem:[%s22162_s11 + $0xf8] sm:$0xff]  ;;  %v22251_v48 = vpack.c.bf16 %v390_v45, %v389_v44  ;;  %v393_v49 = vld [vmem:[%s22162_s11 + $0x100] sm:$0xff] }
  0x27   : > { %1292 = vmatpush1.bf16.msra.mxu0 %v22177_v10  ;;  %v22256_v50 = vpack.c.bf16 %v392_v47, %v391_v46  ;;  %v394_v51 = vld [vmem:[%s22162_s11 + $0x108] sm:$0xff]  ;;  %v395_v54 = vld [vmem:[%s22162_s11 + $0x110] sm:$0xff]  ;;  %v396_v55 = vld [vmem:[%s22162_s11 + $0x118] sm:$0xff] }
  0x28   : > { %1293 = vmatprep.subr.bf16.mxu0 %v28634_v0  ;;  %v22269_v56 = vpack.c.bf16 %v394_v51, %v393_v49  ;;  %v397_v57 = vld [vmem:[%s22162_s11 + $0x120] sm:$0xff]  ;;  %v22274_v58 = vpack.c.bf16 %v396_v55, %v395_v54  ;;  %v398_v59 = vld [vmem:[%s22162_s11 + $0x128] sm:$0xff]  ;;  %v399_v62 = vld [vmem:[%s22162_s11 + $0x130] sm:$0xff] }
  0x29   : > { %v400_v63 = vld [vmem:[%s22162_s11 + $0x138] sm:$0xff]  ;;  %v22287_v1 = vpack.c.bf16 %v398_v59, %v397_v57  ;;  %v401_v2 = vld [vmem:[%s22162_s11 + $0x140] sm:$0xff]  ;;  %v402_v4 = vld [vmem:[%s22162_s11 + $0x148] sm:$0xff] }
  0x2a   : > { %v22292_v3 = vpack.c.bf16 %v400_v63, %v399_v62  ;;  %v20820_v6 = vld [vmem:[%s28604_s1 + $0x60] ss:$24 sps:$4 sm:$0xff]   ;;  %v20821_v8 = vld [vmem:[%s28604_s1 + $0x94] ss:$24 sps:$4 sm:$0xff]   ;;  %v22303_v9 = vpack.c.bf16 %v402_v4, %v401_v2  ;;  %v20823_v18 = vld [vmem:[%s28604_s1 + $0x90] ss:$24 sps:$4 sm:$0xff]  }
  0x2b   : > { %1294 = vmatpush1.bf16.msra.mxu0 %v22183_v13  ;;  %v403_v11 = vld [vmem:[%s22162_s11 + $0x150] sm:$0xff]  ;;  %v404_v12 = vld [vmem:[%s22162_s11 + $0x158] sm:$0xff]  ;;  %v405_v14 = vld [vmem:[%s22162_s11 + $0x160] sm:$0xff] }
  0x2c   : > { %1295 = vmatprep.subr.bf16.mxu0 %v28634_v0  ;;  %v22310_v15 = vpack.c.bf16 %v404_v12, %v403_v11  ;;  %v406_v17 = vld [vmem:[%s22162_s11 + $0x168] sm:$0xff]  ;;  %v20824_v20 = vld [vmem:[%s28604_s1 + $0xc4] ss:$24 sps:$4 sm:$0xff]   ;;  %v407_v22 = vld [vmem:[%s22162_s11 + $0x170] sm:$0xff] }
  0x2d   : > { %v22321_v21 = vpack.c.bf16 %v406_v17, %v405_v14  ;;  %v408_v23 = vld [vmem:[%s22162_s11 + $0x178] sm:$0xff]  ;;  %v409_v25 = vld [vmem:[%s22162_s11 + $0x180] sm:$0xff]  ;;  %v410_v28 = vld [vmem:[%s22162_s11 + $0x188] sm:$0xff] }
  0x2e   : > { %v22328_v27 = vpack.c.bf16 %v408_v23, %v407_v22  ;;  %v20826_v29 = vld [vmem:[%s28604_s1 + $0xc0] ss:$24 sps:$4 sm:$0xff]   ;;  %v20827_v31 = vld [vmem:[%s28604_s1 + $0xf4] ss:$24 sps:$4 sm:$0xff]   ;;  %v22339_v33 = vpack.c.bf16 %v410_v28, %v409_v25  ;;  %v20829_v41 = vld [vmem:[%s28604_s1 + $0xf0] ss:$24 sps:$4 sm:$0xff]  }
  0x2f   : > { %1296 = vmatpush1.bf16.msra.mxu0 %v22189_v16  ;;  %v411_v34 = vld [vmem:[%s22162_s11 + $0x190] sm:$0xff]  ;;  %v412_v35 = vld [vmem:[%s22162_s11 + $0x198] sm:$0xff]  ;;  %v413_v37 = vld [vmem:[%s22162_s11 + $0x1a0] sm:$0xff] }
  0x30   : > { %1297 = vmatprep.subr.bf16.mxu0 %v28634_v0  ;;  %v22346_v39 = vpack.c.bf16 %v412_v35, %v411_v34  ;;  %v414_v40 = vld [vmem:[%s22162_s11 + $0x1a8] sm:$0xff]  ;;  %v20830_v44 = vld [vmem:[%s28604_s1 + $0x124] ss:$24 sps:$4 sm:$0xff]   ;;  %v415_v45 = vld [vmem:[%s22162_s11 + $0x1b0] sm:$0xff] }
  0x31   : > { %v416_v46 = vld [vmem:[%s22162_s11 + $0x1b8] sm:$0xff]  ;;  %v22359_v47 = vpack.c.bf16 %v414_v40, %v413_v37  ;;  %v417_v49 = vld [vmem:[%s22162_s11 + $0x1c0] sm:$0xff]  ;;  %v20833_v54 = vld [vmem:[%s28604_s1 + $0x154] ss:$24 sps:$4 sm:$0xff]  }
  0x32   : > { %v22364_v51 = vpack.c.bf16 %v416_v46, %v415_v45  ;;  %v419_v55 = vld [vmem:[%s22162_s11 + $0x1d0] sm:$0xff]  ;;  %v420_v57 = vld [vmem:[%s22162_s11 + $0x1d8] sm:$0xff]  ;;  %v422_v62 = vld [vmem:[%s22162_s11 + $0x1e8] sm:$0xff] }
  0x33   : > { %1298 = vmatpush1.bf16.msra.mxu0 %v22195_v19  ;;  %v20835_v63 = vld [vmem:[%s28604_s1 + $0x150] ss:$24 sps:$4 sm:$0xff]   ;;  %v20836_v2 = vld [vmem:[%s28604_s1 + $0x184] ss:$24 sps:$4 sm:$0xff]   ;;  %v20838_v12 = vld [vmem:[%s28604_s1 + $0x180] ss:$24 sps:$4 sm:$0xff]  }
  0x34   : > { %1299 = vmatprep.subr.bf16.mxu0 %v28634_v0  ;;  %v423_v4 = vld [vmem:[%s22162_s11 + $0x1f0] sm:$0xff]  ;;  %v20848_v25 = vld [vmem:[%s28604_s1 + $0x244] ss:$24 sps:$4 sm:$0xff]   ;;  %v20850_v28 = vld [vmem:[%s28604_s1 + $0x240] ss:$24 sps:$4 sm:$0xff]  }
  0x35   : > { %v20839_v14 = vld [vmem:[%s28604_s1 + $0x1b4] ss:$24 sps:$4 sm:$0xff]   ;;  %v20841_v17 = vld [vmem:[%s28604_s1 + $0x1b0] ss:$24 sps:$4 sm:$0xff]   ;;  %v20854_v34 = vld [vmem:[%s28604_s1 + $0x2a4] ss:$24 sps:$4 sm:$0xff]  }
  0x36   : > { %v20845_v22 = vld [vmem:[%s28604_s1 + $0x214] ss:$24 sps:$4 sm:$0xff]   ;;  %v20847_v23 = vld [vmem:[%s28604_s1 + $0x210] ss:$24 sps:$4 sm:$0xff]   ;;  %v20856_v35 = vld [vmem:[%s28604_s1 + $0x2a0] ss:$24 sps:$4 sm:$0xff]  }
  0x37   : > { %1300 = vmatpush1.bf16.msra.mxu0 %v22203_v24  ;;  %v20857_v37 = vld [vmem:[%s28604_s1 + $0x2d4] ss:$24 sps:$4 sm:$0xff]   ;;  %v20859_v40 = vld [vmem:[%s28604_s1 + $0x2d0] ss:$24 sps:$4 sm:$0xff]  }
  0x38   : > { %1301 = vmatprep.subr.bf16.mxu0 %v28634_v0  ;;  %v20863_v45 = vld [vmem:[%s28604_s1 + $0x334] ss:$24 sps:$4 sm:$0xff]   ;;  %v20865_v46 = vld [vmem:[%s28604_s1 + $0x330] ss:$24 sps:$4 sm:$0xff]  }
  0x3b   : > { %1302 = vmatpush1.bf16.msra.mxu0 %v22208_v26 }
  0x3c   : > { %1303 = vmatprep.subr.bf16.mxu0 %v28634_v0 }
  0x3f   : > { %1304 = vmatpush1.bf16.msra.mxu0 %v22215_v30 }
  0x40   : > { %1305 = vmatprep.subr.bf16.mxu0 %v28634_v0 }
  0x43   : > { %1306 = vmatpush1.bf16.msra.mxu0 %v22220_v32 }
  0x44   : > { %1307 = vmatprep.subr.bf16.mxu0 %v28634_v0 }
  0x47   : > { %1308 = vmatpush1.bf16.msra.mxu0 %v22227_v36 }
  0x48   : > { %1309 = vmatprep.subr.bf16.mxu0 %v28634_v0 }
  0x4b   : > { %1310 = vmatpush1.bf16.msra.mxu0 %v22232_v38 }
  0x4c   : > { %1311 = vmatprep.subr.bf16.mxu0 %v28634_v0 }
  0x4f   : > { %1312 = vmatpush1.bf16.msra.mxu0 %v22239_v42 }
  0x50   : > { %1313 = vmatprep.subr.bf16.mxu0 %v28634_v0 }
  0x53   : > { %1314 = vmatpush1.bf16.msra.mxu0 %v22243_v43 }
  0x54   : > { %1315 = vmatprep.subr.bf16.mxu0 %v28634_v0 }
  0x57   : > { %1316 = vmatpush1.bf16.msra.mxu0 %v22251_v48 }
  0x58   : > { %1317 = vmatprep.subr.bf16.mxu0 %v28634_v0 }
  0x5b   : > { %1318 = vmatpush1.bf16.msra.mxu0 %v22256_v50 }
  0x5c   : > { %1488 = vmatprep.subr.bf16.mxu0 %v28634_v0 }
  0x5e   : > { %1320 = vmatmul.mubr.bf16.vlgmr.msra.gmra.mrb[0].mxu0 %v20812_v52  ;;  %v418_v52 = vld [vmem:[%s22162_s11 + $0x1c8] sm:$0xff] }
  0x5f   : > { %1327 = vmatprep.mubr.bf16.mxu0 %v20815_v53  ;;  %1489 = vmatpush1.bf16.msra.mxu0 %v22269_v56  ;;  %v20832_v53 = vld [vmem:[%s28604_s1 + $0x120] ss:$24 sps:$4 sm:$0xff]   ;;  %v22377_v59 = vpack.c.bf16 %v418_v52, %v417_v49  ;;  %v20866_v49 = vld [vmem:[%s28604_s1 + $0x364] ss:$24 sps:$4 sm:$0xff]  }
  0x60   : > { %1490 = vmatprep.subr.bf16.mxu0 %v28634_v0  ;;  %v20868_v52 = vld [vmem:[%s28604_s1 + $0x360] ss:$24 sps:$4 sm:$0xff]  }
  0x63   : > { %1491 = vmatpush1.bf16.msra.mxu0 %v22274_v58 }
  0x64   : > { %1492 = vmatprep.subr.bf16.mxu0 %v28634_v0 }
  0x66   : > { %1328 = vmatmul.mubr.bf16.gmra.mrb[4].mxu0 %v20817_v60  ;;  %v421_v60 = vld [vmem:[%s22162_s11 + $0x1e0] sm:$0xff] }
  0x67   : > { %1335 = vmatprep.mubr.bf16.mxu0 %v20818_v61  ;;  %1493 = vmatpush1.bf16.msra.mxu0 %v22287_v1  ;;  %v22382_v61 = vpack.c.bf16 %v420_v57, %v419_v55  ;;  %v20872_v55 = vld [vmem:[%s28604_s1 + $0x3c4] ss:$24 sps:$4 sm:$0xff]   ;;  %v20874_v57 = vld [vmem:[%s28604_s1 + $0x3c0] ss:$24 sps:$4 sm:$0xff]  }
  0x68   : > { %1494 = vmatprep.subr.bf16.mxu0 %v28634_v0 }
  0x6b   : > { %1495 = vmatpush1.bf16.msra.mxu0 %v22292_v3 }
  0x6c   : > { %1496 = vmatprep.subr.bf16.mxu0 %v28634_v0 }
  0x6e   : > { %1336 = vmatmul.mubr.bf16.gmra.mrb[8].mxu0 %v20820_v6  ;;  %v424_v6 = vld [vmem:[%s22162_s11 + $0x1f8] sm:$0xff] }
  0x6f   : > { %1343 = vmatprep.mubr.bf16.mxu0 %v20821_v8  ;;  %1497 = vmatpush1.bf16.msra.mxu0 %v22303_v9  ;;  %v22395_v8 = vpack.c.bf16 %v422_v62, %v421_v60  ;;  %v22399_v11 = vpack.c.bf16 %v424_v6, %v423_v4  ;;  %v20877_v60 = vld [vmem:[%s28604_s1 + $0xc] ss:$24 sps:$4 sm:$0xff]   ;;  %v20878_v4 = vld [vmem:[%s28604_s1 + $0x3c] ss:$24 sps:$4 sm:$0xff]  }
  0x70   : > { %1498 = vmatprep.subr.bf16.mxu0 %v28634_v0  ;;  %v425_v62 = vld [vmem:[%s22162_s11 + $0x200] sm:$0xff]  ;;  %v427_v6 = vld [vmem:[%s22162_s11 + $0x210] sm:$0xff] }
  0x73   : > { %1499 = vmatpush1.bf16.msra.mxu0 %v22310_v15 }
  0x74   : > { %1500 = vmatprep.subr.bf16.mxu0 %v28634_v0 }
  0x76   : > { %1344 = vmatmul.mubr.bf16.gmra.mrb[12].mxu0 %v20823_v18  ;;  %v20842_v18 = vld [vmem:[%s28604_s1 + $0x1e4] ss:$24 sps:$4 sm:$0xff]  }
  0x77   : > { %1351 = vmatprep.mubr.bf16.mxu0 %v20824_v20  ;;  %1501 = vmatpush1.bf16.msra.mxu0 %v22321_v21  ;;  %v20844_v20 = vld [vmem:[%s28604_s1 + $0x1e0] ss:$24 sps:$4 sm:$0xff]  }
  0x78   : > { %1502 = vmatprep.subr.bf16.mxu0 %v28634_v0 }
  0x7b   : > { %1503 = vmatpush1.bf16.msra.mxu0 %v22328_v27 }
  0x7c   : > { %1504 = vmatprep.subr.bf16.mxu0 %v28634_v0 }
  0x7e   : > { %1352 = vmatmul.mubr.bf16.gmra.mrb[16].mxu0 %v20826_v29  ;;  %v20851_v29 = vld [vmem:[%s28604_s1 + $0x274] ss:$24 sps:$4 sm:$0xff]  }
  0x7f   : > { %1359 = vmatprep.mubr.bf16.mxu0 %v20827_v31  ;;  %1505 = vmatpush1.bf16.msra.mxu0 %v22339_v33  ;;  %v20853_v31 = vld [vmem:[%s28604_s1 + $0x270] ss:$24 sps:$4 sm:$0xff]  }
  0x80   : > { %1506 = vmatprep.subr.bf16.mxu0 %v28634_v0 }
  0x83   : > { %1507 = vmatpush1.bf16.msra.mxu0 %v22346_v39 }
  0x84   : > { %1508 = vmatprep.subr.bf16.mxu0 %v28634_v0 }
  0x86   : > { %1360 = vmatmul.mubr.bf16.gmra.mrb[20].mxu0 %v20829_v41  ;;  %v20860_v41 = vld [vmem:[%s28604_s1 + $0x304] ss:$24 sps:$4 sm:$0xff]  }
  0x87   : > { %1367 = vmatprep.mubr.bf16.mxu0 %v20830_v44  ;;  %1509 = vmatpush1.bf16.msra.mxu0 %v22359_v47  ;;  %v20862_v44 = vld [vmem:[%s28604_s1 + $0x300] ss:$24 sps:$4 sm:$0xff]  }
  0x88   : > { %1510 = vmatprep.subr.bf16.mxu0 %v28634_v0 }
  0x8b   : > { %1511 = vmatpush1.bf16.msra.mxu0 %v22364_v51 }
  0x8c   : > { %1512 = vmatprep.subr.bf16.mxu0 %v28634_v0 }
  0x8e   : > { %1368 = vmatmul.mubr.bf16.gmra.mrb[24].mxu0 %v20832_v53  ;;  %v20869_v53 = vld [vmem:[%s28604_s1 + $0x394] ss:$24 sps:$4 sm:$0xff]  }
  0x8f   : > { %1375 = vmatprep.mubr.bf16.mxu0 %v20833_v54  ;;  %1513 = vmatpush1.bf16.msra.mxu0 %v22377_v59  ;;  %v20871_v54 = vld [vmem:[%s28604_s1 + $0x390] ss:$24 sps:$4 sm:$0xff]  }
  0x90   : > { %1514 = vmatprep.subr.bf16.mxu0 %v28634_v0 }
  0x93   : > { %1515 = vmatpush1.bf16.msra.mxu0 %v22382_v61 }
  0x94   : > { %1516 = vmatprep.subr.bf16.mxu0 %v28634_v0 }
  0x96   : > { %1376 = vmatmul.mubr.bf16.gmra.mrb[28].mxu0 %v20835_v63  ;;  %v426_v63 = vld [vmem:[%s22162_s11 + $0x208] sm:$0xff] }
  0x97   : > { %1383 = vmatprep.mubr.bf16.mxu0 %v20836_v2  ;;  %1517 = vmatpush1.bf16.msra.mxu0 %v22395_v8  ;;  %v20875_v2 = vld [vmem:[%s28604_s1 + $0x8] ss:$24 sps:$4 sm:$0xff]  }
  0x98   : > { %1518 = vmatprep.subr.bf16.mxu0 %v28634_v0 }
  0x9b   : > { %1519 = vmatpush1.bf16.msra.mxu0 %v22399_v11 }
  0x9c   : > { %1689 = vmatprep.subr.bf16.mxu0 %v28634_v0 }
  0x9e   : > { %1384 = vmatmul.mubr.bf16.gmra.mrb[32].mxu0 %v20838_v12  ;;  %v428_v12 = vld [vmem:[%s22162_s11 + $0x218] sm:$0xff] }
  0x9f   : > { %1391 = vmatprep.mubr.bf16.mxu0 %v20839_v14  ;;  %v22492_v14 = vpack.c.bf16 %v426_v63, %v425_v62  ;;  %v20889_v63 = vld [vmem:[%s28604_s1 + $0xc8] ss:$24 sps:$4 sm:$0xff]  }
  0xa6   : > { %1392 = vmatmul.mubr.bf16.gmra.mrb[36].mxu0 %v20841_v17  ;;  %v429_v17 = vld [vmem:[%s22162_s11 + $0x220] sm:$0xff] }
  0xa7   : > { %1399 = vmatprep.mubr.bf16.mxu0 %v20842_v18  ;;  %v22496_v18 = vpack.c.bf16 %v428_v12, %v427_v6  ;;  %v442_v6 = vld [vmem:[%s22162_s11 + $0x288] sm:$0xff] }
  0xae   : > { %1400 = vmatmul.mubr.bf16.gmra.mrb[40].mxu0 %v20844_v20  ;;  %v430_v20 = vld [vmem:[%s22162_s11 + $0x228] sm:$0xff] }
  0xaf   : > { %1407 = vmatprep.mubr.bf16.mxu0 %v20845_v22  ;;  %v20880_v22 = vld [vmem:[%s28604_s1 + $0x38] ss:$24 sps:$4 sm:$0xff]  }
  0xb6   : > { %1408 = vmatmul.mubr.bf16.gmra.mrb[44].mxu0 %v20847_v23  ;;  %v20881_v23 = vld [vmem:[%s28604_s1 + $0x6c] ss:$24 sps:$4 sm:$0xff]  }
  0xb7   : > { %1415 = vmatprep.mubr.bf16.mxu0 %v20848_v25  ;;  %v431_v25 = vld [vmem:[%s22162_s11 + $0x230] sm:$0xff] }
  0xbe   : > { %1416 = vmatmul.mubr.bf16.gmra.mrb[48].mxu0 %v20850_v28  ;;  %v432_v28 = vld [vmem:[%s22162_s11 + $0x238] sm:$0xff] }
  0xbf   : > { %1423 = vmatprep.mubr.bf16.mxu0 %v20851_v29  ;;  %v22509_v29 = vpack.c.bf16 %v430_v20, %v429_v17  ;;  %v443_v17 = vld [vmem:[%s22162_s11 + $0x290] sm:$0xff]  ;;  %v444_v20 = vld [vmem:[%s22162_s11 + $0x298] sm:$0xff] }
  0xc1   : > { %28757 = vst [vmem:[#allocation5_spill] sm:$0xff] %v22509_v29 }
  0xc6   : > { %1424 = vmatmul.mubr.bf16.gmra.mrb[52].mxu0 %v20853_v31  ;;  %v433_v31 = vld [vmem:[%s22162_s11 + $0x240] sm:$0xff] }
  0xc7   : > { %1431 = vmatprep.mubr.bf16.mxu0 %v20854_v34  ;;  %v22514_v34 = vpack.c.bf16 %v432_v28, %v431_v25  ;;  %v20893_v25 = vld [vmem:[%s28604_s1 + $0x12c] ss:$24 sps:$4 sm:$0xff]   ;;  %v20895_v28 = vld [vmem:[%s28604_s1 + $0x128] ss:$24 sps:$4 sm:$0xff]  }
  0xc9   : > { %28758 = vst [vmem:[#allocation6_spill] sm:$0xff] %v22514_v34 }
  0xce   : > { %1432 = vmatmul.mubr.bf16.gmra.mrb[56].mxu0 %v20856_v35  ;;  %v434_v35 = vld [vmem:[%s22162_s11 + $0x248] sm:$0xff] }
  0xcf   : > { %1439 = vmatprep.mubr.bf16.mxu0 %v20857_v37  ;;  %v20883_v37 = vld [vmem:[%s28604_s1 + $0x68] ss:$24 sps:$4 sm:$0xff]  }
  0xd6   : > { %1440 = vmatmul.mubr.bf16.gmra.mrb[60].mxu0 %v20859_v40  ;;  %v20884_v40 = vld [vmem:[%s28604_s1 + $0x9c] ss:$24 sps:$4 sm:$0xff]  }
  0xd7   : > { %1447 = vmatprep.mubr.bf16.mxu0 %v20860_v41  ;;  %v435_v41 = vld [vmem:[%s22162_s11 + $0x250] sm:$0xff] }
  0xde   : > { %1448 = vmatmul.mubr.bf16.gmra.mrb[64].mxu0 %v20862_v44  ;;  %v436_v44 = vld [vmem:[%s22162_s11 + $0x258] sm:$0xff] }
  0xdf   : > { %1455 = vmatprep.mubr.bf16.mxu0 %v20863_v45  ;;  %v22527_v45 = vpack.c.bf16 %v434_v35, %v433_v31  ;;  %v20896_v31 = vld [vmem:[%s28604_s1 + $0x15c] ss:$24 sps:$4 sm:$0xff]   ;;  %v20898_v35 = vld [vmem:[%s28604_s1 + $0x158] ss:$24 sps:$4 sm:$0xff]  }
  0xe1   : > { %28759 = vst [vmem:[#allocation7_spill] sm:$0xff] %v22527_v45 }
  0xe6   : > { %1456 = vmatmul.mubr.bf16.gmra.mrb[68].mxu0 %v20865_v46  ;;  %v437_v46 = vld [vmem:[%s22162_s11 + $0x260] sm:$0xff] }
  0xe7   : > { %1463 = vmatprep.mubr.bf16.mxu0 %v20866_v49  ;;  %v22532_v49 = vpack.c.bf16 %v436_v44, %v435_v41  ;;  %v20902_v41 = vld [vmem:[%s28604_s1 + $0x1bc] ss:$24 sps:$4 sm:$0xff]   ;;  %v20904_v44 = vld [vmem:[%s28604_s1 + $0x1b8] ss:$24 sps:$4 sm:$0xff]  }
  0xe9   : > { %28760 = vst [vmem:[#allocation8_spill] sm:$0xff] %v22532_v49 }
  0xee   : > { %1464 = vmatmul.mubr.bf16.gmra.mrb[72].mxu0 %v20868_v52  ;;  %v438_v52 = vld [vmem:[%s22162_s11 + $0x268] sm:$0xff] }
  0xef   : > { %1471 = vmatprep.mubr.bf16.mxu0 %v20869_v53  ;;  %v20886_v53 = vld [vmem:[%s28604_s1 + $0x98] ss:$24 sps:$4 sm:$0xff]  }
  0xf6   : > { %1472 = vmatmul.mubr.bf16.gmra.mrb[76].mxu0 %v20871_v54  ;;  %v20887_v54 = vld [vmem:[%s28604_s1 + $0xcc] ss:$24 sps:$4 sm:$0xff]  }
  0xf7   : > { %1479 = vmatprep.mubr.bf16.mxu0 %v20872_v55  ;;  %v22543_v55 = vpack.c.bf16 %v438_v52, %v437_v46  ;;  %v20905_v46 = vld [vmem:[%s28604_s1 + $0x1ec] ss:$24 sps:$4 sm:$0xff]   ;;  %v20907_v52 = vld [vmem:[%s28604_s1 + $0x1e8] ss:$24 sps:$4 sm:$0xff]  }
  0xf9   : > { %28761 = vst [vmem:[#allocation9_spill] sm:$0xff] %v22543_v55 }
  0xfe   : > { %1480 = vmatmul.mubr.bf16.gmra.mrb[80].mxu0 %v20874_v57  ;;  %v439_v57 = vld [vmem:[%s22162_s11 + $0x270] sm:$0xff] }
  0xff   : > { %1520 = vmatprep.mubr.bf16.mxu0 %v20877_v60  ;;  %v440_v60 = vld [vmem:[%s22162_s11 + $0x278] sm:$0xff] }
 0x100   : > { %v22549_v62 = vpack.c.bf16 %v440_v60, %v439_v57  ;;  %v20911_v57 = vld [vmem:[%s28604_s1 + $0x24c] ss:$24 sps:$4 sm:$0xff]   ;;  %v20913_v60 = vld [vmem:[%s28604_s1 + $0x248] ss:$24 sps:$4 sm:$0xff]  }
 0x102   : > { %28762 = vst [vmem:[#allocation10_spill] sm:$0xff] %v22549_v62 }
 0x106   : > { %1521 = vmatmul.mubr.bf16.vlgmr.msra.gmra.mrb[0].mxu0 %v20875_v2  ;;  %v20890_v2 = vld [vmem:[%s28604_s1 + $0xfc] ss:$24 sps:$4 sm:$0xff]  }
 0x107   : > { %1528 = vmatprep.mubr.bf16.mxu0 %v20878_v4  ;;  %1690 = vmatpush1.bf16.msra.mxu0 %v22492_v14  ;;  %v441_v4 = vld [vmem:[%s22162_s11 + $0x280] sm:$0xff]  ;;  %s15517_s11 = scalar_lea.sflag [#allocation3], %s351_s12 }
 0x108   : > { %1691 = vmatprep.subr.bf16.mxu0 %v28634_v0  ;;  %v22562_v12 = vpack.c.bf16 %v442_v6, %v441_v4  ;;  %v20917_v4 = vld [vmem:[%s28604_s1 + $0x2ac] ss:$24 sps:$4 sm:$0xff]   ;;  %v20919_v6 = vld [vmem:[%s28604_s1 + $0x2a8] ss:$24 sps:$4 sm:$0xff]  }
 0x10a   : > { %28763 = vst [vmem:[#allocation11_spill] sm:$0xff] %v22562_v12 }
 0x10b   : > { %1692 = vmatpush1.bf16.msra.mxu0 %v22496_v18 }
 0x10c   : > { %1693 = vmatprep.subr.bf16.mxu0 %v28634_v0 }
 0x10e   : > { %1529 = vmatmul.mubr.bf16.gmra.mrb[4].mxu0 %v20880_v22  ;;  %v22567_v22 = vpack.c.bf16 %v444_v20, %v443_v17  ;;  %v20920_v17 = vld [vmem:[%s28604_s1 + $0x2dc] ss:$24 sps:$4 sm:$0xff]   ;;  %v20922_v20 = vld [vmem:[%s28604_s1 + $0x2d8] ss:$24 sps:$4 sm:$0xff]  }
 0x10f   : > { %1536 = vmatprep.mubr.bf16.mxu0 %v20881_v23  ;;  %1694 = vmatpush1.bf16.msra.mxu0 %v22509_v29  ;;  %v20892_v23 = vld [vmem:[%s28604_s1 + $0xf8] ss:$24 sps:$4 sm:$0xff]  }
 0x110   : > { %1695 = vmatprep.subr.bf16.mxu0 %v28634_v0  ;;  %28764 = vst [vmem:[#allocation12_spill] sm:$0xff] %v22567_v22 }
 0x113   : > { %1696 = vmatpush1.bf16.msra.mxu0 %v22514_v34 }
 0x114   : > { %1697 = vmatprep.subr.bf16.mxu0 %v28634_v0 }
 0x116   : > { %1537 = vmatmul.mubr.bf16.gmra.mrb[8].mxu0 %v20883_v37  ;;  %v20899_v37 = vld [vmem:[%s28604_s1 + $0x18c] ss:$24 sps:$4 sm:$0xff]  }
 0x117   : > { %1544 = vmatprep.mubr.bf16.mxu0 %v20884_v40  ;;  %1698 = vmatpush1.bf16.msra.mxu0 %v22527_v45  ;;  %v20901_v40 = vld [vmem:[%s28604_s1 + $0x188] ss:$24 sps:$4 sm:$0xff]  }
 0x118   : > { %1699 = vmatprep.subr.bf16.mxu0 %v28634_v0 }
 0x11b   : > { %1700 = vmatpush1.bf16.msra.mxu0 %v22532_v49 }
 0x11c   : > { %1701 = vmatprep.subr.bf16.mxu0 %v28634_v0 }
 0x11e   : > { %1545 = vmatmul.mubr.bf16.gmra.mrb[12].mxu0 %v20886_v53  ;;  %v20908_v53 = vld [vmem:[%s28604_s1 + $0x21c] ss:$24 sps:$4 sm:$0xff]  }
 0x11f   : > { %1552 = vmatprep.mubr.bf16.mxu0 %v20887_v54  ;;  %1702 = vmatpush1.bf16.msra.mxu0 %v22543_v55  ;;  %v20910_v54 = vld [vmem:[%s28604_s1 + $0x218] ss:$24 sps:$4 sm:$0xff]  }
 0x120   : > { %1703 = vmatprep.subr.bf16.mxu0 %v28634_v0 }
 0x123   : > { %1704 = vmatpush1.bf16.msra.mxu0 %v22549_v62 }
 0x124   : > { %1705 = vmatprep.subr.bf16.mxu0 %v28634_v0 }
 0x126   : > { %1553 = vmatmul.mubr.bf16.gmra.mrb[16].mxu0 %v20889_v63  ;;  %v20914_v63 = vld [vmem:[%s28604_s1 + $0x27c] ss:$24 sps:$4 sm:$0xff]  }
 0x127   : > { %1560 = vmatprep.mubr.bf16.mxu0 %v20890_v2  ;;  %1706 = vmatpush1.bf16.msra.mxu0 %v22562_v12  ;;  %v20916_v2 = vld [vmem:[%s28604_s1 + $0x278] ss:$24 sps:$4 sm:$0xff]  }
 0x128   : > { %1707 = vmatprep.subr.bf16.mxu0 %v28634_v0 }
 0x12b   : > { %1708 = vmatpush1.bf16.msra.mxu0 %v22567_v22 }
 0x12c   : > { %5656 = vmatprep.subr.bf16.mxu0 %v28634_v0 }
 0x12e   : > { %1561 = vmatmul.mubr.bf16.gmra.mrb[20].mxu0 %v20892_v23  ;;  %v20923_v23 = vld [vmem:[%s28604_s1 + $0x30c] ss:$24 sps:$4 sm:$0xff]  }
 0x12f   : > { %1568 = vmatprep.mubr.bf16.mxu0 %v20893_v25  ;;  %v20925_v25 = vld [vmem:[%s28604_s1 + $0x308] ss:$24 sps:$4 sm:$0xff]  }
 0x136   : > { %1569 = vmatmul.mubr.bf16.gmra.mrb[24].mxu0 %v20895_v28  ;;  %v20926_v28 = vld [vmem:[%s28604_s1 + $0x33c] ss:$24 sps:$4 sm:$0xff]  }
 0x137   : > { %1576 = vmatprep.mubr.bf16.mxu0 %v20896_v31  ;;  %v20928_v31 = vld [vmem:[%s28604_s1 + $0x338] ss:$24 sps:$4 sm:$0xff]  }
 0x13e   : > { %1577 = vmatmul.mubr.bf16.gmra.mrb[28].mxu0 %v20898_v35  ;;  %v20929_v35 = vld [vmem:[%s28604_s1 + $0x36c] ss:$24 sps:$4 sm:$0xff]  }
 0x13f   : > { %1584 = vmatprep.mubr.bf16.mxu0 %v20899_v37  ;;  %v20931_v37 = vld [vmem:[%s28604_s1 + $0x368] ss:$24 sps:$4 sm:$0xff]  }
 0x146   : > { %1585 = vmatmul.mubr.bf16.gmra.mrb[32].mxu0 %v20901_v40  ;;  %v20932_v40 = vld [vmem:[%s28604_s1 + $0x39c] ss:$24 sps:$4 sm:$0xff]  }
 0x147   : > { %1592 = vmatprep.mubr.bf16.mxu0 %v20902_v41  ;;  %v20934_v41 = vld [vmem:[%s28604_s1 + $0x398] ss:$24 sps:$4 sm:$0xff]  }
 0x14e   : > { %1593 = vmatmul.mubr.bf16.gmra.mrb[36].mxu0 %v20904_v44  ;;  %v20935_v44 = vld [vmem:[%s28604_s1 + $0x3cc] ss:$24 sps:$4 sm:$0xff]  }
 0x14f   : > { %1600 = vmatprep.mubr.bf16.mxu0 %v20905_v46  ;;  %v20937_v46 = vld [vmem:[%s28604_s1 + $0x3c8] ss:$24 sps:$4 sm:$0xff]  }
 0x156   : > { %1601 = vmatmul.mubr.bf16.gmra.mrb[40].mxu0 %v20907_v52  ;;  %v20940_v52 = vld [vmem:[%s28604_s1 + $0x14] ss:$24 sps:$4 sm:$0xff]  }
 0x157   : > { %1608 = vmatprep.mubr.bf16.mxu0 %v20908_v53  ;;  %v20938_v53 = vld [vmem:[%s28604_s1 + $0x10] ss:$24 sps:$4 sm:$0xff]  }
 0x15e   : > { %1609 = vmatmul.mubr.bf16.gmra.mrb[44].mxu0 %v20910_v54  ;;  %v20941_v54 = vld [vmem:[%s28604_s1 + $0x44] ss:$24 sps:$4 sm:$0xff]  }
 0x15f   : > { %1616 = vmatprep.mubr.bf16.mxu0 %v20911_v57  ;;  %v20943_v57 = vld [vmem:[%s28604_s1 + $0x40] ss:$24 sps:$4 sm:$0xff]  }
 0x166   : > { %1617 = vmatmul.mubr.bf16.gmra.mrb[48].mxu0 %v20913_v60  ;;  %v20944_v60 = vld [vmem:[%s28604_s1 + $0x74] ss:$24 sps:$4 sm:$0xff]  }
 0x167   : > { %1624 = vmatprep.mubr.bf16.mxu0 %v20914_v63  ;;  %v20946_v63 = vld [vmem:[%s28604_s1 + $0x70] ss:$24 sps:$4 sm:$0xff]  }
 0x16e   : > { %1625 = vmatmul.mubr.bf16.gmra.mrb[52].mxu0 %v20916_v2  ;;  %v20947_v2 = vld [vmem:[%s28604_s1 + $0xa4] ss:$24 sps:$4 sm:$0xff]  }
 0x16f   : > { %1632 = vmatprep.mubr.bf16.mxu0 %v20917_v4  ;;  %v20949_v4 = vld [vmem:[%s28604_s1 + $0xa0] ss:$24 sps:$4 sm:$0xff]  }
 0x176   : > { %1633 = vmatmul.mubr.bf16.gmra.mrb[56].mxu0 %v20919_v6  ;;  %v20950_v6 = vld [vmem:[%s28604_s1 + $0xd4] ss:$24 sps:$4 sm:$0xff]  }
 0x177   : > { %1640 = vmatprep.mubr.bf16.mxu0 %v20920_v17  ;;  %v20952_v17 = vld [vmem:[%s28604_s1 + $0xd0] ss:$24 sps:$4 sm:$0xff]  }
 0x17e   : > { %1641 = vmatmul.mubr.bf16.gmra.mrb[60].mxu0 %v20922_v20  ;;  %v20953_v20 = vld [vmem:[%s28604_s1 + $0x104] ss:$24 sps:$4 sm:$0xff]  }
 0x17f   : > { %1648 = vmatprep.mubr.bf16.mxu0 %v20923_v23  ;;  %v21001_v23 = vld [vmem:[%s28605_s2 + $0x4] ss:$12 sps:$4 sm:$0xff]  }
 0x180   : > { %2095 = vmatprep.subr.bf16.mxu1 %v21001_v23  ;;  %v20971_v23 = vld [vmem:[%s28604_s1 + $0x224] ss:$24 sps:$4 sm:$0xff]  }
 0x186   : > { %1649 = vmatmul.mubr.bf16.gmra.mrb[64].mxu0 %v20925_v25  ;;  %v21003_v25 = vld [vmem:[%s28605_s2] ss:$12 sps:$4 sm:$0xff]  }
 0x187   : > { %1656 = vmatprep.mubr.bf16.mxu0 %v20926_v28  ;;  %v21004_v28 = vld [vmem:[%s28605_s2 + $0x1c] ss:$12 sps:$4 sm:$0xff]   ;;  %2096 = vmatpush1.bf16.msra.mxu1 %v21003_v25 }
 0x188   : > { %2097 = vmatprep.subr.bf16.mxu1 %v21004_v28  ;;  %v1931_v25 = vld [vmem:[%s28605_s2 + $0x78] sm:$0x33] }
 0x189   : > { %v15758_v28 = vcombine.high %v1931_v25, %v1931_v25 }
 0x18e   : > { %1657 = vmatmul.mubr.bf16.gmra.mrb[68].mxu0 %v20928_v31  ;;  %v21006_v31 = vld [vmem:[%s28605_s2 + $0x18] ss:$12 sps:$4 sm:$0xff]  }
 0x18f   : > { %1664 = vmatprep.mubr.bf16.mxu0 %v20929_v35  ;;  %v20955_v35 = vld [vmem:[%s28604_s1 + $0x100] ss:$24 sps:$4 sm:$0xff]   ;;  %2098 = vmatpush1.bf16.msra.mxu1 %v21006_v31  ;;  %v15757_v31 = vcombine.low %v1931_v25, %v1931_v25 }
 0x190   : > { %v20997_v25 = vld [vmem:[%s28604_s1 + $0x3a0] ss:$24 sps:$4 sm:$0xff]  }
 0x196   : > { %1665 = vmatmul.mubr.bf16.gmra.mrb[72].mxu0 %v20931_v37  ;;  %v21007_v37 = vld [vmem:[%s28605_s2 + $0x34] ss:$12 sps:$4 sm:$0xff]  }
 0x197   : > { %1672 = vmatprep.mubr.bf16.mxu0 %v20932_v40  ;;  %v20956_v40 = vld [vmem:[%s28604_s1 + $0x134] ss:$24 sps:$4 sm:$0xff]   ;;  %2099 = vmatprep.subr.bf16.mxu1 %v21007_v37  ;;  %v2087_v37 = vsel %vm2085_vm1, %v15757_v31, 0  ;;  %v21000_v31 = vld [vmem:[%s28604_s1 + $0x3d0] ss:$24 sps:$4 sm:$0xff]  }
 0x19e   : > { %1673 = vmatmul.mubr.bf16.gmra.mrb[76].mxu0 %v20934_v41  ;;  %v21009_v41 = vld [vmem:[%s28605_s2 + $0x30] ss:$12 sps:$4 sm:$0xff]  }
 0x19f   : > { %1680 = vmatprep.mubr.bf16.mxu0 %v20935_v44  ;;  %v21010_v44 = vld [vmem:[%s28605_s2 + $0x4c] ss:$12 sps:$4 sm:$0xff]   ;;  %2100 = vmatpush1.bf16.msra.mxu1 %v21009_v41  ;;  %v20976_v41 = vld [vmem:[%s28604_s1 + $0x250] ss:$24 sps:$4 sm:$0xff]  }
 0x1a0   : > { %2101 = vmatprep.subr.bf16.mxu1 %v21010_v44  ;;  %v20977_v44 = vld [vmem:[%s28604_s1 + $0x284] ss:$24 sps:$4 sm:$0xff]  }
 0x1a6   : > { %1681 = vmatmul.mubr.bf16.gmra.mrb[80].mxu0 %v20937_v46  ;;  %v21012_v46 = vld [vmem:[%s28605_s2 + $0x48] ss:$12 sps:$4 sm:$0xff]  }
 0x1a7   : > { %15721 = vmatprep.mubr.msk.bf16.mxu0 %vm1223_vm0, %v20940_v52  ;;  %v20958_v52 = vld [vmem:[%s28604_s1 + $0x130] ss:$24 sps:$4 sm:$0xff]   ;;  %2102 = vmatpush1.bf16.msra.mxu1 %v21012_v46  ;;  %v20979_v46 = vld [vmem:[%s28604_s1 + $0x280] ss:$24 sps:$4 sm:$0xff]  }
 0x1ae   : > { %1722 = vmatmul.mubr.bf16.vlgmr.msra.gmra.mrb[0].mxu0 %v20938_v53  ;;  %v21013_v53 = vld [vmem:[%s28605_s2 + $0x64] ss:$12 sps:$4 sm:$0xff]  }
 0x1af   : > { %15722 = vmatprep.mubr.msk.bf16.mxu0 %vm1223_vm0, %v20941_v54  ;;  %5657 = vmatpush1.bf16.msra.mxu0 %v22167_v5  ;;  %v20959_v54 = vld [vmem:[%s28604_s1 + $0x164] ss:$24 sps:$4 sm:$0xff]  }
 0x1b0   : > { %5658 = vmatprep.subr.bf16.mxu0 %v28634_v0  ;;  %2103 = vmatprep.subr.bf16.mxu1 %v21013_v53  ;;  %v20982_v53 = vld [vmem:[%s28604_s1 + $0x2b0] ss:$24 sps:$4 sm:$0xff]  }
 0x1b3   : > { %5659 = vmatpush1.bf16.msra.mxu0 %v22171_v7 }
 0x1b4   : > { %5660 = vmatprep.subr.bf16.mxu0 %v28634_v0 }
 0x1b6   : > { %1730 = vmatmul.mubr.bf16.gmra.mrb[4].mxu0 %v20943_v57  ;;  %v21015_v57 = vld [vmem:[%s28605_s2 + $0x60] ss:$12 sps:$4 sm:$0xff]  }
 0x1b7   : > { %15723 = vmatprep.mubr.msk.bf16.mxu0 %vm1223_vm0, %v20944_v60  ;;  %5661 = vmatpush1.bf16.msra.mxu0 %v22177_v10  ;;  %v20961_v60 = vld [vmem:[%s28604_s1 + $0x160] ss:$24 sps:$4 sm:$0xff]  }
 0x1b8   : > { %5662 = vmatprep.subr.bf16.mxu0 %v28634_v0  ;;  %2104 = vmatpush1.bf16.msra.mxu1 %v21015_v57  ;;  %v20985_v57 = vld [vmem:[%s28604_s1 + $0x2e0] ss:$24 sps:$4 sm:$0xff]  }
 0x1b9   : > { %15760 = vmatprep.subr.msk.bf16.mxu1 %vm2085_vm1, %v15758_v28  ;;  %v20998_v28 = vld [vmem:[%s28604_s1 + $0x3d4] ss:$24 sps:$4 sm:$0xff]  }
 0x1bb   : > { %5663 = vmatpush1.bf16.msra.mxu0 %v22183_v13 }
 0x1bc   : > { %5664 = vmatprep.subr.bf16.mxu0 %v28634_v0  ;;  %2106 = vmatpush1.bf16.msra.mxu1 %v2087_v37 }
 0x1be   : > { %1738 = vmatmul.mubr.bf16.gmra.mrb[8].mxu0 %v20946_v63  ;;  %v20962_v63 = vld [vmem:[%s28604_s1 + $0x194] ss:$24 sps:$4 sm:$0xff]  }
 0x1bf   : > { %15724 = vmatprep.mubr.msk.bf16.mxu0 %vm1223_vm0, %v20947_v2  ;;  %5665 = vmatpush1.bf16.msra.mxu0 %v22189_v16  ;;  %v20964_v2 = vld [vmem:[%s28604_s1 + $0x190] ss:$24 sps:$4 sm:$0xff]  }
 0x1c0   : > { %5666 = vmatprep.subr.bf16.mxu0 %v28634_v0 }
 0x1c3   : > { %5667 = vmatpush1.bf16.msra.mxu0 %v22195_v19 }
 0x1c4   : > { %5668 = vmatprep.subr.bf16.mxu0 %v28634_v0 }
 0x1c6   : > { %1746 = vmatmul.mubr.bf16.gmra.mrb[12].mxu0 %v20949_v4  ;;  %v20965_v4 = vld [vmem:[%s28604_s1 + $0x1c4] ss:$24 sps:$4 sm:$0xff]  }
 0x1c7   : > { %15725 = vmatprep.mubr.msk.bf16.mxu0 %vm1223_vm0, %v20950_v6  ;;  %5669 = vmatpush1.bf16.msra.mxu0 %v22203_v24  ;;  %v20967_v6 = vld [vmem:[%s28604_s1 + $0x1c0] ss:$24 sps:$4 sm:$0xff]  }
 0x1c8   : > { %5670 = vmatprep.subr.bf16.mxu0 %v28634_v0 }
 0x1cb   : > { %5671 = vmatpush1.bf16.msra.mxu0 %v22208_v26 }
 0x1cc   : > { %5672 = vmatprep.subr.bf16.mxu0 %v28634_v0 }
 0x1ce   : > { %1754 = vmatmul.mubr.bf16.gmra.mrb[16].mxu0 %v20952_v17  ;;  %v20968_v17 = vld [vmem:[%s28604_s1 + $0x1f4] ss:$24 sps:$4 sm:$0xff]  }
 0x1cf   : > { %15726 = vmatprep.mubr.msk.bf16.mxu0 %vm1223_vm0, %v20953_v20  ;;  %5673 = vmatpush1.bf16.msra.mxu0 %v22215_v30  ;;  %v20970_v20 = vld [vmem:[%s28604_s1 + $0x1f0] ss:$24 sps:$4 sm:$0xff]  }
 0x1d0   : > { %5674 = vmatprep.subr.bf16.mxu0 %v28634_v0 }
 0x1d3   : > { %5675 = vmatpush1.bf16.msra.mxu0 %v22220_v32 }
 0x1d4   : > { %5676 = vmatprep.subr.bf16.mxu0 %v28634_v0 }
 0x1d6   : > { %1762 = vmatmul.mubr.bf16.gmra.mrb[20].mxu0 %v20955_v35  ;;  %v20973_v35 = vld [vmem:[%s28604_s1 + $0x220] ss:$24 sps:$4 sm:$0xff]  }
 0x1d7   : > { %15727 = vmatprep.mubr.msk.bf16.mxu0 %vm1223_vm0, %v20956_v40  ;;  %5677 = vmatpush1.bf16.msra.mxu0 %v22227_v36  ;;  %v20974_v40 = vld [vmem:[%s28604_s1 + $0x254] ss:$24 sps:$4 sm:$0xff]  }
 0x1d8   : > { %5678 = vmatprep.subr.bf16.mxu0 %v28634_v0 }
 0x1db   : > { %5679 = vmatpush1.bf16.msra.mxu0 %v22232_v38 }
 0x1dc   : > { %5680 = vmatprep.subr.bf16.mxu0 %v28634_v0 }
 0x1de   : > { %1770 = vmatmul.mubr.bf16.gmra.mrb[24].mxu0 %v20958_v52  ;;  %v20980_v52 = vld [vmem:[%s28604_s1 + $0x2b4] ss:$24 sps:$4 sm:$0xff]  }
 0x1df   : > { %15728 = vmatprep.mubr.msk.bf16.mxu0 %vm1223_vm0, %v20959_v54  ;;  %5681 = vmatpush1.bf16.msra.mxu0 %v22239_v42  ;;  %v20983_v54 = vld [vmem:[%s28604_s1 + $0x2e4] ss:$24 sps:$4 sm:$0xff]  }
 0x1e0   : > { %5682 = vmatprep.subr.bf16.mxu0 %v28634_v0 }
 0x1e3   : > { %5683 = vmatpush1.bf16.msra.mxu0 %v22243_v43 }
 0x1e4   : > { %5684 = vmatprep.subr.bf16.mxu0 %v28634_v0 }
 0x1e6   : > { %1778 = vmatmul.mubr.bf16.gmra.mrb[28].mxu0 %v20961_v60  ;;  %v20986_v60 = vld [vmem:[%s28604_s1 + $0x314] ss:$24 sps:$4 sm:$0xff]  }
 0x1e7   : > { %15729 = vmatprep.mubr.msk.bf16.mxu0 %vm1223_vm0, %v20962_v63  ;;  %5685 = vmatpush1.bf16.msra.mxu0 %v22251_v48  ;;  %v20988_v63 = vld [vmem:[%s28604_s1 + $0x310] ss:$24 sps:$4 sm:$0xff]  }
 0x1e8   : > { %5686 = vmatprep.subr.bf16.mxu0 %v28634_v0 }
 0x1eb   : > { %5687 = vmatpush1.bf16.msra.mxu0 %v22256_v50 }
 0x1ec   : > { %5857 = vmatprep.subr.bf16.mxu0 %v28634_v0 }
 0x1ee   : > { %1786 = vmatmul.mubr.bf16.gmra.mrb[32].mxu0 %v20964_v2  ;;  %v20989_v2 = vld [vmem:[%s28604_s1 + $0x344] ss:$24 sps:$4 sm:$0xff]  }
 0x1ef   : > { %15730 = vmatprep.mubr.msk.bf16.mxu0 %vm1223_vm0, %v20965_v4  ;;  %v20991_v4 = vld [vmem:[%s28604_s1 + $0x340] ss:$24 sps:$4 sm:$0xff]  }
 0x1f6   : > { %1794 = vmatmul.mubr.bf16.gmra.mrb[36].mxu0 %v20967_v6  ;;  %v20992_v6 = vld [vmem:[%s28604_s1 + $0x374] ss:$24 sps:$4 sm:$0xff]  }
 0x1f7   : > { %15731 = vmatprep.mubr.msk.bf16.mxu0 %vm1223_vm0, %v20968_v17  ;;  %v28614_v17 = vmov 0.0  }
 0x1f8   : > { %18428 = vmatprep.subr.bf16.mxu1 %v28614_v17 }
 0x1fe   : > { %1802 = vmatmul.mubr.bf16.gmra.mrb[40].mxu0 %v20970_v20  ;;  %v20994_v20 = vld [vmem:[%s28604_s1 + $0x370] ss:$24 sps:$4 sm:$0xff]  }
 0x1ff   : > { %15732 = vmatprep.mubr.msk.bf16.mxu0 %vm1223_vm0, %v20971_v23  ;;  %v20995_v23 = vld [vmem:[%s28604_s1 + $0x3a4] ss:$24 sps:$4 sm:$0xff]  }
 0x206   : > { %1810 = vmatmul.mubr.bf16.gmra.mrb[44].mxu0 %v20973_v35 }
 0x207   : > { %15733 = vmatprep.mubr.msk.bf16.mxu0 %vm1223_vm0, %v20974_v40 }
 0x20e   : > { %1818 = vmatmul.mubr.bf16.gmra.mrb[48].mxu0 %v20976_v41  ;;  %v21018_v41 = vld [vmem:[%s28605_s2 + $0x8] ss:$12 sps:$4 sm:$0xff]  }
 0x20f   : > { %15734 = vmatprep.mubr.msk.bf16.mxu0 %vm1223_vm0, %v20977_v44 }
 0x216   : > { %1826 = vmatmul.mubr.bf16.gmra.mrb[52].mxu0 %v20979_v46 }
 0x217   : > { %15735 = vmatprep.mubr.msk.bf16.mxu0 %vm1223_vm0, %v20980_v52  ;;  %v21019_v52 = vld [vmem:[%s28605_s2 + $0x20] ss:$12 sps:$4 sm:$0xff]  }
 0x21e   : > { %1834 = vmatmul.mubr.bf16.gmra.mrb[56].mxu0 %v20982_v53 }
 0x21f   : > { %15736 = vmatprep.mubr.msk.bf16.mxu0 %vm1223_vm0, %v20983_v54 }
 0x226   : > { %1842 = vmatmul.mubr.bf16.gmra.mrb[60].mxu0 %v20985_v57 }
 0x227   : > { %15737 = vmatprep.mubr.msk.bf16.mxu0 %vm1223_vm0, %v20986_v60  ;;  %v21020_v60 = vld [vmem:[%s28605_s2 + $0x38] ss:$12 sps:$4 sm:$0xff]  }
 0x22e   : > { %1850 = vmatmul.mubr.bf16.gmra.mrb[64].mxu0 %v20988_v63 }
 0x22f   : > { %15738 = vmatprep.mubr.msk.bf16.mxu0 %vm1223_vm0, %v20989_v2 }
 0x236   : > { %1858 = vmatmul.mubr.bf16.gmra.mrb[68].mxu0 %v20991_v4  ;;  %v21021_v4 = vld [vmem:[%s28605_s2 + $0x50] ss:$12 sps:$4 sm:$0xff]  }
 0x237   : > { %15739 = vmatprep.mubr.msk.bf16.mxu0 %vm1223_vm0, %v20992_v6 }
 0x23e   : > { %1866 = vmatmul.mubr.bf16.gmra.mrb[72].mxu0 %v20994_v20 }
 0x23f   : > { %15740 = vmatprep.mubr.msk.bf16.mxu0 %vm1223_vm0, %v20995_v23 }
 0x246   : > { %1874 = vmatmul.mubr.bf16.gmra.mrb[76].mxu0 %v20997_v25 }
 0x247   : > { %15741 = vmatprep.mubr.msk.bf16.mxu0 %vm1223_vm0, %v20998_v28 }
 0x24e   : > { %1882 = vmatmul.mubr.bf16.gmra.mrb[80].mxu0 %v21000_v31 }
 0x281   : > { %v1723_v35 = vpop.f32.mrb[0].mxu0 }
 0x282   : > { %v1725_v37 = vpop.f32.mrb[1].mxu0 }
 0x283   : > { %v1726_v40 = vpop.f32.mrb[2].mxu0 }
 0x284   : > { %v22883_v44 = vpack.c.bf16 %v1726_v40, %v1723_v35  ;;  %v1728_v46 = vpop.f32.mrb[3].mxu0 }
 0x286   : > { %15761 = vmatmul.mubr.msk.bf16.vlgmr.msra.gmra.mrb[0].mxu1 %vm2021_vm2, %v22883_v44 }
 0x287   : > { %2137 = vmatprep.mubr.bf16.mxu1 %v28634_v0  ;;  %18429 = vmatpush3.bf16.msra.mxu1 %v21018_v41 }
 0x288   : > { %18430 = vmatprep.subr.bf16.mxu1 %v28614_v17 }
 0x289   : > { %v1731_v53 = vpop.f32.mrb[4].mxu0 }
 0x28a   : > { %v1733_v54 = vpop.f32.mrb[5].mxu0 }
 0x28b   : > { %v1734_v57 = vpop.f32.mrb[6].mxu0  ;;  %18431 = vmatpush3.bf16.msra.mxu1 %v21019_v52  ;;  %v21022_v54 = vld [vmem:[%s28605_s2 + $0x68] ss:$12 sps:$4 sm:$0xff]  }
 0x28c   : > { %v22895_v63 = vpack.c.bf16 %v1734_v57, %v1731_v53  ;;  %v1736_v2 = vpop.f32.mrb[7].mxu0  ;;  %18432 = vmatprep.subr.bf16.mxu1 %v28614_v17 }
 0x28d   : > { %v21023_v2 = vld [vmem:[%s28605_s2 + $0x80] ss:$0 sps:$4 sm:$0x33]  }
 0x28e   : > { %15762 = vmatmul.mubr.msk.bf16.gmra.mrb[4].mxu1 %vm2021_vm2, %v22895_v63 }
 0x28f   : > { %2147 = vmatprep.mubr.bf16.mxu1 %v28634_v0  ;;  %18433 = vmatpush3.bf16.msra.mxu1 %v21020_v60 }
 0x290   : > { %18434 = vmatprep.subr.bf16.mxu1 %v28614_v17 }
 0x291   : > { %v1739_v6 = vpop.f32.mrb[8].mxu0 }
 0x292   : > { %v1741_v20 = vpop.f32.mrb[9].mxu0 }
 0x293   : > { %v1742_v23 = vpop.f32.mrb[10].mxu0  ;;  %18435 = vmatpush3.bf16.msra.mxu1 %v21021_v4  ;;  %v2093_v4 = vsel %vm2085_vm1, %v21023_v2, 0 }
 0x294   : > { %v22905_v25 = vpack.c.bf16 %v1742_v23, %v1739_v6  ;;  %v1744_v28 = vpop.f32.mrb[11].mxu0  ;;  %18436 = vmatprep.subr.bf16.mxu1 %v28614_v17 }
 0x296   : > { %15763 = vmatmul.mubr.msk.bf16.gmra.mrb[8].mxu1 %vm2021_vm2, %v22905_v25 }
 0x297   : > { %2157 = vmatprep.mubr.bf16.mxu1 %v28634_v0  ;;  %18437 = vmatpush3.bf16.msra.mxu1 %v21022_v54 }
 0x298   : > { %18438 = vmatprep.subr.bf16.mxu1 %v28614_v17 }
 0x299   : > { %v1747_v31 = vpop.f32.mrb[12].mxu0 }
 0x29a   : > { %v1749_v35 = vpop.f32.mrb[13].mxu0 }
 0x29b   : > { %v1750_v37 = vpop.f32.mrb[14].mxu0  ;;  %18439 = vmatpush3.bf16.msra.mxu1 %v2093_v4 }
 0x29c   : > { %v22911_v40 = vpack.c.bf16 %v1750_v37, %v1747_v31  ;;  %v1752_v41 = vpop.f32.mrb[15].mxu0  ;;  %3480 = vmatprep.subr.bf16.mxu1 %v28634_v0 }
 0x29e   : > { %15764 = vmatmul.mubr.msk.bf16.gmra.mrb[12].mxu1 %vm2021_vm2, %v22911_v40 }
 0x29f   : > { %2167 = vmatprep.mubr.bf16.mxu1 %v28634_v0 }
 0x2a1   : > { %v1755_v46 = vpop.f32.mrb[16].mxu0 }
 0x2a2   : > { %v1757_v52 = vpop.f32.mrb[17].mxu0 }
 0x2a3   : > { %v1758_v53 = vpop.f32.mrb[18].mxu0 }
 0x2a4   : > { %v22919_v57 = vpack.c.bf16 %v1758_v53, %v1755_v46  ;;  %v1760_v60 = vpop.f32.mrb[19].mxu0 }
 0x2a6   : > { %15765 = vmatmul.mubr.msk.bf16.gmra.mrb[16].mxu1 %vm2021_vm2, %v22919_v57 }
 0x2a7   : > { %2177 = vmatprep.mubr.bf16.mxu1 %v28634_v0 }
 0x2a9   : > { %v1763_v6 = vpop.f32.mrb[20].mxu0 }
 0x2aa   : > { %v1765_v20 = vpop.f32.mrb[21].mxu0 }
 0x2ab   : > { %v1766_v23 = vpop.f32.mrb[22].mxu0 }
 0x2ac   : > { %v22930_v28 = vpack.c.bf16 %v1766_v23, %v1763_v6  ;;  %v1768_v31 = vpop.f32.mrb[23].mxu0 }
 0x2ae   : > { %15766 = vmatmul.mubr.msk.bf16.gmra.mrb[20].mxu1 %vm2021_vm2, %v22930_v28 }
 0x2af   : > { %2187 = vmatprep.mubr.bf16.mxu1 %v28634_v0 }
 0x2b1   : > { %v1771_v35 = vpop.f32.mrb[24].mxu0 }
 0x2b2   : > { %v1773_v37 = vpop.f32.mrb[25].mxu0 }
 0x2b3   : > { %v1774_v41 = vpop.f32.mrb[26].mxu0 }
 0x2b4   : > { %v22935_v46 = vpack.c.bf16 %v1774_v41, %v1771_v35  ;;  %v1776_v52 = vpop.f32.mrb[27].mxu0 }
 0x2b6   : > { %15767 = vmatmul.mubr.msk.bf16.gmra.mrb[24].mxu1 %vm2021_vm2, %v22935_v46 }
 0x2b7   : > { %2197 = vmatprep.mubr.bf16.mxu1 %v28634_v0 }
 0x2b9   : > { %v1779_v53 = vpop.f32.mrb[28].mxu0 }
 0x2ba   : > { %v1781_v54 = vpop.f32.mrb[29].mxu0 }
 0x2bb   : > { %v1782_v60 = vpop.f32.mrb[30].mxu0 }
 0x2bc   : > { %v22940_v2 = vpack.c.bf16 %v1782_v60, %v1779_v53  ;;  %v1784_v4 = vpop.f32.mrb[31].mxu0 }
 0x2be   : > { %15768 = vmatmul.mubr.msk.bf16.gmra.mrb[28].mxu1 %vm2021_vm2, %v22940_v2 }
 0x2bf   : > { %2207 = vmatprep.mubr.bf16.mxu1 %v28634_v0 }
 0x2c1   : > { %v1787_v6 = vpop.f32.mrb[32].mxu0 }
 0x2c2   : > { %v1789_v20 = vpop.f32.mrb[33].mxu0 }
 0x2c3   : > { %v1790_v23 = vpop.f32.mrb[34].mxu0 }
 0x2c4   : > { %v22945_v31 = vpack.c.bf16 %v1790_v23, %v1787_v6  ;;  %v1792_v35 = vpop.f32.mrb[35].mxu0 }
 0x2c6   : > { %15769 = vmatmul.mubr.msk.bf16.gmra.mrb[32].mxu1 %vm2021_vm2, %v22945_v31 }
 0x2c7   : > { %2217 = vmatprep.mubr.bf16.mxu1 %v28634_v0 }
 0x2c9   : > { %v1795_v37 = vpop.f32.mrb[36].mxu0 }
 0x2ca   : > { %v1797_v41 = vpop.f32.mrb[37].mxu0 }
 0x2cb   : > { %v1798_v52 = vpop.f32.mrb[38].mxu0 }
 0x2cc   : > { %v22950_v53 = vpack.c.bf16 %v1798_v52, %v1795_v37  ;;  %v1800_v54 = vpop.f32.mrb[39].mxu0 }
 0x2ce   : > { %15770 = vmatmul.mubr.msk.bf16.gmra.mrb[36].mxu1 %vm2021_vm2, %v22950_v53 }
 0x2cf   : > { %2227 = vmatprep.mubr.bf16.mxu1 %v28634_v0 }
 0x2d1   : > { %v1803_v60 = vpop.f32.mrb[40].mxu0 }
 0x2d2   : > { %v1805_v4 = vpop.f32.mrb[41].mxu0 }
 0x2d3   : > { %v1806_v6 = vpop.f32.mrb[42].mxu0 }
 0x2d4   : > { %v22955_v20 = vpack.c.bf16 %v1806_v6, %v1803_v60  ;;  %v1808_v23 = vpop.f32.mrb[43].mxu0 }
 0x2d6   : > { %15771 = vmatmul.mubr.msk.bf16.gmra.mrb[40].mxu1 %vm2021_vm2, %v22955_v20 }
 0x2d7   : > { %2237 = vmatprep.mubr.bf16.mxu1 %v28634_v0 }
 0x2d9   : > { %v1811_v35 = vpop.f32.mrb[44].mxu0 }
 0x2da   : > { %v1813_v37 = vpop.f32.mrb[45].mxu0 }
 0x2db   : > { %v1814_v41 = vpop.f32.mrb[46].mxu0 }
 0x2dc   : > { %v1816_v52 = vpop.f32.mrb[47].mxu0  ;;  %v22960_v54 = vpack.c.bf16 %v1814_v41, %v1811_v35 }
 0x2de   : > { %15772 = vmatmul.mubr.msk.bf16.gmra.mrb[44].mxu1 %vm2021_vm2, %v22960_v54 }
 0x2df   : > { %2247 = vmatprep.mubr.bf16.mxu1 %v28634_v0 }
 0x2e1   : > { %v1819_v4 = vpop.f32.mrb[48].mxu0 }
 0x2e2   : > { %v1821_v60 = vpop.f32.mrb[49].mxu0 }
 0x2e3   : > { %v1822_v6 = vpop.f32.mrb[50].mxu0 }
 0x2e4   : > { %v1824_v23 = vpop.f32.mrb[51].mxu0  ;;  %v22965_v17 = vpack.c.bf16 %v1822_v6, %v1819_v4 }
 0x2e6   : > { %15773 = vmatmul.mubr.msk.bf16.gmra.mrb[48].mxu1 %vm2021_vm2, %v22965_v17 }
 0x2e7   : > { %2257 = vmatprep.mubr.bf16.mxu1 %v28634_v0 }
 0x2e9   : > { %v1827_v37 = vpop.f32.mrb[52].mxu0 }
 0x2ea   : > { %v1829_v52 = vpop.f32.mrb[53].mxu0 }
 0x2eb   : > { %v1830_v35 = vpop.f32.mrb[54].mxu0 }
 0x2ec   : > { %v1832_v41 = vpop.f32.mrb[55].mxu0  ;;  %v22970_v22 = vpack.c.bf16 %v1830_v35, %v1827_v37 }
 0x2ee   : > { %15774 = vmatmul.mubr.msk.bf16.gmra.mrb[52].mxu1 %vm2021_vm2, %v22970_v22 }
 0x2ef   : > { %2267 = vmatprep.mubr.bf16.mxu1 %v28634_v0 }
 0x2f1   : > { %v1835_v60 = vpop.f32.mrb[56].mxu0 }
 0x2f2   : > { %v1837_v23 = vpop.f32.mrb[57].mxu0 }
 0x2f3   : > { %v1838_v4 = vpop.f32.mrb[58].mxu0 }
 0x2f4   : > { %v1840_v6 = vpop.f32.mrb[59].mxu0  ;;  %v22975_v12 = vpack.c.bf16 %v1838_v4, %v1835_v60 }
 0x2f6   : > { %15775 = vmatmul.mubr.msk.bf16.gmra.mrb[56].mxu1 %vm2021_vm2, %v22975_v12 }
 0x2f7   : > { %2277 = vmatprep.mubr.bf16.mxu1 %v28634_v0 }
 0x2f9   : > { %v1843_v52 = vpop.f32.mrb[60].mxu0 }
 0x2fa   : > { %v1845_v41 = vpop.f32.mrb[61].mxu0 }
 0x2fb   : > { %v1846_v37 = vpop.f32.mrb[62].mxu0 }
 0x2fc   : > { %v1848_v35 = vpop.f32.mrb[63].mxu0  ;;  %v22980_v62 = vpack.c.bf16 %v1846_v37, %v1843_v52 }
 0x2fe   : > { %15776 = vmatmul.mubr.msk.bf16.gmra.mrb[60].mxu1 %vm2021_vm2, %v22980_v62 }
 0x2ff   : > { %2287 = vmatprep.mubr.bf16.mxu1 %v28634_v0 }
 0x301   : > { %v1851_v23 = vpop.f32.mrb[64].mxu0 }
 0x302   : > { %v1853_v6 = vpop.f32.mrb[65].mxu0 }
 0x303   : > { %v1854_v60 = vpop.f32.mrb[66].mxu0 }
 0x304   : > { %v1856_v4 = vpop.f32.mrb[67].mxu0  ;;  %v22985_v55 = vpack.c.bf16 %v1854_v60, %v1851_v23 }
 0x306   : > { %15777 = vmatmul.mubr.msk.bf16.gmra.mrb[64].mxu1 %vm2021_vm2, %v22985_v55 }
 0x307   : > { %2297 = vmatprep.mubr.bf16.mxu1 %v28634_v0 }
 0x309   : > { %v1859_v41 = vpop.f32.mrb[68].mxu0 }
 0x30a   : > { %v1861_v35 = vpop.f32.mrb[69].mxu0 }
 0x30b   : > { %v1862_v52 = vpop.f32.mrb[70].mxu0 }
 0x30c   : > { %v1864_v37 = vpop.f32.mrb[71].mxu0  ;;  %v22990_v49 = vpack.c.bf16 %v1862_v52, %v1859_v41 }
 0x30e   : > { %15778 = vmatmul.mubr.msk.bf16.gmra.mrb[68].mxu1 %vm2021_vm2, %v22990_v49 }
 0x30f   : > { %2307 = vmatprep.mubr.bf16.mxu1 %v28634_v0 }
 0x311   : > { %v1867_v6 = vpop.f32.mrb[72].mxu0 }
 0x312   : > { %v1869_v4 = vpop.f32.mrb[73].mxu0 }
 0x313   : > { %v1870_v23 = vpop.f32.mrb[74].mxu0 }
 0x314   : > { %v1872_v60 = vpop.f32.mrb[75].mxu0  ;;  %v22995_v45 = vpack.c.bf16 %v1870_v23, %v1867_v6 }
 0x316   : > { %15779 = vmatmul.mubr.msk.bf16.gmra.mrb[72].mxu1 %vm2021_vm2, %v22995_v45 }
 0x317   : > { %2317 = vmatprep.mubr.bf16.mxu1 %v28634_v0 }
 0x319   : > { %v1875_v35 = vpop.f32.mrb[76].mxu0 }
 0x31a   : > { %v1877_v37 = vpop.f32.mrb[77].mxu0 }
 0x31b   : > { %v1878_v41 = vpop.f32.mrb[78].mxu0  ;;  %v28765_v37 = vmov 0.0  }
 0x31c   : > { %v1880_v52 = vpop.f32.mrb[79].mxu0  ;;  %v23000_v34 = vpack.c.bf16 %v1878_v41, %v1875_v35  ;;  %v21033_v35 = vld [vmem:[%s28604_s1 + $0x424] ss:$24 sps:$4 sm:$0xff]   ;;  %v21128_v41 = vld [vmem:[%s28604_s1 + $0xb10] ss:$24 sps:$4 sm:$0xff]  }
 0x31d   : > { %v21035_v52 = vld [vmem:[%s28604_s1 + $0x420] ss:$24 sps:$4 sm:$0xff]  }
 0x31e   : > { %15780 = vmatmul.mubr.msk.bf16.gmra.mrb[76].mxu1 %vm2021_vm2, %v23000_v34 }
 0x31f   : > { %2327 = vmatprep.mubr.bf16.mxu1 %v28634_v0 }
 0x321   : > { %v1883_v4 = vpop.f32.mrb[80].mxu0 }
 0x322   : > { %v1885_v60 = vpop.f32.mrb[81].mxu0 }
 0x323   : > { %v1886_v6 = vpop.f32.mrb[82].mxu0  ;;  %v21134_v60 = vld [vmem:[%s28604_s1 + $0xb40] ss:$24 sps:$4 sm:$0xff]  }
 0x324   : > { %v1888_v23 = vpop.f32.mrb[83].mxu0  ;;  %v23005_v29 = vpack.c.bf16 %v1886_v6, %v1883_v4  ;;  %v21039_v4 = vld [vmem:[%s28604_s1 + $0x454] ss:$24 sps:$4 sm:$0xff]   ;;  %v21045_v6 = vld [vmem:[%s28604_s1 + $0x484] ss:$24 sps:$4 sm:$0xff]  }
 0x325   : > { %v21140_v23 = vld [vmem:[%s28604_s1 + $0xb70] ss:$24 sps:$4 sm:$0xff]  }
 0x326   : > { %15781 = vmatmul.mubr.msk.bf16.gmra.mrb[80].mxu1 %vm2021_vm2, %v23005_v29 }
 0x327   : > { %18440 = vmatprep.mubr.msk.bf16.mxu1 %vm22046_vm3, %v28765_v37 }
 0x32e   : > { %18441 = vmatmul.mubr.msk.bf16.vlgmr.msra.gmra.mrb[84].mxu1 %vm2021_vm2, %v22883_v44  ;;  %v21072_v44 = vld [vmem:[%s28604_s1 + $0x964] ss:$24 sps:$4 sm:$0xff]  }
 0x32f   : > { %18444 = vmatprep.mubr.msk.bf16.mxu1 %vm22046_vm3, %v28765_v37  ;;  %3481 = vmatpush1.bf16.msra.mxu1 %v22167_v5  ;;  %v21024_v5 = vld [vmem:[%s28604_s1 + $0x7e0] ss:$24 sps:$4 sm:$0xff]  }
 0x330   : > { %3482 = vmatprep.subr.bf16.mxu1 %v28634_v0 }
 0x333   : > { %3483 = vmatpush1.bf16.msra.mxu1 %v22171_v7  ;;  %v21026_v7 = vld [vmem:[%s28604_s1 + $0x7e4] ss:$24 sps:$4 sm:$0xff]  }
 0x334   : > { %3484 = vmatprep.subr.bf16.mxu1 %v28634_v0  ;;  %5688 = vmatprep.mubr.bf16.mxu0 %v21026_v7  ;;  %v21146_v7 = vld [vmem:[%s28604_s1 + $0xba0] ss:$24 sps:$4 sm:$0xff]  }
 0x335   : > { %5689 = vmatmul.mubr.bf16.vlgmr.msra.gmra.mrb[84].mxu0 %v21024_v5  ;;  %v21051_v5 = vld [vmem:[%s28604_s1 + $0x4b4] ss:$24 sps:$4 sm:$0xff]  }
 0x336   : > { %18445 = vmatmul.mubr.msk.bf16.gmra.mrb[88].mxu1 %vm2021_vm2, %v22895_v63  ;;  %5858 = vmatpush1.bf16.msra.mxu0 %v22269_v56  ;;  %v21074_v63 = vld [vmem:[%s28604_s1 + $0x960] ss:$24 sps:$4 sm:$0xff]  }
 0x337   : > { %18448 = vmatprep.mubr.msk.bf16.mxu1 %vm22046_vm3, %v28765_v37  ;;  %3485 = vmatpush1.bf16.msra.mxu1 %v22177_v10  ;;  %v21030_v10 = vld [vmem:[%s28604_s1 + $0x814] ss:$24 sps:$4 sm:$0xff]  }
 0x338   : > { %3486 = vmatprep.subr.bf16.mxu1 %v28634_v0  ;;  %5859 = vmatprep.subr.bf16.mxu0 %v28634_v0 }
 0x339   : > { %5696 = vmatprep.mubr.bf16.mxu0 %v21030_v10  ;;  %v21057_v10 = vld [vmem:[%s28604_s1 + $0x4e4] ss:$24 sps:$4 sm:$0xff]  }
 0x33a   : > { %5860 = vmatpush1.bf16.msra.mxu0 %v22274_v58 }
 0x33b   : > { %3487 = vmatpush1.bf16.msra.mxu1 %v22183_v13  ;;  %v21032_v13 = vld [vmem:[%s28604_s1 + $0x810] ss:$24 sps:$4 sm:$0xff]   ;;  %5861 = vmatprep.subr.bf16.mxu0 %v28634_v0 }
 0x33c   : > { %3488 = vmatprep.subr.bf16.mxu1 %v28634_v0 }
 0x33d   : > { %5697 = vmatmul.mubr.bf16.gmra.mrb[88].mxu0 %v21032_v13  ;;  %v21152_v13 = vld [vmem:[%s28604_s1 + $0x7ec] ss:$24 sps:$4 sm:$0xff]  }
 0x33e   : > { %18449 = vmatmul.mubr.msk.bf16.gmra.mrb[92].mxu1 %vm2021_vm2, %v22905_v25  ;;  %5862 = vmatpush1.bf16.msra.mxu0 %v22287_v1  ;;  %v21080_v25 = vld [vmem:[%s28604_s1 + $0x990] ss:$24 sps:$4 sm:$0xff]  }
 0x33f   : > { %18452 = vmatprep.mubr.msk.bf16.mxu1 %vm22046_vm3, %v28765_v37  ;;  %3489 = vmatpush1.bf16.msra.mxu1 %v22189_v16  ;;  %v21036_v16 = vld [vmem:[%s28604_s1 + $0x844] ss:$24 sps:$4 sm:$0xff]  }
 0x340   : > { %3490 = vmatprep.subr.bf16.mxu1 %v28634_v0  ;;  %5863 = vmatprep.subr.bf16.mxu0 %v28634_v0 }
 0x341   : > { %5704 = vmatprep.mubr.bf16.mxu0 %v21036_v16  ;;  %v21063_v16 = vld [vmem:[%s28604_s1 + $0x514] ss:$24 sps:$4 sm:$0xff]  }
 0x342   : > { %5864 = vmatpush1.bf16.msra.mxu0 %v22292_v3 }
 0x343   : > { %3491 = vmatpush1.bf16.msra.mxu1 %v22195_v19  ;;  %v21038_v19 = vld [vmem:[%s28604_s1 + $0x840] ss:$24 sps:$4 sm:$0xff]   ;;  %5865 = vmatprep.subr.bf16.mxu0 %v28634_v0 }
 0x344   : > { %3492 = vmatprep.subr.bf16.mxu1 %v28634_v0 }
 0x345   : > { %5705 = vmatmul.mubr.bf16.gmra.mrb[92].mxu0 %v21038_v19  ;;  %v21158_v19 = vld [vmem:[%s28604_s1 + $0x818] ss:$24 sps:$4 sm:$0xff]  }
 0x346   : > { %18453 = vmatmul.mubr.msk.bf16.gmra.mrb[96].mxu1 %vm2021_vm2, %v22911_v40  ;;  %5866 = vmatpush1.bf16.msra.mxu0 %v22303_v9  ;;  %v21086_v40 = vld [vmem:[%s28604_s1 + $0x9c0] ss:$24 sps:$4 sm:$0xff]  }
 0x347   : > { %18456 = vmatprep.mubr.msk.bf16.mxu1 %vm22046_vm3, %v28765_v37  ;;  %3493 = vmatpush1.bf16.msra.mxu1 %v22203_v24  ;;  %v21042_v24 = vld [vmem:[%s28604_s1 + $0x874] ss:$24 sps:$4 sm:$0xff]  }
 0x348   : > { %3494 = vmatprep.subr.bf16.mxu1 %v28634_v0  ;;  %5867 = vmatprep.subr.bf16.mxu0 %v28634_v0 }
 0x349   : > { %5712 = vmatprep.mubr.bf16.mxu0 %v21042_v24  ;;  %v28766_v24 = vld [vmem:[#allocation5_spill] sm:$0xff] }
 0x34a   : > { %5868 = vmatpush1.bf16.msra.mxu0 %v22310_v15 }
 0x34b   : > { %3495 = vmatpush1.bf16.msra.mxu1 %v22208_v26  ;;  %v21044_v26 = vld [vmem:[%s28604_s1 + $0x870] ss:$24 sps:$4 sm:$0xff]   ;;  %5869 = vmatprep.subr.bf16.mxu0 %v28634_v0 }
 0x34c   : > { %3496 = vmatprep.subr.bf16.mxu1 %v28634_v0 }
 0x34d   : > { %5713 = vmatmul.mubr.bf16.gmra.mrb[96].mxu0 %v21044_v26  ;;  %v21069_v26 = vld [vmem:[%s28604_s1 + $0x544] ss:$24 sps:$4 sm:$0xff]  }
 0x34e   : > { %18457 = vmatmul.mubr.msk.bf16.gmra.mrb[100].mxu1 %vm2021_vm2, %v22919_v57  ;;  %5870 = vmatpush1.bf16.msra.mxu0 %v22321_v21  ;;  %v21092_v57 = vld [vmem:[%s28604_s1 + $0x9f0] ss:$24 sps:$4 sm:$0xff]  }
 0x34f   : > { %18460 = vmatprep.mubr.msk.bf16.mxu1 %vm22046_vm3, %v28765_v37  ;;  %3497 = vmatpush1.bf16.msra.mxu1 %v22215_v30  ;;  %v21048_v30 = vld [vmem:[%s28604_s1 + $0x8a4] ss:$24 sps:$4 sm:$0xff]  }
 0x350   : > { %3498 = vmatprep.subr.bf16.mxu1 %v28634_v0  ;;  %5871 = vmatprep.subr.bf16.mxu0 %v28634_v0 }
 0x351   : > { %5720 = vmatprep.mubr.bf16.mxu0 %v21048_v30  ;;  %v21164_v30 = vld [vmem:[%s28604_s1 + $0x848] ss:$24 sps:$4 sm:$0xff]  }
 0x352   : > { %5872 = vmatpush1.bf16.msra.mxu0 %v22328_v27 }
 0x353   : > { %3499 = vmatpush1.bf16.msra.mxu1 %v22220_v32  ;;  %v21050_v32 = vld [vmem:[%s28604_s1 + $0x8a0] ss:$24 sps:$4 sm:$0xff]   ;;  %5873 = vmatprep.subr.bf16.mxu0 %v28634_v0 }
 0x354   : > { %3500 = vmatprep.subr.bf16.mxu1 %v28634_v0 }
 0x355   : > { %5721 = vmatmul.mubr.bf16.gmra.mrb[100].mxu0 %v21050_v32  ;;  %v28767_v32 = vld [vmem:[#allocation6_spill] sm:$0xff] }
 0x356   : > { %18461 = vmatmul.mubr.msk.bf16.gmra.mrb[104].mxu1 %vm2021_vm2, %v22930_v28  ;;  %5874 = vmatpush1.bf16.msra.mxu0 %v22339_v33  ;;  %v21098_v28 = vld [vmem:[%s28604_s1 + $0xa20] ss:$24 sps:$4 sm:$0xff]  }
 0x357   : > { %18464 = vmatprep.mubr.msk.bf16.mxu1 %vm22046_vm3, %v28765_v37  ;;  %3501 = vmatpush1.bf16.msra.mxu1 %v22227_v36  ;;  %v21054_v36 = vld [vmem:[%s28604_s1 + $0x8d4] ss:$24 sps:$4 sm:$0xff]  }
 0x358   : > { %3502 = vmatprep.subr.bf16.mxu1 %v28634_v0  ;;  %5875 = vmatprep.subr.bf16.mxu0 %v28634_v0 }
 0x359   : > { %5728 = vmatprep.mubr.bf16.mxu0 %v21054_v36  ;;  %v28768_v36 = vld [vmem:[#allocation7_spill] sm:$0xff] }
 0x35a   : > { %5876 = vmatpush1.bf16.msra.mxu0 %v22346_v39 }
 0x35b   : > { %3503 = vmatpush1.bf16.msra.mxu1 %v22232_v38  ;;  %v21056_v38 = vld [vmem:[%s28604_s1 + $0x8d0] ss:$24 sps:$4 sm:$0xff]   ;;  %5877 = vmatprep.subr.bf16.mxu0 %v28634_v0 }
 0x35c   : > { %3504 = vmatprep.subr.bf16.mxu1 %v28634_v0 }
 0x35d   : > { %5729 = vmatmul.mubr.bf16.gmra.mrb[104].mxu0 %v21056_v38  ;;  %v21075_v38 = vld [vmem:[%s28604_s1 + $0x574] ss:$24 sps:$4 sm:$0xff]  }
 0x35e   : > { %18465 = vmatmul.mubr.msk.bf16.gmra.mrb[108].mxu1 %vm2021_vm2, %v22935_v46  ;;  %5878 = vmatpush1.bf16.msra.mxu0 %v22359_v47  ;;  %v21104_v46 = vld [vmem:[%s28604_s1 + $0xa50] ss:$24 sps:$4 sm:$0xff]  }
 0x35f   : > { %18468 = vmatprep.mubr.msk.bf16.mxu1 %vm22046_vm3, %v28765_v37  ;;  %3505 = vmatpush1.bf16.msra.mxu1 %v22239_v42  ;;  %v21060_v42 = vld [vmem:[%s28604_s1 + $0x904] ss:$24 sps:$4 sm:$0xff]  }
 0x360   : > { %3506 = vmatprep.subr.bf16.mxu1 %v28634_v0  ;;  %5879 = vmatprep.subr.bf16.mxu0 %v28634_v0 }
 0x361   : > { %5736 = vmatprep.mubr.bf16.mxu0 %v21060_v42  ;;  %v21170_v42 = vld [vmem:[%s28604_s1 + $0x878] ss:$24 sps:$4 sm:$0xff]  }
 0x362   : > { %5880 = vmatpush1.bf16.msra.mxu0 %v22364_v51 }
 0x363   : > { %3507 = vmatpush1.bf16.msra.mxu1 %v22243_v43  ;;  %v21062_v43 = vld [vmem:[%s28604_s1 + $0x900] ss:$24 sps:$4 sm:$0xff]   ;;  %5881 = vmatprep.subr.bf16.mxu0 %v28634_v0 }
 0x364   : > { %3508 = vmatprep.subr.bf16.mxu1 %v28634_v0 }
 0x365   : > { %5737 = vmatmul.mubr.bf16.gmra.mrb[108].mxu0 %v21062_v43  ;;  %v28769_v43 = vld [vmem:[#allocation8_spill] sm:$0xff] }
 0x366   : > { %18469 = vmatmul.mubr.msk.bf16.gmra.mrb[112].mxu1 %vm2021_vm2, %v22940_v2  ;;  %5882 = vmatpush1.bf16.msra.mxu0 %v22377_v59  ;;  %v21110_v2 = vld [vmem:[%s28604_s1 + $0xa80] ss:$24 sps:$4 sm:$0xff]  }
 0x367   : > { %18472 = vmatprep.mubr.msk.bf16.mxu1 %vm22046_vm3, %v28765_v37  ;;  %3509 = vmatpush1.bf16.msra.mxu1 %v22251_v48  ;;  %v21066_v48 = vld [vmem:[%s28604_s1 + $0x934] ss:$24 sps:$4 sm:$0xff]  }
 0x368   : > { %3510 = vmatprep.subr.bf16.mxu1 %v28634_v0  ;;  %5883 = vmatprep.subr.bf16.mxu0 %v28634_v0 }
 0x369   : > { %5744 = vmatprep.mubr.bf16.mxu0 %v21066_v48  ;;  %v28770_v48 = vld [vmem:[#allocation9_spill] sm:$0xff] }
 0x36a   : > { %5884 = vmatpush1.bf16.msra.mxu0 %v22382_v61 }
 0x36b   : > { %3511 = vmatpush1.bf16.msra.mxu1 %v22256_v50  ;;  %v21068_v50 = vld [vmem:[%s28604_s1 + $0x930] ss:$24 sps:$4 sm:$0xff]   ;;  %5885 = vmatprep.subr.bf16.mxu0 %v28634_v0 }
 0x36c   : > { %3681 = vmatprep.subr.bf16.mxu1 %v28634_v0 }
 0x36d   : > { %5745 = vmatmul.mubr.bf16.gmra.mrb[112].mxu0 %v21068_v50  ;;  %v21081_v50 = vld [vmem:[%s28604_s1 + $0x5a4] ss:$24 sps:$4 sm:$0xff]  }
 0x36e   : > { %18473 = vmatmul.mubr.msk.bf16.gmra.mrb[116].mxu1 %vm2021_vm2, %v22945_v31  ;;  %5886 = vmatpush1.bf16.msra.mxu0 %v22395_v8  ;;  %v21116_v31 = vld [vmem:[%s28604_s1 + $0xab0] ss:$24 sps:$4 sm:$0xff]  }
 0x36f   : > { %18476 = vmatprep.mubr.msk.bf16.mxu1 %vm22046_vm3, %v28765_v37  ;;  %5887 = vmatprep.subr.bf16.mxu0 %v28634_v0 }
 0x370   : > { %5752 = vmatprep.mubr.bf16.mxu0 %v21072_v44  ;;  %v21176_v44 = vld [vmem:[%s28604_s1 + $0x8a8] ss:$24 sps:$4 sm:$0xff]  }
 0x372   : > { %5888 = vmatpush1.bf16.msra.mxu0 %v22399_v11 }
 0x373   : > { %6058 = vmatprep.subr.bf16.mxu0 %v28634_v0 }
 0x375   : > { %5753 = vmatmul.mubr.bf16.gmra.mrb[116].mxu0 %v21074_v63  ;;  %v28771_v63 = vld [vmem:[#allocation10_spill] sm:$0xff] }
 0x376   : > { %18477 = vmatmul.mubr.msk.bf16.gmra.mrb[120].mxu1 %vm2021_vm2, %v22950_v53  ;;  %v21029_v53 = vld [vmem:[%s28604_s1 + $0x3f4] ss:$24 sps:$4 sm:$0xff]  }
 0x377   : > { %18480 = vmatprep.mubr.msk.bf16.mxu1 %vm22046_vm3, %v28765_v37 }
 0x37e   : > { %18481 = vmatmul.mubr.msk.bf16.gmra.mrb[124].mxu1 %vm2021_vm2, %v22955_v20  ;;  %v21122_v20 = vld [vmem:[%s28604_s1 + $0xae0] ss:$24 sps:$4 sm:$0xff]  }
 0x37f   : > { %18484 = vmatprep.mubr.msk.bf16.mxu1 %vm22046_vm3, %v28765_v37 }
 0x386   : > { %18485 = vmatmul.mubr.msk.bf16.gmra.mrb[128].mxu1 %vm2021_vm2, %v22960_v54  ;;  %v21027_v54 = vld [vmem:[%s28604_s1 + $0x3f0] ss:$24 sps:$4 sm:$0xff]  }
 0x387   : > { %18488 = vmatprep.mubr.msk.bf16.mxu1 %vm22046_vm3, %v28765_v37 }
 0x38e   : > { %18489 = vmatmul.mubr.msk.bf16.gmra.mrb[132].mxu1 %vm2021_vm2, %v22965_v17  ;;  %v21078_v17 = vld [vmem:[%s28604_s1 + $0x994] ss:$24 sps:$4 sm:$0xff]  }
 0x38f   : > { %18492 = vmatprep.mubr.msk.bf16.mxu1 %vm22046_vm3, %v28765_v37  ;;  %5760 = vmatprep.mubr.bf16.mxu0 %v21078_v17  ;;  %v28772_v17 = vld [vmem:[#allocation11_spill] sm:$0xff] }
 0x390   : > { %5761 = vmatmul.mubr.bf16.gmra.mrb[120].mxu0 %v21080_v25  ;;  %v21087_v25 = vld [vmem:[%s28604_s1 + $0x5d4] ss:$24 sps:$4 sm:$0xff]  }
 0x396   : > { %18493 = vmatmul.mubr.msk.bf16.gmra.mrb[136].mxu1 %vm2021_vm2, %v22970_v22  ;;  %v21084_v22 = vld [vmem:[%s28604_s1 + $0x9c4] ss:$24 sps:$4 sm:$0xff]  }
 0x397   : > { %18496 = vmatprep.mubr.msk.bf16.mxu1 %vm22046_vm3, %v28765_v37  ;;  %5768 = vmatprep.mubr.bf16.mxu0 %v21084_v22  ;;  %v21180_v22 = vld [vmem:[%s28604_s1 + $0x8dc] ss:$24 sps:$4 sm:$0xff]  }
 0x398   : > { %5769 = vmatmul.mubr.bf16.gmra.mrb[124].mxu0 %v21086_v40  ;;  %v21182_v40 = vld [vmem:[%s28604_s1 + $0x8d8] ss:$24 sps:$4 sm:$0xff]  }
 0x39e   : > { %18497 = vmatmul.mubr.msk.bf16.gmra.mrb[140].mxu1 %vm2021_vm2, %v22975_v12  ;;  %v21090_v12 = vld [vmem:[%s28604_s1 + $0x9f4] ss:$24 sps:$4 sm:$0xff]  }
 0x39f   : > { %18500 = vmatprep.mubr.msk.bf16.mxu1 %vm22046_vm3, %v28765_v37  ;;  %5776 = vmatprep.mubr.bf16.mxu0 %v21090_v12  ;;  %v28773_v12 = vld [vmem:[#allocation12_spill] sm:$0xff] }
 0x3a0   : > { %5777 = vmatmul.mubr.bf16.gmra.mrb[128].mxu0 %v21092_v57  ;;  %v21089_v57 = vld [vmem:[%s28604_s1 + $0x5d0] ss:$24 sps:$4 sm:$0xff]  }
 0x3a6   : > { %18501 = vmatmul.mubr.msk.bf16.gmra.mrb[144].mxu1 %vm2021_vm2, %v22980_v62  ;;  %v21096_v62 = vld [vmem:[%s28604_s1 + $0xa24] ss:$24 sps:$4 sm:$0xff]  }
 0x3a7   : > { %18504 = vmatprep.mubr.msk.bf16.mxu1 %vm22046_vm3, %v28765_v37  ;;  %5784 = vmatprep.mubr.bf16.mxu0 %v21096_v62  ;;  %v21093_v62 = vld [vmem:[%s28604_s1 + $0x604] ss:$24 sps:$4 sm:$0xff]  }
 0x3a8   : > { %5785 = vmatmul.mubr.bf16.gmra.mrb[132].mxu0 %v21098_v28  ;;  %v21186_v28 = vld [vmem:[%s28604_s1 + $0x90c] ss:$24 sps:$4 sm:$0xff]  }
 0x3ae   : > { %18505 = vmatmul.mubr.msk.bf16.gmra.mrb[148].mxu1 %vm2021_vm2, %v22985_v55  ;;  %v21102_v55 = vld [vmem:[%s28604_s1 + $0xa54] ss:$24 sps:$4 sm:$0xff]  }
 0x3af   : > { %18508 = vmatprep.mubr.msk.bf16.mxu1 %vm22046_vm3, %v28765_v37  ;;  %5792 = vmatprep.mubr.bf16.mxu0 %v21102_v55  ;;  %v21188_v55 = vld [vmem:[%s28604_s1 + $0x908] ss:$24 sps:$4 sm:$0xff]  }
 0x3b0   : > { %5793 = vmatmul.mubr.bf16.gmra.mrb[136].mxu0 %v21104_v46  ;;  %v21095_v46 = vld [vmem:[%s28604_s1 + $0x600] ss:$24 sps:$4 sm:$0xff]  }
 0x3b6   : > { %18509 = vmatmul.mubr.msk.bf16.gmra.mrb[152].mxu1 %vm2021_vm2, %v22990_v49  ;;  %v21108_v49 = vld [vmem:[%s28604_s1 + $0xa84] ss:$24 sps:$4 sm:$0xff]  }
 0x3b7   : > { %18512 = vmatprep.mubr.msk.bf16.mxu1 %vm22046_vm3, %v28765_v37  ;;  %5800 = vmatprep.mubr.bf16.mxu0 %v21108_v49  ;;  %v21099_v49 = vld [vmem:[%s28604_s1 + $0x634] ss:$24 sps:$4 sm:$0xff]  }
 0x3b8   : > { %5801 = vmatmul.mubr.bf16.gmra.mrb[140].mxu0 %v21110_v2  ;;  %v21192_v2 = vld [vmem:[%s28604_s1 + $0x93c] ss:$24 sps:$4 sm:$0xff]  }
 0x3be   : > { %18513 = vmatmul.mubr.msk.bf16.gmra.mrb[156].mxu1 %vm2021_vm2, %v22995_v45  ;;  %v21114_v45 = vld [vmem:[%s28604_s1 + $0xab4] ss:$24 sps:$4 sm:$0xff]  }
 0x3bf   : > { %18516 = vmatprep.mubr.msk.bf16.mxu1 %vm22046_vm3, %v28765_v37  ;;  %5808 = vmatprep.mubr.bf16.mxu0 %v21114_v45  ;;  %v21194_v45 = vld [vmem:[%s28604_s1 + $0x938] ss:$24 sps:$4 sm:$0xff]  }
 0x3c0   : > { %5809 = vmatmul.mubr.bf16.gmra.mrb[144].mxu0 %v21116_v31  ;;  %v21101_v31 = vld [vmem:[%s28604_s1 + $0x630] ss:$24 sps:$4 sm:$0xff]  }
 0x3c6   : > { %18517 = vmatmul.mubr.msk.bf16.gmra.mrb[160].mxu1 %vm2021_vm2, %v23000_v34  ;;  %v21120_v34 = vld [vmem:[%s28604_s1 + $0xae4] ss:$24 sps:$4 sm:$0xff]  }
 0x3c7   : > { %18520 = vmatprep.mubr.msk.bf16.mxu1 %vm22046_vm3, %v28765_v37  ;;  %5816 = vmatprep.mubr.bf16.mxu0 %v21120_v34  ;;  %v21198_v34 = vld [vmem:[%s28604_s1 + $0x96c] ss:$24 sps:$4 sm:$0xff]  }
 0x3c8   : > { %5817 = vmatmul.mubr.bf16.gmra.mrb[148].mxu0 %v21122_v20  ;;  %v21200_v20 = vld [vmem:[%s28604_s1 + $0x968] ss:$24 sps:$4 sm:$0xff]  }
 0x3ce   : > { %18521 = vmatmul.mubr.msk.bf16.gmra.mrb[164].mxu1 %vm2021_vm2, %v23005_v29  ;;  %v21126_v29 = vld [vmem:[%s28604_s1 + $0xb14] ss:$24 sps:$4 sm:$0xff]  }
 0x3cf   : > { %3512 = vmatprep.mubr.bf16.mxu1 %v21029_v53  ;;  %5824 = vmatprep.mubr.bf16.mxu0 %v21126_v29  ;;  %v21105_v53 = vld [vmem:[%s28604_s1 + $0x664] ss:$24 sps:$4 sm:$0xff]  }
 0x3d0   : > { %5825 = vmatmul.mubr.bf16.gmra.mrb[152].mxu0 %v21128_v41  ;;  %v21204_v29 = vld [vmem:[%s28604_s1 + $0x99c] ss:$24 sps:$4 sm:$0xff]   ;;  %v21206_v41 = vld [vmem:[%s28604_s1 + $0x998] ss:$24 sps:$4 sm:$0xff]  }
 0x3d6   : > { %3513 = vmatmul.mubr.bf16.vlgmr.msra.gmra.mrb[168].mxu1 %v21027_v54  ;;  %v21107_v54 = vld [vmem:[%s28604_s1 + $0x660] ss:$24 sps:$4 sm:$0xff]  }
 0x3d7   : > { %3520 = vmatprep.mubr.bf16.mxu1 %v21033_v35  ;;  %3682 = vmatpush1.bf16.msra.mxu1 %v22269_v56  ;;  %v21132_v56 = vld [vmem:[%s28604_s1 + $0xb44] ss:$24 sps:$4 sm:$0xff]   ;;  %v21111_v35 = vld [vmem:[%s28604_s1 + $0x694] ss:$24 sps:$4 sm:$0xff]  }
 0x3d8   : > { %3683 = vmatprep.subr.bf16.mxu1 %v28634_v0  ;;  %5832 = vmatprep.mubr.bf16.mxu0 %v21132_v56  ;;  %v21210_v56 = vld [vmem:[%s28604_s1 + $0x9cc] ss:$24 sps:$4 sm:$0xff]  }
 0x3d9   : > { %5833 = vmatmul.mubr.bf16.gmra.mrb[156].mxu0 %v21134_v60  ;;  %v21212_v60 = vld [vmem:[%s28604_s1 + $0x9c8] ss:$24 sps:$4 sm:$0xff]  }
 0x3db   : > { %3684 = vmatpush1.bf16.msra.mxu1 %v22274_v58  ;;  %v21041_v58 = vld [vmem:[%s28604_s1 + $0x450] ss:$24 sps:$4 sm:$0xff]  }
 0x3dc   : > { %3685 = vmatprep.subr.bf16.mxu1 %v28634_v0 }
 0x3de   : > { %3521 = vmatmul.mubr.bf16.gmra.mrb[172].mxu1 %v21035_v52  ;;  %v21113_v52 = vld [vmem:[%s28604_s1 + $0x690] ss:$24 sps:$4 sm:$0xff]  }
 0x3df   : > { %3528 = vmatprep.mubr.bf16.mxu1 %v21039_v4  ;;  %3686 = vmatpush1.bf16.msra.mxu1 %v22287_v1  ;;  %v21138_v1 = vld [vmem:[%s28604_s1 + $0xb74] ss:$24 sps:$4 sm:$0xff]   ;;  %v21117_v4 = vld [vmem:[%s28604_s1 + $0x6c4] ss:$24 sps:$4 sm:$0xff]  }
 0x3e0   : > { %3687 = vmatprep.subr.bf16.mxu1 %v28634_v0  ;;  %5840 = vmatprep.mubr.bf16.mxu0 %v21138_v1  ;;  %v21216_v1 = vld [vmem:[%s28604_s1 + $0x9fc] ss:$24 sps:$4 sm:$0xff]  }
 0x3e1   : > { %5841 = vmatmul.mubr.bf16.gmra.mrb[160].mxu0 %v21140_v23  ;;  %v21218_v23 = vld [vmem:[%s28604_s1 + $0x9f8] ss:$24 sps:$4 sm:$0xff]  }
 0x3e3   : > { %3688 = vmatpush1.bf16.msra.mxu1 %v22292_v3  ;;  %v21047_v3 = vld [vmem:[%s28604_s1 + $0x480] ss:$24 sps:$4 sm:$0xff]  }
 0x3e4   : > { %3689 = vmatprep.subr.bf16.mxu1 %v28634_v0 }
 0x3e6   : > { %3529 = vmatmul.mubr.bf16.gmra.mrb[176].mxu1 %v21041_v58  ;;  %v21119_v58 = vld [vmem:[%s28604_s1 + $0x6c0] ss:$24 sps:$4 sm:$0xff]  }
 0x3e7   : > { %3536 = vmatprep.mubr.bf16.mxu1 %v21045_v6  ;;  %3690 = vmatpush1.bf16.msra.mxu1 %v22303_v9  ;;  %v21144_v9 = vld [vmem:[%s28604_s1 + $0xba4] ss:$24 sps:$4 sm:$0xff]   ;;  %v21123_v6 = vld [vmem:[%s28604_s1 + $0x6f4] ss:$24 sps:$4 sm:$0xff]  }
 0x3e8   : > { %3691 = vmatprep.subr.bf16.mxu1 %v28634_v0  ;;  %5848 = vmatprep.mubr.bf16.mxu0 %v21144_v9  ;;  %v21222_v9 = vld [vmem:[%s28604_s1 + $0xa2c] ss:$24 sps:$4 sm:$0xff]  }
 0x3e9   : > { %5849 = vmatmul.mubr.bf16.gmra.mrb[164].mxu0 %v21146_v7  ;;  %v21224_v7 = vld [vmem:[%s28604_s1 + $0xa28] ss:$24 sps:$4 sm:$0xff]  }
 0x3ea   : > { %5889 = vmatprep.mubr.bf16.mxu0 %v21152_v13  ;;  %v21230_v13 = vld [vmem:[%s28604_s1 + $0xa58] ss:$24 sps:$4 sm:$0xff]  }
 0x3eb   : > { %3692 = vmatpush1.bf16.msra.mxu1 %v22310_v15  ;;  %v21053_v15 = vld [vmem:[%s28604_s1 + $0x4b0] ss:$24 sps:$4 sm:$0xff]  }
 0x3ec   : > { %3693 = vmatprep.subr.bf16.mxu1 %v28634_v0 }
 0x3ee   : > { %3537 = vmatmul.mubr.bf16.gmra.mrb[180].mxu1 %v21047_v3  ;;  %v21125_v3 = vld [vmem:[%s28604_s1 + $0x6f0] ss:$24 sps:$4 sm:$0xff]  }
 0x3ef   : > { %3544 = vmatprep.mubr.bf16.mxu1 %v21051_v5  ;;  %3694 = vmatpush1.bf16.msra.mxu1 %v22321_v21  ;;  %v21150_v21 = vld [vmem:[%s28604_s1 + $0x7e8] ss:$24 sps:$4 sm:$0xff]   ;;  %v21129_v5 = vld [vmem:[%s28604_s1 + $0x724] ss:$24 sps:$4 sm:$0xff]  }
 0x3f0   : > { %3695 = vmatprep.subr.bf16.mxu1 %v28634_v0 }
 0x3f1   : > { %5890 = vmatmul.mubr.bf16.vlgmr.msra.gmra.mrb[84].mxu0 %v21150_v21  ;;  %v21228_v21 = vld [vmem:[%s28604_s1 + $0xa5c] ss:$24 sps:$4 sm:$0xff]  }
 0x3f2   : > { %6059 = vmatpush1.bf16.msra.mxu0 %v22492_v14 }
 0x3f3   : > { %3696 = vmatpush1.bf16.msra.mxu1 %v22328_v27  ;;  %v21059_v27 = vld [vmem:[%s28604_s1 + $0x4e0] ss:$24 sps:$4 sm:$0xff]   ;;  %6060 = vmatprep.subr.bf16.mxu0 %v28634_v0 }
 0x3f4   : > { %3697 = vmatprep.subr.bf16.mxu1 %v28634_v0 }
 0x3f6   : > { %3545 = vmatmul.mubr.bf16.gmra.mrb[184].mxu1 %v21053_v15  ;;  %6061 = vmatpush1.bf16.msra.mxu0 %v22496_v18  ;;  %v21131_v15 = vld [vmem:[%s28604_s1 + $0x720] ss:$24 sps:$4 sm:$0xff]  }
 0x3f7   : > { %3552 = vmatprep.mubr.bf16.mxu1 %v21057_v10  ;;  %3698 = vmatpush1.bf16.msra.mxu1 %v22339_v33  ;;  %v21156_v33 = vld [vmem:[%s28604_s1 + $0x81c] ss:$24 sps:$4 sm:$0xff]  }
 0x3f8   : > { %3699 = vmatprep.subr.bf16.mxu1 %v28634_v0  ;;  %5897 = vmatprep.mubr.bf16.mxu0 %v21156_v33  ;;  %v21135_v10 = vld [vmem:[%s28604_s1 + $0x754] ss:$24 sps:$4 sm:$0xff]  }
 0x3f9   : > { %5898 = vmatmul.mubr.bf16.gmra.mrb[88].mxu0 %v21158_v19  ;;  %6062 = vmatprep.subr.bf16.mxu0 %v28634_v0  ;;  %v21234_v33 = vld [vmem:[%s28604_s1 + $0xa8c] ss:$24 sps:$4 sm:$0xff]   ;;  %v21236_v19 = vld [vmem:[%s28604_s1 + $0xa88] ss:$24 sps:$4 sm:$0xff]  }
 0x3fa   : > { %6063 = vmatpush1.bf16.msra.mxu0 %v28766_v24 }
 0x3fb   : > { %3700 = vmatpush1.bf16.msra.mxu1 %v22346_v39  ;;  %v21065_v39 = vld [vmem:[%s28604_s1 + $0x510] ss:$24 sps:$4 sm:$0xff]   ;;  %6064 = vmatprep.subr.bf16.mxu0 %v28634_v0 }
 0x3fc   : > { %3701 = vmatprep.subr.bf16.mxu1 %v28634_v0 }
 0x3fe   : > { %3553 = vmatmul.mubr.bf16.gmra.mrb[188].mxu1 %v21059_v27  ;;  %6065 = vmatpush1.bf16.msra.mxu0 %v28767_v32  ;;  %v21137_v27 = vld [vmem:[%s28604_s1 + $0x750] ss:$24 sps:$4 sm:$0xff]  }
 0x3ff   : > { %3560 = vmatprep.mubr.bf16.mxu1 %v21063_v16  ;;  %3702 = vmatpush1.bf16.msra.mxu1 %v22359_v47  ;;  %v21162_v47 = vld [vmem:[%s28604_s1 + $0x84c] ss:$24 sps:$4 sm:$0xff]  }
 0x400   : > { %3703 = vmatprep.subr.bf16.mxu1 %v28634_v0  ;;  %5905 = vmatprep.mubr.bf16.mxu0 %v21162_v47  ;;  %v21141_v16 = vld [vmem:[%s28604_s1 + $0x784] ss:$24 sps:$4 sm:$0xff]  }
 0x401   : > { %5906 = vmatmul.mubr.bf16.gmra.mrb[92].mxu0 %v21164_v30  ;;  %6066 = vmatprep.subr.bf16.mxu0 %v28634_v0  ;;  %v21240_v47 = vld [vmem:[%s28604_s1 + $0xabc] ss:$24 sps:$4 sm:$0xff]   ;;  %v21242_v30 = vld [vmem:[%s28604_s1 + $0xab8] ss:$24 sps:$4 sm:$0xff]  }
 0x402   : > { %6067 = vmatpush1.bf16.msra.mxu0 %v28768_v36 }
 0x403   : > { %3704 = vmatpush1.bf16.msra.mxu1 %v22364_v51  ;;  %v21071_v51 = vld [vmem:[%s28604_s1 + $0x540] ss:$24 sps:$4 sm:$0xff]   ;;  %6068 = vmatprep.subr.bf16.mxu0 %v28634_v0 }
 0x404   : > { %3705 = vmatprep.subr.bf16.mxu1 %v28634_v0 }
 0x406   : > { %3561 = vmatmul.mubr.bf16.gmra.mrb[192].mxu1 %v21065_v39  ;;  %6069 = vmatpush1.bf16.msra.mxu0 %v28769_v43  ;;  %v21143_v39 = vld [vmem:[%s28604_s1 + $0x780] ss:$24 sps:$4 sm:$0xff]  }
 0x407   : > { %3568 = vmatprep.mubr.bf16.mxu1 %v21069_v26  ;;  %3706 = vmatpush1.bf16.msra.mxu1 %v22377_v59  ;;  %v21168_v59 = vld [vmem:[%s28604_s1 + $0x87c] ss:$24 sps:$4 sm:$0xff]  }
 0x408   : > { %3707 = vmatprep.subr.bf16.mxu1 %v28634_v0  ;;  %5913 = vmatprep.mubr.bf16.mxu0 %v21168_v59  ;;  %v21147_v26 = vld [vmem:[%s28604_s1 + $0x7b4] ss:$24 sps:$4 sm:$0xff]  }
 0x409   : > { %5914 = vmatmul.mubr.bf16.gmra.mrb[96].mxu0 %v21170_v42  ;;  %6070 = vmatprep.subr.bf16.mxu0 %v28634_v0  ;;  %v21246_v59 = vld [vmem:[%s28604_s1 + $0xaec] ss:$24 sps:$4 sm:$0xff]   ;;  %v21248_v42 = vld [vmem:[%s28604_s1 + $0xae8] ss:$24 sps:$4 sm:$0xff]  }
 0x40a   : > { %6071 = vmatpush1.bf16.msra.mxu0 %v28770_v48 }
 0x40b   : > { %3708 = vmatpush1.bf16.msra.mxu1 %v22382_v61  ;;  %v21077_v61 = vld [vmem:[%s28604_s1 + $0x570] ss:$24 sps:$4 sm:$0xff]   ;;  %6072 = vmatprep.subr.bf16.mxu0 %v28634_v0 }
 0x40c   : > { %3709 = vmatprep.subr.bf16.mxu1 %v28634_v0 }
 0x40e   : > { %3569 = vmatmul.mubr.bf16.gmra.mrb[196].mxu1 %v21071_v51  ;;  %6073 = vmatpush1.bf16.msra.mxu0 %v28771_v63  ;;  %v21149_v51 = vld [vmem:[%s28604_s1 + $0x7b0] ss:$24 sps:$4 sm:$0xff]  }
 0x40f   : > { %3576 = vmatprep.mubr.bf16.mxu1 %v21075_v38  ;;  %3710 = vmatpush1.bf16.msra.mxu1 %v22395_v8  ;;  %v21174_v8 = vld [vmem:[%s28604_s1 + $0x8ac] ss:$24 sps:$4 sm:$0xff]   ;;  %v21155_v38 = vld [vmem:[%s28604_s1 + $0x3fc] ss:$24 sps:$4 sm:$0xff]  }
 0x410   : > { %3711 = vmatprep.subr.bf16.mxu1 %v28634_v0  ;;  %6074 = vmatprep.subr.bf16.mxu0 %v28634_v0 }
 0x411   : > { %5921 = vmatprep.mubr.bf16.mxu0 %v21174_v8  ;;  %v21252_v8 = vld [vmem:[%s28604_s1 + $0xb1c] ss:$24 sps:$4 sm:$0xff]  }
 0x412   : > { %5922 = vmatmul.mubr.bf16.gmra.mrb[100].mxu0 %v21176_v44  ;;  %v21254_v44 = vld [vmem:[%s28604_s1 + $0xb18] ss:$24 sps:$4 sm:$0xff]  }
 0x413   : > { %3712 = vmatpush1.bf16.msra.mxu1 %v22399_v11  ;;  %v21083_v11 = vld [vmem:[%s28604_s1 + $0x5a0] ss:$24 sps:$4 sm:$0xff]   ;;  %6075 = vmatpush1.bf16.msra.mxu0 %v28772_v17 }
 0x414   : > { %3882 = vmatprep.subr.bf16.mxu1 %v28634_v0  ;;  %6076 = vmatprep.subr.bf16.mxu0 %v28634_v0 }
 0x415   : > { %5929 = vmatprep.mubr.bf16.mxu0 %v21180_v22  ;;  %v21260_v22 = vld [vmem:[%s28604_s1 + $0xb48] ss:$24 sps:$4 sm:$0xff]  }
 0x416   : > { %3577 = vmatmul.mubr.bf16.gmra.mrb[200].mxu1 %v21077_v61  ;;  %v21153_v61 = vld [vmem:[%s28604_s1 + $0x3f8] ss:$24 sps:$4 sm:$0xff]  }
 0x417   : > { %3584 = vmatprep.mubr.bf16.mxu1 %v21081_v50  ;;  %6077 = vmatpush1.bf16.msra.mxu0 %v28773_v12  ;;  %v21159_v50 = vld [vmem:[%s28604_s1 + $0x42c] ss:$24 sps:$4 sm:$0xff]  }
 0x41a   : > { %5930 = vmatmul.mubr.bf16.gmra.mrb[104].mxu0 %v21182_v40  ;;  %v21171_v40 = vld [vmem:[%s28604_s1 + $0x48c] ss:$24 sps:$4 sm:$0xff]  }
 0x41b   : > { %5937 = vmatprep.mubr.bf16.mxu0 %v21186_v28  ;;  %v21272_v28 = vld [vmem:[%s28604_s1 + $0xba8] ss:$24 sps:$4 sm:$0xff]  }
 0x41e   : > { %3585 = vmatmul.mubr.bf16.gmra.mrb[204].mxu1 %v21083_v11  ;;  %v21161_v11 = vld [vmem:[%s28604_s1 + $0x428] ss:$24 sps:$4 sm:$0xff]  }
 0x41f   : > { %3592 = vmatprep.mubr.bf16.mxu1 %v21087_v25  ;;  %v21165_v25 = vld [vmem:[%s28604_s1 + $0x45c] ss:$24 sps:$4 sm:$0xff]  }
 0x422   : > { %5938 = vmatmul.mubr.bf16.gmra.mrb[108].mxu0 %v21188_v55  ;;  %v21183_v55 = vld [vmem:[%s28604_s1 + $0x4ec] ss:$24 sps:$4 sm:$0xff]  }
 0x423   : > { %5945 = vmatprep.mubr.bf16.mxu0 %v21192_v2  ;;  %v21284_v2 = vld [vmem:[%s28604_s1 + $0x820] ss:$24 sps:$4 sm:$0xff]  }
 0x426   : > { %3593 = vmatmul.mubr.bf16.gmra.mrb[208].mxu1 %v21089_v57  ;;  %v21266_v57 = vld [vmem:[%s28604_s1 + $0xb78] ss:$24 sps:$4 sm:$0xff]  }
 0x427   : > { %3600 = vmatprep.mubr.bf16.mxu1 %v21093_v62  ;;  %v21177_v62 = vld [vmem:[%s28604_s1 + $0x4bc] ss:$24 sps:$4 sm:$0xff]  }
 0x42a   : > { %5946 = vmatmul.mubr.bf16.gmra.mrb[112].mxu0 %v21194_v45  ;;  %v21191_v45 = vld [vmem:[%s28604_s1 + $0x518] ss:$24 sps:$4 sm:$0xff]  }
 0x42b   : > { %5953 = vmatprep.mubr.bf16.mxu0 %v21198_v34  ;;  %v21197_v34 = vld [vmem:[%s28604_s1 + $0x548] ss:$24 sps:$4 sm:$0xff]  }
 0x42e   : > { %3601 = vmatmul.mubr.bf16.gmra.mrb[212].mxu1 %v21095_v46  ;;  %v21278_v46 = vld [vmem:[%s28604_s1 + $0x7f4] ss:$24 sps:$4 sm:$0xff]  }
 0x42f   : > { %3608 = vmatprep.mubr.bf16.mxu1 %v21099_v49  ;;  %v21189_v49 = vld [vmem:[%s28604_s1 + $0x51c] ss:$24 sps:$4 sm:$0xff]  }
 0x432   : > { %5954 = vmatmul.mubr.bf16.gmra.mrb[116].mxu0 %v21200_v20  ;;  %v21201_v20 = vld [vmem:[%s28604_s1 + $0x57c] ss:$24 sps:$4 sm:$0xff]  }
 0x433   : > { %5961 = vmatprep.mubr.bf16.mxu0 %v21204_v29  ;;  %v21203_v29 = vld [vmem:[%s28604_s1 + $0x578] ss:$24 sps:$4 sm:$0xff]  }
 0x436   : > { %3609 = vmatmul.mubr.bf16.gmra.mrb[216].mxu1 %v21101_v31  ;;  %v21288_v31 = vld [vmem:[%s28604_s1 + $0x854] ss:$24 sps:$4 sm:$0xff]  }
 0x437   : > { %3616 = vmatprep.mubr.bf16.mxu1 %v21105_v53  ;;  %v21290_v53 = vld [vmem:[%s28604_s1 + $0x850] ss:$24 sps:$4 sm:$0xff]  }
 0x43a   : > { %5962 = vmatmul.mubr.bf16.gmra.mrb[120].mxu0 %v21206_v41  ;;  %v21207_v41 = vld [vmem:[%s28604_s1 + $0x5ac] ss:$24 sps:$4 sm:$0xff]  }
 0x43b   : > { %5969 = vmatprep.mubr.bf16.mxu0 %v21210_v56  ;;  %v21209_v56 = vld [vmem:[%s28604_s1 + $0x5a8] ss:$24 sps:$4 sm:$0xff]  }
 0x43e   : > { %3617 = vmatmul.mubr.bf16.gmra.mrb[220].mxu1 %v21107_v54  ;;  %v21294_v54 = vld [vmem:[%s28604_s1 + $0x884] ss:$24 sps:$4 sm:$0xff]  }
 0x43f   : > { %3624 = vmatprep.mubr.bf16.mxu1 %v21111_v35  ;;  %v21296_v35 = vld [vmem:[%s28604_s1 + $0x880] ss:$24 sps:$4 sm:$0xff]  }
 0x442   : > { %5970 = vmatmul.mubr.bf16.gmra.mrb[124].mxu0 %v21212_v60  ;;  %v21213_v60 = vld [vmem:[%s28604_s1 + $0x5dc] ss:$24 sps:$4 sm:$0xff]  }
 0x443   : > { %5977 = vmatprep.mubr.bf16.mxu0 %v21216_v1  ;;  %v21215_v1 = vld [vmem:[%s28604_s1 + $0x5d8] ss:$24 sps:$4 sm:$0xff]  }
 0x446   : > { %3625 = vmatmul.mubr.bf16.gmra.mrb[224].mxu1 %v21113_v52  ;;  %v21300_v52 = vld [vmem:[%s28604_s1 + $0x8b4] ss:$24 sps:$4 sm:$0xff]  }
 0x447   : > { %3632 = vmatprep.mubr.bf16.mxu1 %v21117_v4  ;;  %v21302_v4 = vld [vmem:[%s28604_s1 + $0x8b0] ss:$24 sps:$4 sm:$0xff]  }
 0x44a   : > { %5978 = vmatmul.mubr.bf16.gmra.mrb[128].mxu0 %v21218_v23  ;;  %v21219_v23 = vld [vmem:[%s28604_s1 + $0x60c] ss:$24 sps:$4 sm:$0xff]  }
 0x44b   : > { %5985 = vmatprep.mubr.bf16.mxu0 %v21222_v9  ;;  %v21221_v9 = vld [vmem:[%s28604_s1 + $0x608] ss:$24 sps:$4 sm:$0xff]  }
 0x44e   : > { %3633 = vmatmul.mubr.bf16.gmra.mrb[228].mxu1 %v21119_v58  ;;  %v21306_v58 = vld [vmem:[%s28604_s1 + $0x8e4] ss:$24 sps:$4 sm:$0xff]  }
 0x44f   : > { %3640 = vmatprep.mubr.bf16.mxu1 %v21123_v6  ;;  %v21308_v6 = vld [vmem:[%s28604_s1 + $0x8e0] ss:$24 sps:$4 sm:$0xff]  }
 0x452   : > { %5986 = vmatmul.mubr.bf16.gmra.mrb[132].mxu0 %v21224_v7  ;;  %v21225_v7 = vld [vmem:[%s28604_s1 + $0x63c] ss:$24 sps:$4 sm:$0xff]  }
 0x453   : > { %5993 = vmatprep.mubr.bf16.mxu0 %v21228_v21  ;;  %v21227_v21 = vld [vmem:[%s28604_s1 + $0x638] ss:$24 sps:$4 sm:$0xff]  }
 0x456   : > { %3641 = vmatmul.mubr.bf16.gmra.mrb[232].mxu1 %v21125_v3  ;;  %v21312_v3 = vld [vmem:[%s28604_s1 + $0x914] ss:$24 sps:$4 sm:$0xff]  }
 0x457   : > { %3648 = vmatprep.mubr.bf16.mxu1 %v21129_v5  ;;  %v21314_v5 = vld [vmem:[%s28604_s1 + $0x910] ss:$24 sps:$4 sm:$0xff]  }
 0x45a   : > { %5994 = vmatmul.mubr.bf16.gmra.mrb[136].mxu0 %v21230_v13  ;;  %v21231_v13 = vld [vmem:[%s28604_s1 + $0x66c] ss:$24 sps:$4 sm:$0xff]  }
 0x45b   : > { %6001 = vmatprep.mubr.bf16.mxu0 %v21234_v33  ;;  %v21233_v33 = vld [vmem:[%s28604_s1 + $0x668] ss:$24 sps:$4 sm:$0xff]  }
 0x45e   : > { %3649 = vmatmul.mubr.bf16.gmra.mrb[236].mxu1 %v21131_v15  ;;  %v21318_v15 = vld [vmem:[%s28604_s1 + $0x944] ss:$24 sps:$4 sm:$0xff]  }
 0x45f   : > { %3656 = vmatprep.mubr.bf16.mxu1 %v21135_v10  ;;  %v21320_v10 = vld [vmem:[%s28604_s1 + $0x940] ss:$24 sps:$4 sm:$0xff]  }
 0x462   : > { %6002 = vmatmul.mubr.bf16.gmra.mrb[140].mxu0 %v21236_v19  ;;  %v21237_v19 = vld [vmem:[%s28604_s1 + $0x69c] ss:$24 sps:$4 sm:$0xff]  }
 0x463   : > { %6009 = vmatprep.mubr.bf16.mxu0 %v21240_v47  ;;  %v21239_v47 = vld [vmem:[%s28604_s1 + $0x698] ss:$24 sps:$4 sm:$0xff]  }
 0x466   : > { %3657 = vmatmul.mubr.bf16.gmra.mrb[240].mxu1 %v21137_v27  ;;  %v21324_v27 = vld [vmem:[%s28604_s1 + $0x974] ss:$24 sps:$4 sm:$0xff]  }
 0x467   : > { %3664 = vmatprep.mubr.bf16.mxu1 %v21141_v16  ;;  %v21326_v16 = vld [vmem:[%s28604_s1 + $0x970] ss:$24 sps:$4 sm:$0xff]  }
 0x46a   : > { %6010 = vmatmul.mubr.bf16.gmra.mrb[144].mxu0 %v21242_v30  ;;  %v21243_v30 = vld [vmem:[%s28604_s1 + $0x6cc] ss:$24 sps:$4 sm:$0xff]  }
 0x46b   : > { %6017 = vmatprep.mubr.bf16.mxu0 %v21246_v59  ;;  %v21245_v59 = vld [vmem:[%s28604_s1 + $0x6c8] ss:$24 sps:$4 sm:$0xff]  }
 0x46e   : > { %3665 = vmatmul.mubr.bf16.gmra.mrb[244].mxu1 %v21143_v39  ;;  %v21330_v39 = vld [vmem:[%s28604_s1 + $0x9a4] ss:$24 sps:$4 sm:$0xff]  }
 0x46f   : > { %3672 = vmatprep.mubr.bf16.mxu1 %v21147_v26  ;;  %v21332_v26 = vld [vmem:[%s28604_s1 + $0x9a0] ss:$24 sps:$4 sm:$0xff]  }
 0x472   : > { %6018 = vmatmul.mubr.bf16.gmra.mrb[148].mxu0 %v21248_v42  ;;  %v21249_v42 = vld [vmem:[%s28604_s1 + $0x6fc] ss:$24 sps:$4 sm:$0xff]  }
 0x473   : > { %6025 = vmatprep.mubr.bf16.mxu0 %v21252_v8  ;;  %v21251_v8 = vld [vmem:[%s28604_s1 + $0x6f8] ss:$24 sps:$4 sm:$0xff]  }
 0x476   : > { %3673 = vmatmul.mubr.bf16.gmra.mrb[248].mxu1 %v21149_v51  ;;  %v21336_v51 = vld [vmem:[%s28604_s1 + $0x9d4] ss:$24 sps:$4 sm:$0xff]  }
 0x477   : > { %3713 = vmatprep.mubr.bf16.mxu1 %v21155_v38  ;;  %v21338_v38 = vld [vmem:[%s28604_s1 + $0x9d0] ss:$24 sps:$4 sm:$0xff]  }
 0x47a   : > { %6026 = vmatmul.mubr.bf16.gmra.mrb[152].mxu0 %v21254_v44  ;;  %v21255_v44 = vld [vmem:[%s28604_s1 + $0x72c] ss:$24 sps:$4 sm:$0xff]  }
 0x47e   : > { %3714 = vmatmul.mubr.bf16.vlgmr.msra.gmra.mrb[168].mxu1 %v21153_v61  ;;  %v21342_v61 = vld [vmem:[%s28604_s1 + $0xa04] ss:$24 sps:$4 sm:$0xff]  }
 0x47f   : > { %3721 = vmatprep.mubr.bf16.mxu1 %v21159_v50  ;;  %3883 = vmatpush1.bf16.msra.mxu1 %v22492_v14  ;;  %v21258_v14 = vld [vmem:[%s28604_s1 + $0xb4c] ss:$24 sps:$4 sm:$0xff]   ;;  %v21344_v50 = vld [vmem:[%s28604_s1 + $0xa00] ss:$24 sps:$4 sm:$0xff]  }
 0x480   : > { %3884 = vmatprep.subr.bf16.mxu1 %v28634_v0  ;;  %6033 = vmatprep.mubr.bf16.mxu0 %v21258_v14  ;;  %v21353_v14 = vld [vmem:[%s28604_s1 + $0xa30] ss:$24 sps:$4 sm:$0xff]  }
 0x482   : > { %6034 = vmatmul.mubr.bf16.gmra.mrb[156].mxu0 %v21260_v22  ;;  %v21257_v22 = vld [vmem:[%s28604_s1 + $0x728] ss:$24 sps:$4 sm:$0xff]  }
 0x483   : > { %3885 = vmatpush1.bf16.msra.mxu1 %v22496_v18  ;;  %v21167_v18 = vld [vmem:[%s28604_s1 + $0x458] ss:$24 sps:$4 sm:$0xff]  }
 0x484   : > { %3886 = vmatprep.subr.bf16.mxu1 %v28634_v0 }
 0x486   : > { %3722 = vmatmul.mubr.bf16.gmra.mrb[172].mxu1 %v21161_v11  ;;  %v21350_v11 = vld [vmem:[%s28605_s2 + $0x88] ss:$12 sps:$4 sm:$0xff]  }
 0x487   : > { %3729 = vmatprep.mubr.bf16.mxu1 %v21165_v25  ;;  %3887 = vmatpush1.bf16.msra.mxu1 %v28766_v24  ;;  %v21264_v24 = vld [vmem:[%s28604_s1 + $0xb7c] ss:$24 sps:$4 sm:$0xff]  }
 0x488   : > { %3888 = vmatprep.subr.bf16.mxu1 %v28634_v0  ;;  %6041 = vmatprep.mubr.bf16.mxu0 %v21264_v24  ;;  %v21351_v25 = vld [vmem:[%s28604_s1 + $0xa34] ss:$24 sps:$4 sm:$0xff]   ;;  %v21359_v24 = vld [vmem:[%s28604_s1 + $0xa60] ss:$24 sps:$4 sm:$0xff]  }
 0x48a   : > { %6042 = vmatmul.mubr.bf16.gmra.mrb[160].mxu0 %v21266_v57  ;;  %v21263_v57 = vld [vmem:[%s28604_s1 + $0x758] ss:$24 sps:$4 sm:$0xff]  }
 0x48b   : > { %3889 = vmatpush1.bf16.msra.mxu1 %v28767_v32  ;;  %v21173_v32 = vld [vmem:[%s28604_s1 + $0x488] ss:$24 sps:$4 sm:$0xff]  }
 0x48c   : > { %3890 = vmatprep.subr.bf16.mxu1 %v28634_v0 }
 0x48e   : > { %3730 = vmatmul.mubr.bf16.gmra.mrb[176].mxu1 %v21167_v18  ;;  %v21261_v18 = vld [vmem:[%s28604_s1 + $0x75c] ss:$24 sps:$4 sm:$0xff]  }
 0x48f   : > { %3737 = vmatprep.mubr.bf16.mxu1 %v21171_v40  ;;  %3891 = vmatpush1.bf16.msra.mxu1 %v28768_v36  ;;  %v21270_v36 = vld [vmem:[%s28604_s1 + $0xbac] ss:$24 sps:$4 sm:$0xff]  }
 0x490   : > { %3892 = vmatprep.subr.bf16.mxu1 %v28634_v0  ;;  %6049 = vmatprep.mubr.bf16.mxu0 %v21270_v36  ;;  %v21357_v40 = vld [vmem:[%s28604_s1 + $0xa64] ss:$24 sps:$4 sm:$0xff]   ;;  %v21365_v36 = vld [vmem:[%s28604_s1 + $0xa90] ss:$24 sps:$4 sm:$0xff]  }
 0x492   : > { %6050 = vmatmul.mubr.bf16.gmra.mrb[164].mxu0 %v21272_v28  ;;  %v21269_v28 = vld [vmem:[%s28604_s1 + $0x788] ss:$24 sps:$4 sm:$0xff]  }
 0x493   : > { %3893 = vmatpush1.bf16.msra.mxu1 %v28769_v43  ;;  %v21179_v43 = vld [vmem:[%s28604_s1 + $0x4b8] ss:$24 sps:$4 sm:$0xff]   ;;  %16411 = vmatprep.mubr.msk.bf16.mxu0 %vm1223_vm0, %v21278_v46 }
 0x494   : > { %3894 = vmatprep.subr.bf16.mxu1 %v28634_v0  ;;  %v21275_v46 = vld [vmem:[%s28604_s1 + $0x7b8] ss:$24 sps:$4 sm:$0xff]  }
 0x496   : > { %3738 = vmatmul.mubr.bf16.gmra.mrb[180].mxu1 %v21173_v32  ;;  %v21267_v32 = vld [vmem:[%s28604_s1 + $0x78c] ss:$24 sps:$4 sm:$0xff]  }
 0x497   : > { %3745 = vmatprep.mubr.bf16.mxu1 %v21177_v62  ;;  %3895 = vmatpush1.bf16.msra.mxu1 %v28770_v48  ;;  %v21276_v48 = vld [vmem:[%s28604_s1 + $0x7f0] ss:$24 sps:$4 sm:$0xff]   ;;  %v21363_v62 = vld [vmem:[%s28604_s1 + $0xa94] ss:$24 sps:$4 sm:$0xff]  }
 0x498   : > { %3896 = vmatprep.subr.bf16.mxu1 %v28634_v0 }
 0x49a   : > { %6091 = vmatmul.mubr.bf16.vlgmr.msra.gmra.mrb[84].mxu0 %v21276_v48  ;;  %v21371_v48 = vld [vmem:[%s28604_s1 + $0xac0] ss:$24 sps:$4 sm:$0xff]  }
 0x49b   : > { %3897 = vmatpush1.bf16.msra.mxu1 %v28771_v63  ;;  %v21185_v63 = vld [vmem:[%s28604_s1 + $0x4e8] ss:$24 sps:$4 sm:$0xff]  }
 0x49c   : > { %3898 = vmatprep.subr.bf16.mxu1 %v28634_v0 }
 0x49e   : > { %3746 = vmatmul.mubr.bf16.gmra.mrb[184].mxu1 %v21179_v43  ;;  %v21273_v43 = vld [vmem:[%s28604_s1 + $0x7bc] ss:$24 sps:$4 sm:$0xff]  }
 0x49f   : > { %3753 = vmatprep.mubr.bf16.mxu1 %v21183_v55  ;;  %3899 = vmatpush1.bf16.msra.mxu1 %v28772_v17  ;;  %v21282_v17 = vld [vmem:[%s28604_s1 + $0x824] ss:$24 sps:$4 sm:$0xff]  }
 0x4a0   : > { %3900 = vmatprep.subr.bf16.mxu1 %v28634_v0  ;;  %16412 = vmatprep.mubr.msk.bf16.mxu0 %vm1223_vm0, %v21282_v17  ;;  %v21369_v55 = vld [vmem:[%s28604_s1 + $0xac4] ss:$24 sps:$4 sm:$0xff]   ;;  %v21380_v17 = vld [vmem:[%s28604_s1 + $0xaf0] ss:$24 sps:$4 sm:$0xff]  }
 0x4a2   : > { %6099 = vmatmul.mubr.bf16.gmra.mrb[88].mxu0 %v21284_v2  ;;  %v21279_v2 = vld [vmem:[%s28604_s1 + $0x400] ss:$24 sps:$4 sm:$0xff]  }
 0x4a3   : > { %3901 = vmatpush1.bf16.msra.mxu1 %v28773_v12  ;;  %v21195_v12 = vld [vmem:[%s28604_s1 + $0x54c] ss:$24 sps:$4 sm:$0xff]   ;;  %16413 = vmatprep.mubr.msk.bf16.mxu0 %vm1223_vm0, %v21288_v31 }
 0x4a4   : > { %4287 = vmatprep.subr.bf16.mxu1 %v21350_v11  ;;  %v21377_v31 = vld [vmem:[%s28605_s2 + $0xa0] ss:$12 sps:$4 sm:$0xff]  }
 0x4a5   : > { %v16096_v11 = vld [vmem:[%s28605_s2 + $0xfc] sm:$0x33] }
 0x4a6   : > { %3754 = vmatmul.mubr.bf16.gmra.mrb[188].mxu1 %v21185_v63  ;;  %v21281_v63 = vld [vmem:[%s28604_s1 + $0x404] ss:$24 sps:$4 sm:$0xff]  }
 0x4a7   : > { %3761 = vmatprep.mubr.bf16.mxu1 %v21189_v49  ;;  %v21378_v49 = vld [vmem:[%s28604_s1 + $0xaf4] ss:$24 sps:$4 sm:$0xff]  }
 0x4aa   : > { %6107 = vmatmul.mubr.bf16.gmra.mrb[92].mxu0 %v21290_v53  ;;  %v21384_v53 = vld [vmem:[%s28604_s1 + $0xb24] ss:$24 sps:$4 sm:$0xff]  }
 0x4ab   : > { %16414 = vmatprep.mubr.msk.bf16.mxu0 %vm1223_vm0, %v21294_v54  ;;  %v21287_v54 = vld [vmem:[%s28604_s1 + $0x430] ss:$24 sps:$4 sm:$0xff]  }
 0x4ae   : > { %3762 = vmatmul.mubr.bf16.gmra.mrb[192].mxu1 %v21191_v45  ;;  %v21285_v45 = vld [vmem:[%s28604_s1 + $0x434] ss:$24 sps:$4 sm:$0xff]  }
 0x4af   : > { %3769 = vmatprep.mubr.bf16.mxu1 %v21195_v12  ;;  %v21348_v12 = vld [vmem:[%s28605_s2 + $0x84] ss:$12 sps:$4 sm:$0xff]  }
 0x4b2   : > { %6115 = vmatmul.mubr.bf16.gmra.mrb[96].mxu0 %v21296_v35  ;;  %v21291_v35 = vld [vmem:[%s28604_s1 + $0x464] ss:$24 sps:$4 sm:$0xff]  }
 0x4b3   : > { %16415 = vmatprep.mubr.msk.bf16.mxu0 %vm1223_vm0, %v21300_v52  ;;  %v21293_v52 = vld [vmem:[%s28604_s1 + $0x460] ss:$24 sps:$4 sm:$0xff]  }
 0x4b6   : > { %3770 = vmatmul.mubr.bf16.gmra.mrb[196].mxu1 %v21197_v34  ;;  %v21386_v34 = vld [vmem:[%s28604_s1 + $0xb20] ss:$24 sps:$4 sm:$0xff]  }
 0x4b7   : > { %3777 = vmatprep.mubr.bf16.mxu1 %v21201_v20  ;;  %v21375_v20 = vld [vmem:[%s28605_s2 + $0x9c] ss:$12 sps:$4 sm:$0xff]  }
 0x4ba   : > { %6123 = vmatmul.mubr.bf16.gmra.mrb[100].mxu0 %v21302_v4  ;;  %v21297_v4 = vld [vmem:[%s28604_s1 + $0x494] ss:$24 sps:$4 sm:$0xff]  }
 0x4bb   : > { %16416 = vmatprep.mubr.msk.bf16.mxu0 %vm1223_vm0, %v21306_v58  ;;  %v21399_v58 = vld [vmem:[%s28604_s1 + $0xb84] ss:$24 sps:$4 sm:$0xff]  }
 0x4be   : > { %3778 = vmatmul.mubr.bf16.gmra.mrb[200].mxu1 %v21203_v29  ;;  %v21390_v29 = vld [vmem:[%s28604_s1 + $0xb54] ss:$24 sps:$4 sm:$0xff]  }
 0x4bf   : > { %3785 = vmatprep.mubr.bf16.mxu1 %v21207_v41  ;;  %v21392_v41 = vld [vmem:[%s28604_s1 + $0xb50] ss:$24 sps:$4 sm:$0xff]  }
 0x4c2   : > { %6131 = vmatmul.mubr.bf16.gmra.mrb[104].mxu0 %v21308_v6  ;;  %v21401_v6 = vld [vmem:[%s28604_s1 + $0xb80] ss:$24 sps:$4 sm:$0xff]  }
 0x4c3   : > { %16417 = vmatprep.mubr.msk.bf16.mxu0 %vm1223_vm0, %v21312_v3  ;;  %v21405_v3 = vld [vmem:[%s28604_s1 + $0xbb4] ss:$24 sps:$4 sm:$0xff]  }
 0x4c6   : > { %3786 = vmatmul.mubr.bf16.gmra.mrb[204].mxu1 %v21209_v56  ;;  %v21396_v56 = vld [vmem:[%s28605_s2 + $0xb4] ss:$12 sps:$4 sm:$0xff]  }
 0x4c7   : > { %3793 = vmatprep.mubr.bf16.mxu1 %v21213_v60  ;;  %v21398_v60 = vld [vmem:[%s28605_s2 + $0xb8] ss:$12 sps:$4 sm:$0xff]  }
 0x4ca   : > { %6139 = vmatmul.mubr.bf16.gmra.mrb[108].mxu0 %v21314_v5  ;;  %v21407_v5 = vld [vmem:[%s28604_s1 + $0xbb0] ss:$24 sps:$4 sm:$0xff]  }
 0x4cb   : > { %16418 = vmatprep.mubr.msk.bf16.mxu0 %vm1223_vm0, %v21318_v15  ;;  %v21411_v15 = vld [vmem:[%s28605_s2 + $0xcc] ss:$12 sps:$4 sm:$0xff]  }
 0x4ce   : > { %3794 = vmatmul.mubr.bf16.gmra.mrb[208].mxu1 %v21215_v1  ;;  %v21299_v1 = vld [vmem:[%s28604_s1 + $0x490] ss:$24 sps:$4 sm:$0xff]  }
 0x4cf   : > { %3801 = vmatprep.mubr.bf16.mxu1 %v21219_v23  ;;  %v21303_v23 = vld [vmem:[%s28604_s1 + $0x4c4] ss:$24 sps:$4 sm:$0xff]  }
 0x4d2   : > { %6147 = vmatmul.mubr.bf16.gmra.mrb[112].mxu0 %v21320_v10  ;;  %v21413_v10 = vld [vmem:[%s28605_s2 + $0xd0] ss:$12 sps:$4 sm:$0xff]  }
 0x4d3   : > { %16419 = vmatprep.mubr.msk.bf16.mxu0 %vm1223_vm0, %v21324_v27  ;;  %v21311_v27 = vld [vmem:[%s28604_s1 + $0x4f0] ss:$24 sps:$4 sm:$0xff]  }
 0x4d6   : > { %3802 = vmatmul.mubr.bf16.gmra.mrb[212].mxu1 %v21221_v9  ;;  %v21305_v9 = vld [vmem:[%s28604_s1 + $0x4c0] ss:$24 sps:$4 sm:$0xff]  }
 0x4d7   : > { %3809 = vmatprep.mubr.bf16.mxu1 %v21225_v7  ;;  %v21309_v7 = vld [vmem:[%s28604_s1 + $0x4f4] ss:$24 sps:$4 sm:$0xff]  }
 0x4da   : > { %6155 = vmatmul.mubr.bf16.gmra.mrb[116].mxu0 %v21326_v16  ;;  %v21315_v16 = vld [vmem:[%s28604_s1 + $0x524] ss:$24 sps:$4 sm:$0xff]  }
 0x4db   : > { %16420 = vmatprep.mubr.msk.bf16.mxu0 %vm1223_vm0, %v21330_v39  ;;  %v21323_v39 = vld [vmem:[%s28604_s1 + $0x550] ss:$24 sps:$4 sm:$0xff]  }
 0x4de   : > { %3810 = vmatmul.mubr.bf16.gmra.mrb[216].mxu1 %v21227_v21  ;;  %v21416_v21 = vld [vmem:[%s28605_s2 + $0xe8] ss:$12 sps:$4 sm:$0xff]  }
 0x4df   : > { %3817 = vmatprep.mubr.bf16.mxu1 %v21231_v13  ;;  %v21414_v13 = vld [vmem:[%s28605_s2 + $0xe4] ss:$12 sps:$4 sm:$0xff]  }
 0x4e2   : > { %6163 = vmatmul.mubr.bf16.gmra.mrb[120].mxu0 %v21332_v26  ;;  %v21327_v26 = vld [vmem:[%s28604_s1 + $0x584] ss:$24 sps:$4 sm:$0xff]  }
 0x4e3   : > { %16421 = vmatprep.mubr.msk.bf16.mxu0 %vm1223_vm0, %v21336_v51  ;;  %v21335_v51 = vld [vmem:[%s28604_s1 + $0x5b0] ss:$24 sps:$4 sm:$0xff]  }
 0x4e6   : > { %3818 = vmatmul.mubr.bf16.gmra.mrb[220].mxu1 %v21233_v33  ;;  %v21317_v33 = vld [vmem:[%s28604_s1 + $0x520] ss:$24 sps:$4 sm:$0xff]  }
 0x4e7   : > { %3825 = vmatprep.mubr.bf16.mxu1 %v21237_v19  ;;  %v21321_v19 = vld [vmem:[%s28604_s1 + $0x554] ss:$24 sps:$4 sm:$0xff]  }
 0x4ea   : > { %6171 = vmatmul.mubr.bf16.gmra.mrb[124].mxu0 %v21338_v38  ;;  %v21339_v38 = vld [vmem:[%s28604_s1 + $0x5e4] ss:$24 sps:$4 sm:$0xff]  }
 0x4eb   : > { %16422 = vmatprep.mubr.msk.bf16.mxu0 %vm1223_vm0, %v21342_v61 }
 0x4ee   : > { %3826 = vmatmul.mubr.bf16.gmra.mrb[224].mxu1 %v21239_v47  ;;  %v21329_v47 = vld [vmem:[%s28604_s1 + $0x580] ss:$24 sps:$4 sm:$0xff]  }
 0x4ef   : > { %3833 = vmatprep.mubr.bf16.mxu1 %v21243_v30  ;;  %v21333_v30 = vld [vmem:[%s28604_s1 + $0x5b4] ss:$24 sps:$4 sm:$0xff]  }
 0x4f2   : > { %6179 = vmatmul.mubr.bf16.gmra.mrb[128].mxu0 %v21344_v50 }
 0x4f3   : > { %16423 = vmatprep.mubr.msk.bf16.mxu0 %vm1223_vm0, %v21351_v25  ;;  %v16114_v25 = vcombine.high %v16096_v11, %v16096_v11 }
 0x4f6   : > { %3834 = vmatmul.mubr.bf16.gmra.mrb[228].mxu1 %v21245_v59  ;;  %v21341_v59 = vld [vmem:[%s28604_s1 + $0x5e0] ss:$24 sps:$4 sm:$0xff]  }
 0x4f7   : > { %3841 = vmatprep.mubr.bf16.mxu1 %v21249_v42  ;;  %v21345_v42 = vld [vmem:[%s28604_s1 + $0x614] ss:$24 sps:$4 sm:$0xff]  }
 0x4fa   : > { %6187 = vmatmul.mubr.bf16.gmra.mrb[132].mxu0 %v21353_v14  ;;  %v16113_v14 = vcombine.low %v16096_v11, %v16096_v11  ;;  %v21408_v11 = vld [vmem:[%s28604_s1 + $0x7c4] ss:$24 sps:$4 sm:$0xff]  }
 0x4fb   : > { %16424 = vmatprep.mubr.msk.bf16.mxu0 %vm1223_vm0, %v21357_v40 }
 0x4fe   : > { %3842 = vmatmul.mubr.bf16.gmra.mrb[232].mxu1 %v21251_v8 }
 0x4ff   : > { %3849 = vmatprep.mubr.bf16.mxu1 %v21255_v44 }
 0x502   : > { %6195 = vmatmul.mubr.bf16.gmra.mrb[136].mxu0 %v21359_v24  ;;  %v21354_v24 = vld [vmem:[%s28604_s1 + $0x644] ss:$24 sps:$4 sm:$0xff]  }
 0x503   : > { %16425 = vmatprep.mubr.msk.bf16.mxu0 %vm1223_vm0, %v21363_v62 }
 0x506   : > { %3850 = vmatmul.mubr.bf16.gmra.mrb[236].mxu1 %v21257_v22  ;;  %v21347_v22 = vld [vmem:[%s28604_s1 + $0x610] ss:$24 sps:$4 sm:$0xff]  }
 0x507   : > { %3857 = vmatprep.mubr.bf16.mxu1 %v21261_v18  ;;  %v4279_v18 = vsel %vm2085_vm1, %v16113_v14, 0 }
 0x50a   : > { %6203 = vmatmul.mubr.bf16.gmra.mrb[140].mxu0 %v21365_v36 }
 0x50b   : > { %16426 = vmatprep.mubr.msk.bf16.mxu0 %vm1223_vm0, %v21369_v55  ;;  %v21360_v55 = vld [vmem:[%s28604_s1 + $0x674] ss:$24 sps:$4 sm:$0xff]  }
 0x50e   : > { %3858 = vmatmul.mubr.bf16.gmra.mrb[240].mxu1 %v21263_v57 }
 0x50f   : > { %3865 = vmatprep.mubr.bf16.mxu1 %v21267_v32 }
 0x512   : > { %6211 = vmatmul.mubr.bf16.gmra.mrb[144].mxu0 %v21371_v48 }
 0x513   : > { %16427 = vmatprep.mubr.msk.bf16.mxu0 %vm1223_vm0, %v21378_v49 }
 0x516   : > { %3866 = vmatmul.mubr.bf16.gmra.mrb[244].mxu1 %v21269_v28  ;;  %v21356_v28 = vld [vmem:[%s28604_s1 + $0x640] ss:$24 sps:$4 sm:$0xff]  }
 0x517   : > { %3873 = vmatprep.mubr.bf16.mxu1 %v21273_v43 }
 0x51a   : > { %6219 = vmatmul.mubr.bf16.gmra.mrb[148].mxu0 %v21380_v17  ;;  %v21362_v17 = vld [vmem:[%s28604_s1 + $0x670] ss:$24 sps:$4 sm:$0xff]  }
 0x51b   : > { %16428 = vmatprep.mubr.msk.bf16.mxu0 %vm1223_vm0, %v21384_v53 }
 0x51e   : > { %3874 = vmatmul.mubr.bf16.gmra.mrb[248].mxu1 %v21275_v46 }
 0x51f   : > { %16055 = vmatprep.mubr.msk.bf16.mxu1 %vm1223_vm0, %v21281_v63 }
 0x522   : > { %6227 = vmatmul.mubr.bf16.gmra.mrb[152].mxu0 %v21386_v34 }
 0x523   : > { %16429 = vmatprep.mubr.msk.bf16.mxu0 %vm1223_vm0, %v21390_v29 }
 0x526   : > { %3915 = vmatmul.mubr.bf16.vlgmr.msra.gmra.mrb[168].mxu1 %v21279_v2 }
 0x527   : > { %16056 = vmatprep.mubr.msk.bf16.mxu1 %vm1223_vm0, %v21285_v45  ;;  %4288 = vmatpush1.bf16.msra.mxu1 %v21348_v12  ;;  %v21366_v45 = vld [vmem:[%s28604_s1 + $0x6a4] ss:$24 sps:$4 sm:$0xff]  }
 0x528   : > { %4289 = vmatprep.subr.bf16.mxu1 %v21377_v31 }
 0x52a   : > { %6235 = vmatmul.mubr.bf16.gmra.mrb[156].mxu0 %v21392_v41 }
 0x52b   : > { %4290 = vmatpush1.bf16.msra.mxu1 %v21375_v20  ;;  %16430 = vmatprep.mubr.msk.bf16.mxu0 %vm1223_vm0, %v21399_v58  ;;  %v21368_v20 = vld [vmem:[%s28604_s1 + $0x6a0] ss:$24 sps:$4 sm:$0xff]   ;;  %v21381_v58 = vld [vmem:[%s28604_s1 + $0x704] ss:$24 sps:$4 sm:$0xff]  }
 0x52c   : > { %4291 = vmatprep.subr.bf16.mxu1 %v21398_v60 }
 0x52e   : > { %3923 = vmatmul.mubr.bf16.gmra.mrb[172].mxu1 %v21287_v54 }
 0x52f   : > { %16057 = vmatprep.mubr.msk.bf16.mxu1 %vm1223_vm0, %v21291_v35  ;;  %4292 = vmatpush1.bf16.msra.mxu1 %v21396_v56  ;;  %v21372_v35 = vld [vmem:[%s28604_s1 + $0x6d4] ss:$24 sps:$4 sm:$0xff]   ;;  %v21374_v56 = vld [vmem:[%s28604_s1 + $0x6d0] ss:$24 sps:$4 sm:$0xff]  }
 0x530   : > { %4293 = vmatprep.subr.bf16.mxu1 %v21413_v10 }
 0x532   : > { %6243 = vmatmul.mubr.bf16.gmra.mrb[160].mxu0 %v21401_v6 }
 0x533   : > { %16431 = vmatprep.mubr.msk.bf16.mxu0 %vm1223_vm0, %v21405_v3  ;;  %4294 = vmatpush1.bf16.msra.mxu1 %v21411_v15 }
 0x534   : > { %4295 = vmatprep.subr.bf16.mxu1 %v21416_v21 }
 0x536   : > { %3931 = vmatmul.mubr.bf16.gmra.mrb[176].mxu1 %v21293_v52 }
 0x537   : > { %16058 = vmatprep.mubr.msk.bf16.mxu1 %vm1223_vm0, %v21297_v4  ;;  %4296 = vmatpush1.bf16.msra.mxu1 %v21414_v13 }
 0x538   : > { %16116 = vmatprep.subr.msk.bf16.mxu1 %vm2085_vm1, %v16114_v25 }
 0x53a   : > { %6251 = vmatmul.mubr.bf16.gmra.mrb[164].mxu0 %v21407_v5  ;;  %v21383_v5 = vld [vmem:[%s28604_s1 + $0x700] ss:$24 sps:$4 sm:$0xff]  }
 0x53b   : > { %4298 = vmatpush1.bf16.msra.mxu1 %v4279_v18 }
 0x53c   : > { %18524 = vmatprep.subr.bf16.mxu1 %v28765_v37 }
 0x53e   : > { %3939 = vmatmul.mubr.bf16.gmra.mrb[180].mxu1 %v21299_v1 }
 0x53f   : > { %16059 = vmatprep.mubr.msk.bf16.mxu1 %vm1223_vm0, %v21303_v23 }
 0x546   : > { %3947 = vmatmul.mubr.bf16.gmra.mrb[184].mxu1 %v21305_v9 }
 0x547   : > { %16060 = vmatprep.mubr.msk.bf16.mxu1 %vm1223_vm0, %v21309_v7  ;;  %v21387_v7 = vld [vmem:[%s28604_s1 + $0x734] ss:$24 sps:$4 sm:$0xff]  }
 0x54e   : > { %3955 = vmatmul.mubr.bf16.gmra.mrb[188].mxu1 %v21311_v27  ;;  %v21389_v27 = vld [vmem:[%s28604_s1 + $0x730] ss:$24 sps:$4 sm:$0xff]  }
 0x54f   : > { %16061 = vmatprep.mubr.msk.bf16.mxu1 %vm1223_vm0, %v21315_v16 }
 0x556   : > { %3963 = vmatmul.mubr.bf16.gmra.mrb[192].mxu1 %v21317_v33  ;;  %v21393_v33 = vld [vmem:[%s28604_s1 + $0x764] ss:$24 sps:$4 sm:$0xff]  }
 0x557   : > { %16062 = vmatprep.mubr.msk.bf16.mxu1 %vm1223_vm0, %v21321_v19 }
 0x55e   : > { %3971 = vmatmul.mubr.bf16.gmra.mrb[196].mxu1 %v21323_v39 }
 0x55f   : > { %16063 = vmatprep.mubr.msk.bf16.mxu1 %vm1223_vm0, %v21327_v26 }
 0x566   : > { %3979 = vmatmul.mubr.bf16.gmra.mrb[200].mxu1 %v21329_v47 }
 0x567   : > { %16064 = vmatprep.mubr.msk.bf16.mxu1 %vm1223_vm0, %v21333_v30  ;;  %v21395_v30 = vld [vmem:[%s28604_s1 + $0x760] ss:$24 sps:$4 sm:$0xff]  }
 0x56d   : > { %v6092_v61 = vpop.f32.mrb[84].mxu0 }
 0x56e   : > { %3987 = vmatmul.mubr.bf16.gmra.mrb[204].mxu1 %v21335_v51  ;;  %v6094_v50 = vpop.f32.mrb[85].mxu0 }
 0x56f   : > { %16065 = vmatprep.mubr.msk.bf16.mxu1 %vm1223_vm0, %v21339_v38  ;;  %v6095_v8 = vpop.f32.mrb[86].mxu0  ;;  %v21402_v38 = vld [vmem:[%s28604_s1 + $0x794] ss:$24 sps:$4 sm:$0xff]  }
 0x570   : > { %v6097_v44 = vpop.f32.mrb[87].mxu0  ;;  %v23997_v40 = vpack.c.bf16 %v6095_v8, %v6092_v61  ;;  %v21404_v8 = vld [vmem:[%s28604_s1 + $0x790] ss:$24 sps:$4 sm:$0xff]  }
 0x575   : > { %v6100_v57 = vpop.f32.mrb[88].mxu0 }
 0x576   : > { %3995 = vmatmul.mubr.bf16.gmra.mrb[208].mxu1 %v21341_v59  ;;  %v6102_v32 = vpop.f32.mrb[89].mxu0 }
 0x577   : > { %16066 = vmatprep.mubr.msk.bf16.mxu1 %vm1223_vm0, %v21345_v42  ;;  %v6103_v62 = vpop.f32.mrb[90].mxu0 }
 0x578   : > { %v6105_v36 = vpop.f32.mrb[91].mxu0  ;;  %v24007_v43 = vpack.c.bf16 %v6103_v62, %v6100_v57 }
 0x57d   : > { %v6108_v48 = vpop.f32.mrb[92].mxu0 }
 0x57e   : > { %4003 = vmatmul.mubr.bf16.gmra.mrb[212].mxu1 %v21347_v22  ;;  %v6110_v46 = vpop.f32.mrb[93].mxu0 }
 0x57f   : > { %16067 = vmatprep.mubr.msk.bf16.mxu1 %vm1223_vm0, %v21354_v24  ;;  %v6111_v63 = vpop.f32.mrb[94].mxu0  ;;  %v21410_v24 = vld [vmem:[%s28604_s1 + $0x7c0] ss:$24 sps:$4 sm:$0xff]  }
 0x580   : > { %v6113_v49 = vpop.f32.mrb[95].mxu0  ;;  %v24016_v2 = vpack.c.bf16 %v6111_v63, %v6108_v48 }
 0x585   : > { %v6116_v12 = vpop.f32.mrb[96].mxu0 }
 0x586   : > { %4011 = vmatmul.mubr.bf16.gmra.mrb[216].mxu1 %v21356_v28  ;;  %v6118_v31 = vpop.f32.mrb[97].mxu0 }
 0x587   : > { %16068 = vmatprep.mubr.msk.bf16.mxu1 %vm1223_vm0, %v21360_v55  ;;  %v6119_v53 = vpop.f32.mrb[98].mxu0 }
 0x588   : > { %v6121_v34 = vpop.f32.mrb[99].mxu0  ;;  %v24025_v54 = vpack.c.bf16 %v6119_v53, %v6116_v12 }
 0x58d   : > { %v6124_v29 = vpop.f32.mrb[100].mxu0 }
 0x58e   : > { %4019 = vmatmul.mubr.bf16.gmra.mrb[220].mxu1 %v21362_v17  ;;  %v6126_v41 = vpop.f32.mrb[101].mxu0 }
 0x58f   : > { %16069 = vmatprep.mubr.msk.bf16.mxu1 %vm1223_vm0, %v21366_v45  ;;  %v6127_v52 = vpop.f32.mrb[102].mxu0 }
 0x590   : > { %v6129_v4 = vpop.f32.mrb[103].mxu0  ;;  %v24034_v60 = vpack.c.bf16 %v6127_v52, %v6124_v29 }
 0x595   : > { %v6132_v6 = vpop.f32.mrb[104].mxu0 }
 0x596   : > { %4027 = vmatmul.mubr.bf16.gmra.mrb[224].mxu1 %v21368_v20  ;;  %v6134_v1 = vpop.f32.mrb[105].mxu0 }
 0x597   : > { %16070 = vmatprep.mubr.msk.bf16.mxu1 %vm1223_vm0, %v21372_v35  ;;  %v6135_v23 = vpop.f32.mrb[106].mxu0 }
 0x598   : > { %v6137_v3 = vpop.f32.mrb[107].mxu0  ;;  %v24043_v9 = vpack.c.bf16 %v6135_v23, %v6132_v6 }
 0x59d   : > { %v6140_v15 = vpop.f32.mrb[108].mxu0 }
 0x59e   : > { %4035 = vmatmul.mubr.bf16.gmra.mrb[228].mxu1 %v21374_v56  ;;  %v6142_v10 = vpop.f32.mrb[109].mxu0 }
 0x59f   : > { %16071 = vmatprep.mubr.msk.bf16.mxu1 %vm1223_vm0, %v21381_v58  ;;  %v6143_v21 = vpop.f32.mrb[110].mxu0 }
 0x5a0   : > { %v6145_v13 = vpop.f32.mrb[111].mxu0  ;;  %v24052_v16 = vpack.c.bf16 %v6143_v21, %v6140_v15 }
 0x5a5   : > { %v6148_v19 = vpop.f32.mrb[112].mxu0 }
 0x5a6   : > { %4043 = vmatmul.mubr.bf16.gmra.mrb[232].mxu1 %v21383_v5  ;;  %v6150_v39 = vpop.f32.mrb[113].mxu0 }
 0x5a7   : > { %16072 = vmatprep.mubr.msk.bf16.mxu1 %vm1223_vm0, %v21387_v7  ;;  %v6151_v26 = vpop.f32.mrb[114].mxu0 }
 0x5a8   : > { %v6153_v47 = vpop.f32.mrb[115].mxu0  ;;  %v24061_v51 = vpack.c.bf16 %v6151_v26, %v6148_v19 }
 0x5a9   : > { %v21419_v47 = vld [vmem:[%s28605_s2 + $0x8c] ss:$12 sps:$4 sm:$0xff]  }
 0x5ad   : > { %v6156_v59 = vpop.f32.mrb[116].mxu0 }
 0x5ae   : > { %4051 = vmatmul.mubr.bf16.gmra.mrb[236].mxu1 %v21389_v27  ;;  %v6158_v42 = vpop.f32.mrb[117].mxu0 }
 0x5af   : > { %16073 = vmatprep.mubr.msk.bf16.mxu1 %vm1223_vm0, %v21393_v33  ;;  %v6159_v61 = vpop.f32.mrb[118].mxu0  ;;  %v21420_v42 = vld [vmem:[%s28605_s2 + $0xa4] ss:$12 sps:$4 sm:$0xff]  }
 0x5b0   : > { %v6161_v50 = vpop.f32.mrb[119].mxu0  ;;  %v24070_v44 = vpack.c.bf16 %v6159_v61, %v6156_v59 }
 0x5b5   : > { %v6164_v25 = vpop.f32.mrb[120].mxu0 }
 0x5b6   : > { %4059 = vmatmul.mubr.bf16.gmra.mrb[240].mxu1 %v21395_v30  ;;  %v6166_v14 = vpop.f32.mrb[121].mxu0 }
 0x5b7   : > { %16074 = vmatprep.mubr.msk.bf16.mxu1 %vm1223_vm0, %v21402_v38  ;;  %v6167_v22 = vpop.f32.mrb[122].mxu0 }
 0x5b8   : > { %v6169_v18 = vpop.f32.mrb[123].mxu0  ;;  %v24079_v57 = vpack.c.bf16 %v6167_v22, %v6164_v25 }
 0x5b9   : > { %v21421_v18 = vld [vmem:[%s28605_s2 + $0xbc] ss:$12 sps:$4 sm:$0xff]  }
 0x5bd   : > { %v6172_v32 = vpop.f32.mrb[124].mxu0 }
 0x5be   : > { %4067 = vmatmul.mubr.bf16.gmra.mrb[244].mxu1 %v21404_v8  ;;  %v6174_v62 = vpop.f32.mrb[125].mxu0 }
 0x5bf   : > { %16075 = vmatprep.mubr.msk.bf16.mxu1 %vm1223_vm0, %v21408_v11  ;;  %v6175_v36 = vpop.f32.mrb[126].mxu0 }
 0x5c0   : > { %v6177_v28 = vpop.f32.mrb[127].mxu0  ;;  %v24082_v55 = vpack.c.bf16 %v6175_v36, %v6172_v32  ;;  %v21422_v36 = vld [vmem:[%s28605_s2 + $0xd4] ss:$12 sps:$4 sm:$0xff]  }
 0x5c5   : > { %v6180_v48 = vpop.f32.mrb[128].mxu0 }
 0x5c6   : > { %4075 = vmatmul.mubr.bf16.gmra.mrb[248].mxu1 %v21410_v24  ;;  %v6182_v46 = vpop.f32.mrb[129].mxu0 }
 0x5c7   : > { %4319 = vmatprep.mubr.bf16.mxu1 %v28634_v0  ;;  %v6183_v63 = vpop.f32.mrb[130].mxu0 }
 0x5c8   : > { %v6185_v49 = vpop.f32.mrb[131].mxu0  ;;  %v24084_v17 = vpack.c.bf16 %v6183_v63, %v6180_v48 }
 0x5cd   : > { %v6188_v45 = vpop.f32.mrb[132].mxu0 }
 0x5ce   : > { %v6190_v12 = vpop.f32.mrb[133].mxu0 }
 0x5cf   : > { %v6191_v31 = vpop.f32.mrb[134].mxu0 }
 0x5d0   : > { %v24086_v53 = vpack.c.bf16 %v6191_v31, %v6188_v45  ;;  %v6193_v34 = vpop.f32.mrb[135].mxu0 }
 0x5d5   : > { %v6196_v20 = vpop.f32.mrb[136].mxu0 }
 0x5d6   : > { %v6198_v35 = vpop.f32.mrb[137].mxu0 }
 0x5d7   : > { %v6199_v29 = vpop.f32.mrb[138].mxu0 }
 0x5d8   : > { %v24088_v41 = vpack.c.bf16 %v6199_v29, %v6196_v20  ;;  %v6201_v52 = vpop.f32.mrb[139].mxu0 }
 0x5dd   : > { %v6204_v4 = vpop.f32.mrb[140].mxu0 }
 0x5de   : > { %v6206_v56 = vpop.f32.mrb[141].mxu0 }
 0x5df   : > { %v6207_v58 = vpop.f32.mrb[142].mxu0 }
 0x5e0   : > { %v24090_v6 = vpack.c.bf16 %v6207_v58, %v6204_v4  ;;  %v6209_v1 = vpop.f32.mrb[143].mxu0 }
 0x5e5   : > { %v6212_v23 = vpop.f32.mrb[144].mxu0 }
 0x5e6   : > { %v6214_v3 = vpop.f32.mrb[145].mxu0 }
 0x5e7   : > { %v6215_v5 = vpop.f32.mrb[146].mxu0 }
 0x5e8   : > { %v24092_v7 = vpack.c.bf16 %v6215_v5, %v6212_v23  ;;  %v6217_v15 = vpop.f32.mrb[147].mxu0 }
 0x5ed   : > { %v6220_v10 = vpop.f32.mrb[148].mxu0 }
 0x5ee   : > { %v6222_v21 = vpop.f32.mrb[149].mxu0 }
 0x5ef   : > { %v6223_v13 = vpop.f32.mrb[150].mxu0 }
 0x5f0   : > { %v24094_v33 = vpack.c.bf16 %v6223_v13, %v6220_v10  ;;  %v6225_v19 = vpop.f32.mrb[151].mxu0 }
 0x5f5   : > { %v6228_v59 = vpop.f32.mrb[152].mxu0 }
 0x5f6   : > { %v6230_v61 = vpop.f32.mrb[153].mxu0 }
 0x5f7   : > { %v6231_v50 = vpop.f32.mrb[154].mxu0 }
 0x5f8   : > { %v24108_v11 = vpack.c.bf16 %v6231_v50, %v6228_v59  ;;  %v6233_v25 = vpop.f32.mrb[155].mxu0  ;;  %v21424_v59 = vld [vmem:[%s28605_s2 + $0x104] ss:$0 sps:$4 sm:$0x33]  }
 0x5f9   : > { %v3916_v27 = vpop.f32.mrb[168].mxu1 }
 0x5fa   : > { %v3918_v39 = vpop.f32.mrb[169].mxu1 }
 0x5fb   : > { %v3919_v26 = vpop.f32.mrb[170].mxu1 }
 0x5fc   : > { %v24099_v30 = vpack.c.bf16 %v3919_v26, %v3916_v27  ;;  %v3921_v38 = vpop.f32.mrb[171].mxu1 }
 0x5fd   : > { %v6236_v62 = vpop.f32.mrb[156].mxu0  ;;  %v21423_v38 = vld [vmem:[%s28605_s2 + $0xec] ss:$12 sps:$4 sm:$0xff]  }
 0x5fe   : > { %16117 = vmatmul.mubr.msk.bf16.vlgmr.msra.gmra.mrb[0].mxu1 %vm2021_vm2, %v24099_v30  ;;  %v6238_v28 = vpop.f32.mrb[157].mxu0 }
 0x5ff   : > { %4329 = vmatprep.mubr.bf16.mxu1 %v28634_v0  ;;  %18525 = vmatpush3.bf16.msra.mxu1 %v21419_v47  ;;  %v6239_v48 = vpop.f32.mrb[158].mxu0 }
 0x600   : > { %18526 = vmatprep.subr.bf16.mxu1 %v28765_v37  ;;  %v24123_v63 = vpack.c.bf16 %v6239_v48, %v6236_v62  ;;  %v6241_v49 = vpop.f32.mrb[159].mxu0 }
 0x601   : > { %v3924_v8 = vpop.f32.mrb[172].mxu1 }
 0x602   : > { %v3926_v14 = vpop.f32.mrb[173].mxu1 }
 0x603   : > { %v3927_v22 = vpop.f32.mrb[174].mxu1  ;;  %18527 = vmatpush3.bf16.msra.mxu1 %v21420_v42  ;;  %v4285_v42 = vsel %vm2085_vm1, %v21424_v59, 0 }
 0x604   : > { %v24113_v24 = vpack.c.bf16 %v3927_v22, %v3924_v8  ;;  %v3929_v32 = vpop.f32.mrb[175].mxu1  ;;  %18528 = vmatprep.subr.bf16.mxu1 %v28765_v37 }
 0x605   : > { %v6244_v20 = vpop.f32.mrb[160].mxu0 }
 0x606   : > { %16118 = vmatmul.mubr.msk.bf16.gmra.mrb[4].mxu1 %vm2021_vm2, %v24113_v24  ;;  %v6246_v35 = vpop.f32.mrb[161].mxu0 }
 0x607   : > { %4339 = vmatprep.mubr.bf16.mxu1 %v28634_v0  ;;  %18529 = vmatpush3.bf16.msra.mxu1 %v21421_v18  ;;  %v6247_v29 = vpop.f32.mrb[162].mxu0 }
 0x608   : > { %18530 = vmatprep.subr.bf16.mxu1 %v28765_v37  ;;  %v24131_v4 = vpack.c.bf16 %v6247_v29, %v6244_v20  ;;  %v6249_v56 = vpop.f32.mrb[163].mxu0 }
 0x609   : > { %v3932_v46 = vpop.f32.mrb[176].mxu1 }
 0x60a   : > { %v3934_v45 = vpop.f32.mrb[177].mxu1 }
 0x60b   : > { %v3935_v12 = vpop.f32.mrb[178].mxu1  ;;  %18531 = vmatpush3.bf16.msra.mxu1 %v21422_v36 }
 0x60c   : > { %v24125_v31 = vpack.c.bf16 %v3935_v12, %v3932_v46  ;;  %v3937_v34 = vpop.f32.mrb[179].mxu1  ;;  %18532 = vmatprep.subr.bf16.mxu1 %v28765_v37 }
 0x60d   : > { %v6252_v5 = vpop.f32.mrb[164].mxu0 }
 0x60e   : > { %16119 = vmatmul.mubr.msk.bf16.gmra.mrb[8].mxu1 %vm2021_vm2, %v24125_v31  ;;  %v6254_v15 = vpop.f32.mrb[165].mxu0 }
 0x60f   : > { %4349 = vmatprep.mubr.bf16.mxu1 %v28634_v0  ;;  %v6255_v10 = vpop.f32.mrb[166].mxu0  ;;  %18533 = vmatpush3.bf16.msra.mxu1 %v21423_v38 }
 0x610   : > { %v24138_v13 = vpack.c.bf16 %v6255_v10, %v6252_v5  ;;  %v6257_v27 = vpop.f32.mrb[167].mxu0  ;;  %18534 = vmatprep.subr.bf16.mxu1 %v28765_v37 }
 0x611   : > { %v3940_v52 = vpop.f32.mrb[180].mxu1 }
 0x612   : > { %v3942_v58 = vpop.f32.mrb[181].mxu1 }
 0x613   : > { %v3943_v1 = vpop.f32.mrb[182].mxu1  ;;  %18535 = vmatpush3.bf16.msra.mxu1 %v4285_v42 }
 0x614   : > { %v24133_v23 = vpack.c.bf16 %v3943_v1, %v3940_v52  ;;  %v3945_v3 = vpop.f32.mrb[183].mxu1 }
 0x616   : > { %16120 = vmatmul.mubr.msk.bf16.gmra.mrb[12].mxu1 %vm2021_vm2, %v24133_v23 }
 0x617   : > { %4359 = vmatprep.mubr.bf16.mxu1 %v28634_v0 }
 0x619   : > { %v3948_v21 = vpop.f32.mrb[184].mxu1 }
 0x61a   : > { %v3950_v19 = vpop.f32.mrb[185].mxu1 }
 0x61b   : > { %v3951_v39 = vpop.f32.mrb[186].mxu1  ;;  %v21427_v19 = vld [vmem:[%s28605_s2 + $0x10c] ss:$12 sps:$4 sm:$0xff]  }
 0x61c   : > { %v24140_v26 = vpack.c.bf16 %v3951_v39, %v3948_v21  ;;  %v3953_v47 = vpop.f32.mrb[187].mxu1  ;;  %6463 = vmatprep.subr.bf16.mxu1 %v21427_v19 }
 0x61e   : > { %16121 = vmatmul.mubr.msk.bf16.gmra.mrb[16].mxu1 %vm2021_vm2, %v24140_v26 }
 0x61f   : > { %4369 = vmatprep.mubr.bf16.mxu1 %v28634_v0 }
 0x621   : > { %v3956_v61 = vpop.f32.mrb[188].mxu1 }
 0x622   : > { %v3958_v50 = vpop.f32.mrb[189].mxu1 }
 0x623   : > { %v3959_v8 = vpop.f32.mrb[190].mxu1 }
 0x624   : > { %v24153_v25 = vpack.c.bf16 %v3959_v8, %v3956_v61  ;;  %v3961_v14 = vpop.f32.mrb[191].mxu1 }
 0x626   : > { %16122 = vmatmul.mubr.msk.bf16.gmra.mrb[20].mxu1 %vm2021_vm2, %v24153_v25 }
 0x627   : > { %4379 = vmatprep.mubr.bf16.mxu1 %v28634_v0 }
 0x629   : > { %v3964_v22 = vpop.f32.mrb[192].mxu1 }
 0x62a   : > { %v3966_v18 = vpop.f32.mrb[193].mxu1 }
 0x62b   : > { %v3967_v32 = vpop.f32.mrb[194].mxu1 }
 0x62c   : > { %v24158_v62 = vpack.c.bf16 %v3967_v32, %v3964_v22  ;;  %v3969_v36 = vpop.f32.mrb[195].mxu1 }
 0x62e   : > { %16123 = vmatmul.mubr.msk.bf16.gmra.mrb[24].mxu1 %vm2021_vm2, %v24158_v62 }
 0x62f   : > { %4389 = vmatprep.mubr.bf16.mxu1 %v28634_v0 }
 0x631   : > { %v3972_v28 = vpop.f32.mrb[196].mxu1 }
 0x632   : > { %v3974_v48 = vpop.f32.mrb[197].mxu1 }
 0x633   : > { %v3975_v46 = vpop.f32.mrb[198].mxu1 }
 0x634   : > { %v24163_v49 = vpack.c.bf16 %v3975_v46, %v3972_v28  ;;  %v3977_v45 = vpop.f32.mrb[199].mxu1 }
 0x636   : > { %16124 = vmatmul.mubr.msk.bf16.gmra.mrb[28].mxu1 %vm2021_vm2, %v24163_v49 }
 0x637   : > { %4399 = vmatprep.mubr.bf16.mxu1 %v28634_v0 }
 0x639   : > { %v3980_v12 = vpop.f32.mrb[200].mxu1 }
 0x63a   : > { %v3982_v34 = vpop.f32.mrb[201].mxu1 }
 0x63b   : > { %v3983_v20 = vpop.f32.mrb[202].mxu1 }
 0x63c   : > { %v24168_v35 = vpack.c.bf16 %v3983_v20, %v3980_v12  ;;  %v3985_v29 = vpop.f32.mrb[203].mxu1 }
 0x63e   : > { %16125 = vmatmul.mubr.msk.bf16.gmra.mrb[32].mxu1 %vm2021_vm2, %v24168_v35 }
 0x63f   : > { %4409 = vmatprep.mubr.bf16.mxu1 %v28634_v0 }
 0x641   : > { %v3988_v52 = vpop.f32.mrb[204].mxu1 }
 0x642   : > { %v3990_v56 = vpop.f32.mrb[205].mxu1 }
 0x643   : > { %v3991_v58 = vpop.f32.mrb[206].mxu1 }
 0x644   : > { %v24173_v1 = vpack.c.bf16 %v3991_v58, %v3988_v52  ;;  %v3993_v3 = vpop.f32.mrb[207].mxu1 }
 0x646   : > { %16126 = vmatmul.mubr.msk.bf16.gmra.mrb[36].mxu1 %vm2021_vm2, %v24173_v1 }
 0x647   : > { %4419 = vmatprep.mubr.bf16.mxu1 %v28634_v0 }
 0x649   : > { %v3996_v5 = vpop.f32.mrb[208].mxu1 }
 0x64a   : > { %v3998_v15 = vpop.f32.mrb[209].mxu1 }
 0x64b   : > { %v3999_v10 = vpop.f32.mrb[210].mxu1 }
 0x64c   : > { %v24178_v21 = vpack.c.bf16 %v3999_v10, %v3996_v5  ;;  %v4001_v27 = vpop.f32.mrb[211].mxu1 }
 0x64e   : > { %16127 = vmatmul.mubr.msk.bf16.gmra.mrb[40].mxu1 %vm2021_vm2, %v24178_v21 }
 0x64f   : > { %4429 = vmatprep.mubr.bf16.mxu1 %v28634_v0 }
 0x651   : > { %v4004_v39 = vpop.f32.mrb[212].mxu1 }
 0x652   : > { %v4006_v47 = vpop.f32.mrb[213].mxu1 }
 0x653   : > { %v4007_v38 = vpop.f32.mrb[214].mxu1 }
 0x654   : > { %v24186_v59 = vpack.c.bf16 %v4007_v38, %v4004_v39  ;;  %v4009_v42 = vpop.f32.mrb[215].mxu1 }
 0x656   : > { %16128 = vmatmul.mubr.msk.bf16.gmra.mrb[44].mxu1 %vm2021_vm2, %v24186_v59 }
 0x657   : > { %4439 = vmatprep.mubr.bf16.mxu1 %v28634_v0 }
 0x659   : > { %v4012_v61 = vpop.f32.mrb[216].mxu1 }
 0x65a   : > { %v4014_v50 = vpop.f32.mrb[217].mxu1 }
 0x65b   : > { %v4015_v8 = vpop.f32.mrb[218].mxu1 }
 0x65c   : > { %v24191_v14 = vpack.c.bf16 %v4015_v8, %v4012_v61  ;;  %v4017_v22 = vpop.f32.mrb[219].mxu1 }
 0x65e   : > { %16129 = vmatmul.mubr.msk.bf16.gmra.mrb[48].mxu1 %vm2021_vm2, %v24191_v14 }
 0x65f   : > { %4449 = vmatprep.mubr.bf16.mxu1 %v28634_v0 }
 0x661   : > { %v4020_v18 = vpop.f32.mrb[220].mxu1 }
 0x662   : > { %v4022_v32 = vpop.f32.mrb[221].mxu1 }
 0x663   : > { %v4023_v36 = vpop.f32.mrb[222].mxu1 }
 0x664   : > { %v24196_v28 = vpack.c.bf16 %v4023_v36, %v4020_v18  ;;  %v4025_v48 = vpop.f32.mrb[223].mxu1 }
 0x666   : > { %16130 = vmatmul.mubr.msk.bf16.gmra.mrb[52].mxu1 %vm2021_vm2, %v24196_v28 }
 0x667   : > { %4459 = vmatprep.mubr.bf16.mxu1 %v28634_v0 }
 0x669   : > { %v4028_v46 = vpop.f32.mrb[224].mxu1 }
 0x66a   : > { %v4030_v45 = vpop.f32.mrb[225].mxu1 }
 0x66b   : > { %v4031_v12 = vpop.f32.mrb[226].mxu1 }
 0x66c   : > { %v24201_v34 = vpack.c.bf16 %v4031_v12, %v4028_v46  ;;  %v4033_v20 = vpop.f32.mrb[227].mxu1 }
 0x66e   : > { %16131 = vmatmul.mubr.msk.bf16.gmra.mrb[56].mxu1 %vm2021_vm2, %v24201_v34 }
 0x66f   : > { %4469 = vmatprep.mubr.bf16.mxu1 %v28634_v0 }
 0x671   : > { %v4036_v29 = vpop.f32.mrb[228].mxu1 }
 0x672   : > { %v4038_v52 = vpop.f32.mrb[229].mxu1 }
 0x673   : > { %v4039_v56 = vpop.f32.mrb[230].mxu1 }
 0x674   : > { %v24206_v58 = vpack.c.bf16 %v4039_v56, %v4036_v29  ;;  %v4041_v3 = vpop.f32.mrb[231].mxu1 }
 0x676   : > { %16132 = vmatmul.mubr.msk.bf16.gmra.mrb[60].mxu1 %vm2021_vm2, %v24206_v58 }
 0x677   : > { %4479 = vmatprep.mubr.bf16.mxu1 %v28634_v0 }
 0x679   : > { %v4044_v5 = vpop.f32.mrb[232].mxu1 }
 0x67a   : > { %v4046_v15 = vpop.f32.mrb[233].mxu1 }
 0x67b   : > { %v4047_v10 = vpop.f32.mrb[234].mxu1  ;;  %v21430_v15 = vld [vmem:[%s28605_s2 + $0x124] ss:$12 sps:$4 sm:$0xff]  }
 0x67c   : > { %v24211_v27 = vpack.c.bf16 %v4047_v10, %v4044_v5  ;;  %v4049_v19 = vpop.f32.mrb[235].mxu1  ;;  %v21425_v5 = vld [vmem:[%s28605_s2 + $0x108] ss:$12 sps:$4 sm:$0xff]   ;;  %v21428_v10 = vld [vmem:[%s28605_s2 + $0x120] ss:$12 sps:$4 sm:$0xff]  }
 0x67d   : > { %v21433_v19 = vld [vmem:[%s28605_s2 + $0x13c] ss:$12 sps:$4 sm:$0xff]  }
 0x67e   : > { %16133 = vmatmul.mubr.msk.bf16.gmra.mrb[64].mxu1 %vm2021_vm2, %v24211_v27 }
 0x67f   : > { %4489 = vmatprep.mubr.bf16.mxu1 %v28634_v0 }
 0x681   : > { %v4052_v39 = vpop.f32.mrb[236].mxu1 }
 0x682   : > { %v4054_v47 = vpop.f32.mrb[237].mxu1 }
 0x683   : > { %v4055_v38 = vpop.f32.mrb[238].mxu1  ;;  %v21434_v47 = vld [vmem:[%s28605_s2 + $0x150] ss:$12 sps:$4 sm:$0xff]  }
 0x684   : > { %v24216_v42 = vpack.c.bf16 %v4055_v38, %v4052_v39  ;;  %v4057_v61 = vpop.f32.mrb[239].mxu1  ;;  %v21431_v39 = vld [vmem:[%s28605_s2 + $0x138] ss:$12 sps:$4 sm:$0xff]  }
 0x685   : > { %v21439_v38 = vld [vmem:[%s28605_s2 + $0x16c] ss:$12 sps:$4 sm:$0xff]  }
 0x686   : > { %16134 = vmatmul.mubr.msk.bf16.gmra.mrb[68].mxu1 %vm2021_vm2, %v24216_v42 }
 0x687   : > { %4499 = vmatprep.mubr.bf16.mxu1 %v28634_v0 }
 0x689   : > { %v4060_v50 = vpop.f32.mrb[240].mxu1 }
 0x68a   : > { %v4062_v8 = vpop.f32.mrb[241].mxu1 }
 0x68b   : > { %v4063_v22 = vpop.f32.mrb[242].mxu1  ;;  %v21456_v8 = vld [vmem:[%s28608_s5 + $0x128] ss:$12 sps:$4 sm:$0xff]  }
 0x68c   : > { %v24221_v18 = vpack.c.bf16 %v4063_v22, %v4060_v50  ;;  %v4065_v32 = vpop.f32.mrb[243].mxu1  ;;  %v21457_v22 = vld [vmem:[%s28608_s5 + $0x68] ss:$12 sps:$4 sm:$0xff]  }
 0x68d   : > { %v21460_v32 = vld [vmem:[%s28608_s5 + $0x158] ss:$12 sps:$4 sm:$0xff]  }
 0x68e   : > { %16135 = vmatmul.mubr.msk.bf16.gmra.mrb[72].mxu1 %vm2021_vm2, %v24221_v18 }
 0x68f   : > { %4509 = vmatprep.mubr.bf16.mxu1 %v28634_v0 }
 0x691   : > { %v4068_v36 = vpop.f32.mrb[244].mxu1 }
 0x692   : > { %v4070_v48 = vpop.f32.mrb[245].mxu1 }
 0x693   : > { %v4071_v46 = vpop.f32.mrb[246].mxu1  ;;  %v21463_v48 = vld [vmem:[%s28608_s5 + $0xb0] ss:$12 sps:$4 sm:$0xff]  }
 0x694   : > { %v24226_v45 = vpack.c.bf16 %v4071_v46, %v4068_v36  ;;  %v4073_v12 = vpop.f32.mrb[247].mxu1  ;;  %v21461_v36 = vld [vmem:[%s28608_s5 + $0x98] ss:$12 sps:$4 sm:$0xff]   ;;  %v2540_v46 = vlaneseq }
 0x695   : > { %v24515_v12 = vld [vmem:[%s28606_s3] sm:$0x7] }
 0x696   : > { %16136 = vmatmul.mubr.msk.bf16.gmra.mrb[76].mxu1 %vm2021_vm2, %v24226_v45 }
 0x697   : > { %4519 = vmatprep.mubr.bf16.mxu1 %v28634_v0 }
 0x699   : > { %v4076_v20 = vpop.f32.mrb[248].mxu1 }
 0x69a   : > { %v4078_v29 = vpop.f32.mrb[249].mxu1 }
 0x69b   : > { %v4079_v52 = vpop.f32.mrb[250].mxu1 }
 0x69c   : > { %v24231_v56 = vpack.c.bf16 %v4079_v52, %v4076_v20  ;;  %v4081_v3 = vpop.f32.mrb[251].mxu1 }
 0x69e   : > { %16137 = vmatmul.mubr.msk.bf16.gmra.mrb[80].mxu1 %vm2021_vm2, %v24231_v56 }
 0x69f   : > { %18536 = vmatprep.mubr.msk.bf16.mxu1 %vm22046_vm3, %v28765_v37 }
 0x6a6   : > { %18537 = vmatmul.mubr.msk.bf16.vlgmr.msra.gmra.mrb[84].mxu1 %vm2021_vm2, %v24099_v30  ;;  %v21436_v30 = vld [vmem:[%s28605_s2 + $0x154] ss:$12 sps:$4 sm:$0xff]  }
 0x6a7   : > { %18540 = vmatprep.mubr.msk.bf16.mxu1 %vm22046_vm3, %v28765_v37  ;;  %6464 = vmatpush1.bf16.msra.mxu1 %v21425_v5 }
 0x6a8   : > { %6465 = vmatprep.subr.bf16.mxu1 %v21430_v15 }
 0x6ab   : > { %6466 = vmatpush1.bf16.msra.mxu1 %v21428_v10 }
 0x6ac   : > { %6467 = vmatprep.subr.bf16.mxu1 %v21433_v19  ;;  %v21466_v19 = vld [vmem:[%s28607_s4 + $0x4] ss:$12 sps:$4 sm:$0xff]  }
 0x6ad   : > { %7491 = vmatprep.mubr.bf16.mxu0 %v21466_v19 }
 0x6ae   : > { %18541 = vmatmul.mubr.msk.bf16.gmra.mrb[88].mxu1 %vm2021_vm2, %v24113_v24  ;;  %v21437_v24 = vld [vmem:[%s28605_s2 + $0x168] ss:$12 sps:$4 sm:$0xff]  }
 0x6af   : > { %18544 = vmatprep.mubr.msk.bf16.mxu1 %vm22046_vm3, %v28765_v37  ;;  %6468 = vmatpush1.bf16.msra.mxu1 %v21431_v39 }
 0x6b0   : > { %6469 = vmatprep.subr.bf16.mxu1 %v21436_v30 }
 0x6b3   : > { %6470 = vmatpush1.bf16.msra.mxu1 %v21434_v47 }
 0x6b4   : > { %6471 = vmatprep.subr.bf16.mxu1 %v21439_v38 }
 0x6b6   : > { %18545 = vmatmul.mubr.msk.bf16.gmra.mrb[92].mxu1 %vm2021_vm2, %v24125_v31  ;;  %v16452_v31 = vld [vmem:[%s28605_s2 + $0x180] sm:$0x33] }
 0x6b7   : > { %18548 = vmatprep.mubr.msk.bf16.mxu1 %vm22046_vm3, %v28765_v37  ;;  %6472 = vmatpush1.bf16.msra.mxu1 %v21437_v24  ;;  %v16469_v61 = vcombine.low %v16452_v31, %v16452_v31 }
 0x6b9   : > { %v6455_v50 = vsel %vm2085_vm1, %v16469_v61, 0 }
 0x6be   : > { %18549 = vmatmul.mubr.msk.bf16.gmra.mrb[96].mxu1 %vm2021_vm2, %v24133_v23  ;;  %v16470_v23 = vcombine.high %v16452_v31, %v16452_v31 }
 0x6bf   : > { %18552 = vmatprep.mubr.msk.bf16.mxu1 %vm22046_vm3, %v28765_v37 }
 0x6c0   : > { %16472 = vmatprep.subr.msk.bf16.mxu1 %vm2085_vm1, %v16470_v23 }
 0x6c1   : > { %6474 = vmatpush1.bf16.msra.mxu1 %v6455_v50 }
 0x6c2   : > { %18620 = vmatprep.subr.bf16.mxu1 %v28765_v37 }
 0x6c6   : > { %18553 = vmatmul.mubr.msk.bf16.gmra.mrb[100].mxu1 %vm2021_vm2, %v24140_v26  ;;  %v21442_v26 = vld [vmem:[%s28605_s2 + $0x110] ss:$12 sps:$4 sm:$0xff]  }
 0x6c7   : > { %18556 = vmatprep.mubr.msk.bf16.mxu1 %vm22046_vm3, %v28765_v37 }
 0x6ce   : > { %18557 = vmatmul.mubr.msk.bf16.gmra.mrb[104].mxu1 %vm2021_vm2, %v24153_v25  ;;  %v21443_v25 = vld [vmem:[%s28605_s2 + $0x128] ss:$12 sps:$4 sm:$0xff]  }
 0x6cf   : > { %18560 = vmatprep.mubr.msk.bf16.mxu1 %vm22046_vm3, %v28765_v37 }
 0x6d6   : > { %18561 = vmatmul.mubr.msk.bf16.gmra.mrb[108].mxu1 %vm2021_vm2, %v24158_v62  ;;  %v21444_v62 = vld [vmem:[%s28605_s2 + $0x140] ss:$12 sps:$4 sm:$0xff]  }
 0x6d7   : > { %18564 = vmatprep.mubr.msk.bf16.mxu1 %vm22046_vm3, %v28765_v37 }
 0x6de   : > { %18565 = vmatmul.mubr.msk.bf16.gmra.mrb[112].mxu1 %vm2021_vm2, %v24163_v49  ;;  %v21445_v49 = vld [vmem:[%s28605_s2 + $0x158] ss:$12 sps:$4 sm:$0xff]  }
 0x6df   : > { %18568 = vmatprep.mubr.msk.bf16.mxu1 %vm22046_vm3, %v28765_v37 }
 0x6e6   : > { %18569 = vmatmul.mubr.msk.bf16.gmra.mrb[116].mxu1 %vm2021_vm2, %v24168_v35  ;;  %v21446_v35 = vld [vmem:[%s28605_s2 + $0x170] ss:$12 sps:$4 sm:$0xff]  }
 0x6e7   : > { %18572 = vmatprep.mubr.msk.bf16.mxu1 %vm22046_vm3, %v28765_v37 }
 0x6ee   : > { %18573 = vmatmul.mubr.msk.bf16.gmra.mrb[120].mxu1 %vm2021_vm2, %v24173_v1  ;;  %v21447_v1 = vld [vmem:[%s28605_s2 + $0x188] ss:$0 sps:$4 sm:$0x33]  }
 0x6ef   : > { %18576 = vmatprep.mubr.msk.bf16.mxu1 %vm22046_vm3, %v28765_v37 }
 0x6f6   : > { %18577 = vmatmul.mubr.msk.bf16.gmra.mrb[124].mxu1 %vm2021_vm2, %v24178_v21  ;;  %v6461_v21 = vsel %vm2085_vm1, %v21447_v1, 0 }
 0x6f7   : > { %18580 = vmatprep.mubr.msk.bf16.mxu1 %vm22046_vm3, %v28765_v37 }
 0x6fe   : > { %18581 = vmatmul.mubr.msk.bf16.gmra.mrb[128].mxu1 %vm2021_vm2, %v24186_v59  ;;  %v21448_v59 = vld [vmem:[%s28608_s5 + $0xc8] ss:$12 sps:$4 sm:$0xff]  }
 0x6ff   : > { %18584 = vmatprep.mubr.msk.bf16.mxu1 %vm22046_vm3, %v28765_v37 }
 0x706   : > { %18585 = vmatmul.mubr.msk.bf16.gmra.mrb[132].mxu1 %vm2021_vm2, %v24191_v14  ;;  %v21449_v14 = vld [vmem:[%s28608_s5 + $0x8] ss:$12 sps:$4 sm:$0xff]  }
 0x707   : > { %18588 = vmatprep.mubr.msk.bf16.mxu1 %vm22046_vm3, %v28765_v37 }
 0x70e   : > { %18589 = vmatmul.mubr.msk.bf16.gmra.mrb[136].mxu1 %vm2021_vm2, %v24196_v28  ;;  %v21450_v28 = vld [vmem:[%s28608_s5 + $0xe0] ss:$12 sps:$4 sm:$0xff]  }
 0x70f   : > { %18592 = vmatprep.mubr.msk.bf16.mxu1 %vm22046_vm3, %v28765_v37 }
 0x716   : > { %18593 = vmatmul.mubr.msk.bf16.gmra.mrb[140].mxu1 %vm2021_vm2, %v24201_v34  ;;  %v21451_v34 = vld [vmem:[%s28608_s5 + $0x20] ss:$12 sps:$4 sm:$0xff]  }
 0x717   : > { %18596 = vmatprep.mubr.msk.bf16.mxu1 %vm22046_vm3, %v28765_v37 }
 0x71e   : > { %18597 = vmatmul.mubr.msk.bf16.gmra.mrb[144].mxu1 %vm2021_vm2, %v24206_v58  ;;  %v21452_v58 = vld [vmem:[%s28608_s5 + $0xf8] ss:$12 sps:$4 sm:$0xff]  }
 0x71f   : > { %18600 = vmatprep.mubr.msk.bf16.mxu1 %vm22046_vm3, %v28765_v37 }
 0x726   : > { %18601 = vmatmul.mubr.msk.bf16.gmra.mrb[148].mxu1 %vm2021_vm2, %v24211_v27  ;;  %v21453_v27 = vld [vmem:[%s28608_s5 + $0x38] ss:$12 sps:$4 sm:$0xff]  }
 0x727   : > { %18604 = vmatprep.mubr.msk.bf16.mxu1 %vm22046_vm3, %v28765_v37 }
 0x72e   : > { %18605 = vmatmul.mubr.msk.bf16.gmra.mrb[152].mxu1 %vm2021_vm2, %v24216_v42  ;;  %v21455_v42 = vld [vmem:[%s28608_s5 + $0x50] ss:$12 sps:$4 sm:$0xff]  }
 0x72f   : > { %18608 = vmatprep.mubr.msk.bf16.mxu1 %vm22046_vm3, %v28765_v37 }
 0x736   : > { %18609 = vmatmul.mubr.msk.bf16.gmra.mrb[156].mxu1 %vm2021_vm2, %v24221_v18  ;;  %v21459_v18 = vld [vmem:[%s28608_s5 + $0x80] ss:$12 sps:$4 sm:$0xff]  }
 0x737   : > { %18612 = vmatprep.mubr.msk.bf16.mxu1 %vm22046_vm3, %v28765_v37 }
 0x73e   : > { %18613 = vmatmul.mubr.msk.bf16.gmra.mrb[160].mxu1 %vm2021_vm2, %v24226_v45  ;;  %v24507_v45 = vshrl.u32 %v2540_v46, 7 }
 0x73f   : > { %18616 = vmatprep.mubr.msk.bf16.mxu1 %vm22046_vm3, %v28765_v37 }
 0x740   : > { %28774 = vst [vmem:[#allocation5_spill] sm:$0xff] %v24507_v45  ;;  %v28632_v20 = vsub.s32 1, %v24507_v45 }
 0x742   : > { %v24528_v29 = vrot.slane %v24515_v12, %v28632_v20 }
 0x746   : > { %18617 = vmatmul.mubr.msk.bf16.gmra.mrb[164].mxu1 %vm2021_vm2, %v24231_v56 }
 0x747   : > { %6495 = vmatprep.mubr.bf16.mxu1 %v28634_v0 }
 0x74e   : > { %16473 = vmatmul.mubr.msk.bf16.vlgmr.msra.gmra.mrb[0].mxu1 %vm2021_vm2, %v23997_v40 }
 0x74f   : > { %6505 = vmatprep.mubr.bf16.mxu1 %v28634_v0  ;;  %18621 = vmatpush3.bf16.msra.mxu1 %v21442_v26 }
 0x750   : > { %18622 = vmatprep.subr.bf16.mxu1 %v28765_v37 }
 0x753   : > { %18623 = vmatpush3.bf16.msra.mxu1 %v21443_v25 }
 0x754   : > { %18624 = vmatprep.subr.bf16.mxu1 %v28765_v37 }
 0x756   : > { %16474 = vmatmul.mubr.msk.bf16.gmra.mrb[4].mxu1 %vm2021_vm2, %v24007_v43 }
 0x757   : > { %6515 = vmatprep.mubr.bf16.mxu1 %v28634_v0  ;;  %18625 = vmatpush3.bf16.msra.mxu1 %v21444_v62 }
 0x758   : > { %18626 = vmatprep.subr.bf16.mxu1 %v28765_v37 }
 0x75b   : > { %18627 = vmatpush3.bf16.msra.mxu1 %v21445_v49 }
 0x75c   : > { %18628 = vmatprep.subr.bf16.mxu1 %v28765_v37 }
 0x75e   : > { %16475 = vmatmul.mubr.msk.bf16.gmra.mrb[8].mxu1 %vm2021_vm2, %v24016_v2 }
 0x75f   : > { %6525 = vmatprep.mubr.bf16.mxu1 %v28634_v0  ;;  %18629 = vmatpush3.bf16.msra.mxu1 %v21446_v35 }
 0x760   : > { %18630 = vmatprep.subr.bf16.mxu1 %v28765_v37 }
 0x763   : > { %18631 = vmatpush3.bf16.msra.mxu1 %v6461_v21 }
 0x764   : > { %17756 = vmatprep.subr.bf16.mxu1 %v21448_v59 }
 0x766   : > { %16476 = vmatmul.mubr.msk.bf16.gmra.mrb[12].mxu1 %vm2021_vm2, %v24025_v54 }
 0x767   : > { %6535 = vmatprep.mubr.bf16.mxu1 %v28634_v0 }
 0x76e   : > { %16477 = vmatmul.mubr.msk.bf16.gmra.mrb[16].mxu1 %vm2021_vm2, %v24034_v60 }
 0x76f   : > { %6545 = vmatprep.mubr.bf16.mxu1 %v28634_v0 }
 0x776   : > { %16478 = vmatmul.mubr.msk.bf16.gmra.mrb[20].mxu1 %vm2021_vm2, %v24043_v9 }
 0x777   : > { %6555 = vmatprep.mubr.bf16.mxu1 %v28634_v0 }
 0x77e   : > { %16479 = vmatmul.mubr.msk.bf16.gmra.mrb[24].mxu1 %vm2021_vm2, %v24052_v16 }
 0x77f   : > { %6565 = vmatprep.mubr.bf16.mxu1 %v28634_v0 }
 0x786   : > { %16480 = vmatmul.mubr.msk.bf16.gmra.mrb[28].mxu1 %vm2021_vm2, %v24061_v51 }
 0x787   : > { %6575 = vmatprep.mubr.bf16.mxu1 %v28634_v0 }
 0x78e   : > { %16481 = vmatmul.mubr.msk.bf16.gmra.mrb[32].mxu1 %vm2021_vm2, %v24070_v44 }
 0x78f   : > { %6585 = vmatprep.mubr.bf16.mxu1 %v28634_v0 }
 0x796   : > { %16482 = vmatmul.mubr.msk.bf16.gmra.mrb[36].mxu1 %vm2021_vm2, %v24079_v57 }
 0x797   : > { %6595 = vmatprep.mubr.bf16.mxu1 %v28634_v0 }
 0x79e   : > { %16483 = vmatmul.mubr.msk.bf16.gmra.mrb[40].mxu1 %vm2021_vm2, %v24082_v55 }
 0x79f   : > { %6605 = vmatprep.mubr.bf16.mxu1 %v28634_v0 }
 0x7a6   : > { %16484 = vmatmul.mubr.msk.bf16.gmra.mrb[44].mxu1 %vm2021_vm2, %v24084_v17 }
 0x7a7   : > { %6615 = vmatprep.mubr.bf16.mxu1 %v28634_v0 }
 0x7ae   : > { %16485 = vmatmul.mubr.msk.bf16.gmra.mrb[48].mxu1 %vm2021_vm2, %v24086_v53 }
 0x7af   : > { %6625 = vmatprep.mubr.bf16.mxu1 %v28634_v0 }
 0x7b6   : > { %16486 = vmatmul.mubr.msk.bf16.gmra.mrb[52].mxu1 %vm2021_vm2, %v24088_v41 }
 0x7b7   : > { %6635 = vmatprep.mubr.bf16.mxu1 %v28634_v0 }
 0x7be   : > { %16487 = vmatmul.mubr.msk.bf16.gmra.mrb[56].mxu1 %vm2021_vm2, %v24090_v6 }
 0x7bf   : > { %6645 = vmatprep.mubr.bf16.mxu1 %v28634_v0 }
 0x7c6   : > { %16488 = vmatmul.mubr.msk.bf16.gmra.mrb[60].mxu1 %vm2021_vm2, %v24092_v7 }
 0x7c7   : > { %6655 = vmatprep.mubr.bf16.mxu1 %v28634_v0 }
 0x7ce   : > { %16489 = vmatmul.mubr.msk.bf16.gmra.mrb[64].mxu1 %vm2021_vm2, %v24094_v33 }
 0x7cf   : > { %6665 = vmatprep.mubr.bf16.mxu1 %v28634_v0 }
 0x7d6   : > { %16490 = vmatmul.mubr.msk.bf16.gmra.mrb[68].mxu1 %vm2021_vm2, %v24108_v11 }
 0x7d7   : > { %6675 = vmatprep.mubr.bf16.mxu1 %v28634_v0 }
 0x7de   : > { %16491 = vmatmul.mubr.msk.bf16.gmra.mrb[72].mxu1 %vm2021_vm2, %v24123_v63 }
 0x7df   : > { %6685 = vmatprep.mubr.bf16.mxu1 %v28634_v0 }
 0x7e6   : > { %16492 = vmatmul.mubr.msk.bf16.gmra.mrb[76].mxu1 %vm2021_vm2, %v24131_v4 }
 0x7e7   : > { %6695 = vmatprep.mubr.bf16.mxu1 %v28634_v0 }
 0x7ee   : > { %16493 = vmatmul.mubr.msk.bf16.gmra.mrb[80].mxu1 %vm2021_vm2, %v24138_v13 }
 0x7ef   : > { %18632 = vmatprep.mubr.msk.bf16.mxu1 %vm22046_vm3, %v28765_v37 }
 0x7f6   : > { %18633 = vmatmul.mubr.msk.bf16.vlgmr.msra.gmra.mrb[84].mxu1 %vm2021_vm2, %v23997_v40  ;;  %v21454_v40 = vld [vmem:[%s28608_s5 + $0x110] ss:$12 sps:$4 sm:$0xff]  }
 0x7f7   : > { %18636 = vmatprep.mubr.msk.bf16.mxu1 %vm22046_vm3, %v28765_v37  ;;  %17757 = vmatpush3.bf16.msra.mxu1 %v21449_v14 }
 0x7f8   : > { %17758 = vmatprep.subr.bf16.mxu1 %v21450_v28 }
 0x7fb   : > { %17759 = vmatpush3.bf16.msra.mxu1 %v21451_v34 }
 0x7fc   : > { %17760 = vmatprep.subr.bf16.mxu1 %v21452_v58 }
 0x7fe   : > { %18637 = vmatmul.mubr.msk.bf16.gmra.mrb[88].mxu1 %vm2021_vm2, %v24007_v43  ;;  %v21458_v43 = vld [vmem:[%s28608_s5 + $0x140] ss:$12 sps:$4 sm:$0xff]  }
 0x7ff   : > { %18640 = vmatprep.mubr.msk.bf16.mxu1 %vm22046_vm3, %v28765_v37  ;;  %17761 = vmatpush3.bf16.msra.mxu1 %v21453_v27 }
 0x800   : > { %17762 = vmatprep.subr.bf16.mxu1 %v21454_v40 }
 0x803   : > { %17763 = vmatpush3.bf16.msra.mxu1 %v21455_v42 }
 0x804   : > { %17764 = vmatprep.subr.bf16.mxu1 %v21456_v8 }
 0x806   : > { %18641 = vmatmul.mubr.msk.bf16.gmra.mrb[92].mxu1 %vm2021_vm2, %v24016_v2  ;;  %v21462_v2 = vld [vmem:[%s28608_s5 + $0x170] ss:$12 sps:$4 sm:$0xff]  }
 0x807   : > { %18644 = vmatprep.mubr.msk.bf16.mxu1 %vm22046_vm3, %v28765_v37  ;;  %17765 = vmatpush3.bf16.msra.mxu1 %v21457_v22 }
 0x808   : > { %17766 = vmatprep.subr.bf16.mxu1 %v21458_v43 }
 0x80b   : > { %17767 = vmatpush3.bf16.msra.mxu1 %v21459_v18 }
 0x80c   : > { %17768 = vmatprep.subr.bf16.mxu1 %v21460_v32 }
 0x80e   : > { %18645 = vmatmul.mubr.msk.bf16.gmra.mrb[96].mxu1 %vm2021_vm2, %v24025_v54  ;;  %v28633_v54 = vsub.s32 0, %v24507_v45 }
 0x80f   : > { %18648 = vmatprep.mubr.msk.bf16.mxu1 %vm22046_vm3, %v28765_v37  ;;  %17769 = vmatpush3.bf16.msra.mxu1 %v21461_v36 }
 0x810   : > { %17770 = vmatprep.subr.bf16.mxu1 %v21462_v2 }
 0x813   : > { %17771 = vmatpush3.bf16.msra.mxu1 %v21463_v48 }
 0x816   : > { %18649 = vmatmul.mubr.msk.bf16.gmra.mrb[100].mxu1 %vm2021_vm2, %v24034_v60  ;;  %v24523_v60 = vrot.slane %v24515_v12, %v28633_v54 }
 0x817   : > { %18652 = vmatprep.mubr.msk.bf16.mxu1 %vm22046_vm3, %v28765_v37 }
 0x81e   : > { %18653 = vmatmul.mubr.msk.bf16.gmra.mrb[104].mxu1 %vm2021_vm2, %v24043_v9 }
 0x81f   : > { %18656 = vmatprep.mubr.msk.bf16.mxu1 %vm22046_vm3, %v28765_v37 }
 0x821   : > { %v6497_v52 = vpop.f32.mrb[0].mxu1 }
 0x822   : > { %v19110_v56 = vadd.f32 %v6497_v52, %v24523_v60  ;;  %v6499_v3 = vpop.f32.mrb[1].mxu1 }
 0x823   : > { %v19111_v5 = vadd.f32 %v6499_v3, %v24528_v29  ;;  %v6501_v9 = vpop.f32.mrb[2].mxu1 }
 0x824   : > { %v19112_v15 = vadd.f32 %v6501_v9, %v24523_v60  ;;  %v6503_v10 = vpop.f32.mrb[3].mxu1  ;;  %v7033_v30 = vmax.f32 %v19110_v56, 0.0 }
 0x825   : > { %v19113_v39 = vadd.f32 %v6503_v10, %v24528_v29  ;;  %v7034_v24 = vmax.f32 %v19111_v5, 0.0 }
 0x826   : > { %v7036_v47 = vmax.f32 %v19112_v15, 0.0  ;;  %18657 = vmatmul.mubr.msk.bf16.gmra.mrb[108].mxu1 %vm2021_vm2, %v24052_v16 }
 0x827   : > { %v7037_v38 = vmax.f32 %v19113_v39, 0.0  ;;  %18660 = vmatprep.mubr.msk.bf16.mxu1 %vm22046_vm3, %v28765_v37 }
 0x828   : > { %v24543_v31 = vpack.c.bf16 %v7036_v47, %v7033_v30 }
 0x829   : > { %v6507_v23 = vpop.f32.mrb[4].mxu1  ;;  %v24545_v61 = vpack.c.bf16 %v7037_v38, %v7034_v24 }
 0x82a   : > { %v19114_v50 = vadd.f32 %v6507_v23, %v24523_v60  ;;  %v6509_v26 = vpop.f32.mrb[5].mxu1 }
 0x82b   : > { %28775 = vst [vmem:[#allocation6_spill] sm:$0xff] %v24545_v61  ;;  %v19115_v25 = vadd.f32 %v6509_v26, %v24528_v29  ;;  %v6511_v62 = vpop.f32.mrb[6].mxu1  ;;  %7459 = vmatprep.subr.bf16.mxu0 %v24545_v61  ;;  %9304 = vmatprep.subr.bf16.mxu1 %v24545_v61 }
 0x82c   : > { %v19116_v16 = vadd.f32 %v6511_v62, %v24523_v60  ;;  %v6513_v49 = vpop.f32.mrb[7].mxu1  ;;  %7460 = vmatpush1.bf16.msra.mxu0 %v24543_v31  ;;  %v7039_v1 = vmax.f32 %v19114_v50, 0.0 }
 0x82d   : > { %v19117_v35 = vadd.f32 %v6513_v49, %v24528_v29  ;;  %v7040_v59 = vmax.f32 %v19115_v25, 0.0 }
 0x82e   : > { %v7042_v21 = vmax.f32 %v19116_v16, 0.0  ;;  %18661 = vmatmul.mubr.msk.bf16.gmra.mrb[112].mxu1 %vm2021_vm2, %v24061_v51 }
 0x82f   : > { %v7043_v14 = vmax.f32 %v19117_v35, 0.0  ;;  %18664 = vmatprep.mubr.msk.bf16.mxu1 %vm22046_vm3, %v28765_v37 }
 0x830   : > { %v24558_v28 = vpack.c.bf16 %v7042_v21, %v7039_v1 }
 0x831   : > { %v6517_v34 = vpop.f32.mrb[8].mxu1  ;;  %v24560_v58 = vpack.c.bf16 %v7043_v14, %v7040_v59 }
 0x832   : > { %v19118_v27 = vadd.f32 %v6517_v34, %v24523_v60  ;;  %v6519_v40 = vpop.f32.mrb[9].mxu1 }
 0x833   : > { %v19119_v42 = vadd.f32 %v6519_v40, %v24528_v29  ;;  %v6521_v8 = vpop.f32.mrb[10].mxu1  ;;  %7461 = vmatprep.subr.bf16.mxu0 %v24560_v58 }
 0x834   : > { %v19120_v51 = vadd.f32 %v6521_v8, %v24523_v60  ;;  %v6523_v22 = vpop.f32.mrb[11].mxu1  ;;  %7462 = vmatpush1.bf16.msra.mxu0 %v24558_v28  ;;  %v7045_v18 = vmax.f32 %v19118_v27, 0.0 }
 0x835   : > { %v19121_v43 = vadd.f32 %v6523_v22, %v24528_v29  ;;  %v7046_v36 = vmax.f32 %v19119_v42, 0.0 }
 0x836   : > { %v7048_v32 = vmax.f32 %v19120_v51, 0.0  ;;  %18665 = vmatmul.mubr.msk.bf16.gmra.mrb[116].mxu1 %vm2021_vm2, %v24070_v44 }
 0x837   : > { %v7049_v2 = vmax.f32 %v19121_v43, 0.0  ;;  %18668 = vmatprep.mubr.msk.bf16.mxu1 %vm22046_vm3, %v28765_v37 }
 0x838   : > { %v24572_v48 = vpack.c.bf16 %v7048_v32, %v7045_v18 }
 0x839   : > { %v6527_v46 = vpop.f32.mrb[12].mxu1  ;;  %v24574_v52 = vpack.c.bf16 %v7049_v2, %v7046_v36 }
 0x83a   : > { %v19122_v56 = vadd.f32 %v6527_v46, %v24523_v60  ;;  %v6529_v3 = vpop.f32.mrb[13].mxu1 }
 0x83b   : > { %v19123_v5 = vadd.f32 %v6529_v3, %v24528_v29  ;;  %v6531_v9 = vpop.f32.mrb[14].mxu1  ;;  %7463 = vmatprep.subr.bf16.mxu0 %v24574_v52 }
 0x83c   : > { %v19124_v44 = vadd.f32 %v6531_v9, %v24523_v60  ;;  %v6533_v15 = vpop.f32.mrb[15].mxu1  ;;  %7464 = vmatpush1.bf16.msra.mxu0 %v24572_v48  ;;  %v7051_v19 = vmax.f32 %v19122_v56, 0.0 }
 0x83d   : > { %v19125_v10 = vadd.f32 %v6533_v15, %v24528_v29  ;;  %v7052_v30 = vmax.f32 %v19123_v5, 0.0 }
 0x83e   : > { %v7054_v39 = vmax.f32 %v19124_v44, 0.0  ;;  %18669 = vmatmul.mubr.msk.bf16.gmra.mrb[120].mxu1 %vm2021_vm2, %v24079_v57 }
 0x83f   : > { %v7055_v47 = vmax.f32 %v19125_v10, 0.0  ;;  %18672 = vmatprep.mubr.msk.bf16.mxu1 %vm22046_vm3, %v28765_v37 }
 0x840   : > { %v24586_v24 = vpack.c.bf16 %v7054_v39, %v7051_v19 }
 0x841   : > { %v6537_v38 = vpop.f32.mrb[16].mxu1  ;;  %v24588_v23 = vpack.c.bf16 %v7055_v47, %v7052_v30 }
 0x842   : > { %v19126_v50 = vadd.f32 %v6537_v38, %v24523_v60  ;;  %v6539_v26 = vpop.f32.mrb[17].mxu1 }
 0x843   : > { %v19127_v25 = vadd.f32 %v6539_v26, %v24528_v29  ;;  %v6541_v62 = vpop.f32.mrb[18].mxu1  ;;  %7465 = vmatprep.subr.bf16.mxu0 %v24588_v23 }
 0x844   : > { %v19128_v57 = vadd.f32 %v6541_v62, %v24523_v60  ;;  %v6543_v16 = vpop.f32.mrb[19].mxu1  ;;  %7466 = vmatpush1.bf16.msra.mxu0 %v24586_v24  ;;  %v7057_v35 = vmax.f32 %v19126_v50, 0.0 }
 0x845   : > { %v19129_v49 = vadd.f32 %v6543_v16, %v24528_v29  ;;  %v7058_v21 = vmax.f32 %v19127_v25, 0.0 }
 0x846   : > { %v7060_v1 = vmax.f32 %v19128_v57, 0.0  ;;  %18673 = vmatmul.mubr.msk.bf16.gmra.mrb[124].mxu1 %vm2021_vm2, %v24082_v55 }
 0x847   : > { %v7061_v59 = vmax.f32 %v19129_v49, 0.0  ;;  %18676 = vmatprep.mubr.msk.bf16.mxu1 %vm22046_vm3, %v28765_v37 }
 0x848   : > { %v24600_v14 = vpack.c.bf16 %v7060_v1, %v7057_v35 }
 0x849   : > { %v6547_v34 = vpop.f32.mrb[20].mxu1  ;;  %v24602_v27 = vpack.c.bf16 %v7061_v59, %v7058_v21 }
 0x84a   : > { %28776 = vst [vmem:[#allocation7_spill] sm:$0xff] %v24600_v14  ;;  %v19130_v40 = vadd.f32 %v6547_v34, %v24523_v60  ;;  %v6549_v42 = vpop.f32.mrb[21].mxu1 }
 0x84b   : > { %v19131_v8 = vadd.f32 %v6549_v42, %v24528_v29  ;;  %v6551_v51 = vpop.f32.mrb[22].mxu1  ;;  %7467 = vmatprep.subr.bf16.mxu0 %v24602_v27 }
 0x84c   : > { %v19132_v55 = vadd.f32 %v6551_v51, %v24523_v60  ;;  %v6553_v22 = vpop.f32.mrb[23].mxu1  ;;  %7468 = vmatpush1.bf16.msra.mxu0 %v24600_v14  ;;  %v7063_v18 = vmax.f32 %v19130_v40, 0.0 }
 0x84d   : > { %v19133_v43 = vadd.f32 %v6553_v22, %v24528_v29  ;;  %v7064_v36 = vmax.f32 %v19131_v8, 0.0 }
 0x84e   : > { %v7066_v32 = vmax.f32 %v19132_v55, 0.0  ;;  %18677 = vmatmul.mubr.msk.bf16.gmra.mrb[128].mxu1 %vm2021_vm2, %v24084_v17 }
 0x84f   : > { %v7067_v2 = vmax.f32 %v19133_v43, 0.0  ;;  %18680 = vmatprep.mubr.msk.bf16.mxu1 %vm22046_vm3, %v28765_v37 }
 0x850   : > { %v24614_v46 = vpack.c.bf16 %v7066_v32, %v7063_v18 }
 0x851   : > { %v6557_v56 = vpop.f32.mrb[24].mxu1  ;;  %v24616_v3 = vpack.c.bf16 %v7067_v2, %v7064_v36 }
 0x852   : > { %28777 = vst [vmem:[#allocation8_spill] sm:$0xff] %v24614_v46  ;;  %v19134_v5 = vadd.f32 %v6557_v56, %v24523_v60  ;;  %v6559_v9 = vpop.f32.mrb[25].mxu1 }
 0x853   : > { %28778 = vst [vmem:[#allocation9_spill] sm:$0xff] %v24616_v3  ;;  %v19135_v44 = vadd.f32 %v6559_v9, %v24528_v29  ;;  %v6561_v15 = vpop.f32.mrb[26].mxu1  ;;  %7469 = vmatprep.subr.bf16.mxu0 %v24616_v3 }
 0x854   : > { %v19136_v17 = vadd.f32 %v6561_v15, %v24523_v60  ;;  %v6563_v10 = vpop.f32.mrb[27].mxu1  ;;  %7470 = vmatpush1.bf16.msra.mxu0 %v24614_v46  ;;  %v7069_v39 = vmax.f32 %v19134_v5, 0.0 }
 0x855   : > { %v19137_v19 = vadd.f32 %v6563_v10, %v24528_v29  ;;  %v7070_v47 = vmax.f32 %v19135_v44, 0.0 }
 0x856   : > { %v7072_v30 = vmax.f32 %v19136_v17, 0.0  ;;  %18681 = vmatmul.mubr.msk.bf16.gmra.mrb[132].mxu1 %vm2021_vm2, %v24086_v53 }
 0x857   : > { %v7073_v38 = vmax.f32 %v19137_v19, 0.0  ;;  %18684 = vmatprep.mubr.msk.bf16.mxu1 %vm22046_vm3, %v28765_v37 }
 0x858   : > { %v24628_v50 = vpack.c.bf16 %v7072_v30, %v7069_v39 }
 0x859   : > { %v6567_v26 = vpop.f32.mrb[28].mxu1  ;;  %v24630_v25 = vpack.c.bf16 %v7073_v38, %v7070_v47 }
 0x85a   : > { %28779 = vst [vmem:[#allocation10_spill] sm:$0xff] %v24628_v50  ;;  %v19138_v62 = vadd.f32 %v6567_v26, %v24523_v60  ;;  %v6569_v57 = vpop.f32.mrb[29].mxu1 }
 0x85b   : > { %28780 = vst [vmem:[#allocation11_spill] sm:$0xff] %v24630_v25  ;;  %v19139_v16 = vadd.f32 %v6569_v57, %v24528_v29  ;;  %v6571_v49 = vpop.f32.mrb[30].mxu1  ;;  %7471 = vmatprep.subr.bf16.mxu0 %v24630_v25 }
 0x85c   : > { %v19140_v53 = vadd.f32 %v6571_v49, %v24523_v60  ;;  %v6573_v35 = vpop.f32.mrb[31].mxu1  ;;  %7472 = vmatpush1.bf16.msra.mxu0 %v24628_v50  ;;  %v7075_v21 = vmax.f32 %v19138_v62, 0.0 }
 0x85d   : > { %v19141_v1 = vadd.f32 %v6573_v35, %v24528_v29  ;;  %v7076_v34 = vmax.f32 %v19139_v16, 0.0 }
 0x85e   : > { %v7078_v59 = vmax.f32 %v19140_v53, 0.0  ;;  %18685 = vmatmul.mubr.msk.bf16.gmra.mrb[136].mxu1 %vm2021_vm2, %v24088_v41 }
 0x85f   : > { %v7079_v40 = vmax.f32 %v19141_v1, 0.0  ;;  %18688 = vmatprep.mubr.msk.bf16.mxu1 %vm22046_vm3, %v28765_v37 }
 0x860   : > { %v24642_v42 = vpack.c.bf16 %v7078_v59, %v7075_v21 }
 0x861   : > { %v6577_v8 = vpop.f32.mrb[32].mxu1  ;;  %v24644_v51 = vpack.c.bf16 %v7079_v40, %v7076_v34 }
 0x862   : > { %28781 = vst [vmem:[#allocation12_spill] sm:$0xff] %v24642_v42  ;;  %v19142_v55 = vadd.f32 %v6577_v8, %v24523_v60  ;;  %v6579_v22 = vpop.f32.mrb[33].mxu1 }
 0x863   : > { %28782 = vst [vmem:[#allocation13_spill] sm:$0xff] %v24644_v51  ;;  %v19143_v43 = vadd.f32 %v6579_v22, %v24528_v29  ;;  %v6581_v18 = vpop.f32.mrb[34].mxu1  ;;  %7473 = vmatprep.subr.bf16.mxu0 %v24644_v51 }
 0x864   : > { %v19144_v41 = vadd.f32 %v6581_v18, %v24523_v60  ;;  %v6583_v32 = vpop.f32.mrb[35].mxu1  ;;  %7474 = vmatpush1.bf16.msra.mxu0 %v24642_v42  ;;  %v7081_v2 = vmax.f32 %v19142_v55, 0.0 }
 0x865   : > { %v19145_v36 = vadd.f32 %v6583_v32, %v24528_v29  ;;  %v7082_v5 = vmax.f32 %v19143_v43, 0.0 }
 0x866   : > { %v7084_v56 = vmax.f32 %v19144_v41, 0.0  ;;  %18689 = vmatmul.mubr.msk.bf16.gmra.mrb[140].mxu1 %vm2021_vm2, %v24090_v6 }
 0x867   : > { %v7085_v9 = vmax.f32 %v19145_v36, 0.0  ;;  %18692 = vmatprep.mubr.msk.bf16.mxu1 %vm22046_vm3, %v28765_v37 }
 0x868   : > { %v24656_v44 = vpack.c.bf16 %v7084_v56, %v7081_v2 }
 0x869   : > { %v6587_v15 = vpop.f32.mrb[36].mxu1  ;;  %v24658_v17 = vpack.c.bf16 %v7085_v9, %v7082_v5 }
 0x86a   : > { %28783 = vst [vmem:[#allocation14_spill] sm:$0xff] %v24656_v44  ;;  %v19146_v10 = vadd.f32 %v6587_v15, %v24523_v60  ;;  %v6589_v19 = vpop.f32.mrb[37].mxu1 }
 0x86b   : > { %28784 = vst [vmem:[#allocation15_spill] sm:$0xff] %v24658_v17  ;;  %v19147_v39 = vadd.f32 %v6589_v19, %v24528_v29  ;;  %v6591_v30 = vpop.f32.mrb[38].mxu1  ;;  %7475 = vmatprep.subr.bf16.mxu0 %v24658_v17 }
 0x86c   : > { %v19148_v6 = vadd.f32 %v6591_v30, %v24523_v60  ;;  %v6593_v47 = vpop.f32.mrb[39].mxu1  ;;  %7476 = vmatpush1.bf16.msra.mxu0 %v24656_v44  ;;  %v7087_v26 = vmax.f32 %v19146_v10, 0.0 }
 0x86d   : > { %v19149_v38 = vadd.f32 %v6593_v47, %v24528_v29  ;;  %v7088_v57 = vmax.f32 %v19147_v39, 0.0 }
 0x86e   : > { %v7090_v62 = vmax.f32 %v19148_v6, 0.0  ;;  %18693 = vmatmul.mubr.msk.bf16.gmra.mrb[144].mxu1 %vm2021_vm2, %v24092_v7 }
 0x86f   : > { %v7091_v16 = vmax.f32 %v19149_v38, 0.0  ;;  %18696 = vmatprep.mubr.msk.bf16.mxu1 %vm22046_vm3, %v28765_v37 }
 0x870   : > { %v24670_v49 = vpack.c.bf16 %v7090_v62, %v7087_v26 }
 0x871   : > { %v6597_v53 = vpop.f32.mrb[40].mxu1  ;;  %v24672_v35 = vpack.c.bf16 %v7091_v16, %v7088_v57 }
 0x872   : > { %28785 = vst [vmem:[#allocation16_spill] sm:$0xff] %v24670_v49  ;;  %v19150_v1 = vadd.f32 %v6597_v53, %v24523_v60  ;;  %v6599_v21 = vpop.f32.mrb[41].mxu1 }
 0x873   : > { %28786 = vst [vmem:[#allocation17_spill] sm:$0xff] %v24672_v35  ;;  %v19151_v59 = vadd.f32 %v6599_v21, %v24528_v29  ;;  %v6601_v34 = vpop.f32.mrb[42].mxu1  ;;  %7477 = vmatprep.subr.bf16.mxu0 %v24672_v35 }
 0x874   : > { %v19152_v7 = vadd.f32 %v6601_v34, %v24523_v60  ;;  %v6603_v40 = vpop.f32.mrb[43].mxu1  ;;  %7478 = vmatpush1.bf16.msra.mxu0 %v24670_v49  ;;  %v7093_v55 = vmax.f32 %v19150_v1, 0.0 }
 0x875   : > { %v19153_v8 = vadd.f32 %v6603_v40, %v24528_v29  ;;  %v7094_v43 = vmax.f32 %v19151_v59, 0.0 }
 0x876   : > { %v7096_v22 = vmax.f32 %v19152_v7, 0.0  ;;  %18697 = vmatmul.mubr.msk.bf16.gmra.mrb[148].mxu1 %vm2021_vm2, %v24094_v33 }
 0x877   : > { %v7097_v18 = vmax.f32 %v19153_v8, 0.0  ;;  %18700 = vmatprep.mubr.msk.bf16.mxu1 %vm22046_vm3, %v28765_v37 }
 0x878   : > { %v24684_v41 = vpack.c.bf16 %v7096_v22, %v7093_v55 }
 0x879   : > { %v6607_v32 = vpop.f32.mrb[44].mxu1  ;;  %v24686_v36 = vpack.c.bf16 %v7097_v18, %v7094_v43 }
 0x87a   : > { %28787 = vst [vmem:[#allocation18_spill] sm:$0xff] %v24684_v41  ;;  %v19154_v2 = vadd.f32 %v6607_v32, %v24523_v60  ;;  %v6609_v56 = vpop.f32.mrb[45].mxu1 }
 0x87b   : > { %28788 = vst [vmem:[#allocation19_spill] sm:$0xff] %v24686_v36  ;;  %v19155_v5 = vadd.f32 %v6609_v56, %v24528_v29  ;;  %v6611_v9 = vpop.f32.mrb[46].mxu1  ;;  %7479 = vmatprep.subr.bf16.mxu0 %v24686_v36  ;;  %v24986_v36 = vld [vmem:[%s28607_s4 + $0x38] ss:$12 sps:$4 sm:$0xff]  }
 0x87c   : > { %v19156_v33 = vadd.f32 %v6611_v9, %v24523_v60  ;;  %v6613_v15 = vpop.f32.mrb[47].mxu1  ;;  %7480 = vmatpush1.bf16.msra.mxu0 %v24684_v41  ;;  %v7099_v19 = vmax.f32 %v19154_v2, 0.0 }
 0x87d   : > { %v19157_v10 = vadd.f32 %v6613_v15, %v24528_v29  ;;  %v7100_v30 = vmax.f32 %v19155_v5, 0.0 }
 0x87e   : > { %v7102_v39 = vmax.f32 %v19156_v33, 0.0  ;;  %18701 = vmatmul.mubr.msk.bf16.gmra.mrb[152].mxu1 %vm2021_vm2, %v24108_v11 }
 0x87f   : > { %v7103_v6 = vmax.f32 %v19157_v10, 0.0  ;;  %18704 = vmatprep.mubr.msk.bf16.mxu1 %vm22046_vm3, %v28765_v37 }
 0x880   : > { %v24698_v47 = vpack.c.bf16 %v7102_v39, %v7099_v19 }
 0x881   : > { %v6617_v38 = vpop.f32.mrb[48].mxu1  ;;  %v24700_v26 = vpack.c.bf16 %v7103_v6, %v7100_v30 }
 0x882   : > { %28789 = vst [vmem:[#allocation20_spill] sm:$0xff] %v24698_v47  ;;  %v19158_v62 = vadd.f32 %v6617_v38, %v24523_v60  ;;  %v6619_v57 = vpop.f32.mrb[49].mxu1 }
 0x883   : > { %28790 = vst [vmem:[#allocation21_spill] sm:$0xff] %v24700_v26  ;;  %v19159_v16 = vadd.f32 %v6619_v57, %v24528_v29  ;;  %v6621_v53 = vpop.f32.mrb[50].mxu1  ;;  %7481 = vmatprep.subr.bf16.mxu0 %v24700_v26 }
 0x884   : > { %v19160_v11 = vadd.f32 %v6621_v53, %v24523_v60  ;;  %v6623_v1 = vpop.f32.mrb[51].mxu1  ;;  %7482 = vmatpush1.bf16.msra.mxu0 %v24698_v47  ;;  %v7105_v59 = vmax.f32 %v19158_v62, 0.0 }
 0x885   : > { %v19161_v21 = vadd.f32 %v6623_v1, %v24528_v29  ;;  %v7106_v7 = vmax.f32 %v19159_v16, 0.0 }
 0x886   : > { %v7108_v34 = vmax.f32 %v19160_v11, 0.0  ;;  %18705 = vmatmul.mubr.msk.bf16.gmra.mrb[156].mxu1 %vm2021_vm2, %v24123_v63 }
 0x887   : > { %v7109_v40 = vmax.f32 %v19161_v21, 0.0  ;;  %18708 = vmatprep.mubr.msk.bf16.mxu1 %vm22046_vm3, %v28765_v37 }
 0x888   : > { %v24712_v8 = vpack.c.bf16 %v7108_v34, %v7105_v59 }
 0x889   : > { %v6627_v55 = vpop.f32.mrb[52].mxu1  ;;  %v24714_v22 = vpack.c.bf16 %v7109_v40, %v7106_v7 }
 0x88a   : > { %28791 = vst [vmem:[#allocation22_spill] sm:$0xff] %v24712_v8  ;;  %v19162_v43 = vadd.f32 %v6627_v55, %v24523_v60  ;;  %v6629_v18 = vpop.f32.mrb[53].mxu1 }
 0x88b   : > { %28792 = vst [vmem:[#allocation23_spill] sm:$0xff] %v24714_v22  ;;  %v19163_v32 = vadd.f32 %v6629_v18, %v24528_v29  ;;  %v6631_v2 = vpop.f32.mrb[54].mxu1  ;;  %7483 = vmatprep.subr.bf16.mxu0 %v24714_v22 }
 0x88c   : > { %v19164_v63 = vadd.f32 %v6631_v2, %v24523_v60  ;;  %v6633_v56 = vpop.f32.mrb[55].mxu1  ;;  %7484 = vmatpush1.bf16.msra.mxu0 %v24712_v8  ;;  %v7111_v9 = vmax.f32 %v19162_v43, 0.0 }
 0x88d   : > { %v19165_v5 = vadd.f32 %v6633_v56, %v24528_v29  ;;  %v7112_v15 = vmax.f32 %v19163_v32, 0.0 }
 0x88e   : > { %v7114_v33 = vmax.f32 %v19164_v63, 0.0  ;;  %18709 = vmatmul.mubr.msk.bf16.gmra.mrb[160].mxu1 %vm2021_vm2, %v24131_v4 }
 0x88f   : > { %v7115_v10 = vmax.f32 %v19165_v5, 0.0  ;;  %18712 = vmatprep.mubr.msk.bf16.mxu1 %vm22046_vm3, %v28765_v37 }
 0x890   : > { %v24726_v19 = vpack.c.bf16 %v7114_v33, %v7111_v9 }
 0x891   : > { %v6637_v39 = vpop.f32.mrb[56].mxu1  ;;  %v24728_v30 = vpack.c.bf16 %v7115_v10, %v7112_v15 }
 0x892   : > { %28793 = vst [vmem:[#allocation24_spill] sm:$0xff] %v24726_v19  ;;  %v19166_v6 = vadd.f32 %v6637_v39, %v24523_v60  ;;  %v6639_v38 = vpop.f32.mrb[57].mxu1 }
 0x893   : > { %28794 = vst [vmem:[#allocation25_spill] sm:$0xff] %v24728_v30  ;;  %v19167_v62 = vadd.f32 %v6639_v38, %v24528_v29  ;;  %v6641_v57 = vpop.f32.mrb[58].mxu1  ;;  %7485 = vmatprep.subr.bf16.mxu0 %v24728_v30 }
 0x894   : > { %v19168_v4 = vadd.f32 %v6641_v57, %v24523_v60  ;;  %v6643_v16 = vpop.f32.mrb[59].mxu1  ;;  %7486 = vmatpush1.bf16.msra.mxu0 %v24726_v19  ;;  %v7117_v11 = vmax.f32 %v19166_v6, 0.0 }
 0x895   : > { %v19169_v53 = vadd.f32 %v6643_v16, %v24528_v29  ;;  %v7118_v21 = vmax.f32 %v19167_v62, 0.0 }
 0x896   : > { %v7120_v1 = vmax.f32 %v19168_v4, 0.0  ;;  %18713 = vmatmul.mubr.msk.bf16.gmra.mrb[164].mxu1 %vm2021_vm2, %v24138_v13  ;;  %v24758_v4 = vld [vmem:[%s28607_s4] ss:$12 sps:$4 sm:$0xff]  }
 0x897   : > { %v7121_v59 = vmax.f32 %v19169_v53, 0.0 }
 0x898   : > { %v24738_v34 = vpack.c.bf16 %v7120_v1, %v7117_v11  ;;  %v24765_v11 = vld [vmem:[%s28607_s4 + $0x1c] ss:$12 sps:$4 sm:$0xff]  }
 0x899   : > { %v6647_v7 = vpop.f32.mrb[60].mxu1  ;;  %v24740_v40 = vpack.c.bf16 %v7121_v59, %v7118_v21 }
 0x89a   : > { %28795 = vst [vmem:[#allocation26_spill] sm:$0xff] %v24738_v34  ;;  %v19170_v55 = vadd.f32 %v6647_v7, %v24523_v60  ;;  %v6649_v43 = vpop.f32.mrb[61].mxu1 }
 0x89b   : > { %28796 = vst [vmem:[#allocation27_spill] sm:$0xff] %v24740_v40  ;;  %v19171_v18 = vadd.f32 %v6649_v43, %v24528_v29  ;;  %v6651_v32 = vpop.f32.mrb[62].mxu1  ;;  %7487 = vmatprep.subr.bf16.mxu0 %v24740_v40 }
 0x89c   : > { %v19172_v2 = vadd.f32 %v6651_v32, %v24523_v60  ;;  %v6653_v63 = vpop.f32.mrb[63].mxu1  ;;  %7488 = vmatpush1.bf16.msra.mxu0 %v24738_v34  ;;  %v7123_v56 = vmax.f32 %v19170_v55, 0.0 }
 0x89d   : > { %v19173_v13 = vadd.f32 %v6653_v63, %v24528_v29  ;;  %v7124_v9 = vmax.f32 %v19171_v18, 0.0 }
 0x89e   : > { %v7126_v5 = vmax.f32 %v19172_v2, 0.0 }
 0x89f   : > { %v7127_v33 = vmax.f32 %v19173_v13, 0.0 }
 0x8a0   : > { %v24748_v15 = vpack.c.bf16 %v7126_v5, %v7123_v56  ;;  %v24780_v5 = vld [vmem:[%s28607_s4 + $0x18] ss:$12 sps:$4 sm:$0xff]  }
 0x8a1   : > { %v6657_v10 = vpop.f32.mrb[64].mxu1  ;;  %v24750_v39 = vpack.c.bf16 %v7127_v33, %v7124_v9 }
 0x8a2   : > { %28797 = vst [vmem:[#allocation28_spill] sm:$0xff] %v24748_v15  ;;  %v19174_v6 = vadd.f32 %v6657_v10, %v24523_v60  ;;  %v6659_v38 = vpop.f32.mrb[65].mxu1  ;;  %v24787_v10 = vld [vmem:[%s28607_s4 + $0x34] ss:$12 sps:$4 sm:$0xff]  }
 0x8a3   : > { %28798 = vst [vmem:[#allocation29_spill] sm:$0xff] %v24750_v39  ;;  %v19175_v62 = vadd.f32 %v6659_v38, %v24528_v29  ;;  %v6661_v57 = vpop.f32.mrb[66].mxu1  ;;  %7489 = vmatprep.subr.bf16.mxu0 %v24750_v39 }
 0x8a4   : > { %v19176_v16 = vadd.f32 %v6661_v57, %v24523_v60  ;;  %v6663_v53 = vpop.f32.mrb[67].mxu1  ;;  %7490 = vmatpush1.bf16.msra.mxu0 %v24748_v15  ;;  %v7129_v21 = vmax.f32 %v19174_v6, 0.0 }
 0x8a5   : > { %v19177_v1 = vadd.f32 %v6663_v53, %v24528_v29  ;;  %v7130_v7 = vmax.f32 %v19175_v62, 0.0 }
 0x8a6   : > { %v7132_v59 = vmax.f32 %v19176_v16, 0.0 }
 0x8a7   : > { %7492 = vmatmul.mubr.bf16.vlgmr.msra.gmra.mrb[168].mxu0 %v24758_v4  ;;  %v7133_v55 = vmax.f32 %v19177_v1, 0.0 }
 0x8a8   : > { %v24769_v43 = vpack.c.bf16 %v7132_v59, %v7129_v21  ;;  %7501 = vmatprep.mubr.bf16.mxu0 %v24765_v11 }
 0x8a9   : > { %v6667_v18 = vpop.f32.mrb[68].mxu1  ;;  %v24772_v32 = vpack.c.bf16 %v7133_v55, %v7130_v7 }
 0x8aa   : > { %28799 = vst [vmem:[#allocation30_spill] sm:$0xff] %v24769_v43  ;;  %v19178_v2 = vadd.f32 %v6667_v18, %v24523_v60  ;;  %v6669_v63 = vpop.f32.mrb[69].mxu1 }
 0x8ab   : > { %28800 = vst [vmem:[#allocation31_spill] sm:$0xff] %v24772_v32  ;;  %v19179_v13 = vadd.f32 %v6669_v63, %v24528_v29  ;;  %v6671_v56 = vpop.f32.mrb[70].mxu1  ;;  %7600 = vmatprep.subr.bf16.mxu0 %v24772_v32 }
 0x8ac   : > { %v19180_v9 = vadd.f32 %v6671_v56, %v24523_v60  ;;  %v6673_v33 = vpop.f32.mrb[71].mxu1  ;;  %7601 = vmatpush1.bf16.msra.mxu0 %v24769_v43  ;;  %v7135_v38 = vmax.f32 %v19178_v2, 0.0  ;;  %v24802_v2 = vld [vmem:[%s28607_s4 + $0x30] ss:$12 sps:$4 sm:$0xff]   ;;  %v24809_v56 = vld [vmem:[%s28607_s4 + $0x4c] ss:$12 sps:$4 sm:$0xff]  }
 0x8ad   : > { %v19181_v6 = vadd.f32 %v6673_v33, %v24528_v29  ;;  %v7136_v57 = vmax.f32 %v19179_v13, 0.0  ;;  %v7263_v43 = vld [vmem:[%s28607_s4 + $0xf0] sm:$0xff] }
 0x8ae   : > { %v7138_v62 = vmax.f32 %v19180_v9, 0.0  ;;  %v24951_v30 = vcombine.low %v7263_v43, %v7263_v43 }
 0x8af   : > { %7502 = vmatmul.mubr.bf16.gmra.mrb[172].mxu0 %v24780_v5  ;;  %v7139_v16 = vmax.f32 %v19181_v6, 0.0 }
 0x8b0   : > { %v24791_v53 = vpack.c.bf16 %v7138_v62, %v7135_v38  ;;  %7511 = vmatprep.mubr.bf16.mxu0 %v24787_v10 }
 0x8b1   : > { %v6677_v1 = vpop.f32.mrb[72].mxu1  ;;  %v24794_v21 = vpack.c.bf16 %v7139_v16, %v7136_v57 }
 0x8b2   : > { %28801 = vst [vmem:[#allocation32_spill] sm:$0xff] %v24791_v53  ;;  %v19182_v59 = vadd.f32 %v6677_v1, %v24523_v60  ;;  %v6679_v7 = vpop.f32.mrb[73].mxu1 }
 0x8b3   : > { %28802 = vst [vmem:[#allocation33_spill] sm:$0xff] %v24794_v21  ;;  %v19183_v55 = vadd.f32 %v6679_v7, %v24528_v29  ;;  %v6681_v18 = vpop.f32.mrb[74].mxu1  ;;  %7602 = vmatprep.subr.bf16.mxu0 %v24794_v21 }
 0x8b4   : > { %v19184_v63 = vadd.f32 %v6681_v18, %v24523_v60  ;;  %v6683_v13 = vpop.f32.mrb[75].mxu1  ;;  %7603 = vmatpush1.bf16.msra.mxu0 %v24791_v53  ;;  %v7141_v33 = vmax.f32 %v19182_v59, 0.0  ;;  %v24824_v59 = vld [vmem:[%s28607_s4 + $0x48] ss:$12 sps:$4 sm:$0xff]  }
 0x8b5   : > { %v19185_v9 = vadd.f32 %v6683_v13, %v24528_v29  ;;  %v7142_v38 = vmax.f32 %v19183_v55, 0.0  ;;  %v24831_v13 = vld [vmem:[%s28607_s4 + $0x64] ss:$12 sps:$4 sm:$0xff]  }
 0x8b6   : > { %v7144_v6 = vmax.f32 %v19184_v63, 0.0 }
 0x8b7   : > { %7512 = vmatmul.mubr.bf16.gmra.mrb[176].mxu0 %v24802_v2  ;;  %v7145_v62 = vmax.f32 %v19185_v9, 0.0 }
 0x8b8   : > { %v24813_v57 = vpack.c.bf16 %v7144_v6, %v7141_v33  ;;  %7521 = vmatprep.mubr.bf16.mxu0 %v24809_v56 }
 0x8b9   : > { %v6687_v16 = vpop.f32.mrb[76].mxu1  ;;  %v24816_v1 = vpack.c.bf16 %v7145_v62, %v7142_v38 }
 0x8ba   : > { %28803 = vst [vmem:[#allocation34_spill] sm:$0xff] %v24813_v57  ;;  %v19186_v7 = vadd.f32 %v6687_v16, %v24523_v60  ;;  %v6689_v18 = vpop.f32.mrb[77].mxu1 }
 0x8bb   : > { %28804 = vst [vmem:[#allocation35_spill] sm:$0xff] %v24816_v1  ;;  %v19187_v20 = vadd.f32 %v6689_v18, %v24528_v29  ;;  %v6691_v54 = vpop.f32.mrb[78].mxu1  ;;  %7604 = vmatprep.subr.bf16.mxu0 %v24816_v1 }
 0x8bc   : > { %v19188_v55 = vadd.f32 %v6691_v54, %v24523_v60  ;;  %v6693_v63 = vpop.f32.mrb[79].mxu1  ;;  %7605 = vmatpush1.bf16.msra.mxu0 %v24813_v57  ;;  %v7147_v33 = vmax.f32 %v19186_v7, 0.0  ;;  %v28643_v57 = vsub.s32 2, %v24507_v45 }
 0x8bd   : > { %v19189_v9 = vadd.f32 %v6693_v63, %v24528_v29  ;;  %v7148_v38 = vmax.f32 %v19187_v20, 0.0  ;;  %v24847_v20 = vld [vmem:[%s28607_s4 + $0x60] ss:$12 sps:$4 sm:$0xff]  }
 0x8be   : > { %v7150_v6 = vmax.f32 %v19188_v55, 0.0 }
 0x8bf   : > { %7522 = vmatmul.mubr.bf16.gmra.mrb[180].mxu0 %v24824_v59  ;;  %v7151_v62 = vmax.f32 %v19189_v9, 0.0 }
 0x8c0   : > { %v24835_v16 = vpack.c.bf16 %v7150_v6, %v7147_v33  ;;  %7531 = vmatprep.mubr.bf16.mxu0 %v24831_v13  ;;  %v24854_v33 = vld [vmem:[%s28607_s4 + $0x7c] ss:$12 sps:$4 sm:$0xff]  }
 0x8c1   : > { %v6697_v54 = vpop.f32.mrb[80].mxu1  ;;  %v24838_v18 = vpack.c.bf16 %v7151_v62, %v7148_v38  ;;  %v24860_v62 = vrot.slane %v24515_v12, %v28643_v57  ;;  %v24873_v12 = vld [vmem:[%s28607_s4 + $0x78] ss:$12 sps:$4 sm:$0xff]  }
 0x8c2   : > { %28805 = vst [vmem:[#allocation36_spill] sm:$0xff] %v24835_v16  ;;  %v19190_v0 = vadd.f32 %v6697_v54, %v24523_v60  ;;  %v6699_v61 = vpop.f32.mrb[81].mxu1 }
 0x8c3   : > { %28806 = vst [vmem:[#allocation37_spill] sm:$0xff] %v24838_v18  ;;  %v19191_v63 = vadd.f32 %v6699_v61, %v24528_v29  ;;  %v6701_v7 = vpop.f32.mrb[82].mxu1  ;;  %7606 = vmatprep.subr.bf16.mxu0 %v24838_v18 }
 0x8c4   : > { %v19192_v55 = vadd.f32 %v6701_v7, %v24523_v60  ;;  %v6703_v9 = vpop.f32.mrb[83].mxu1  ;;  %7607 = vmatpush1.bf16.msra.mxu0 %v24835_v16  ;;  %v7153_v6 = vmax.f32 %v19190_v0, 0.0 }
 0x8c5   : > { %v19193_v61 = vadd.f32 %v6703_v9, %v24528_v29  ;;  %v7154_v60 = vmax.f32 %v19191_v63, 0.0 }
 0x8c6   : > { %v7156_v38 = vmax.f32 %v19192_v55, 0.0 }
 0x8c7   : > { %7532 = vmatmul.mubr.bf16.gmra.mrb[184].mxu0 %v24847_v20  ;;  %v7157_v54 = vmax.f32 %v19193_v61, 0.0  ;;  %v24880_v61 = vld [vmem:[%s28607_s4 + $0x94] ss:$12 sps:$4 sm:$0xff]  }
 0x8c8   : > { %v24863_v7 = vpack.c.bf16 %v7156_v38, %v7153_v6  ;;  %7541 = vmatprep.mubr.bf16.mxu0 %v24854_v33 }
 0x8c9   : > { %v6740_v16 = vpop.f32.mrb[84].mxu1  ;;  %v24866_v18 = vpack.c.bf16 %v7157_v54, %v7154_v60 }
 0x8ca   : > { %28807 = vst [vmem:[#allocation38_spill] sm:$0xff] %v24863_v7  ;;  %v19194_v29 = vadd.f32 %v6740_v16, %v24860_v62  ;;  %v18634_v0 = vpop.f32.mrb[85].mxu1 }
 0x8cb   : > { %28808 = vst [vmem:[#allocation39_spill] sm:$0xff] %v24866_v18  ;;  %v6743_v55 = vpop.f32.mrb[86].mxu1  ;;  %7608 = vmatprep.subr.bf16.mxu0 %v24866_v18 }
 0x8cc   : > { %v19195_v63 = vadd.f32 %v6743_v55, %v24860_v62  ;;  %v18635_v9 = vpop.f32.mrb[87].mxu1  ;;  %7609 = vmatpush1.bf16.msra.mxu0 %v24863_v7  ;;  %v7035_v16 = vmax.f32 %v19194_v29, 0.0 }
 0x8cd   : > { %v24890_v9 = vld [vmem:[%s28607_s4 + $0x90] ss:$12 sps:$4 sm:$0xff]  }
 0x8ce   : > { %v7038_v6 = vmax.f32 %v19195_v63, 0.0  ;;  %v24896_v63 = vld [vmem:[%s28607_s4 + $0xac] ss:$12 sps:$4 sm:$0xff]  }
 0x8cf   : > { %7542 = vmatmul.mubr.bf16.gmra.mrb[188].mxu0 %v24873_v12 }
 0x8d0   : > { %7551 = vmatprep.mubr.bf16.mxu0 %v24880_v61  ;;  %v24884_v38 = vpack.c.bf16 %v7038_v6, %v7035_v16 }
 0x8d1   : > { %v6748_v60 = vpop.f32.mrb[88].mxu1 }
 0x8d2   : > { %28809 = vst [vmem:[#allocation40_spill] sm:$0xff] %v24884_v38  ;;  %v19196_v54 = vadd.f32 %v6748_v60, %v24860_v62  ;;  %v18638_v0 = vpop.f32.mrb[89].mxu1 }
 0x8d3   : > { %v6751_v55 = vpop.f32.mrb[90].mxu1 }
 0x8d4   : > { %v19197_v57 = vadd.f32 %v6751_v55, %v24860_v62  ;;  %v18639_v29 = vpop.f32.mrb[91].mxu1  ;;  %v7041_v16 = vmax.f32 %v19196_v54, 0.0  ;;  %v24906_v55 = vld [vmem:[%s28607_s4 + $0xa8] ss:$12 sps:$4 sm:$0xff]  }
 0x8d6   : > { %v7044_v6 = vmax.f32 %v19197_v57, 0.0  ;;  %v24912_v57 = vld [vmem:[%s28607_s4 + $0xc4] ss:$12 sps:$4 sm:$0xff]  }
 0x8d7   : > { %7552 = vmatmul.mubr.bf16.gmra.mrb[192].mxu0 %v24890_v9 }
 0x8d8   : > { %v24899_v60 = vpack.c.bf16 %v7044_v6, %v7041_v16  ;;  %7561 = vmatprep.mubr.bf16.mxu0 %v24896_v63 }
 0x8d9   : > { %v6756_v0 = vpop.f32.mrb[92].mxu1 }
 0x8da   : > { %28810 = vst [vmem:[#allocation41_spill] sm:$0xff] %v24899_v60  ;;  %v19198_v45 = vadd.f32 %v6756_v0, %v24860_v62  ;;  %v18642_v7 = vpop.f32.mrb[93].mxu1 }
 0x8db   : > { %v6759_v18 = vpop.f32.mrb[94].mxu1 }
 0x8dc   : > { %v19199_v29 = vadd.f32 %v6759_v18, %v24860_v62  ;;  %v18643_v54 = vpop.f32.mrb[95].mxu1  ;;  %v7047_v16 = vmax.f32 %v19198_v45, 0.0  ;;  %v24922_v18 = vld [vmem:[%s28607_s4 + $0xc0] ss:$12 sps:$4 sm:$0xff]  }
 0x8de   : > { %v7050_v6 = vmax.f32 %v19199_v29, 0.0  ;;  %v24928_v29 = vld [vmem:[%s28607_s4 + $0xdc] ss:$12 sps:$4 sm:$0xff]  }
 0x8df   : > { %7562 = vmatmul.mubr.bf16.gmra.mrb[196].mxu0 %v24906_v55 }
 0x8e0   : > { %v24915_v0 = vpack.c.bf16 %v7050_v6, %v7047_v16  ;;  %7571 = vmatprep.mubr.bf16.mxu0 %v24912_v57 }
 0x8e1   : > { %v6764_v7 = vpop.f32.mrb[96].mxu1 }
 0x8e2   : > { %28811 = vst [vmem:[#allocation42_spill] sm:$0xff] %v24915_v0  ;;  %v19200_v1 = vadd.f32 %v6764_v7, %v24860_v62  ;;  %v18646_v53 = vpop.f32.mrb[97].mxu1 }
 0x8e3   : > { %v6767_v21 = vpop.f32.mrb[98].mxu1 }
 0x8e4   : > { %v19201_v54 = vadd.f32 %v6767_v21, %v24860_v62  ;;  %v18647_v45 = vpop.f32.mrb[99].mxu1  ;;  %v7053_v16 = vmax.f32 %v19200_v1, 0.0  ;;  %v24941_v1 = vld [vmem:[%s28607_s4 + $0xd8] ss:$12 sps:$4 sm:$0xff]  }
 0x8e6   : > { %v7056_v6 = vmax.f32 %v19201_v54, 0.0 }
 0x8e7   : > { %7572 = vmatmul.mubr.bf16.gmra.mrb[200].mxu0 %v24922_v18 }
 0x8e8   : > { %v24931_v7 = vpack.c.bf16 %v7056_v6, %v7053_v16  ;;  %7581 = vmatprep.mubr.bf16.mxu0 %v24928_v29  ;;  %v24944_v6 = vcombine.high %v7263_v43, %v7263_v43 }
 0x8e9   : > { %v6772_v53 = vpop.f32.mrb[100].mxu1 }
 0x8ea   : > { %28812 = vst [vmem:[#allocation43_spill] sm:$0xff] %v24931_v7  ;;  %v19202_v21 = vadd.f32 %v6772_v53, %v24860_v62  ;;  %v18650_v45 = vpop.f32.mrb[101].mxu1 }
 0x8eb   : > { %v6775_v32 = vpop.f32.mrb[102].mxu1 }
 0x8ec   : > { %v19203_v54 = vadd.f32 %v6775_v32, %v24860_v62  ;;  %v18651_v16 = vpop.f32.mrb[103].mxu1  ;;  %v7059_v15 = vmax.f32 %v19202_v21, 0.0 }
 0x8ee   : > { %v7062_v39 = vmax.f32 %v19203_v54, 0.0 }
 0x8ef   : > { %7582 = vmatmul.mubr.bf16.gmra.mrb[204].mxu0 %v24941_v1 }
 0x8f0   : > { %v24947_v34 = vpack.c.bf16 %v7062_v39, %v7059_v15  ;;  %7591 = vmatprep.mubr.bf16.mxu0 %v24944_v6  ;;  %v28815_v15 = vmov 0  }
 0x8f1   : > { %v6780_v53 = vpop.f32.mrb[104].mxu1 }
 0x8f2   : > { %28813 = vst [vmem:[#allocation44_spill] sm:$0xff] %v24947_v34  ;;  %v19204_v45 = vadd.f32 %v6780_v53, %v24860_v62  ;;  %v18654_v40 = vpop.f32.mrb[105].mxu1 }
 0x8f3   : > { %v6783_v19 = vpop.f32.mrb[106].mxu1  ;;  %v24962_v40 = vld [vmem:[%s28607_s4 + $0x8] ss:$12 sps:$4 sm:$0xff]  }
 0x8f4   : > { %v19205_v32 = vadd.f32 %v6783_v19, %v24860_v62  ;;  %v18655_v16 = vpop.f32.mrb[107].mxu1  ;;  %v7065_v8 = vmax.f32 %v19204_v45, 0.0 }
 0x8f6   : > { %v7068_v22 = vmax.f32 %v19205_v32, 0.0 }
 0x8f7   : > { %7592 = vmatmul.mubr.bf16.gmra.mrb[208].mxu0 %v24951_v30 }
 0x8f8   : > { %v24955_v21 = vpack.c.bf16 %v7068_v22, %v7065_v8  ;;  %7632 = vmatprep.mubr.bf16.mxu0 %v28815_v15 }
 0x8f9   : > { %v6788_v39 = vpop.f32.mrb[108].mxu1 }
 0x8fa   : > { %28814 = vst [vmem:[#allocation45_spill] sm:$0xff] %v24955_v21  ;;  %v19206_v54 = vadd.f32 %v6788_v39, %v24860_v62  ;;  %v18658_v47 = vpop.f32.mrb[109].mxu1 }
 0x8fb   : > { %v6791_v53 = vpop.f32.mrb[110].mxu1 }
 0x8fc   : > { %v19207_v19 = vadd.f32 %v6791_v53, %v24860_v62  ;;  %v18659_v43 = vpop.f32.mrb[111].mxu1  ;;  %v7071_v45 = vmax.f32 %v19206_v54, 0.0  ;;  %v24974_v53 = vld [vmem:[%s28607_s4 + $0x20] ss:$12 sps:$4 sm:$0xff]  }
 0x8fe   : > { %v7074_v32 = vmax.f32 %v19207_v19, 0.0 }
 0x8ff   : > { %16548 = vmatmul.mubr.msk.bf16.vlgmr.msra.gmra.mrb[168].mxu0 %vm7425_vm4, %v24962_v40 }
 0x900   : > { %v24967_v8 = vpack.c.bf16 %v7074_v32, %v7071_v45  ;;  %7642 = vmatprep.mubr.bf16.mxu0 %v28815_v15 }
 0x901   : > { %v6796_v47 = vpop.f32.mrb[112].mxu1 }
 0x902   : > { %28816 = vst [vmem:[#allocation46_spill] sm:$0xff] %v24967_v8  ;;  %v19208_v22 = vadd.f32 %v6796_v47, %v24860_v62  ;;  %v18662_v16 = vpop.f32.mrb[113].mxu1 }
 0x903   : > { %v6799_v39 = vpop.f32.mrb[114].mxu1 }
 0x904   : > { %v19209_v54 = vadd.f32 %v6799_v39, %v24860_v62  ;;  %v18663_v19 = vpop.f32.mrb[115].mxu1  ;;  %v7077_v43 = vmax.f32 %v19208_v22, 0.0 }
 0x906   : > { %v7080_v26 = vmax.f32 %v19209_v54, 0.0 }
 0x907   : > { %16549 = vmatmul.mubr.msk.bf16.gmra.mrb[172].mxu0 %vm7425_vm4, %v24974_v53 }
 0x908   : > { %v24979_v45 = vpack.c.bf16 %v7080_v26, %v7077_v43  ;;  %7652 = vmatprep.mubr.bf16.mxu0 %v28815_v15 }
 0x909   : > { %v6804_v32 = vpop.f32.mrb[116].mxu1 }
 0x90a   : > { %28817 = vst [vmem:[#allocation47_spill] sm:$0xff] %v24979_v45  ;;  %v19210_v47 = vadd.f32 %v6804_v32, %v24860_v62  ;;  %v18666_v16 = vpop.f32.mrb[117].mxu1 }
 0x90b   : > { %v6807_v41 = vpop.f32.mrb[118].mxu1 }
 0x90c   : > { %v19211_v22 = vadd.f32 %v6807_v41, %v24860_v62  ;;  %v18667_v39 = vpop.f32.mrb[119].mxu1  ;;  %v7083_v54 = vmax.f32 %v19210_v47, 0.0  ;;  %v25000_v41 = vld [vmem:[%s28607_s4 + $0x50] ss:$12 sps:$4 sm:$0xff]  }
 0x90e   : > { %v7086_v19 = vmax.f32 %v19211_v22, 0.0 }
 0x90f   : > { %16550 = vmatmul.mubr.msk.bf16.gmra.mrb[176].mxu0 %vm7425_vm4, %v24986_v36 }
 0x910   : > { %v24991_v26 = vpack.c.bf16 %v7086_v19, %v7083_v54  ;;  %7662 = vmatprep.mubr.bf16.mxu0 %v28815_v15 }
 0x911   : > { %v6812_v43 = vpop.f32.mrb[120].mxu1 }
 0x912   : > { %28818 = vst [vmem:[#allocation48_spill] sm:$0xff] %v24991_v26  ;;  %v19212_v32 = vadd.f32 %v6812_v43, %v24860_v62  ;;  %v18670_v16 = vpop.f32.mrb[121].mxu1  ;;  %17658 = vmatprep.subr.bf16.mxu0 %v24991_v26 }
 0x913   : > { %v6815_v49 = vpop.f32.mrb[122].mxu1  ;;  %17659 = vmatpush3.bf16.msra.mxu0 %v24884_v38 }
 0x914   : > { %v19213_v47 = vadd.f32 %v6815_v49, %v24860_v62  ;;  %v18671_v22 = vpop.f32.mrb[123].mxu1  ;;  %v7089_v39 = vmax.f32 %v19212_v32, 0.0  ;;  %v25014_v49 = vld [vmem:[%s28607_s4 + $0x68] ss:$12 sps:$4 sm:$0xff]  }
 0x916   : > { %v7092_v54 = vmax.f32 %v19213_v47, 0.0 }
 0x917   : > { %16551 = vmatmul.mubr.msk.bf16.gmra.mrb[180].mxu0 %vm7425_vm4, %v25000_v41 }
 0x918   : > { %v25005_v19 = vpack.c.bf16 %v7092_v54, %v7089_v39  ;;  %7672 = vmatprep.mubr.bf16.mxu0 %v28815_v15 }
 0x919   : > { %v6820_v43 = vpop.f32.mrb[124].mxu1 }
 0x91a   : > { %28819 = vst [vmem:[#allocation49_spill] sm:$0xff] %v25005_v19  ;;  %v19214_v16 = vadd.f32 %v6820_v43, %v24860_v62  ;;  %v18674_v38 = vpop.f32.mrb[125].mxu1  ;;  %17660 = vmatprep.subr.bf16.mxu0 %v25005_v19 }
 0x91b   : > { %v6823_v26 = vpop.f32.mrb[126].mxu1  ;;  %17661 = vmatpush3.bf16.msra.mxu0 %v24899_v60 }
 0x91c   : > { %v19215_v32 = vadd.f32 %v6823_v26, %v24860_v62  ;;  %v18675_v47 = vpop.f32.mrb[127].mxu1  ;;  %v7095_v22 = vmax.f32 %v19214_v16, 0.0  ;;  %v25028_v26 = vld [vmem:[%s28607_s4 + $0x80] ss:$12 sps:$4 sm:$0xff]  }
 0x91e   : > { %v7098_v39 = vmax.f32 %v19215_v32, 0.0 }
 0x91f   : > { %16552 = vmatmul.mubr.msk.bf16.gmra.mrb[184].mxu0 %vm7425_vm4, %v25014_v49 }
 0x920   : > { %v25019_v54 = vpack.c.bf16 %v7098_v39, %v7095_v22  ;;  %7682 = vmatprep.mubr.bf16.mxu0 %v28815_v15 }
 0x921   : > { %v6828_v38 = vpop.f32.mrb[128].mxu1 }
 0x922   : > { %28820 = vst [vmem:[#allocation50_spill] sm:$0xff] %v25019_v54  ;;  %v19216_v43 = vadd.f32 %v6828_v38, %v24860_v62  ;;  %v18678_v60 = vpop.f32.mrb[129].mxu1  ;;  %17662 = vmatprep.subr.bf16.mxu0 %v25019_v54 }
 0x923   : > { %v6831_v19 = vpop.f32.mrb[130].mxu1  ;;  %17663 = vmatpush3.bf16.msra.mxu0 %v24915_v0 }
 0x924   : > { %v19217_v16 = vadd.f32 %v6831_v19, %v24860_v62  ;;  %v18679_v32 = vpop.f32.mrb[131].mxu1  ;;  %v7101_v47 = vmax.f32 %v19216_v43, 0.0  ;;  %v25042_v19 = vld [vmem:[%s28607_s4 + $0x98] ss:$12 sps:$4 sm:$0xff]  }
 0x926   : > { %v7104_v22 = vmax.f32 %v19217_v16, 0.0 }
 0x927   : > { %16553 = vmatmul.mubr.msk.bf16.gmra.mrb[188].mxu0 %vm7425_vm4, %v25028_v26 }
 0x928   : > { %v25033_v39 = vpack.c.bf16 %v7104_v22, %v7101_v47  ;;  %7692 = vmatprep.mubr.bf16.mxu0 %v28815_v15 }
 0x929   : > { %v6836_v60 = vpop.f32.mrb[132].mxu1 }
 0x92a   : > { %28821 = vst [vmem:[#allocation51_spill] sm:$0xff] %v25033_v39  ;;  %v19218_v38 = vadd.f32 %v6836_v60, %v24860_v62  ;;  %v18682_v0 = vpop.f32.mrb[133].mxu1  ;;  %17664 = vmatprep.subr.bf16.mxu0 %v25033_v39 }
 0x92b   : > { %v6839_v54 = vpop.f32.mrb[134].mxu1  ;;  %17665 = vmatpush3.bf16.msra.mxu0 %v24931_v7 }
 0x92c   : > { %v19219_v43 = vadd.f32 %v6839_v54, %v24860_v62  ;;  %v18683_v16 = vpop.f32.mrb[135].mxu1  ;;  %v7107_v32 = vmax.f32 %v19218_v38, 0.0  ;;  %v25056_v54 = vld [vmem:[%s28607_s4 + $0xb0] ss:$12 sps:$4 sm:$0xff]  }
 0x92e   : > { %v7110_v47 = vmax.f32 %v19219_v43, 0.0 }
 0x92f   : > { %16554 = vmatmul.mubr.msk.bf16.gmra.mrb[192].mxu0 %vm7425_vm4, %v25042_v19 }
 0x930   : > { %v25047_v22 = vpack.c.bf16 %v7110_v47, %v7107_v32  ;;  %7702 = vmatprep.mubr.bf16.mxu0 %v28815_v15 }
 0x931   : > { %v6844_v0 = vpop.f32.mrb[136].mxu1 }
 0x932   : > { %28822 = vst [vmem:[#allocation52_spill] sm:$0xff] %v25047_v22  ;;  %v19220_v60 = vadd.f32 %v6844_v0, %v24860_v62  ;;  %v18686_v7 = vpop.f32.mrb[137].mxu1  ;;  %17666 = vmatprep.subr.bf16.mxu0 %v25047_v22 }
 0x933   : > { %v6847_v39 = vpop.f32.mrb[138].mxu1  ;;  %17667 = vmatpush3.bf16.msra.mxu0 %v24947_v34 }
 0x934   : > { %v19221_v38 = vadd.f32 %v6847_v39, %v24860_v62  ;;  %v18687_v43 = vpop.f32.mrb[139].mxu1  ;;  %v7113_v16 = vmax.f32 %v19220_v60, 0.0  ;;  %v25070_v39 = vld [vmem:[%s28607_s4 + $0xc8] ss:$12 sps:$4 sm:$0xff]  }
 0x936   : > { %v7116_v32 = vmax.f32 %v19221_v38, 0.0 }
 0x937   : > { %16555 = vmatmul.mubr.msk.bf16.gmra.mrb[196].mxu0 %vm7425_vm4, %v25056_v54 }
 0x938   : > { %v25061_v47 = vpack.c.bf16 %v7116_v32, %v7113_v16  ;;  %7712 = vmatprep.mubr.bf16.mxu0 %v28815_v15 }
 0x939   : > { %v6852_v7 = vpop.f32.mrb[140].mxu1 }
 0x93a   : > { %28823 = vst [vmem:[#allocation53_spill] sm:$0xff] %v25061_v47  ;;  %v19222_v0 = vadd.f32 %v6852_v7, %v24860_v62  ;;  %v18690_v34 = vpop.f32.mrb[141].mxu1  ;;  %17668 = vmatprep.subr.bf16.mxu0 %v25061_v47 }
 0x93b   : > { %v6855_v22 = vpop.f32.mrb[142].mxu1  ;;  %17669 = vmatpush3.bf16.msra.mxu0 %v24955_v21 }
 0x93c   : > { %v19223_v60 = vadd.f32 %v6855_v22, %v24860_v62  ;;  %v18691_v38 = vpop.f32.mrb[143].mxu1  ;;  %v7119_v43 = vmax.f32 %v19222_v0, 0.0  ;;  %v25084_v22 = vld [vmem:[%s28607_s4 + $0xe0] ss:$12 sps:$4 sm:$0xff]  }
 0x93e   : > { %v7122_v16 = vmax.f32 %v19223_v60, 0.0 }
 0x93f   : > { %16556 = vmatmul.mubr.msk.bf16.gmra.mrb[200].mxu0 %vm7425_vm4, %v25070_v39 }
 0x940   : > { %v25075_v32 = vpack.c.bf16 %v7122_v16, %v7119_v43  ;;  %7722 = vmatprep.mubr.bf16.mxu0 %v28815_v15 }
 0x941   : > { %v6860_v34 = vpop.f32.mrb[144].mxu1 }
 0x942   : > { %28824 = vst [vmem:[#allocation54_spill] sm:$0xff] %v25075_v32  ;;  %v19224_v7 = vadd.f32 %v6860_v34, %v24860_v62  ;;  %v18694_v21 = vpop.f32.mrb[145].mxu1  ;;  %17670 = vmatprep.subr.bf16.mxu0 %v25075_v32 }
 0x943   : > { %v6863_v47 = vpop.f32.mrb[146].mxu1  ;;  %17671 = vmatpush3.bf16.msra.mxu0 %v24967_v8 }
 0x944   : > { %v19225_v0 = vadd.f32 %v6863_v47, %v24860_v62  ;;  %v18695_v60 = vpop.f32.mrb[147].mxu1  ;;  %v7125_v38 = vmax.f32 %v19224_v7, 0.0  ;;  %v25098_v47 = vld [vmem:[%s28607_s4 + $0xf8] ss:$0 sps:$4 sm:$0xff]  }
 0x945   : > { %28826 = vst [vmem:[#allocation56_spill] sm:$0xff] %v25098_v47 }
 0x946   : > { %v7128_v43 = vmax.f32 %v19225_v0, 0.0 }
 0x947   : > { %16557 = vmatmul.mubr.msk.bf16.gmra.mrb[204].mxu0 %vm7425_vm4, %v25084_v22 }
 0x948   : > { %v25089_v16 = vpack.c.bf16 %v7128_v43, %v7125_v38  ;;  %7732 = vmatprep.mubr.bf16.mxu0 %v28815_v15  ;;  %v21977_v43 = vld [vmem:[%s28607_s4 + $0x4] ss:$12 sps:$4 sm:$0xff]  }
 0x949   : > { %v6868_v21 = vpop.f32.mrb[148].mxu1 }
 0x94a   : > { %28825 = vst [vmem:[#allocation55_spill] sm:$0xff] %v25089_v16  ;;  %v19226_v34 = vadd.f32 %v6868_v21, %v24860_v62  ;;  %v18698_v8 = vpop.f32.mrb[149].mxu1  ;;  %17672 = vmatprep.subr.bf16.mxu0 %v25089_v16 }
 0x94b   : > { %v6871_v32 = vpop.f32.mrb[150].mxu1  ;;  %17673 = vmatpush3.bf16.msra.mxu0 %v24979_v45 }
 0x94c   : > { %v19227_v7 = vadd.f32 %v6871_v32, %v24860_v62  ;;  %v18699_v0 = vpop.f32.mrb[151].mxu1  ;;  %18716 = vmatprep.subr.bf16.mxu0 %v28765_v37  ;;  %v7131_v60 = vmax.f32 %v19226_v34, 0.0 }
 0x94e   : > { %v7134_v38 = vmax.f32 %v19227_v7, 0.0 }
 0x94f   : > { %16558 = vmatmul.mubr.msk.bf16.gmra.mrb[208].mxu0 %vm7425_vm4, %v25098_v47 }
 0x950   : > { %v25104_v8 = vpack.c.bf16 %v7134_v38, %v7131_v60  ;;  %7773 = vmatprep.mubr.bf16.mxu0 %v21977_v43 }
 0x951   : > { %v6876_v21 = vpop.f32.mrb[152].mxu1 }
 0x952   : > { %28827 = vst [vmem:[#allocation57_spill] sm:$0xff] %v25104_v8  ;;  %v19228_v45 = vadd.f32 %v6876_v21, %v24860_v62  ;;  %v18702_v16 = vpop.f32.mrb[153].mxu1 }
 0x953   : > { %v6879_v32 = vpop.f32.mrb[154].mxu1 }
 0x954   : > { %v19229_v0 = vadd.f32 %v6879_v32, %v24860_v62  ;;  %v18703_v15 = vpop.f32.mrb[155].mxu1  ;;  %v7137_v34 = vmax.f32 %v19228_v45, 0.0 }
 0x956   : > { %v7140_v7 = vmax.f32 %v19229_v0, 0.0 }
 0x957   : > { %7774 = vmatmul.mubr.bf16.vlgmr.msra.gmra.mrb[212].mxu0 %v24758_v4 }
 0x958   : > { %v25112_v47 = vpack.c.bf16 %v7140_v7, %v7137_v34  ;;  %18717 = vmatpush3.bf16.msra.mxu0 %v25104_v8  ;;  %7781 = vmatprep.mubr.bf16.mxu0 %v24765_v11 }
 0x959   : > { %v6884_v60 = vpop.f32.mrb[156].mxu1  ;;  %18718 = vmatprep.subr.bf16.mxu0 %v28765_v37 }
 0x95a   : > { %28828 = vst [vmem:[#allocation58_spill] sm:$0xff] %v25112_v47  ;;  %v19230_v38 = vadd.f32 %v6884_v60, %v24860_v62  ;;  %v18706_v16 = vpop.f32.mrb[157].mxu1 }
 0x95b   : > { %v6887_v43 = vpop.f32.mrb[158].mxu1 }
 0x95c   : > { %v19231_v21 = vadd.f32 %v6887_v43, %v24860_v62  ;;  %18719 = vmatpush3.bf16.msra.mxu0 %v25112_v47  ;;  %v18707_v15 = vpop.f32.mrb[159].mxu1  ;;  %v7143_v4 = vmax.f32 %v19230_v38, 0.0 }
 0x95d   : > { %18720 = vmatprep.subr.bf16.mxu0 %v28765_v37 }
 0x95e   : > { %v7146_v45 = vmax.f32 %v19231_v21, 0.0 }
 0x95f   : > { %7782 = vmatmul.mubr.bf16.gmra.mrb[216].mxu0 %v24780_v5 }
 0x960   : > { %v25122_v32 = vpack.c.bf16 %v7146_v45, %v7143_v4  ;;  %7789 = vmatprep.mubr.bf16.mxu0 %v24787_v10 }
 0x961   : > { %v6892_v11 = vpop.f32.mrb[160].mxu1 }
 0x962   : > { %28829 = vst [vmem:[#allocation59_spill] sm:$0xff] %v25122_v32  ;;  %v19232_v0 = vadd.f32 %v6892_v11, %v24860_v62  ;;  %v18710_v34 = vpop.f32.mrb[161].mxu1  ;;  %18721 = vmatpush3.bf16.msra.mxu0 %v25122_v32 }
 0x963   : > { %v6895_v7 = vpop.f32.mrb[162].mxu1  ;;  %18722 = vmatprep.subr.bf16.mxu0 %v28765_v37 }
 0x964   : > { %v19233_v60 = vadd.f32 %v6895_v7, %v24860_v62  ;;  %v18711_v16 = vpop.f32.mrb[163].mxu1  ;;  %v7149_v38 = vmax.f32 %v19232_v0, 0.0 }
 0x966   : > { %v7152_v43 = vmax.f32 %v19233_v60, 0.0 }
 0x967   : > { %7790 = vmatmul.mubr.bf16.gmra.mrb[220].mxu0 %v24802_v2  ;;  %v21509_v2 = vld [vmem:[%s28608_s5 + $0x4] ss:$12 sps:$4 sm:$0xff]  }
 0x968   : > { %v25130_v5 = vpack.c.bf16 %v7152_v43, %v7149_v38  ;;  %7797 = vmatprep.mubr.bf16.mxu0 %v24809_v56  ;;  %v21537_v43 = vld [vmem:[%s28608_s5 + $0xf0] ss:$12 sps:$4 sm:$0xff]  }
 0x969   : > { %v6900_v10 = vpop.f32.mrb[164].mxu1 }
 0x96a   : > { %28830 = vst [vmem:[#allocation60_spill] sm:$0xff] %v25130_v5  ;;  %v19234_v21 = vadd.f32 %v6900_v10, %v24860_v62  ;;  %v18714_v15 = vpop.f32.mrb[165].mxu1  ;;  %18723 = vmatpush3.bf16.msra.mxu0 %v25130_v5 }
 0x96b   : > { %v6903_v4 = vpop.f32.mrb[166].mxu1  ;;  %18724 = vmatprep.subr.bf16.mxu0 %v28765_v37  ;;  %v21540_v15 = vld [vmem:[%s28608_s5 + $0x108] ss:$12 sps:$4 sm:$0xff]  }
 0x96c   : > { %v19235_v45 = vadd.f32 %v6903_v4, %v24860_v62  ;;  %v18715_v11 = vpop.f32.mrb[167].mxu1  ;;  %v7155_v0 = vmax.f32 %v19234_v21, 0.0  ;;  %v21518_v62 = vld [vmem:[%s28608_s5 + $0x4c] ss:$12 sps:$4 sm:$0xff]  }
 0x96d   : > { %v21542_v21 = vld [vmem:[%s28608_s5 + $0x10c] ss:$12 sps:$4 sm:$0xff]  }
 0x96e   : > { %v7158_v34 = vmax.f32 %v19235_v45, 0.0 }
 0x96f   : > { %7798 = vmatmul.mubr.bf16.gmra.mrb[224].mxu0 %v24824_v59  ;;  %v21507_v59 = vld [vmem:[%s28608_s5] ss:$12 sps:$4 sm:$0xff]  }
 0x970   : > { %v25141_v56 = vpack.c.bf16 %v7158_v34, %v7155_v0  ;;  %7805 = vmatprep.mubr.bf16.mxu0 %v24831_v13  ;;  %v21512_v13 = vld [vmem:[%s28608_s5 + $0x1c] ss:$12 sps:$4 sm:$0xff]  }
 0x972   : > { %28831 = vst [vmem:[#allocation61_spill] sm:$0xff] %v25141_v56  ;;  %18725 = vmatpush3.bf16.msra.mxu0 %v25141_v56 }
 0x973   : > { %8467 = vmatprep.subr.bf16.mxu0 %v21509_v2  ;;  %v21543_v2 = vld [vmem:[%s28608_s5 + $0x120] ss:$12 sps:$4 sm:$0xff]  }
 0x977   : > { %7806 = vmatmul.mubr.bf16.gmra.mrb[228].mxu0 %v24847_v20  ;;  %v21515_v20 = vld [vmem:[%s28608_s5 + $0x34] ss:$12 sps:$4 sm:$0xff]  }
 0x978   : > { %7813 = vmatprep.mubr.bf16.mxu0 %v24854_v33  ;;  %v21513_v33 = vld [vmem:[%s28608_s5 + $0x30] ss:$12 sps:$4 sm:$0xff]  }
 0x97f   : > { %7814 = vmatmul.mubr.bf16.gmra.mrb[232].mxu0 %v24873_v12  ;;  %v21516_v12 = vld [vmem:[%s28608_s5 + $0x48] ss:$12 sps:$4 sm:$0xff]  }
 0x980   : > { %7821 = vmatprep.mubr.bf16.mxu0 %v24880_v61  ;;  %v21521_v61 = vld [vmem:[%s28608_s5 + $0x64] ss:$12 sps:$4 sm:$0xff]  }
 0x987   : > { %7822 = vmatmul.mubr.bf16.gmra.mrb[236].mxu0 %v24890_v9  ;;  %v21519_v9 = vld [vmem:[%s28608_s5 + $0x60] ss:$12 sps:$4 sm:$0xff]  }
 0x988   : > { %7829 = vmatprep.mubr.bf16.mxu0 %v24896_v63  ;;  %v21524_v63 = vld [vmem:[%s28608_s5 + $0x7c] ss:$12 sps:$4 sm:$0xff]  }
 0x98f   : > { %7830 = vmatmul.mubr.bf16.gmra.mrb[240].mxu0 %v24906_v55  ;;  %v21522_v55 = vld [vmem:[%s28608_s5 + $0x78] ss:$12 sps:$4 sm:$0xff]  }
 0x990   : > { %7837 = vmatprep.mubr.bf16.mxu0 %v24912_v57  ;;  %v21527_v57 = vld [vmem:[%s28608_s5 + $0x94] ss:$12 sps:$4 sm:$0xff]  }
 0x997   : > { %7838 = vmatmul.mubr.bf16.gmra.mrb[244].mxu0 %v24922_v18  ;;  %v21525_v18 = vld [vmem:[%s28608_s5 + $0x90] ss:$12 sps:$4 sm:$0xff]  }
 0x998   : > { %7845 = vmatprep.mubr.bf16.mxu0 %v24928_v29  ;;  %v21528_v29 = vld [vmem:[%s28608_s5 + $0xa8] ss:$12 sps:$4 sm:$0xff]  }
 0x99f   : > { %7846 = vmatmul.mubr.bf16.gmra.mrb[248].mxu0 %v24941_v1  ;;  %v21533_v1 = vld [vmem:[%s28608_s5 + $0xc4] ss:$12 sps:$4 sm:$0xff]  }
 0x9a0   : > { %7853 = vmatprep.mubr.bf16.mxu0 %v24944_v6  ;;  %v21531_v6 = vld [vmem:[%s28608_s5 + $0xc0] ss:$12 sps:$4 sm:$0xff]  }
 0x9a7   : > { %7854 = vmatmul.mubr.bf16.gmra.mrb[252].mxu0 %v24951_v30  ;;  %v21510_v30 = vld [vmem:[%s28608_s5 + $0x18] ss:$12 sps:$4 sm:$0xff]  }
 0x9a8   : > { %18726 = vmatprep.mubr.msk.bf16.mxu0 %vm22046_vm3, %v28765_v37 }
 0x9af   : > { %18727 = vmatmul.mubr.msk.bf16.vlgmr.msra.gmra.mrb[0].mxu0 %vm7425_vm4, %v24962_v40  ;;  %v21536_v40 = vld [vmem:[%s28608_s5 + $0xdc] ss:$12 sps:$4 sm:$0xff]  }
 0x9b0   : > { %18730 = vmatprep.mubr.msk.bf16.mxu0 %vm22046_vm3, %v28765_v37  ;;  %8468 = vmatpush1.bf16.msra.mxu0 %v21507_v59 }
 0x9b1   : > { %8469 = vmatprep.subr.bf16.mxu0 %v21512_v13  ;;  %v21548_v13 = vld [vmem:[%s28608_s5 + $0x13c] ss:$12 sps:$4 sm:$0xff]  }
 0x9b4   : > { %8470 = vmatpush1.bf16.msra.mxu0 %v21510_v30  ;;  %v21546_v30 = vld [vmem:[%s28608_s5 + $0x138] ss:$12 sps:$4 sm:$0xff]  }
 0x9b5   : > { %8471 = vmatprep.subr.bf16.mxu0 %v21515_v20 }
 0x9b7   : > { %18731 = vmatmul.mubr.msk.bf16.gmra.mrb[4].mxu0 %vm7425_vm4, %v24974_v53  ;;  %v21534_v53 = vld [vmem:[%s28608_s5 + $0xd8] ss:$12 sps:$4 sm:$0xff]  }
 0x9b8   : > { %18734 = vmatprep.mubr.msk.bf16.mxu0 %vm22046_vm3, %v28765_v37  ;;  %8472 = vmatpush1.bf16.msra.mxu0 %v21513_v33 }
 0x9b9   : > { %8473 = vmatprep.subr.bf16.mxu0 %v21518_v62 }
 0x9bc   : > { %8474 = vmatpush1.bf16.msra.mxu0 %v21516_v12 }
 0x9bd   : > { %8475 = vmatprep.subr.bf16.mxu0 %v21521_v61 }
 0x9bf   : > { %18735 = vmatmul.mubr.msk.bf16.gmra.mrb[8].mxu0 %vm7425_vm4, %v24986_v36  ;;  %v21530_v36 = vld [vmem:[%s28608_s5 + $0xac] ss:$12 sps:$4 sm:$0xff]  }
 0x9c0   : > { %18738 = vmatprep.mubr.msk.bf16.mxu0 %vm22046_vm3, %v28765_v37  ;;  %8476 = vmatpush1.bf16.msra.mxu0 %v21519_v9  ;;  %v21549_v9 = vld [vmem:[%s28608_s5 + $0x150] ss:$12 sps:$4 sm:$0xff]  }
 0x9c1   : > { %8477 = vmatprep.subr.bf16.mxu0 %v21524_v63 }
 0x9c4   : > { %8478 = vmatpush1.bf16.msra.mxu0 %v21522_v55  ;;  %v21554_v55 = vld [vmem:[%s28608_s5 + $0x16c] ss:$12 sps:$4 sm:$0xff]  }
 0x9c5   : > { %8479 = vmatprep.subr.bf16.mxu0 %v21527_v57  ;;  %v21552_v57 = vld [vmem:[%s28608_s5 + $0x168] ss:$12 sps:$4 sm:$0xff]  }
 0x9c7   : > { %18739 = vmatmul.mubr.msk.bf16.gmra.mrb[12].mxu0 %vm7425_vm4, %v25000_v41  ;;  %v21539_v41 = vld [vmem:[%s28608_s5 + $0xf4] ss:$12 sps:$4 sm:$0xff]  }
 0x9c8   : > { %18742 = vmatprep.mubr.msk.bf16.mxu0 %vm22046_vm3, %v28765_v37  ;;  %8480 = vmatpush1.bf16.msra.mxu0 %v21525_v18 }
 0x9c9   : > { %8481 = vmatprep.subr.bf16.mxu0 %v21530_v36 }
 0x9cc   : > { %8482 = vmatpush1.bf16.msra.mxu0 %v21528_v29 }
 0x9cd   : > { %8483 = vmatprep.subr.bf16.mxu0 %v21533_v1 }
 0x9cf   : > { %18743 = vmatmul.mubr.msk.bf16.gmra.mrb[16].mxu0 %vm7425_vm4, %v25014_v49 }
 0x9d0   : > { %18746 = vmatprep.mubr.msk.bf16.mxu0 %vm22046_vm3, %v28765_v37  ;;  %8484 = vmatpush1.bf16.msra.mxu0 %v21531_v6 }
 0x9d1   : > { %8485 = vmatprep.subr.bf16.mxu0 %v21536_v40 }
 0x9d2   : > { %v7634_v7 = vpop.f32.mrb[168].mxu0 }
 0x9d3   : > { %v7636_v60 = vpop.f32.mrb[169].mxu0 }
 0x9d4   : > { %v7638_v16 = vpop.f32.mrb[170].mxu0  ;;  %8486 = vmatpush1.bf16.msra.mxu0 %v21534_v53 }
 0x9d5   : > { %v25240_v38 = vpack.c.bf16 %v7638_v16, %v7634_v7  ;;  %v7640_v49 = vpop.f32.mrb[171].mxu0  ;;  %8487 = vmatprep.subr.bf16.mxu0 %v21539_v41 }
 0x9d6   : > { %v25245_v10 = vpack.c.bf16 %v7640_v49, %v7636_v60 }
 0x9d7   : > { %18747 = vmatmul.mubr.msk.bf16.gmra.mrb[20].mxu0 %vm7425_vm4, %v25028_v26  ;;  %v21545_v26 = vld [vmem:[%s28608_s5 + $0x124] ss:$12 sps:$4 sm:$0xff]  }
 0x9d8   : > { %8781 = vmatprep.mubr.bf16.mxu1 %v25245_v10  ;;  %18750 = vmatprep.mubr.msk.bf16.mxu0 %vm22046_vm3, %v28765_v37 }
 0x9d9   : > { %8782 = vmatmul.mubr.bf16.vlgmr.msra.gmra.mrb[252].mxu1 %v25240_v38  ;;  %8488 = vmatpush1.bf16.msra.mxu0 %v21537_v43 }
 0x9da   : > { %9305 = vmatpush1.bf16.msra.mxu1 %v24543_v31  ;;  %v7644_v4 = vpop.f32.mrb[172].mxu0  ;;  %8489 = vmatprep.subr.bf16.mxu0 %v21542_v21 }
 0x9db   : > { %9306 = vmatprep.subr.bf16.mxu1 %v24560_v58  ;;  %v7646_v45 = vpop.f32.mrb[173].mxu0 }
 0x9dc   : > { %v7648_v11 = vpop.f32.mrb[174].mxu0 }
 0x9dd   : > { %v25264_v0 = vpack.c.bf16 %v7648_v11, %v7644_v4  ;;  %v7650_v34 = vpop.f32.mrb[175].mxu0  ;;  %8490 = vmatpush1.bf16.msra.mxu0 %v21540_v15  ;;  %v28834_v11 = vld [vmem:[#allocation56_spill] sm:$0xff] }
 0x9de   : > { %v25269_v59 = vpack.c.bf16 %v7650_v34, %v7646_v45  ;;  %9307 = vmatpush1.bf16.msra.mxu1 %v24558_v28  ;;  %8491 = vmatprep.subr.bf16.mxu0 %v21545_v26  ;;  %v28833_v45 = vld [vmem:[#allocation19_spill] sm:$0xff]  ;;  %v28835_v34 = vld [vmem:[#allocation18_spill] sm:$0xff] }
 0x9df   : > { %9308 = vmatprep.subr.bf16.mxu1 %v24574_v52  ;;  %18751 = vmatmul.mubr.msk.bf16.gmra.mrb[24].mxu0 %vm7425_vm4, %v25042_v19  ;;  %v21551_v19 = vld [vmem:[%s28608_s5 + $0x154] ss:$12 sps:$4 sm:$0xff]  }
 0x9e0   : > { %8789 = vmatprep.mubr.bf16.mxu1 %v25269_v59  ;;  %18754 = vmatprep.mubr.msk.bf16.mxu0 %vm22046_vm3, %v28765_v37 }
 0x9e1   : > { %8790 = vmatmul.mubr.bf16.gmra.mrb[168].mxu1 %v25264_v0  ;;  %8492 = vmatpush1.bf16.msra.mxu0 %v21543_v2 }
 0x9e2   : > { %9309 = vmatpush1.bf16.msra.mxu1 %v24572_v48  ;;  %v7654_v20 = vpop.f32.mrb[176].mxu0  ;;  %8493 = vmatprep.subr.bf16.mxu0 %v21548_v13  ;;  %v28836_v13 = vld [vmem:[#allocation21_spill] sm:$0xff] }
 0x9e3   : > { %9310 = vmatprep.subr.bf16.mxu1 %v24588_v23  ;;  %v7656_v33 = vpop.f32.mrb[177].mxu0 }
 0x9e4   : > { %v7658_v62 = vpop.f32.mrb[178].mxu0 }
 0x9e5   : > { %v25290_v12 = vpack.c.bf16 %v7658_v62, %v7654_v20  ;;  %v7660_v61 = vpop.f32.mrb[179].mxu0  ;;  %8494 = vmatpush1.bf16.msra.mxu0 %v21546_v30  ;;  %v21573_v62 = vld [vmem:[%s28608_s5 + $0x180] ss:$12 sps:$4 sm:$0xff]  }
 0x9e6   : > { %v25295_v63 = vpack.c.bf16 %v7660_v61, %v7656_v33  ;;  %9311 = vmatpush1.bf16.msra.mxu1 %v24586_v24  ;;  %8495 = vmatprep.subr.bf16.mxu0 %v21551_v19 }
 0x9e7   : > { %9312 = vmatprep.subr.bf16.mxu1 %v24602_v27  ;;  %18755 = vmatmul.mubr.msk.bf16.gmra.mrb[28].mxu0 %vm7425_vm4, %v25056_v54  ;;  %v21575_v54 = vld [vmem:[%s28608_s5 + $0x184] ss:$12 sps:$4 sm:$0xff]  }
 0x9e8   : > { %8797 = vmatprep.mubr.bf16.mxu1 %v25295_v63  ;;  %18758 = vmatprep.mubr.msk.bf16.mxu0 %vm22046_vm3, %v28765_v37 }
 0x9e9   : > { %8798 = vmatmul.mubr.bf16.gmra.mrb[172].mxu1 %v25290_v12  ;;  %8496 = vmatpush1.bf16.msra.mxu0 %v21549_v9  ;;  %v21584_v9 = vld [vmem:[%s28608_s5 + $0x19c] ss:$12 sps:$4 sm:$0xff]  }
 0x9ea   : > { %9313 = vmatpush1.bf16.msra.mxu1 %v24600_v14  ;;  %v7664_v18 = vpop.f32.mrb[180].mxu0  ;;  %8497 = vmatprep.subr.bf16.mxu0 %v21554_v55  ;;  %v28838_v55 = vld [vmem:[#allocation23_spill] sm:$0xff] }
 0x9eb   : > { %9314 = vmatprep.subr.bf16.mxu1 %v24616_v3  ;;  %v7666_v36 = vpop.f32.mrb[181].mxu0 }
 0x9ec   : > { %v7668_v29 = vpop.f32.mrb[182].mxu0 }
 0x9ed   : > { %v25316_v1 = vpack.c.bf16 %v7668_v29, %v7664_v18  ;;  %v7670_v6 = vpop.f32.mrb[183].mxu0  ;;  %8498 = vmatpush1.bf16.msra.mxu0 %v21552_v57  ;;  %v21582_v57 = vld [vmem:[%s28608_s5 + $0x198] ss:$12 sps:$4 sm:$0xff]  }
 0x9ee   : > { %v25318_v40 = vpack.c.bf16 %v7670_v6, %v7666_v36  ;;  %9315 = vmatpush1.bf16.msra.mxu1 %v24614_v46  ;;  %8608 = vmatprep.subr.bf16.mxu0 %v21575_v54  ;;  %v28839_v18 = vld [vmem:[#allocation22_spill] sm:$0xff]  ;;  %v21593_v36 = vld [vmem:[%s28608_s5 + $0x1b4] ss:$12 sps:$4 sm:$0xff]  }
 0x9ef   : > { %9316 = vmatprep.subr.bf16.mxu1 %v24630_v25  ;;  %18759 = vmatmul.mubr.msk.bf16.gmra.mrb[32].mxu0 %vm7425_vm4, %v25070_v39 }
 0x9f0   : > { %8805 = vmatprep.mubr.bf16.mxu1 %v25318_v40  ;;  %18762 = vmatprep.mubr.msk.bf16.mxu0 %vm22046_vm3, %v28765_v37 }
 0x9f1   : > { %8806 = vmatmul.mubr.bf16.gmra.mrb[176].mxu1 %v25316_v1 }
 0x9f2   : > { %9317 = vmatpush1.bf16.msra.mxu1 %v24628_v50  ;;  %v7674_v53 = vpop.f32.mrb[184].mxu0  ;;  %v25617_v50 = vld [vmem:[%s28607_s4 + $0x1d4] ss:$12 sps:$4 sm:$0xff]  }
 0x9f3   : > { %9318 = vmatprep.subr.bf16.mxu1 %v24644_v51  ;;  %v7676_v41 = vpop.f32.mrb[185].mxu0  ;;  %28861 = vst [vmem:[#allocation65_spill] sm:$0xff] %v25617_v50 }
 0x9f4   : > { %v7678_v7 = vpop.f32.mrb[186].mxu0 }
 0x9f5   : > { %v25330_v60 = vpack.c.bf16 %v7678_v7, %v7674_v53  ;;  %v7680_v16 = vpop.f32.mrb[187].mxu0 }
 0x9f6   : > { %v25332_v49 = vpack.c.bf16 %v7680_v16, %v7676_v41  ;;  %9319 = vmatpush1.bf16.msra.mxu1 %v24642_v42  ;;  %v21591_v41 = vld [vmem:[%s28608_s5 + $0x1b0] ss:$12 sps:$4 sm:$0xff]   ;;  %v28841_v16 = vld [vmem:[#allocation24_spill] sm:$0xff] }
 0x9f7   : > { %9320 = vmatprep.subr.bf16.mxu1 %v24658_v17  ;;  %18763 = vmatmul.mubr.msk.bf16.gmra.mrb[36].mxu0 %vm7425_vm4, %v25084_v22  ;;  %v28832_v22 = vld [vmem:[#allocation16_spill] sm:$0xff] }
 0x9f8   : > { %8813 = vmatprep.mubr.bf16.mxu1 %v25332_v49  ;;  %18766 = vmatprep.mubr.msk.bf16.mxu0 %vm22046_vm3, %v28765_v37 }
 0x9f9   : > { %8814 = vmatmul.mubr.bf16.gmra.mrb[180].mxu1 %v25330_v60 }
 0x9fa   : > { %9321 = vmatpush1.bf16.msra.mxu1 %v24656_v44  ;;  %v7684_v39 = vpop.f32.mrb[188].mxu0 }
 0x9fb   : > { %9322 = vmatprep.subr.bf16.mxu1 %v24672_v35  ;;  %v7686_v43 = vpop.f32.mrb[189].mxu0  ;;  %v25598_v35 = vld [vmem:[%s28607_s4 + $0x1bc] ss:$12 sps:$4 sm:$0xff]  }
 0x9fc   : > { %v7688_v21 = vpop.f32.mrb[190].mxu0  ;;  %28859 = vst [vmem:[#allocation63_spill] sm:$0xff] %v25598_v35 }
 0x9fd   : > { %v25344_v15 = vpack.c.bf16 %v7688_v21, %v7684_v39  ;;  %v7690_v4 = vpop.f32.mrb[191].mxu0  ;;  %v21596_v39 = vld [vmem:[%s28608_s5 + $0x1cc] ss:$12 sps:$4 sm:$0xff]   ;;  %v21594_v21 = vld [vmem:[%s28608_s5 + $0x1c8] ss:$12 sps:$4 sm:$0xff]  }
 0x9fe   : > { %v25346_v26 = vpack.c.bf16 %v7690_v4, %v7686_v43  ;;  %9323 = vmatpush1.bf16.msra.mxu1 %v28832_v22  ;;  %v28842_v43 = vld [vmem:[#allocation27_spill] sm:$0xff]  ;;  %v28843_v4 = vld [vmem:[#allocation26_spill] sm:$0xff] }
 0x9ff   : > { %9324 = vmatprep.subr.bf16.mxu1 %v28833_v45  ;;  %18767 = vmatmul.mubr.msk.bf16.gmra.mrb[40].mxu0 %vm7425_vm4, %v28834_v11 }
 0xa00   : > { %8499 = vmatprep.mubr.bf16.mxu0 %v25245_v10  ;;  %8821 = vmatprep.mubr.bf16.mxu1 %v25346_v26  ;;  %v28837_v10 = vld [vmem:[#allocation20_spill] sm:$0xff] }
 0xa01   : > { %8822 = vmatmul.mubr.bf16.gmra.mrb[184].mxu1 %v25344_v15 }
 0xa02   : > { %9325 = vmatpush1.bf16.msra.mxu1 %v28835_v34  ;;  %v7694_v2 = vpop.f32.mrb[192].mxu0 }
 0xa03   : > { %9326 = vmatprep.subr.bf16.mxu1 %v28836_v13  ;;  %v7696_v30 = vpop.f32.mrb[193].mxu0  ;;  %v25582_v13 = vld [vmem:[%s28607_s4 + $0x1a4] ss:$12 sps:$4 sm:$0xff]  }
 0xa04   : > { %v7698_v20 = vpop.f32.mrb[194].mxu0  ;;  %28857 = vst [vmem:[#allocation56_spill] sm:$0xff] %v25582_v13 }
 0xa05   : > { %v25357_v19 = vpack.c.bf16 %v7698_v20, %v7694_v2  ;;  %v7700_v33 = vpop.f32.mrb[195].mxu0  ;;  %v21601_v2 = vld [vmem:[%s28608_s5 + $0x1e4] ss:$12 sps:$4 sm:$0xff]  }
 0xa06   : > { %v25362_v61 = vpack.c.bf16 %v7700_v33, %v7696_v30  ;;  %9327 = vmatpush1.bf16.msra.mxu1 %v28837_v10 }
 0xa07   : > { %9328 = vmatprep.subr.bf16.mxu1 %v28838_v55  ;;  %8500 = vmatmul.mubr.bf16.vlgmr.msra.gmra.mrb[44].mxu0 %v25240_v38  ;;  %v28840_v38 = vld [vmem:[#allocation25_spill] sm:$0xff] }
 0xa08   : > { %8509 = vmatprep.mubr.bf16.mxu0 %v25269_v59  ;;  %8829 = vmatprep.mubr.bf16.mxu1 %v25362_v61 }
 0xa09   : > { %8830 = vmatmul.mubr.bf16.gmra.mrb[188].mxu1 %v25357_v19  ;;  %8609 = vmatpush1.bf16.msra.mxu0 %v21573_v62  ;;  %v21599_v62 = vld [vmem:[%s28608_s5 + $0x1e0] ss:$12 sps:$4 sm:$0xff]  }
 0xa0a   : > { %9329 = vmatpush1.bf16.msra.mxu1 %v28839_v18  ;;  %v7704_v54 = vpop.f32.mrb[196].mxu0  ;;  %8610 = vmatprep.subr.bf16.mxu0 %v21584_v9  ;;  %v25566_v18 = vld [vmem:[%s28607_s4 + $0x18c] ss:$12 sps:$4 sm:$0xff]  }
 0xa0b   : > { %9330 = vmatprep.subr.bf16.mxu1 %v28840_v38  ;;  %v7706_v59 = vpop.f32.mrb[197].mxu0 }
 0xa0c   : > { %v7708_v29 = vpop.f32.mrb[198].mxu0 }
 0xa0d   : > { %v25381_v6 = vpack.c.bf16 %v7708_v29, %v7704_v54  ;;  %v7710_v53 = vpop.f32.mrb[199].mxu0  ;;  %8611 = vmatpush1.bf16.msra.mxu0 %v21582_v57  ;;  %v28845_v57 = vld [vmem:[#allocation28_spill] sm:$0xff]  ;;  %v28846_v54 = vld [vmem:[#allocation31_spill] sm:$0xff] }
 0xa0e   : > { %v25386_v7 = vpack.c.bf16 %v7710_v53, %v7706_v59  ;;  %9331 = vmatpush1.bf16.msra.mxu1 %v28841_v16  ;;  %8612 = vmatprep.subr.bf16.mxu0 %v21593_v36 }
 0xa0f   : > { %9332 = vmatprep.subr.bf16.mxu1 %v28842_v43  ;;  %8510 = vmatmul.mubr.bf16.gmra.mrb[48].mxu0 %v25264_v0  ;;  %v28844_v0 = vld [vmem:[#allocation29_spill] sm:$0xff] }
 0xa10   : > { %8519 = vmatprep.mubr.bf16.mxu0 %v25295_v63  ;;  %8837 = vmatprep.mubr.bf16.mxu1 %v25386_v7  ;;  %v25548_v43 = vld [vmem:[%s28607_s4 + $0x174] ss:$12 sps:$4 sm:$0xff]  }
 0xa11   : > { %8838 = vmatmul.mubr.bf16.gmra.mrb[192].mxu1 %v25381_v6  ;;  %8613 = vmatpush1.bf16.msra.mxu0 %v21591_v41 }
 0xa12   : > { %9333 = vmatpush1.bf16.msra.mxu1 %v28843_v4  ;;  %v7714_v11 = vpop.f32.mrb[200].mxu0  ;;  %8614 = vmatprep.subr.bf16.mxu0 %v21596_v39 }
 0xa13   : > { %9334 = vmatprep.subr.bf16.mxu1 %v28844_v0  ;;  %v7716_v63 = vpop.f32.mrb[201].mxu0  ;;  %v25530_v0 = vld [vmem:[%s28607_s4 + $0x15c] ss:$12 sps:$4 sm:$0xff]  }
 0xa14   : > { %v7718_v30 = vpop.f32.mrb[202].mxu0 }
 0xa15   : > { %v25405_v20 = vpack.c.bf16 %v7718_v30, %v7714_v11  ;;  %v7720_v33 = vpop.f32.mrb[203].mxu0  ;;  %8615 = vmatpush1.bf16.msra.mxu0 %v21594_v21 }
 0xa16   : > { %v25410_v9 = vpack.c.bf16 %v7720_v33, %v7716_v63  ;;  %9335 = vmatpush1.bf16.msra.mxu1 %v28845_v57  ;;  %8616 = vmatprep.subr.bf16.mxu0 %v21601_v2  ;;  %v25433_v63 = vld [vmem:[%s28607_s4 + $0x100] ss:$12 sps:$4 sm:$0xff]  }
 0xa17   : > { %9445 = vmatprep.subr.bf16.mxu1 %v28846_v54  ;;  %8520 = vmatmul.mubr.bf16.gmra.mrb[52].mxu0 %v25290_v12 }
 0xa18   : > { %8529 = vmatprep.mubr.bf16.mxu0 %v25318_v40  ;;  %8845 = vmatprep.mubr.bf16.mxu1 %v25410_v9 }
 0xa19   : > { %8846 = vmatmul.mubr.bf16.gmra.mrb[196].mxu1 %v25405_v20  ;;  %8617 = vmatpush1.bf16.msra.mxu0 %v21599_v62 }
 0xa1a   : > { %v7724_v36 = vpop.f32.mrb[204].mxu0  ;;  %18770 = vmatprep.subr.bf16.mxu0 %v28765_v37 }
 0xa1b   : > { %v7726_v59 = vpop.f32.mrb[205].mxu0 }
 0xa1c   : > { %v7728_v29 = vpop.f32.mrb[206].mxu0 }
 0xa1d   : > { %v25419_v53 = vpack.c.bf16 %v7728_v29, %v7724_v36  ;;  %v7730_v41 = vpop.f32.mrb[207].mxu0  ;;  %v25446_v36 = vld [vmem:[%s28607_s4 + $0xfc] ss:$12 sps:$4 sm:$0xff]  }
 0xa1e   : > { %v25421_v39 = vpack.c.bf16 %v7730_v41, %v7726_v59  ;;  %v28847_v29 = vld [vmem:[#allocation30_spill] sm:$0xff] }
 0xa1f   : > { %8530 = vmatmul.mubr.bf16.gmra.mrb[56].mxu0 %v25316_v1 }
 0xa20   : > { %8539 = vmatprep.mubr.bf16.mxu0 %v25332_v49  ;;  %8853 = vmatprep.mubr.bf16.mxu1 %v25421_v39 }
 0xa21   : > { %8854 = vmatmul.mubr.bf16.gmra.mrb[200].mxu1 %v25419_v53 }
 0xa22   : > { %v7734_v12 = vpop.f32.mrb[208].mxu0 }
 0xa23   : > { %v7736_v40 = vpop.f32.mrb[209].mxu0  ;;  %v25435_v1 = vpack.c.bf16 %v7734_v12, %v7734_v12  ;;  %v28848_v12 = vld [vmem:[#allocation33_spill] sm:$0xff] }
 0xa24   : > { %v25427_v21 = vpack.c.bf16 %v7736_v40, %v7736_v40  ;;  %v7738_v11 = vpop.f32.mrb[210].mxu0 }
 0xa25   : > { %v7739_v2 = vpop.f32.mrb[211].mxu0 }
 0xa26   : > { %8861 = vmatprep.mubr.bf16.mxu1 %v25427_v21 }
 0xa27   : > { %8540 = vmatmul.mubr.bf16.gmra.mrb[60].mxu0 %v25330_v60  ;;  %v25451_v60 = vld [vmem:[%s28607_s4 + $0x118] ss:$12 sps:$4 sm:$0xff]  }
 0xa28   : > { %8549 = vmatprep.mubr.bf16.mxu0 %v25346_v26 }
 0xa29   : > { %8862 = vmatmul.mubr.bf16.gmra.mrb[204].mxu1 %v25435_v1 }
 0xa2a   : > { %9336 = vmatprep.mubr.bf16.mxu1 %v25433_v63  ;;  %v17674_v49 = vpop.f32.mrb[212].mxu0 }
 0xa2b   : > { %v17675_v30 = vpop.f32.mrb[213].mxu0 }
 0xa2c   : > { %v25441_v33 = vadd.f32 %v17675_v30, %v17674_v49  ;;  %v17677_v62 = vpop.f32.mrb[214].mxu0  ;;  %v25466_v49 = vld [vmem:[%s28607_s4 + $0x114] ss:$12 sps:$4 sm:$0xff]   ;;  %v25472_v30 = vld [vmem:[%s28607_s4 + $0x130] ss:$12 sps:$4 sm:$0xff]  }
 0xa2d   : > { %v17678_v59 = vpop.f32.mrb[215].mxu0 }
 0xa2e   : > { %v25453_v26 = vadd.f32 %v17678_v59, %v17677_v62  ;;  %v28850_v59 = vld [vmem:[#allocation35_spill] sm:$0xff] }
 0xa2f   : > { %8550 = vmatmul.mubr.bf16.gmra.mrb[64].mxu0 %v25344_v15 }
 0xa30   : > { %8559 = vmatprep.mubr.bf16.mxu0 %v25362_v61  ;;  %v28849_v61 = vld [vmem:[#allocation32_spill] sm:$0xff] }
 0xa31   : > { %9337 = vmatmul.mubr.bf16.vlgmr.msra.gmra.mrb[208].mxu1 %v25446_v36 }
 0xa32   : > { %9446 = vmatpush1.bf16.msra.mxu1 %v28847_v29  ;;  %9346 = vmatprep.mubr.bf16.mxu1 %v25451_v60  ;;  %v17680_v41 = vpop.f32.mrb[216].mxu0 }
 0xa33   : > { %9447 = vmatprep.subr.bf16.mxu1 %v28848_v12  ;;  %v17681_v40 = vpop.f32.mrb[217].mxu0 }
 0xa34   : > { %v25461_v11 = vadd.f32 %v17681_v40, %v17680_v41  ;;  %v17683_v2 = vpop.f32.mrb[218].mxu0  ;;  %v28851_v41 = vld [vmem:[#allocation34_spill] sm:$0xff] }
 0xa35   : > { %v17684_v15 = vpop.f32.mrb[219].mxu0 }
 0xa36   : > { %9448 = vmatpush1.bf16.msra.mxu1 %v28849_v61  ;;  %v25474_v62 = vadd.f32 %v17684_v15, %v17683_v2  ;;  %v28852_v61 = vld [vmem:[#allocation37_spill] sm:$0xff]  ;;  %v25488_v15 = vld [vmem:[%s28607_s4 + $0x12c] ss:$12 sps:$4 sm:$0xff]  }
 0xa37   : > { %9449 = vmatprep.subr.bf16.mxu1 %v28850_v59  ;;  %8560 = vmatmul.mubr.bf16.gmra.mrb[68].mxu0 %v25357_v19 }
 0xa38   : > { %8569 = vmatprep.mubr.bf16.mxu0 %v25386_v7  ;;  %v28853_v7 = vld [vmem:[#allocation36_spill] sm:$0xff] }
 0xa39   : > { %9347 = vmatmul.mubr.bf16.gmra.mrb[212].mxu1 %v25466_v49 }
 0xa3a   : > { %9450 = vmatpush1.bf16.msra.mxu1 %v28851_v41  ;;  %9356 = vmatprep.mubr.bf16.mxu1 %v25472_v30  ;;  %v17686_v40 = vpop.f32.mrb[220].mxu0  ;;  %v25494_v41 = vld [vmem:[%s28607_s4 + $0x148] ss:$12 sps:$4 sm:$0xff]  }
 0xa3b   : > { %9451 = vmatprep.subr.bf16.mxu1 %v28852_v61  ;;  %v17687_v12 = vpop.f32.mrb[221].mxu0  ;;  %v28854_v61 = vld [vmem:[#allocation39_spill] sm:$0xff] }
 0xa3c   : > { %v25483_v29 = vadd.f32 %v17687_v12, %v17686_v40  ;;  %v17689_v2 = vpop.f32.mrb[222].mxu0  ;;  %v21602_v12 = vld [vmem:[%s28608_s5 + $0x2c0] ss:$12 sps:$4 sm:$0xff]   ;;  %v28855_v40 = vld [vmem:[#allocation38_spill] sm:$0xff] }
 0xa3d   : > { %v17690_v19 = vpop.f32.mrb[223].mxu0 }
 0xa3e   : > { %9452 = vmatpush1.bf16.msra.mxu1 %v28853_v7  ;;  %v25496_v59 = vadd.f32 %v17690_v19, %v17689_v2 }
 0xa3f   : > { %9453 = vmatprep.subr.bf16.mxu1 %v28854_v61  ;;  %8570 = vmatmul.mubr.bf16.gmra.mrb[72].mxu0 %v25381_v6  ;;  %v25512_v6 = vld [vmem:[%s28607_s4 + $0x144] ss:$12 sps:$4 sm:$0xff]  }
 0xa40   : > { %8579 = vmatprep.mubr.bf16.mxu0 %v25410_v9  ;;  %v25517_v9 = vld [vmem:[%s28607_s4 + $0x160] ss:$12 sps:$4 sm:$0xff]  }
 0xa41   : > { %9357 = vmatmul.mubr.bf16.gmra.mrb[216].mxu1 %v25488_v15 }
 0xa42   : > { %9454 = vmatpush1.bf16.msra.mxu1 %v28855_v40  ;;  %9366 = vmatprep.mubr.bf16.mxu1 %v25494_v41  ;;  %v17692_v7 = vpop.f32.mrb[224].mxu0 }
 0xa43   : > { %v17693_v54 = vpop.f32.mrb[225].mxu0  ;;  %17952 = vmatprep.subr.bf16.mxu1 %v21602_v12 }
 0xa44   : > { %v25507_v2 = vadd.f32 %v17693_v54, %v17692_v7  ;;  %v17695_v19 = vpop.f32.mrb[226].mxu0 }
 0xa45   : > { %v17696_v61 = vpop.f32.mrb[227].mxu0 }
 0xa46   : > { %v25519_v40 = vadd.f32 %v17696_v61, %v17695_v19 }
 0xa47   : > { %8580 = vmatmul.mubr.bf16.gmra.mrb[76].mxu0 %v25405_v20  ;;  %v25535_v20 = vld [vmem:[%s28607_s4 + $0x178] ss:$12 sps:$4 sm:$0xff]  }
 0xa48   : > { %8589 = vmatprep.mubr.bf16.mxu0 %v25421_v39 }
 0xa49   : > { %9367 = vmatmul.mubr.bf16.gmra.mrb[220].mxu1 %v25512_v6 }
 0xa4a   : > { %9376 = vmatprep.mubr.bf16.mxu1 %v25517_v9  ;;  %v17698_v54 = vpop.f32.mrb[228].mxu0 }
 0xa4b   : > { %v17699_v7 = vpop.f32.mrb[229].mxu0 }
 0xa4c   : > { %v25525_v12 = vadd.f32 %v17699_v7, %v17698_v54  ;;  %v17701_v57 = vpop.f32.mrb[230].mxu0 }
 0xa4d   : > { %v17702_v61 = vpop.f32.mrb[231].mxu0 }
 0xa4e   : > { %v25537_v39 = vadd.f32 %v17702_v61, %v17701_v57  ;;  %v28856_v61 = vmov 0  }
 0xa4f   : > { %8590 = vmatmul.mubr.bf16.gmra.mrb[80].mxu0 %v25419_v53  ;;  %v25553_v53 = vld [vmem:[%s28607_s4 + $0x190] ss:$12 sps:$4 sm:$0xff]  }
 0xa50   : > { %8599 = vmatprep.mubr.bf16.mxu0 %v25427_v21 }
 0xa51   : > { %9377 = vmatmul.mubr.bf16.gmra.mrb[224].mxu1 %v25530_v0 }
 0xa52   : > { %9386 = vmatprep.mubr.bf16.mxu1 %v25535_v20  ;;  %v17704_v19 = vpop.f32.mrb[232].mxu0 }
 0xa53   : > { %v17705_v54 = vpop.f32.mrb[233].mxu0 }
 0xa54   : > { %v17707_v7 = vpop.f32.mrb[234].mxu0  ;;  %v25543_v4 = vadd.f32 %v17705_v54, %v17704_v19 }
 0xa55   : > { %v17708_v57 = vpop.f32.mrb[235].mxu0 }
 0xa56   : > { %v25555_v21 = vadd.f32 %v17708_v57, %v17707_v7 }
 0xa57   : > { %8600 = vmatmul.mubr.bf16.gmra.mrb[84].mxu0 %v25435_v1  ;;  %v25571_v1 = vld [vmem:[%s28607_s4 + $0x1a8] ss:$12 sps:$4 sm:$0xff]  }
 0xa58   : > { %8640 = vmatprep.mubr.bf16.mxu0 %v28856_v61 }
 0xa59   : > { %9387 = vmatmul.mubr.bf16.gmra.mrb[228].mxu1 %v25548_v43 }
 0xa5a   : > { %9396 = vmatprep.mubr.bf16.mxu1 %v25553_v53  ;;  %v17710_v19 = vpop.f32.mrb[236].mxu0 }
 0xa5b   : > { %v17711_v54 = vpop.f32.mrb[237].mxu0 }
 0xa5c   : > { %v17713_v16 = vpop.f32.mrb[238].mxu0  ;;  %v25561_v38 = vadd.f32 %v17711_v54, %v17710_v19 }
 0xa5d   : > { %v17714_v7 = vpop.f32.mrb[239].mxu0 }
 0xa5e   : > { %v25573_v57 = vadd.f32 %v17714_v7, %v17713_v16  ;;  %v25587_v16 = vld [vmem:[%s28607_s4 + $0x1c0] ss:$12 sps:$4 sm:$0xff]  }
 0xa5f   : > { %28858 = vst [vmem:[#allocation62_spill] sm:$0xff] %v25587_v16 }
 0xa61   : > { %9397 = vmatmul.mubr.bf16.gmra.mrb[232].mxu1 %v25566_v18 }
 0xa62   : > { %9406 = vmatprep.mubr.bf16.mxu1 %v25571_v1  ;;  %v17716_v55 = vpop.f32.mrb[240].mxu0 }
 0xa63   : > { %v17717_v19 = vpop.f32.mrb[241].mxu0 }
 0xa64   : > { %v17719_v54 = vpop.f32.mrb[242].mxu0  ;;  %v25577_v10 = vadd.f32 %v17717_v19, %v17716_v55 }
 0xa65   : > { %v17720_v34 = vpop.f32.mrb[243].mxu0 }
 0xa66   : > { %v25589_v7 = vadd.f32 %v17720_v34, %v17719_v54  ;;  %v25603_v34 = vld [vmem:[%s28607_s4 + $0x1d8] ss:$12 sps:$4 sm:$0xff]  }
 0xa67   : > { %28860 = vst [vmem:[#allocation64_spill] sm:$0xff] %v25603_v34 }
 0xa69   : > { %9407 = vmatmul.mubr.bf16.gmra.mrb[236].mxu1 %v25582_v13 }
 0xa6a   : > { %9416 = vmatprep.mubr.bf16.mxu1 %v25587_v16  ;;  %v17722_v45 = vpop.f32.mrb[244].mxu0 }
 0xa6b   : > { %v17723_v55 = vpop.f32.mrb[245].mxu0 }
 0xa6c   : > { %v17725_v19 = vpop.f32.mrb[246].mxu0  ;;  %v25593_v22 = vadd.f32 %v17723_v55, %v17722_v45  ;;  %v16695_v55 = vld [vmem:[%s28607_s4 + $0x1ec] sm:$0xff] }
 0xa6d   : > { %v17726_v44 = vpop.f32.mrb[247].mxu0 }
 0xa6e   : > { %v25605_v54 = vadd.f32 %v17726_v44, %v17725_v19  ;;  %v25619_v19 = vcombine.high %v16695_v55, %v16695_v55 }
 0xa71   : > { %9417 = vmatmul.mubr.bf16.gmra.mrb[240].mxu1 %v25598_v35 }
 0xa72   : > { %9426 = vmatprep.mubr.bf16.mxu1 %v25603_v34  ;;  %v17728_v17 = vpop.f32.mrb[248].mxu0 }
 0xa73   : > { %v17729_v45 = vpop.f32.mrb[249].mxu0 }
 0xa74   : > { %v17731_v42 = vpop.f32.mrb[250].mxu0  ;;  %v25612_v51 = vadd.f32 %v17729_v45, %v17728_v17  ;;  %v25627_v17 = vcombine.low %v16695_v55, %v16695_v55 }
 0xa75   : > { %v17732_v44 = vpop.f32.mrb[251].mxu0 }
 0xa76   : > { %v25621_v35 = vadd.f32 %v17732_v44, %v17731_v42 }
 0xa79   : > { %9427 = vmatmul.mubr.bf16.gmra.mrb[244].mxu1 %v25617_v50 }
 0xa7a   : > { %v17734_v34 = vpop.f32.mrb[252].mxu0  ;;  %9436 = vmatprep.mubr.bf16.mxu1 %v25619_v19 }
 0xa7b   : > { %v17735_v25 = vpop.f32.mrb[253].mxu0 }
 0xa7c   : > { %v17737_v46 = vpop.f32.mrb[254].mxu0  ;;  %v25625_v3 = vadd.f32 %v17735_v25, %v17734_v34  ;;  %v21603_v25 = vld [vmem:[%s28608_s5 + $0x188] ss:$12 sps:$4 sm:$0xff]   ;;  %v21605_v34 = vld [vmem:[%s28608_s5 + $0x200] ss:$12 sps:$4 sm:$0xff]  }
 0xa7d   : > { %v17738_v45 = vpop.f32.mrb[255].mxu0  ;;  %v25636_v46 = vld [vmem:[%s28607_s4 + $0x104] ss:$12 sps:$4 sm:$0xff]  }
 0xa7e   : > { %v21609_v45 = vld [vmem:[%s28608_s5 + $0x2f0] ss:$12 sps:$4 sm:$0xff]  }
 0xa81   : > { %9437 = vmatmul.mubr.bf16.gmra.mrb[248].mxu1 %v25627_v17 }
 0xa82   : > { %v7895_v14 = vpop.f32.mrb[0].mxu0  ;;  %9477 = vmatprep.mubr.bf16.mxu1 %v28856_v61 }
 0xa83   : > { %v7896_v42 = vadd.f32 %v25441_v33, %v7895_v14  ;;  %v18728_v44 = vpop.f32.mrb[1].mxu0  ;;  %v21606_v14 = vld [vmem:[%s28608_s5 + $0x2d8] ss:$12 sps:$4 sm:$0xff]   ;;  %v21607_v33 = vld [vmem:[%s28608_s5 + $0x1a0] ss:$12 sps:$4 sm:$0xff]  }
 0xa84   : > { %v7898_v16 = vpop.f32.mrb[2].mxu0 }
 0xa85   : > { %v7899_v50 = vadd.f32 %v25453_v26, %v7898_v16  ;;  %v18729_v13 = vpop.f32.mrb[3].mxu0 }
 0xa87   : > { %v25644_v55 = vpack.c.bf16 %v7899_v50, %v7896_v42  ;;  %v21608_v50 = vld [vmem:[%s28608_s5 + $0x218] ss:$12 sps:$4 sm:$0xff]  }
 0xa89   : > { %16633 = vmatmul.mubr.msk.bf16.vlgmr.msra.gmra.mrb[44].mxu0 %vm7425_vm4, %v25644_v55  ;;  %16730 = vmatmul.mubr.msk.bf16.vlgmr.msra.gmra.mrb[208].mxu1 %vm7425_vm4, %v25636_v46 }
 0xa8a   : > { %18771 = vmatpush3.bf16.msra.mxu0 %v21603_v25  ;;  %17953 = vmatpush3.bf16.msra.mxu1 %v21605_v34  ;;  %v7903_v13 = vpop.f32.mrb[4].mxu0  ;;  %v21610_v34 = vld [vmem:[%s28608_s5 + $0x1b8] ss:$12 sps:$4 sm:$0xff]  }
 0xa8b   : > { %v7904_v26 = vadd.f32 %v25461_v11, %v7903_v13  ;;  %v18732_v16 = vpop.f32.mrb[5].mxu0  ;;  %18772 = vmatprep.subr.bf16.mxu0 %v28765_v37  ;;  %17954 = vmatprep.subr.bf16.mxu1 %v21606_v14  ;;  %v25670_v11 = vld [vmem:[%s28607_s4 + $0x11c] ss:$12 sps:$4 sm:$0xff]  }
 0xa8c   : > { %v7906_v42 = vpop.f32.mrb[6].mxu0  ;;  %8650 = vmatprep.mubr.bf16.mxu0 %v28856_v61  ;;  %9487 = vmatprep.mubr.bf16.mxu1 %v28856_v61  ;;  %v21612_v14 = vld [vmem:[%s28608_s5 + $0x230] ss:$12 sps:$4 sm:$0xff]  }
 0xa8d   : > { %v7907_v44 = vadd.f32 %v25474_v62, %v7906_v42  ;;  %v18733_v25 = vpop.f32.mrb[7].mxu0  ;;  %v21613_v62 = vld [vmem:[%s28608_s5 + $0x308] ss:$12 sps:$4 sm:$0xff]   ;;  %v21616_v42 = vld [vmem:[%s28608_s5 + $0x320] ss:$12 sps:$4 sm:$0xff]  }
 0xa8e   : > { %18773 = vmatpush3.bf16.msra.mxu0 %v21607_v33  ;;  %17955 = vmatpush3.bf16.msra.mxu1 %v21608_v50  ;;  %v21614_v50 = vld [vmem:[%s28608_s5 + $0x1d0] ss:$12 sps:$4 sm:$0xff]  }
 0xa8f   : > { %v25678_v13 = vpack.c.bf16 %v7907_v44, %v7904_v26  ;;  %18774 = vmatprep.subr.bf16.mxu0 %v28765_v37  ;;  %17956 = vmatprep.subr.bf16.mxu1 %v21609_v45  ;;  %v21615_v26 = vld [vmem:[%s28608_s5 + $0x248] ss:$12 sps:$4 sm:$0xff]  }
 0xa91   : > { %16634 = vmatmul.mubr.msk.bf16.gmra.mrb[48].mxu0 %vm7425_vm4, %v25678_v13  ;;  %16731 = vmatmul.mubr.msk.bf16.gmra.mrb[212].mxu1 %vm7425_vm4, %v25670_v11 }
 0xa92   : > { %18775 = vmatpush3.bf16.msra.mxu0 %v21610_v34  ;;  %17957 = vmatpush3.bf16.msra.mxu1 %v21612_v14  ;;  %v7911_v33 = vpop.f32.mrb[8].mxu0  ;;  %v21617_v14 = vld [vmem:[%s28608_s5 + $0x1e8] ss:$12 sps:$4 sm:$0xff]  }
 0xa93   : > { %v7912_v16 = vadd.f32 %v25483_v29, %v7911_v33  ;;  %v18736_v45 = vpop.f32.mrb[9].mxu0  ;;  %18776 = vmatprep.subr.bf16.mxu0 %v28765_v37  ;;  %17958 = vmatprep.subr.bf16.mxu1 %v21613_v62  ;;  %v25705_v29 = vld [vmem:[%s28607_s4 + $0x134] ss:$12 sps:$4 sm:$0xff]  }
 0xa94   : > { %v7914_v44 = vpop.f32.mrb[10].mxu0  ;;  %8660 = vmatprep.mubr.bf16.mxu0 %v28856_v61  ;;  %9497 = vmatprep.mubr.bf16.mxu1 %v28856_v61  ;;  %28862 = vst [vmem:[#allocation66_spill] sm:$0xff] %v25705_v29  ;;  %v21619_v62 = vld [vmem:[%s28608_s5 + $0x260] ss:$12 sps:$4 sm:$0xff]  }
 0xa95   : > { %v7915_v25 = vadd.f32 %v25496_v59, %v7914_v44  ;;  %v18737_v34 = vpop.f32.mrb[11].mxu0  ;;  %v21620_v59 = vld [vmem:[%s28608_s5 + $0x338] ss:$12 sps:$4 sm:$0xff]   ;;  %v28863_v45 = vld [vmem:[#allocation48_spill] sm:$0xff]  ;;  %v21622_v44 = vld [vmem:[%s28608_s5 + $0x350] ss:$12 sps:$4 sm:$0xff]  }
 0xa96   : > { %18777 = vmatpush3.bf16.msra.mxu0 %v21614_v50  ;;  %17959 = vmatpush3.bf16.msra.mxu1 %v21615_v26  ;;  %v21621_v26 = vld [vmem:[%s28608_s5 + $0x278] ss:$12 sps:$4 sm:$0xff]  }
 0xa97   : > { %v25713_v33 = vpack.c.bf16 %v7915_v25, %v7912_v16  ;;  %18778 = vmatprep.subr.bf16.mxu0 %v28765_v37  ;;  %17960 = vmatprep.subr.bf16.mxu1 %v21616_v42 }
 0xa99   : > { %16635 = vmatmul.mubr.msk.bf16.gmra.mrb[52].mxu0 %vm7425_vm4, %v25713_v33  ;;  %16732 = vmatmul.mubr.msk.bf16.gmra.mrb[216].mxu1 %vm7425_vm4, %v25705_v29 }
 0xa9a   : > { %18779 = vmatpush3.bf16.msra.mxu0 %v21617_v14  ;;  %17961 = vmatpush3.bf16.msra.mxu1 %v21619_v62  ;;  %v7919_v50 = vpop.f32.mrb[12].mxu0  ;;  %v21624_v62 = vld [vmem:[%s28608_s5 + $0x290] ss:$12 sps:$4 sm:$0xff]  }
 0xa9b   : > { %v7920_v16 = vadd.f32 %v25507_v2, %v7919_v50  ;;  %17854 = vmatprep.subr.bf16.mxu0 %v28863_v45  ;;  %v18740_v42 = vpop.f32.mrb[13].mxu0  ;;  %17962 = vmatprep.subr.bf16.mxu1 %v21620_v59  ;;  %v25737_v2 = vld [vmem:[%s28607_s4 + $0x14c] ss:$12 sps:$4 sm:$0xff]   ;;  %v21625_v50 = vld [vmem:[%s28608_s5 + $0x368] ss:$12 sps:$4 sm:$0xff]  }
 0xa9c   : > { %v7922_v25 = vpop.f32.mrb[14].mxu0  ;;  %8670 = vmatprep.mubr.bf16.mxu0 %v28856_v61  ;;  %9507 = vmatprep.mubr.bf16.mxu1 %v28856_v61  ;;  %28864 = vst [vmem:[#allocation67_spill] sm:$0xff] %v25737_v2  ;;  %v28866_v45 = vld [vmem:[#allocation6_spill] sm:$0xff] }
 0xa9d   : > { %v7923_v34 = vadd.f32 %v25519_v40, %v7922_v25  ;;  %v18741_v14 = vpop.f32.mrb[15].mxu0 }
 0xa9e   : > { %17963 = vmatpush3.bf16.msra.mxu1 %v21621_v26  ;;  %v21626_v26 = vld [vmem:[%s28608_s5 + $0x2a8] ss:$12 sps:$4 sm:$0xff]   ;;  %v25761_v14 = vld [vmem:[%s28607_s4 + $0x164] ss:$12 sps:$4 sm:$0xff]  }
 0xa9f   : > { %v25742_v59 = vpack.c.bf16 %v7923_v34, %v7920_v16  ;;  %17964 = vmatprep.subr.bf16.mxu1 %v21622_v44  ;;  %28865 = vst [vmem:[#allocation68_spill] sm:$0xff] %v25761_v14 }
 0xaa1   : > { %16636 = vmatmul.mubr.msk.bf16.gmra.mrb[56].mxu0 %vm7425_vm4, %v25742_v59  ;;  %16733 = vmatmul.mubr.msk.bf16.gmra.mrb[220].mxu1 %vm7425_vm4, %v25737_v2 }
 0xaa2   : > { %17965 = vmatpush3.bf16.msra.mxu1 %v21624_v62  ;;  %v7927_v40 = vpop.f32.mrb[16].mxu0  ;;  %8680 = vmatprep.mubr.bf16.mxu0 %v28856_v61 }
 0xaa3   : > { %v7928_v16 = vadd.f32 %v25525_v12, %v7927_v40  ;;  %v18744_v42 = vpop.f32.mrb[17].mxu0  ;;  %17966 = vmatprep.subr.bf16.mxu1 %v21625_v50  ;;  %9517 = vmatprep.mubr.bf16.mxu1 %v28856_v61 }
 0xaa4   : > { %v7930_v44 = vpop.f32.mrb[18].mxu0 }
 0xaa5   : > { %v7931_v25 = vadd.f32 %v25537_v39, %v7930_v44  ;;  %v18745_v34 = vpop.f32.mrb[19].mxu0  ;;  %v25777_v44 = vld [vmem:[%s28607_s4 + $0x17c] ss:$12 sps:$4 sm:$0xff]  }
 0xaa6   : > { %17967 = vmatpush3.bf16.msra.mxu1 %v21626_v26 }
 0xaa7   : > { %v25763_v62 = vpack.c.bf16 %v7931_v25, %v7928_v16  ;;  %11134 = vmatprep.subr.bf16.mxu1 %v28866_v45 }
 0xaa9   : > { %16637 = vmatmul.mubr.msk.bf16.gmra.mrb[60].mxu0 %vm7425_vm4, %v25763_v62  ;;  %16734 = vmatmul.mubr.msk.bf16.gmra.mrb[224].mxu1 %vm7425_vm4, %v25761_v14 }
 0xaaa   : > { %v7935_v12 = vpop.f32.mrb[20].mxu0  ;;  %8690 = vmatprep.mubr.bf16.mxu0 %v28856_v61  ;;  %9527 = vmatprep.mubr.bf16.mxu1 %v28856_v61 }
 0xaab   : > { %v7936_v39 = vadd.f32 %v25543_v4, %v7935_v12  ;;  %v18748_v50 = vpop.f32.mrb[21].mxu0 }
 0xaac   : > { %v7938_v40 = vpop.f32.mrb[22].mxu0  ;;  %v17772_v26 = vpop.f32.mrb[252].mxu1 }
 0xaad   : > { %v7939_v16 = vadd.f32 %v25555_v21, %v7938_v40  ;;  %v17773_v42 = vpop.f32.mrb[253].mxu1  ;;  %v18749_v45 = vpop.f32.mrb[23].mxu0 }
 0xaae   : > { %v25779_v25 = vadd.f32 %v17773_v42, %v17772_v26  ;;  %v17775_v34 = vpop.f32.mrb[254].mxu1 }
 0xaaf   : > { %v25781_v14 = vpack.c.bf16 %v7939_v16, %v7936_v39  ;;  %v17776_v2 = vpop.f32.mrb[255].mxu1  ;;  %v25796_v16 = vld [vmem:[%s28607_s4 + $0x194] ss:$12 sps:$4 sm:$0xff]  }
 0xab0   : > { %28867 = vst [vmem:[#allocation6_spill] sm:$0xff] %v25779_v25  ;;  %v25783_v29 = vadd.f32 %v17776_v2, %v17775_v34 }
 0xab1   : > { %16638 = vmatmul.mubr.msk.bf16.gmra.mrb[64].mxu0 %vm7425_vm4, %v25781_v14  ;;  %16735 = vmatmul.mubr.msk.bf16.gmra.mrb[228].mxu1 %vm7425_vm4, %v25777_v44 }
 0xab2   : > { %28868 = vst [vmem:[#allocation69_spill] sm:$0xff] %v25783_v29  ;;  %v7943_v4 = vpop.f32.mrb[24].mxu0  ;;  %8700 = vmatprep.mubr.bf16.mxu0 %v28856_v61  ;;  %9537 = vmatprep.mubr.bf16.mxu1 %v28856_v61 }
 0xab3   : > { %v7944_v21 = vadd.f32 %v25561_v38, %v7943_v4  ;;  %v18752_v12 = vpop.f32.mrb[25].mxu0 }
 0xab4   : > { %v7946_v50 = vpop.f32.mrb[26].mxu0  ;;  %v17778_v39 = vpop.f32.mrb[168].mxu1 }
 0xab5   : > { %v7947_v40 = vadd.f32 %v25573_v57, %v7946_v50  ;;  %v17779_v2 = vpop.f32.mrb[169].mxu1  ;;  %v18753_v26 = vpop.f32.mrb[27].mxu0 }
 0xab6   : > { %v25798_v42 = vadd.f32 %v17779_v2, %v17778_v39  ;;  %v17781_v45 = vpop.f32.mrb[170].mxu1 }
 0xab7   : > { %v25800_v34 = vpack.c.bf16 %v7947_v40, %v7944_v21  ;;  %v17782_v29 = vpop.f32.mrb[171].mxu1  ;;  %v25815_v40 = vld [vmem:[%s28607_s4 + $0x1ac] ss:$12 sps:$4 sm:$0xff]  }
 0xab8   : > { %28869 = vst [vmem:[#allocation70_spill] sm:$0xff] %v25798_v42  ;;  %v25802_v25 = vadd.f32 %v17782_v29, %v17781_v45 }
 0xab9   : > { %16639 = vmatmul.mubr.msk.bf16.gmra.mrb[68].mxu0 %vm7425_vm4, %v25800_v34  ;;  %16736 = vmatmul.mubr.msk.bf16.gmra.mrb[232].mxu1 %vm7425_vm4, %v25796_v16 }
 0xaba   : > { %28870 = vst [vmem:[#allocation71_spill] sm:$0xff] %v25802_v25  ;;  %v7951_v38 = vpop.f32.mrb[28].mxu0  ;;  %8710 = vmatprep.mubr.bf16.mxu0 %v28856_v61  ;;  %9547 = vmatprep.mubr.bf16.mxu1 %v28856_v61 }
 0xabb   : > { %v7952_v57 = vadd.f32 %v25577_v10, %v7951_v38  ;;  %v18756_v4 = vpop.f32.mrb[29].mxu0 }
 0xabc   : > { %v7954_v12 = vpop.f32.mrb[30].mxu0  ;;  %v17784_v21 = vpop.f32.mrb[172].mxu1 }
 0xabd   : > { %v7955_v50 = vadd.f32 %v25589_v7, %v7954_v12  ;;  %v17785_v29 = vpop.f32.mrb[173].mxu1  ;;  %v18757_v39 = vpop.f32.mrb[31].mxu0 }
 0xabe   : > { %v25817_v2 = vadd.f32 %v17785_v29, %v17784_v21  ;;  %v17787_v26 = vpop.f32.mrb[174].mxu1 }
 0xabf   : > { %v25819_v45 = vpack.c.bf16 %v7955_v50, %v7952_v57  ;;  %v17788_v25 = vpop.f32.mrb[175].mxu1  ;;  %v25834_v50 = vld [vmem:[%s28607_s4 + $0x1c4] ss:$12 sps:$4 sm:$0xff]  }
 0xac0   : > { %28871 = vst [vmem:[#allocation72_spill] sm:$0xff] %v25817_v2  ;;  %v25821_v42 = vadd.f32 %v17788_v25, %v17787_v26 }
 0xac1   : > { %16640 = vmatmul.mubr.msk.bf16.gmra.mrb[72].mxu0 %vm7425_vm4, %v25819_v45  ;;  %16737 = vmatmul.mubr.msk.bf16.gmra.mrb[236].mxu1 %vm7425_vm4, %v25815_v40 }
 0xac2   : > { %28872 = vst [vmem:[#allocation73_spill] sm:$0xff] %v25821_v42  ;;  %v7959_v10 = vpop.f32.mrb[32].mxu0  ;;  %8720 = vmatprep.mubr.bf16.mxu0 %v28856_v61  ;;  %9557 = vmatprep.mubr.bf16.mxu1 %v28856_v61 }
 0xac3   : > { %v7960_v7 = vadd.f32 %v25593_v22, %v7959_v10  ;;  %v18760_v38 = vpop.f32.mrb[33].mxu0 }
 0xac4   : > { %v7962_v4 = vpop.f32.mrb[34].mxu0  ;;  %v17790_v57 = vpop.f32.mrb[176].mxu1 }
 0xac5   : > { %v7963_v12 = vadd.f32 %v25605_v54, %v7962_v4  ;;  %v17791_v25 = vpop.f32.mrb[177].mxu1  ;;  %v18761_v21 = vpop.f32.mrb[35].mxu0 }
 0xac6   : > { %v25836_v29 = vadd.f32 %v17791_v25, %v17790_v57  ;;  %v17793_v39 = vpop.f32.mrb[178].mxu1 }
 0xac7   : > { %v25838_v26 = vpack.c.bf16 %v7963_v12, %v7960_v7  ;;  %v17794_v42 = vpop.f32.mrb[179].mxu1  ;;  %v25853_v12 = vld [vmem:[%s28607_s4 + $0x1dc] ss:$12 sps:$4 sm:$0xff]  }
 0xac8   : > { %28873 = vst [vmem:[#allocation74_spill] sm:$0xff] %v25836_v29  ;;  %v25840_v2 = vadd.f32 %v17794_v42, %v17793_v39 }
 0xac9   : > { %16641 = vmatmul.mubr.msk.bf16.gmra.mrb[76].mxu0 %vm7425_vm4, %v25838_v26  ;;  %16738 = vmatmul.mubr.msk.bf16.gmra.mrb[240].mxu1 %vm7425_vm4, %v25834_v50 }
 0xaca   : > { %28874 = vst [vmem:[#allocation75_spill] sm:$0xff] %v25840_v2  ;;  %v7967_v22 = vpop.f32.mrb[36].mxu0  ;;  %8730 = vmatprep.mubr.bf16.mxu0 %v28856_v61  ;;  %9567 = vmatprep.mubr.bf16.mxu1 %v28856_v61 }
 0xacb   : > { %v7968_v54 = vadd.f32 %v25612_v51, %v7967_v22  ;;  %v18764_v10 = vpop.f32.mrb[37].mxu0 }
 0xacc   : > { %v7970_v38 = vpop.f32.mrb[38].mxu0  ;;  %v17796_v7 = vpop.f32.mrb[180].mxu1 }
 0xacd   : > { %v7971_v4 = vadd.f32 %v25621_v35, %v7970_v38  ;;  %v17797_v42 = vpop.f32.mrb[181].mxu1  ;;  %v18765_v57 = vpop.f32.mrb[39].mxu0 }
 0xace   : > { %v25855_v25 = vadd.f32 %v17797_v42, %v17796_v7  ;;  %v17799_v21 = vpop.f32.mrb[182].mxu1 }
 0xacf   : > { %v25857_v39 = vpack.c.bf16 %v7971_v4, %v7968_v54  ;;  %v17800_v2 = vpop.f32.mrb[183].mxu1 }
 0xad0   : > { %28875 = vst [vmem:[#allocation76_spill] sm:$0xff] %v25855_v25  ;;  %v25859_v29 = vadd.f32 %v17800_v2, %v17799_v21  ;;  %v25871_v2 = vld [vmem:[%s28607_s4 + $0x1f4] ss:$0 sps:$4 sm:$0xff]  }
 0xad1   : > { %16642 = vmatmul.mubr.msk.bf16.gmra.mrb[80].mxu0 %vm7425_vm4, %v25857_v39  ;;  %16739 = vmatmul.mubr.msk.bf16.gmra.mrb[244].mxu1 %vm7425_vm4, %v25853_v12 }
 0xad2   : > { %28876 = vst [vmem:[#allocation77_spill] sm:$0xff] %v25859_v29  ;;  %v7975_v51 = vpop.f32.mrb[40].mxu0  ;;  %8740 = vmatprep.mubr.bf16.mxu0 %v28856_v61  ;;  %9577 = vmatprep.mubr.bf16.mxu1 %v28856_v61 }
 0xad3   : > { %v7976_v35 = vadd.f32 %v25625_v3, %v7975_v51  ;;  %v18768_v22 = vpop.f32.mrb[41].mxu0 }
 0xad4   : > { %v17802_v10 = vpop.f32.mrb[184].mxu1  ;;  %v7978_v54 = vpop.f32.mrb[42].mxu0 }
 0xad5   : > { %v17803_v38 = vpop.f32.mrb[185].mxu1  ;;  %v18769_v7 = vpop.f32.mrb[43].mxu0  ;;  %v25875_v57 = vpack.c.bf16 %v7976_v35, %v7976_v35 }
 0xad6   : > { %v25873_v4 = vadd.f32 %v17803_v38, %v17802_v10  ;;  %v17805_v42 = vpop.f32.mrb[186].mxu1  ;;  %v28881_v38 = vld [vmem:[#allocation40_spill] sm:$0xff]  ;;  %v28882_v7 = vld [vmem:[#allocation49_spill] sm:$0xff] }
 0xad7   : > { %v17806_v21 = vpop.f32.mrb[187].mxu1 }
 0xad8   : > { %28877 = vst [vmem:[#allocation78_spill] sm:$0xff] %v25873_v4  ;;  %v25877_v29 = vadd.f32 %v17806_v21, %v17805_v42  ;;  %v28890_v4 = vld [vmem:[#allocation43_spill] sm:$0xff] }
 0xad9   : > { %16643 = vmatmul.mubr.msk.bf16.gmra.mrb[84].mxu0 %vm7425_vm4, %v25875_v57  ;;  %16740 = vmatmul.mubr.msk.bf16.gmra.mrb[248].mxu1 %vm7425_vm4, %v25871_v2 }
 0xada   : > { %28878 = vst [vmem:[#allocation79_spill] sm:$0xff] %v25877_v29  ;;  %18780 = vmatprep.mubr.msk.bf16.mxu0 %vm22046_vm3, %v28765_v37 }
 0xadc   : > { %v17808_v3 = vpop.f32.mrb[188].mxu1 }
 0xadd   : > { %v17809_v51 = vpop.f32.mrb[189].mxu1 }
 0xade   : > { %v25885_v22 = vadd.f32 %v17809_v51, %v17808_v3  ;;  %v17811_v10 = vpop.f32.mrb[190].mxu1  ;;  %v28884_v3 = vld [vmem:[#allocation41_spill] sm:$0xff] }
 0xadf   : > { %v17812_v54 = vpop.f32.mrb[191].mxu1 }
 0xae0   : > { %28879 = vst [vmem:[#allocation80_spill] sm:$0xff] %v25885_v22  ;;  %v25887_v35 = vadd.f32 %v17812_v54, %v17811_v10  ;;  %v28885_v22 = vld [vmem:[#allocation50_spill] sm:$0xff] }
 0xae1   : > { %18781 = vmatmul.mubr.msk.bf16.vlgmr.msra.gmra.mrb[88].mxu0 %vm7425_vm4, %v25644_v55  ;;  %v28887_v55 = vld [vmem:[#allocation42_spill] sm:$0xff] }
 0xae2   : > { %28880 = vst [vmem:[#allocation81_spill] sm:$0xff] %v25887_v35  ;;  %17855 = vmatpush3.bf16.msra.mxu0 %v28881_v38  ;;  %18784 = vmatprep.mubr.msk.bf16.mxu0 %vm22046_vm3, %v28765_v37  ;;  %v28888_v35 = vld [vmem:[#allocation51_spill] sm:$0xff] }
 0xae3   : > { %17856 = vmatprep.subr.bf16.mxu0 %v28882_v7 }
 0xae4   : > { %v17814_v42 = vpop.f32.mrb[192].mxu1 }
 0xae5   : > { %v17815_v21 = vpop.f32.mrb[193].mxu1 }
 0xae6   : > { %v25895_v29 = vadd.f32 %v17815_v21, %v17814_v42  ;;  %17857 = vmatpush3.bf16.msra.mxu0 %v28884_v3  ;;  %v17817_v51 = vpop.f32.mrb[194].mxu1 }
 0xae7   : > { %17858 = vmatprep.subr.bf16.mxu0 %v28885_v22  ;;  %v17818_v10 = vpop.f32.mrb[195].mxu1  ;;  %v28891_v22 = vld [vmem:[#allocation52_spill] sm:$0xff] }
 0xae8   : > { %28883 = vst [vmem:[#allocation40_spill] sm:$0xff] %v25895_v29  ;;  %v25899_v54 = vadd.f32 %v17818_v10, %v17817_v51 }
 0xae9   : > { %18785 = vmatmul.mubr.msk.bf16.gmra.mrb[92].mxu0 %vm7425_vm4, %v25678_v13  ;;  %v28893_v13 = vld [vmem:[#allocation44_spill] sm:$0xff] }
 0xaea   : > { %28886 = vst [vmem:[#allocation49_spill] sm:$0xff] %v25899_v54  ;;  %17859 = vmatpush3.bf16.msra.mxu0 %v28887_v55  ;;  %18788 = vmatprep.mubr.msk.bf16.mxu0 %vm22046_vm3, %v28765_v37  ;;  %v28894_v54 = vld [vmem:[#allocation53_spill] sm:$0xff] }
 0xaeb   : > { %17860 = vmatprep.subr.bf16.mxu0 %v28888_v35  ;;  %v28897_v35 = vld [vmem:[#allocation54_spill] sm:$0xff] }
 0xaec   : > { %v17820_v42 = vpop.f32.mrb[196].mxu1 }
 0xaed   : > { %v17821_v21 = vpop.f32.mrb[197].mxu1 }
 0xaee   : > { %v25907_v29 = vadd.f32 %v17821_v21, %v17820_v42  ;;  %17861 = vmatpush3.bf16.msra.mxu0 %v28890_v4  ;;  %v17823_v25 = vpop.f32.mrb[198].mxu1  ;;  %v28896_v4 = vld [vmem:[#allocation45_spill] sm:$0xff] }
 0xaef   : > { %17862 = vmatprep.subr.bf16.mxu0 %v28891_v22  ;;  %v17824_v51 = vpop.f32.mrb[199].mxu1 }
 0xaf0   : > { %28889 = vst [vmem:[#allocation41_spill] sm:$0xff] %v25907_v29  ;;  %v25911_v10 = vadd.f32 %v17824_v51, %v17823_v25 }
 0xaf1   : > { %18789 = vmatmul.mubr.msk.bf16.gmra.mrb[96].mxu0 %vm7425_vm4, %v25713_v33  ;;  %v28898_v33 = vld [vmem:[#allocation46_spill] sm:$0xff] }
 0xaf2   : > { %28892 = vst [vmem:[#allocation42_spill] sm:$0xff] %v25911_v10  ;;  %17863 = vmatpush3.bf16.msra.mxu0 %v28893_v13  ;;  %18792 = vmatprep.mubr.msk.bf16.mxu0 %vm22046_vm3, %v28765_v37  ;;  %v28899_v10 = vld [vmem:[#allocation55_spill] sm:$0xff] }
 0xaf3   : > { %17864 = vmatprep.subr.bf16.mxu0 %v28894_v54 }
 0xaf4   : > { %v17826_v42 = vpop.f32.mrb[200].mxu1 }
 0xaf5   : > { %v17827_v21 = vpop.f32.mrb[201].mxu1 }
 0xaf6   : > { %v25919_v29 = vadd.f32 %v17827_v21, %v17826_v42  ;;  %17865 = vmatpush3.bf16.msra.mxu0 %v28896_v4  ;;  %v17829_v22 = vpop.f32.mrb[202].mxu1  ;;  %v28900_v4 = vld [vmem:[#allocation47_spill] sm:$0xff] }
 0xaf7   : > { %17866 = vmatprep.subr.bf16.mxu0 %v28897_v35  ;;  %v17830_v25 = vpop.f32.mrb[203].mxu1 }
 0xaf8   : > { %28895 = vst [vmem:[#allocation44_spill] sm:$0xff] %v25919_v29  ;;  %v25923_v51 = vadd.f32 %v17830_v25, %v17829_v22  ;;  %v28907_v22 = vld [vmem:[#allocation63_spill] sm:$0xff] }
 0xaf9   : > { %18793 = vmatmul.mubr.msk.bf16.gmra.mrb[100].mxu0 %vm7425_vm4, %v25742_v59 }
 0xafa   : > { %17867 = vmatpush3.bf16.msra.mxu0 %v28898_v33  ;;  %18796 = vmatprep.mubr.msk.bf16.mxu0 %vm22046_vm3, %v28765_v37 }
 0xafb   : > { %17868 = vmatprep.subr.bf16.mxu0 %v28899_v10 }
 0xafc   : > { %v17832_v42 = vpop.f32.mrb[204].mxu1 }
 0xafd   : > { %v17833_v21 = vpop.f32.mrb[205].mxu1 }
 0xafe   : > { %v25931_v29 = vadd.f32 %v17833_v21, %v17832_v42  ;;  %17869 = vmatpush3.bf16.msra.mxu0 %v28900_v4  ;;  %v17835_v35 = vpop.f32.mrb[206].mxu1  ;;  %v28910_v42 = vld [vmem:[#allocation13_spill] sm:$0xff] }
 0xaff   : > { %v17836_v54 = vpop.f32.mrb[207].mxu1  ;;  %18824 = vmatprep.subr.bf16.mxu0 %v28765_v37  ;;  %v28908_v35 = vld [vmem:[#allocation64_spill] sm:$0xff] }
 0xb00   : > { %v28909_v54 = vld [vmem:[#allocation10_spill] sm:$0xff] }
 0xb01   : > { %18797 = vmatmul.mubr.msk.bf16.gmra.mrb[104].mxu0 %vm7425_vm4, %v25763_v62 }
 0xb02   : > { %18800 = vmatprep.mubr.msk.bf16.mxu0 %vm22046_vm3, %v28765_v37 }
 0xb09   : > { %18801 = vmatmul.mubr.msk.bf16.gmra.mrb[108].mxu0 %vm7425_vm4, %v25781_v14 }
 0xb0a   : > { %18804 = vmatprep.mubr.msk.bf16.mxu0 %vm22046_vm3, %v28765_v37 }
 0xb11   : > { %18805 = vmatmul.mubr.msk.bf16.gmra.mrb[112].mxu0 %vm7425_vm4, %v25800_v34 }
 0xb12   : > { %18808 = vmatprep.mubr.msk.bf16.mxu0 %vm22046_vm3, %v28765_v37 }
 0xb19   : > { %18809 = vmatmul.mubr.msk.bf16.gmra.mrb[116].mxu0 %vm7425_vm4, %v25819_v45 }
 0xb1a   : > { %18812 = vmatprep.mubr.msk.bf16.mxu0 %vm22046_vm3, %v28765_v37 }
 0xb21   : > { %18813 = vmatmul.mubr.msk.bf16.gmra.mrb[120].mxu0 %vm7425_vm4, %v25838_v26 }
 0xb22   : > { %18816 = vmatprep.mubr.msk.bf16.mxu0 %vm22046_vm3, %v28765_v37 }
 0xb29   : > { %18817 = vmatmul.mubr.msk.bf16.gmra.mrb[124].mxu0 %vm7425_vm4, %v25857_v39 }
 0xb2a   : > { %18820 = vmatprep.mubr.msk.bf16.mxu0 %vm22046_vm3, %v28765_v37 }
 0xb31   : > { %18821 = vmatmul.mubr.msk.bf16.gmra.mrb[128].mxu0 %vm7425_vm4, %v25875_v57  ;;  %v28906_v57 = vld [vmem:[#allocation11_spill] sm:$0xff] }
 0xb32   : > { %9618 = vmatprep.mubr.bf16.mxu0 %v25433_v63  ;;  %v21636_v63 = vld [vmem:[%s28608_s5 + $0x1fc] ss:$12 sps:$4 sm:$0xff]  }
 0xb39   : > { %9619 = vmatmul.mubr.bf16.vlgmr.msra.gmra.mrb[132].mxu0 %v25446_v36 }
 0xb3a   : > { %18825 = vmatpush3.bf16.msra.mxu0 %v25104_v8  ;;  %9626 = vmatprep.mubr.bf16.mxu0 %v25451_v60 }
 0xb3b   : > { %18826 = vmatprep.subr.bf16.mxu0 %v28765_v37 }
 0xb3e   : > { %18827 = vmatpush3.bf16.msra.mxu0 %v25112_v47 }
 0xb3f   : > { %18828 = vmatprep.subr.bf16.mxu0 %v28765_v37 }
 0xb41   : > { %9627 = vmatmul.mubr.bf16.gmra.mrb[136].mxu0 %v25466_v49 }
 0xb42   : > { %18829 = vmatpush3.bf16.msra.mxu0 %v25122_v32  ;;  %9634 = vmatprep.mubr.bf16.mxu0 %v25472_v30 }
 0xb43   : > { %18830 = vmatprep.subr.bf16.mxu0 %v28765_v37 }
 0xb46   : > { %18831 = vmatpush3.bf16.msra.mxu0 %v25130_v5 }
 0xb47   : > { %18832 = vmatprep.subr.bf16.mxu0 %v28765_v37 }
 0xb49   : > { %9635 = vmatmul.mubr.bf16.gmra.mrb[140].mxu0 %v25488_v15 }
 0xb4a   : > { %18833 = vmatpush3.bf16.msra.mxu0 %v25141_v56  ;;  %9642 = vmatprep.mubr.bf16.mxu0 %v25494_v41 }
 0xb4b   : > { %10313 = vmatprep.subr.bf16.mxu0 %v21636_v63 }
 0xb51   : > { %9643 = vmatmul.mubr.bf16.gmra.mrb[144].mxu0 %v25512_v6 }
 0xb52   : > { %9650 = vmatprep.mubr.bf16.mxu0 %v25517_v9 }
 0xb59   : > { %9651 = vmatmul.mubr.bf16.gmra.mrb[148].mxu0 %v25530_v0 }
 0xb5a   : > { %9658 = vmatprep.mubr.bf16.mxu0 %v25535_v20 }
 0xb5c   : > { %v9479_v36 = vpop.f32.mrb[208].mxu1 }
 0xb5d   : > { %v9481_v60 = vpop.f32.mrb[209].mxu1 }
 0xb5e   : > { %v9483_v49 = vpop.f32.mrb[210].mxu1 }
 0xb5f   : > { %v25984_v30 = vpack.c.bf16 %v9483_v49, %v9479_v36  ;;  %v9485_v59 = vpop.f32.mrb[211].mxu1 }
 0xb60   : > { %v25986_v15 = vpack.c.bf16 %v9485_v59, %v9481_v60  ;;  %v28911_v59 = vld [vmem:[#allocation12_spill] sm:$0xff] }
 0xb61   : > { %9659 = vmatmul.mubr.bf16.gmra.mrb[152].mxu0 %v25548_v43 }
 0xb62   : > { %10627 = vmatprep.mubr.bf16.mxu1 %v25986_v15  ;;  %9666 = vmatprep.mubr.bf16.mxu0 %v25553_v53 }
 0xb63   : > { %10628 = vmatmul.mubr.bf16.vlgmr.msra.gmra.mrb[0].mxu1 %v25984_v30 }
 0xb64   : > { %11135 = vmatpush1.bf16.msra.mxu1 %v24543_v31  ;;  %v9489_v0 = vpop.f32.mrb[212].mxu1 }
 0xb65   : > { %11136 = vmatprep.subr.bf16.mxu1 %v24560_v58  ;;  %v9491_v41 = vpop.f32.mrb[213].mxu1 }
 0xb66   : > { %v9493_v6 = vpop.f32.mrb[214].mxu1 }
 0xb67   : > { %v25994_v9 = vpack.c.bf16 %v9493_v6, %v9489_v0  ;;  %v9495_v20 = vpop.f32.mrb[215].mxu1  ;;  %v28912_v0 = vld [vmem:[#allocation15_spill] sm:$0xff]  ;;  %v28914_v6 = vld [vmem:[#allocation14_spill] sm:$0xff] }
 0xb68   : > { %v25996_v14 = vpack.c.bf16 %v9495_v20, %v9491_v41  ;;  %11137 = vmatpush1.bf16.msra.mxu1 %v24558_v28  ;;  %v28913_v41 = vld [vmem:[#allocation65_spill] sm:$0xff] }
 0xb69   : > { %11138 = vmatprep.subr.bf16.mxu1 %v24574_v52  ;;  %9667 = vmatmul.mubr.bf16.gmra.mrb[156].mxu0 %v25566_v18  ;;  %v28901_v52 = vld [vmem:[#allocation56_spill] sm:$0xff]  ;;  %v28902_v18 = vld [vmem:[#allocation62_spill] sm:$0xff] }
 0xb6a   : > { %10635 = vmatprep.mubr.bf16.mxu1 %v25996_v14  ;;  %9674 = vmatprep.mubr.bf16.mxu0 %v25571_v1  ;;  %v28904_v1 = vld [vmem:[#allocation9_spill] sm:$0xff] }
 0xb6b   : > { %10636 = vmatmul.mubr.bf16.gmra.mrb[4].mxu1 %v25994_v9 }
 0xb6c   : > { %11139 = vmatpush1.bf16.msra.mxu1 %v24572_v48  ;;  %v9499_v31 = vpop.f32.mrb[216].mxu1  ;;  %v28903_v48 = vld [vmem:[#allocation7_spill] sm:$0xff] }
 0xb6d   : > { %11140 = vmatprep.subr.bf16.mxu1 %v24588_v23  ;;  %v9501_v58 = vpop.f32.mrb[217].mxu1 }
 0xb6e   : > { %v9503_v43 = vpop.f32.mrb[218].mxu1 }
 0xb6f   : > { %v26006_v53 = vpack.c.bf16 %v9503_v43, %v9499_v31  ;;  %v9505_v28 = vpop.f32.mrb[219].mxu1  ;;  %v28915_v31 = vld [vmem:[#allocation17_spill] sm:$0xff] }
 0xb70   : > { %v26008_v62 = vpack.c.bf16 %v9505_v28, %v9501_v58  ;;  %11141 = vmatpush1.bf16.msra.mxu1 %v24586_v24 }
 0xb71   : > { %11142 = vmatprep.subr.bf16.mxu1 %v24602_v27  ;;  %9675 = vmatmul.mubr.bf16.gmra.mrb[160].mxu0 %v28901_v52  ;;  %v28905_v27 = vld [vmem:[#allocation8_spill] sm:$0xff] }
 0xb72   : > { %10643 = vmatprep.mubr.bf16.mxu1 %v26008_v62  ;;  %9682 = vmatprep.mubr.bf16.mxu0 %v28902_v18  ;;  %v28916_v18 = vld [vmem:[#allocation16_spill] sm:$0xff] }
 0xb73   : > { %10644 = vmatmul.mubr.bf16.gmra.mrb[8].mxu1 %v26006_v53 }
 0xb74   : > { %11143 = vmatpush1.bf16.msra.mxu1 %v28903_v48  ;;  %v9509_v23 = vpop.f32.mrb[220].mxu1 }
 0xb75   : > { %11144 = vmatprep.subr.bf16.mxu1 %v28904_v1  ;;  %v9511_v34 = vpop.f32.mrb[221].mxu1 }
 0xb76   : > { %v9513_v45 = vpop.f32.mrb[222].mxu1 }
 0xb77   : > { %v26018_v26 = vpack.c.bf16 %v9513_v45, %v9509_v23  ;;  %v9515_v24 = vpop.f32.mrb[223].mxu1  ;;  %v28917_v23 = vld [vmem:[#allocation19_spill] sm:$0xff] }
 0xb78   : > { %v26020_v39 = vpack.c.bf16 %v9515_v24, %v9511_v34  ;;  %11145 = vmatpush1.bf16.msra.mxu1 %v28905_v27  ;;  %v28919_v34 = vld [vmem:[#allocation21_spill] sm:$0xff] }
 0xb79   : > { %11146 = vmatprep.subr.bf16.mxu1 %v28906_v57  ;;  %9683 = vmatmul.mubr.bf16.gmra.mrb[164].mxu0 %v28907_v22 }
 0xb7a   : > { %10651 = vmatprep.mubr.bf16.mxu1 %v26020_v39  ;;  %9690 = vmatprep.mubr.bf16.mxu0 %v28908_v35  ;;  %v28920_v35 = vld [vmem:[#allocation20_spill] sm:$0xff] }
 0xb7b   : > { %10652 = vmatmul.mubr.bf16.gmra.mrb[12].mxu1 %v26018_v26 }
 0xb7c   : > { %11147 = vmatpush1.bf16.msra.mxu1 %v28909_v54  ;;  %v9519_v25 = vpop.f32.mrb[224].mxu1  ;;  %v21639_v54 = vld [vmem:[%s28608_s5 + $0x214] ss:$12 sps:$4 sm:$0xff]  }
 0xb7d   : > { %11148 = vmatprep.subr.bf16.mxu1 %v28910_v42  ;;  %v9521_v21 = vpop.f32.mrb[225].mxu1  ;;  %v21637_v42 = vld [vmem:[%s28608_s5 + $0x210] ss:$12 sps:$4 sm:$0xff]  }
 0xb7e   : > { %v9523_v63 = vpop.f32.mrb[226].mxu1 }
 0xb7f   : > { %v26030_v36 = vpack.c.bf16 %v9523_v63, %v9519_v25  ;;  %v9525_v60 = vpop.f32.mrb[227].mxu1  ;;  %v28921_v25 = vld [vmem:[#allocation23_spill] sm:$0xff] }
 0xb80   : > { %v26032_v49 = vpack.c.bf16 %v9525_v60, %v9521_v21  ;;  %11149 = vmatpush1.bf16.msra.mxu1 %v28911_v59  ;;  %v28922_v21 = vld [vmem:[#allocation22_spill] sm:$0xff]  ;;  %v28923_v60 = vld [vmem:[#allocation25_spill] sm:$0xff] }
 0xb81   : > { %11150 = vmatprep.subr.bf16.mxu1 %v28912_v0  ;;  %9691 = vmatmul.mubr.bf16.gmra.mrb[168].mxu0 %v28913_v41 }
 0xb82   : > { %10659 = vmatprep.mubr.bf16.mxu1 %v26032_v49  ;;  %9698 = vmatprep.mubr.bf16.mxu0 %v25619_v19  ;;  %v28918_v19 = vld [vmem:[#allocation18_spill] sm:$0xff] }
 0xb83   : > { %10660 = vmatmul.mubr.bf16.gmra.mrb[16].mxu1 %v26030_v36 }
 0xb84   : > { %11151 = vmatpush1.bf16.msra.mxu1 %v28914_v6  ;;  %v9529_v20 = vpop.f32.mrb[228].mxu1 }
 0xb85   : > { %11152 = vmatprep.subr.bf16.mxu1 %v28915_v31  ;;  %v9531_v58 = vpop.f32.mrb[229].mxu1 }
 0xb86   : > { %v9533_v43 = vpop.f32.mrb[230].mxu1 }
 0xb87   : > { %v26042_v28 = vpack.c.bf16 %v9533_v43, %v9529_v20  ;;  %v9535_v52 = vpop.f32.mrb[231].mxu1  ;;  %v21640_v20 = vld [vmem:[%s28608_s5 + $0x228] ss:$12 sps:$4 sm:$0xff]   ;;  %v21645_v43 = vld [vmem:[%s28608_s5 + $0x244] ss:$12 sps:$4 sm:$0xff]  }
 0xb88   : > { %11153 = vmatpush1.bf16.msra.mxu1 %v28916_v18  ;;  %v26045_v48 = vpack.c.bf16 %v9535_v52, %v9531_v58  ;;  %v28924_v58 = vld [vmem:[#allocation24_spill] sm:$0xff]  ;;  %v28925_v52 = vld [vmem:[#allocation27_spill] sm:$0xff] }
 0xb89   : > { %11154 = vmatprep.subr.bf16.mxu1 %v28917_v23  ;;  %9699 = vmatmul.mubr.bf16.gmra.mrb[172].mxu0 %v25627_v17  ;;  %v21634_v17 = vld [vmem:[%s28608_s5 + $0x1f8] ss:$12 sps:$4 sm:$0xff]   ;;  %v21643_v18 = vld [vmem:[%s28608_s5 + $0x240] ss:$12 sps:$4 sm:$0xff]  }
 0xb8a   : > { %10667 = vmatprep.mubr.bf16.mxu1 %v26045_v48  ;;  %18834 = vmatprep.mubr.msk.bf16.mxu0 %vm22046_vm3, %v28765_v37  ;;  %v28926_v23 = vld [vmem:[#allocation26_spill] sm:$0xff] }
 0xb8b   : > { %10668 = vmatmul.mubr.bf16.gmra.mrb[20].mxu1 %v26042_v28 }
 0xb8c   : > { %11155 = vmatpush1.bf16.msra.mxu1 %v28918_v19  ;;  %v9539_v1 = vpop.f32.mrb[232].mxu1 }
 0xb8d   : > { %11156 = vmatprep.subr.bf16.mxu1 %v28919_v34  ;;  %v9541_v45 = vpop.f32.mrb[233].mxu1 }
 0xb8e   : > { %v9543_v24 = vpop.f32.mrb[234].mxu1 }
 0xb8f   : > { %v26055_v27 = vpack.c.bf16 %v9543_v24, %v9539_v1  ;;  %v9545_v57 = vpop.f32.mrb[235].mxu1  ;;  %v28927_v1 = vld [vmem:[#allocation29_spill] sm:$0xff] }
 0xb90   : > { %v26060_v22 = vpack.c.bf16 %v9545_v57, %v9541_v45  ;;  %11157 = vmatpush1.bf16.msra.mxu1 %v28920_v35 }
 0xb91   : > { %11158 = vmatprep.subr.bf16.mxu1 %v28921_v25  ;;  %18835 = vmatmul.mubr.msk.bf16.vlgmr.msra.gmra.mrb[176].mxu0 %vm7425_vm4, %v25636_v46  ;;  %v21642_v46 = vld [vmem:[%s28608_s5 + $0x22c] ss:$12 sps:$4 sm:$0xff]   ;;  %v21654_v25 = vld [vmem:[%s28608_s5 + $0x274] ss:$12 sps:$4 sm:$0xff]  }
 0xb92   : > { %10675 = vmatprep.mubr.bf16.mxu1 %v26060_v22  ;;  %18838 = vmatprep.mubr.msk.bf16.mxu0 %vm22046_vm3, %v28765_v37 }
 0xb93   : > { %10676 = vmatmul.mubr.bf16.gmra.mrb[24].mxu1 %v26055_v27  ;;  %10314 = vmatpush1.bf16.msra.mxu0 %v21634_v17  ;;  %v21646_v17 = vld [vmem:[%s28608_s5 + $0x258] ss:$12 sps:$4 sm:$0xff]  }
 0xb94   : > { %11159 = vmatpush1.bf16.msra.mxu1 %v28922_v21  ;;  %v9549_v63 = vpop.f32.mrb[236].mxu1  ;;  %10315 = vmatprep.subr.bf16.mxu0 %v21639_v54  ;;  %v28928_v54 = vld [vmem:[#allocation28_spill] sm:$0xff]  ;;  %v28930_v21 = vld [vmem:[#allocation66_spill] sm:$0xff] }
 0xb95   : > { %11160 = vmatprep.subr.bf16.mxu1 %v28923_v60  ;;  %v9551_v59 = vpop.f32.mrb[237].mxu1  ;;  %v21657_v60 = vld [vmem:[%s28608_s5 + $0x28c] ss:$12 sps:$4 sm:$0xff]  }
 0xb96   : > { %v9553_v0 = vpop.f32.mrb[238].mxu1 }
 0xb97   : > { %v26081_v41 = vpack.c.bf16 %v9553_v0, %v9549_v63  ;;  %v9555_v6 = vpop.f32.mrb[239].mxu1  ;;  %10316 = vmatpush1.bf16.msra.mxu0 %v21637_v42  ;;  %v28929_v42 = vld [vmem:[#allocation31_spill] sm:$0xff]  ;;  %v21652_v63 = vld [vmem:[%s28608_s5 + $0x270] ss:$12 sps:$4 sm:$0xff]  }
 0xb98   : > { %v26086_v31 = vpack.c.bf16 %v9555_v6, %v9551_v59  ;;  %11161 = vmatpush1.bf16.msra.mxu1 %v28924_v58  ;;  %10317 = vmatprep.subr.bf16.mxu0 %v21642_v46  ;;  %v21655_v58 = vld [vmem:[%s28608_s5 + $0x288] ss:$12 sps:$4 sm:$0xff]  }
 0xb99   : > { %11162 = vmatprep.subr.bf16.mxu1 %v28925_v52  ;;  %18839 = vmatmul.mubr.msk.bf16.gmra.mrb[180].mxu0 %vm7425_vm4, %v25670_v11  ;;  %v21648_v11 = vld [vmem:[%s28608_s5 + $0x25c] ss:$12 sps:$4 sm:$0xff]   ;;  %v21663_v52 = vld [vmem:[%s28608_s5 + $0x2a4] ss:$12 sps:$4 sm:$0xff]  }
 0xb9a   : > { %10683 = vmatprep.mubr.bf16.mxu1 %v26086_v31  ;;  %18842 = vmatprep.mubr.msk.bf16.mxu0 %vm22046_vm3, %v28765_v37 }
 0xb9b   : > { %10684 = vmatmul.mubr.bf16.gmra.mrb[28].mxu1 %v26081_v41  ;;  %10318 = vmatpush1.bf16.msra.mxu0 %v21640_v20 }
 0xb9c   : > { %11163 = vmatpush1.bf16.msra.mxu1 %v28926_v23  ;;  %v9559_v19 = vpop.f32.mrb[240].mxu1  ;;  %10319 = vmatprep.subr.bf16.mxu0 %v21645_v43  ;;  %v21661_v23 = vld [vmem:[%s28608_s5 + $0x2a0] ss:$12 sps:$4 sm:$0xff]  }
 0xb9d   : > { %11164 = vmatprep.subr.bf16.mxu1 %v28927_v1  ;;  %v9561_v34 = vpop.f32.mrb[241].mxu1 }
 0xb9e   : > { %v9563_v45 = vpop.f32.mrb[242].mxu1 }
 0xb9f   : > { %v26107_v24 = vpack.c.bf16 %v9563_v45, %v9559_v19  ;;  %v9565_v57 = vpop.f32.mrb[243].mxu1  ;;  %10320 = vmatpush1.bf16.msra.mxu0 %v21643_v18  ;;  %v28931_v18 = vld [vmem:[#allocation67_spill] sm:$0xff] }
 0xba0   : > { %v26112_v35 = vpack.c.bf16 %v9565_v57, %v9561_v34  ;;  %11165 = vmatpush1.bf16.msra.mxu1 %v28928_v54  ;;  %10321 = vmatprep.subr.bf16.mxu0 %v21648_v11  ;;  %v21666_v11 = vld [vmem:[%s28608_s5 + $0x2bc] ss:$12 sps:$4 sm:$0xff]  }
 0xba1   : > { %11275 = vmatprep.subr.bf16.mxu1 %v28929_v42  ;;  %18843 = vmatmul.mubr.msk.bf16.gmra.mrb[184].mxu0 %vm7425_vm4, %v28930_v21  ;;  %v21672_v42 = vld [vmem:[%s28608_s5 + $0x2d4] ss:$12 sps:$4 sm:$0xff]   ;;  %v28932_v21 = vld [vmem:[#allocation68_spill] sm:$0xff] }
 0xba2   : > { %10691 = vmatprep.mubr.bf16.mxu1 %v26112_v35  ;;  %18846 = vmatprep.mubr.msk.bf16.mxu0 %vm22046_vm3, %v28765_v37 }
 0xba3   : > { %10692 = vmatmul.mubr.bf16.gmra.mrb[32].mxu1 %v26107_v24  ;;  %10322 = vmatpush1.bf16.msra.mxu0 %v21646_v17  ;;  %v21664_v17 = vld [vmem:[%s28608_s5 + $0x2b8] ss:$12 sps:$4 sm:$0xff]  }
 0xba4   : > { %v9569_v46 = vpop.f32.mrb[244].mxu1  ;;  %10323 = vmatprep.subr.bf16.mxu0 %v21654_v25  ;;  %v26164_v25 = vld [vmem:[%s28607_s4 + $0x1fc] ss:$12 sps:$4 sm:$0xff]  }
 0xba5   : > { %v9571_v59 = vpop.f32.mrb[245].mxu1 }
 0xba6   : > { %v9573_v0 = vpop.f32.mrb[246].mxu1 }
 0xba7   : > { %v26131_v6 = vpack.c.bf16 %v9573_v0, %v9569_v46  ;;  %v9575_v20 = vpop.f32.mrb[247].mxu1  ;;  %10324 = vmatpush1.bf16.msra.mxu0 %v21652_v63  ;;  %v21670_v63 = vld [vmem:[%s28608_s5 + $0x2d0] ss:$12 sps:$4 sm:$0xff]   ;;  %v21675_v46 = vld [vmem:[%s28608_s5 + $0x2ec] ss:$12 sps:$4 sm:$0xff]  }
 0xba8   : > { %v26136_v43 = vpack.c.bf16 %v9575_v20, %v9571_v59  ;;  %10325 = vmatprep.subr.bf16.mxu0 %v21657_v60  ;;  %v26184_v60 = vld [vmem:[%s28607_s4 + $0x1f8] ss:$12 sps:$4 sm:$0xff]   ;;  %v21673_v59 = vld [vmem:[%s28608_s5 + $0x2e8] ss:$12 sps:$4 sm:$0xff]  }
 0xba9   : > { %18847 = vmatmul.mubr.msk.bf16.gmra.mrb[188].mxu0 %vm7425_vm4, %v28931_v18  ;;  %v26192_v0 = vld [vmem:[%s28607_s4 + $0x214] ss:$12 sps:$4 sm:$0xff]   ;;  %v21681_v20 = vld [vmem:[%s28608_s5 + $0x304] ss:$12 sps:$4 sm:$0xff]  }
 0xbaa   : > { %10699 = vmatprep.mubr.bf16.mxu1 %v26136_v43  ;;  %18850 = vmatprep.mubr.msk.bf16.mxu0 %vm22046_vm3, %v28765_v37  ;;  %v28934_v18 = vld [vmem:[#allocation33_spill] sm:$0xff] }
 0xbab   : > { %10700 = vmatmul.mubr.bf16.gmra.mrb[36].mxu1 %v26131_v6  ;;  %10326 = vmatpush1.bf16.msra.mxu0 %v21655_v58  ;;  %v21679_v58 = vld [vmem:[%s28608_s5 + $0x300] ss:$12 sps:$4 sm:$0xff]  }
 0xbac   : > { %v9579_v19 = vpop.f32.mrb[248].mxu1  ;;  %10327 = vmatprep.subr.bf16.mxu0 %v21663_v52  ;;  %v28933_v52 = vld [vmem:[#allocation30_spill] sm:$0xff] }
 0xbad   : > { %v9581_v1 = vpop.f32.mrb[249].mxu1  ;;  %v26155_v57 = vpack.c.bf16 %v9579_v19, %v9579_v19  ;;  %v21682_v19 = vld [vmem:[%s28608_s5 + $0x318] ss:$12 sps:$4 sm:$0xff]  }
 0xbae   : > { %v26153_v34 = vpack.c.bf16 %v9581_v1, %v9581_v1  ;;  %v9583_v45 = vpop.f32.mrb[250].mxu1  ;;  %v26223_v1 = vld [vmem:[%s28607_s4 + $0x22c] ss:$12 sps:$4 sm:$0xff]  }
 0xbaf   : > { %10328 = vmatpush1.bf16.msra.mxu0 %v21661_v23  ;;  %v9584_v54 = vpop.f32.mrb[251].mxu1  ;;  %v26214_v23 = vld [vmem:[%s28607_s4 + $0x210] ss:$12 sps:$4 sm:$0xff]   ;;  %v28936_v45 = vld [vmem:[#allocation35_spill] sm:$0xff] }
 0xbb0   : > { %10707 = vmatprep.mubr.bf16.mxu1 %v26153_v34  ;;  %10329 = vmatprep.subr.bf16.mxu0 %v21666_v11  ;;  %v28935_v11 = vld [vmem:[#allocation32_spill] sm:$0xff]  ;;  %v21688_v54 = vld [vmem:[%s28608_s5 + $0x330] ss:$12 sps:$4 sm:$0xff]  }
 0xbb1   : > { %18851 = vmatmul.mubr.msk.bf16.gmra.mrb[192].mxu0 %vm7425_vm4, %v28932_v21  ;;  %v28938_v21 = vld [vmem:[#allocation37_spill] sm:$0xff] }
 0xbb2   : > { %18854 = vmatprep.mubr.msk.bf16.mxu0 %vm22046_vm3, %v28765_v37 }
 0xbb3   : > { %10708 = vmatmul.mubr.bf16.gmra.mrb[40].mxu1 %v26155_v57  ;;  %10330 = vmatpush1.bf16.msra.mxu0 %v21664_v17  ;;  %v21690_v17 = vld [vmem:[%s28608_s5 + $0x334] ss:$12 sps:$4 sm:$0xff]  }
 0xbb4   : > { %11166 = vmatprep.mubr.bf16.mxu1 %v26164_v25  ;;  %10331 = vmatprep.subr.bf16.mxu0 %v21672_v42  ;;  %v28937_v42 = vld [vmem:[#allocation34_spill] sm:$0xff] }
 0xbb7   : > { %10332 = vmatpush1.bf16.msra.mxu0 %v21670_v63  ;;  %v26246_v63 = vld [vmem:[%s28607_s4 + $0x228] ss:$12 sps:$4 sm:$0xff]  }
 0xbb8   : > { %10333 = vmatprep.subr.bf16.mxu0 %v21675_v46  ;;  %v21691_v46 = vld [vmem:[%s28608_s5 + $0x348] ss:$12 sps:$4 sm:$0xff]  }
 0xbb9   : > { %18855 = vmatmul.mubr.msk.bf16.gmra.mrb[196].mxu0 %vm7425_vm4, %v25777_v44  ;;  %v21684_v44 = vld [vmem:[%s28608_s5 + $0x31c] ss:$12 sps:$4 sm:$0xff]  }
 0xbba   : > { %18858 = vmatprep.mubr.msk.bf16.mxu0 %vm22046_vm3, %v28765_v37 }
 0xbbb   : > { %11167 = vmatmul.mubr.bf16.vlgmr.msra.gmra.mrb[44].mxu1 %v26184_v60  ;;  %10334 = vmatpush1.bf16.msra.mxu0 %v21673_v59  ;;  %v28939_v59 = vld [vmem:[#allocation36_spill] sm:$0xff] }
 0xbbc   : > { %11276 = vmatpush1.bf16.msra.mxu1 %v28933_v52  ;;  %11176 = vmatprep.mubr.bf16.mxu1 %v26192_v0  ;;  %v21699_v52 = vld [vmem:[%s28608_s5 + $0x364] ss:$12 sps:$4 sm:$0xff]  }
 0xbbd   : > { %11277 = vmatprep.subr.bf16.mxu1 %v28934_v18  ;;  %10335 = vmatprep.subr.bf16.mxu0 %v21681_v20  ;;  %v26255_v20 = vld [vmem:[%s28607_s4 + $0x244] ss:$12 sps:$4 sm:$0xff]   ;;  %v28941_v18 = vld [vmem:[#allocation38_spill] sm:$0xff] }
 0xbbf   : > { %10336 = vmatpush1.bf16.msra.mxu0 %v21679_v58  ;;  %v28940_v58 = vld [vmem:[#allocation39_spill] sm:$0xff] }
 0xbc0   : > { %11278 = vmatpush1.bf16.msra.mxu1 %v28935_v11  ;;  %10337 = vmatprep.subr.bf16.mxu0 %v21684_v44  ;;  %v21697_v44 = vld [vmem:[%s28608_s5 + $0x360] ss:$12 sps:$4 sm:$0xff]  }
 0xbc1   : > { %11279 = vmatprep.subr.bf16.mxu1 %v28936_v45  ;;  %18859 = vmatmul.mubr.msk.bf16.gmra.mrb[200].mxu0 %vm7425_vm4, %v25796_v16  ;;  %v21693_v16 = vld [vmem:[%s28608_s5 + $0x34c] ss:$12 sps:$4 sm:$0xff]   ;;  %v26283_v45 = vld [vmem:[%s28607_s4 + $0x25c] ss:$12 sps:$4 sm:$0xff]  }
 0xbc2   : > { %18862 = vmatprep.mubr.msk.bf16.mxu0 %vm22046_vm3, %v28765_v37  ;;  %v26278_v11 = vld [vmem:[%s28607_s4 + $0x240] ss:$12 sps:$4 sm:$0xff]  }
 0xbc3   : > { %11177 = vmatmul.mubr.bf16.gmra.mrb[48].mxu1 %v26214_v23  ;;  %10338 = vmatpush1.bf16.msra.mxu0 %v21682_v19  ;;  %v28942_v19 = vld [vmem:[#allocation48_spill] sm:$0xff] }
 0xbc4   : > { %11280 = vmatpush1.bf16.msra.mxu1 %v28937_v42  ;;  %11186 = vmatprep.mubr.bf16.mxu1 %v26223_v1  ;;  %v26315_v42 = vld [vmem:[%s28607_s4 + $0x28c] ss:$12 sps:$4 sm:$0xff]  }
 0xbc5   : > { %11281 = vmatprep.subr.bf16.mxu1 %v28938_v21  ;;  %10339 = vmatprep.subr.bf16.mxu0 %v21690_v17  ;;  %v26294_v17 = vld [vmem:[%s28607_s4 + $0x258] ss:$12 sps:$4 sm:$0xff]   ;;  %v21727_v21 = vld [vmem:[%s28608_s5 + $0x394] ss:$12 sps:$4 sm:$0xff]  }
 0xbc7   : > { %10340 = vmatpush1.bf16.msra.mxu0 %v21688_v54  ;;  %v26299_v54 = vld [vmem:[%s28607_s4 + $0x274] ss:$12 sps:$4 sm:$0xff]  }
 0xbc8   : > { %11282 = vmatpush1.bf16.msra.mxu1 %v28939_v59  ;;  %10341 = vmatprep.subr.bf16.mxu0 %v21693_v16  ;;  %v26328_v16 = vld [vmem:[%s28607_s4 + $0x288] ss:$12 sps:$4 sm:$0xff]   ;;  %v21735_v59 = vld [vmem:[%s28608_s5 + $0x3c4] ss:$12 sps:$4 sm:$0xff]  }
 0xbc9   : > { %11283 = vmatprep.subr.bf16.mxu1 %v28940_v58  ;;  %18863 = vmatmul.mubr.msk.bf16.gmra.mrb[204].mxu0 %vm7425_vm4, %v25815_v40  ;;  %v21722_v40 = vld [vmem:[%s28608_s5 + $0x37c] ss:$12 sps:$4 sm:$0xff]  }
 0xbca   : > { %18866 = vmatprep.mubr.msk.bf16.mxu0 %vm22046_vm3, %v28765_v37  ;;  %v26362_v58 = vld [vmem:[%s28607_s4 + $0x2bc] ss:$12 sps:$4 sm:$0xff]  }
 0xbcb   : > { %11187 = vmatmul.mubr.bf16.gmra.mrb[52].mxu1 %v26246_v63  ;;  %10342 = vmatpush1.bf16.msra.mxu0 %v21691_v46  ;;  %v21732_v46 = vld [vmem:[%s28608_s5 + $0x3ac] ss:$12 sps:$4 sm:$0xff]  }
 0xbcc   : > { %11284 = vmatpush1.bf16.msra.mxu1 %v28941_v18  ;;  %11196 = vmatprep.mubr.bf16.mxu1 %v26255_v20  ;;  %v26385_v18 = vld [vmem:[%s28607_s4 + $0x2d4] ss:$12 sps:$4 sm:$0xff]  }
 0xbcd   : > { %18050 = vmatprep.subr.bf16.mxu1 %v28942_v19  ;;  %10343 = vmatprep.subr.bf16.mxu0 %v21699_v52  ;;  %v21733_v52 = vld [vmem:[%s28608_s5 + $0x3c0] ss:$12 sps:$4 sm:$0xff]   ;;  %v26398_v19 = vld [vmem:[%s28607_s4 + $0x2d0] ss:$12 sps:$4 sm:$0xff]  }
 0xbcf   : > { %10344 = vmatpush1.bf16.msra.mxu0 %v21697_v44  ;;  %v21739_v44 = vld [vmem:[%s28608_s5 + $0x3dc] ss:$12 sps:$4 sm:$0xff]  }
 0xbd0   : > { %10454 = vmatprep.subr.bf16.mxu0 %v21722_v40  ;;  %v16961_v40 = vld [vmem:[%s28607_s4 + $0x2e8] sm:$0xff] }
 0xbd1   : > { %18867 = vmatmul.mubr.msk.bf16.gmra.mrb[208].mxu0 %vm7425_vm4, %v25834_v50  ;;  %v26310_v50 = vld [vmem:[%s28607_s4 + $0x270] ss:$12 sps:$4 sm:$0xff]  }
 0xbd2   : > { %18870 = vmatprep.mubr.msk.bf16.mxu0 %vm22046_vm3, %v28765_v37 }
 0xbd3   : > { %11197 = vmatmul.mubr.bf16.gmra.mrb[56].mxu1 %v26278_v11 }
 0xbd4   : > { %11206 = vmatprep.mubr.bf16.mxu1 %v26283_v45 }
 0xbd9   : > { %18871 = vmatmul.mubr.msk.bf16.gmra.mrb[212].mxu0 %vm7425_vm4, %v25853_v12  ;;  %v21720_v12 = vld [vmem:[%s28608_s5 + $0x378] ss:$12 sps:$4 sm:$0xff]  }
 0xbda   : > { %18874 = vmatprep.mubr.msk.bf16.mxu0 %vm22046_vm3, %v28765_v37 }
 0xbdb   : > { %11207 = vmatmul.mubr.bf16.gmra.mrb[60].mxu1 %v26294_v17 }
 0xbdc   : > { %11216 = vmatprep.mubr.bf16.mxu1 %v26299_v54 }
 0xbe1   : > { %18875 = vmatmul.mubr.msk.bf16.gmra.mrb[216].mxu0 %vm7425_vm4, %v25871_v2  ;;  %v26336_v2 = vld [vmem:[%s28607_s4 + $0x2a4] ss:$12 sps:$4 sm:$0xff]  }
 0xbe2   : > { %10345 = vmatprep.mubr.bf16.mxu0 %v25986_v15  ;;  %v21725_v15 = vld [vmem:[%s28608_s5 + $0x390] ss:$12 sps:$4 sm:$0xff]  }
 0xbe3   : > { %11217 = vmatmul.mubr.bf16.gmra.mrb[64].mxu1 %v26310_v50 }
 0xbe4   : > { %11226 = vmatprep.mubr.bf16.mxu1 %v26315_v42 }
 0xbe9   : > { %10346 = vmatmul.mubr.bf16.vlgmr.msra.gmra.mrb[44].mxu0 %v25984_v30  ;;  %v21730_v30 = vld [vmem:[%s28608_s5 + $0x3a8] ss:$12 sps:$4 sm:$0xff]  }
 0xbea   : > { %10355 = vmatprep.mubr.bf16.mxu0 %v25996_v14  ;;  %10455 = vmatpush1.bf16.msra.mxu0 %v21720_v12  ;;  %v26354_v14 = vld [vmem:[%s28607_s4 + $0x2a0] ss:$12 sps:$4 sm:$0xff]   ;;  %v26400_v12 = vcombine.high %v16961_v40, %v16961_v40 }
 0xbeb   : > { %11227 = vmatmul.mubr.bf16.gmra.mrb[68].mxu1 %v26328_v16  ;;  %10456 = vmatprep.subr.bf16.mxu0 %v21727_v21 }
 0xbec   : > { %11236 = vmatprep.mubr.bf16.mxu1 %v26336_v2 }
 0xbee   : > { %10457 = vmatpush1.bf16.msra.mxu0 %v21725_v15 }
 0xbef   : > { %10458 = vmatprep.subr.bf16.mxu0 %v21732_v46 }
 0xbf1   : > { %10356 = vmatmul.mubr.bf16.gmra.mrb[48].mxu0 %v25994_v9  ;;  %v21737_v9 = vld [vmem:[%s28608_s5 + $0x3d8] ss:$12 sps:$4 sm:$0xff]  }
 0xbf2   : > { %10365 = vmatprep.mubr.bf16.mxu0 %v26008_v62  ;;  %10459 = vmatpush1.bf16.msra.mxu0 %v21730_v30  ;;  %v26380_v62 = vld [vmem:[%s28607_s4 + $0x2b8] ss:$12 sps:$4 sm:$0xff]  }
 0xbf3   : > { %11237 = vmatmul.mubr.bf16.gmra.mrb[72].mxu1 %v26354_v14  ;;  %10460 = vmatprep.subr.bf16.mxu0 %v21735_v59 }
 0xbf4   : > { %11246 = vmatprep.mubr.bf16.mxu1 %v26362_v58 }
 0xbf6   : > { %10461 = vmatpush1.bf16.msra.mxu0 %v21733_v52 }
 0xbf7   : > { %10462 = vmatprep.subr.bf16.mxu0 %v21739_v44 }
 0xbf9   : > { %10366 = vmatmul.mubr.bf16.gmra.mrb[52].mxu0 %v26006_v53  ;;  %v26406_v53 = vcombine.low %v16961_v40, %v16961_v40 }
 0xbfa   : > { %10375 = vmatprep.mubr.bf16.mxu0 %v26020_v39  ;;  %10463 = vmatpush1.bf16.msra.mxu0 %v21737_v9  ;;  %v28946_v9 = vld [vmem:[#allocation51_spill] sm:$0xff] }
 0xbfb   : > { %11247 = vmatmul.mubr.bf16.gmra.mrb[76].mxu1 %v26380_v62  ;;  %18878 = vmatprep.subr.bf16.mxu0 %v28765_v37 }
 0xbfc   : > { %11256 = vmatprep.mubr.bf16.mxu1 %v26385_v18 }
 0xc01   : > { %10376 = vmatmul.mubr.bf16.gmra.mrb[56].mxu0 %v26018_v26 }
 0xc02   : > { %10385 = vmatprep.mubr.bf16.mxu0 %v26032_v49  ;;  %v26417_v49 = vld [vmem:[%s28607_s4 + $0x200] ss:$12 sps:$4 sm:$0xff]  }
 0xc03   : > { %11257 = vmatmul.mubr.bf16.gmra.mrb[80].mxu1 %v26398_v19  ;;  %28943 = vst [vmem:[#allocation46_spill] sm:$0xff] %v26417_v49 }
 0xc04   : > { %11266 = vmatprep.mubr.bf16.mxu1 %v26400_v12 }
 0xc09   : > { %10386 = vmatmul.mubr.bf16.gmra.mrb[60].mxu0 %v26030_v36 }
 0xc0a   : > { %10395 = vmatprep.mubr.bf16.mxu0 %v26045_v48 }
 0xc0b   : > { %11267 = vmatmul.mubr.bf16.gmra.mrb[84].mxu1 %v26406_v53 }
 0xc0c   : > { %11307 = vmatprep.mubr.bf16.mxu1 %v28856_v61  ;;  %v17870_v39 = vpop.f32.mrb[132].mxu0 }
 0xc0d   : > { %v17871_v21 = vpop.f32.mrb[133].mxu0 }
 0xc0e   : > { %v26412_v15 = vadd.f32 %v17871_v21, %v17870_v39  ;;  %v17873_v26 = vpop.f32.mrb[134].mxu0  ;;  %v28948_v21 = vld [vmem:[#allocation43_spill] sm:$0xff] }
 0xc0f   : > { %v17874_v46 = vpop.f32.mrb[135].mxu0 }
 0xc10   : > { %v26419_v30 = vadd.f32 %v17874_v46, %v17873_v26 }
 0xc11   : > { %10396 = vmatmul.mubr.bf16.gmra.mrb[64].mxu0 %v26042_v28  ;;  %v26433_v28 = vld [vmem:[%s28607_s4 + $0x218] ss:$12 sps:$4 sm:$0xff]  }
 0xc12   : > { %10405 = vmatprep.mubr.bf16.mxu0 %v26060_v22  ;;  %28944 = vst [vmem:[#allocation55_spill] sm:$0xff] %v26433_v28 }
 0xc13   : > { %16996 = vmatmul.mubr.msk.bf16.vlgmr.msra.gmra.mrb[44].mxu1 %vm7425_vm4, %v26417_v49 }
 0xc14   : > { %18051 = vmatpush3.bf16.msra.mxu1 %v28881_v38  ;;  %11317 = vmatprep.mubr.bf16.mxu1 %v28856_v61  ;;  %v17876_v36 = vpop.f32.mrb[136].mxu0  ;;  %v28945_v38 = vld [vmem:[#allocation50_spill] sm:$0xff] }
 0xc15   : > { %18052 = vmatprep.subr.bf16.mxu1 %v28882_v7  ;;  %v17877_v48 = vpop.f32.mrb[137].mxu0 }
 0xc16   : > { %v26428_v59 = vadd.f32 %v17877_v48, %v17876_v36  ;;  %v17879_v52 = vpop.f32.mrb[138].mxu0  ;;  %v28950_v36 = vld [vmem:[#allocation53_spill] sm:$0xff] }
 0xc17   : > { %v17880_v22 = vpop.f32.mrb[139].mxu0 }
 0xc18   : > { %18053 = vmatpush3.bf16.msra.mxu1 %v28884_v3  ;;  %v26436_v44 = vadd.f32 %v17880_v22, %v17879_v52 }
 0xc19   : > { %18054 = vmatprep.subr.bf16.mxu1 %v28945_v38  ;;  %10406 = vmatmul.mubr.bf16.gmra.mrb[68].mxu0 %v26055_v27  ;;  %v26451_v27 = vld [vmem:[%s28607_s4 + $0x230] ss:$12 sps:$4 sm:$0xff]  }
 0xc1a   : > { %10415 = vmatprep.mubr.bf16.mxu0 %v26086_v31  ;;  %28947 = vst [vmem:[#allocation47_spill] sm:$0xff] %v26451_v27  ;;  %v28952_v38 = vld [vmem:[#allocation45_spill] sm:$0xff] }
 0xc1b   : > { %16997 = vmatmul.mubr.msk.bf16.gmra.mrb[48].mxu1 %vm7425_vm4, %v26433_v28 }
 0xc1c   : > { %18055 = vmatpush3.bf16.msra.mxu1 %v28887_v55  ;;  %11327 = vmatprep.mubr.bf16.mxu1 %v28856_v61  ;;  %v17882_v7 = vpop.f32.mrb[140].mxu0  ;;  %v28949_v55 = vld [vmem:[#allocation52_spill] sm:$0xff] }
 0xc1d   : > { %18056 = vmatprep.subr.bf16.mxu1 %v28946_v9  ;;  %v17883_v40 = vpop.f32.mrb[141].mxu0 }
 0xc1e   : > { %v26446_v3 = vadd.f32 %v17883_v40, %v17882_v7  ;;  %v17885_v39 = vpop.f32.mrb[142].mxu0 }
 0xc1f   : > { %v17886_v31 = vpop.f32.mrb[143].mxu0 }
 0xc20   : > { %18057 = vmatpush3.bf16.msra.mxu1 %v28948_v21  ;;  %v26454_v26 = vadd.f32 %v17886_v31, %v17885_v39 }
 0xc21   : > { %18058 = vmatprep.subr.bf16.mxu1 %v28949_v55  ;;  %10416 = vmatmul.mubr.bf16.gmra.mrb[72].mxu0 %v26081_v41  ;;  %v26469_v41 = vld [vmem:[%s28607_s4 + $0x248] ss:$12 sps:$4 sm:$0xff]  }
 0xc22   : > { %10425 = vmatprep.mubr.bf16.mxu0 %v26112_v35  ;;  %28951 = vst [vmem:[#allocation56_spill] sm:$0xff] %v26469_v41 }
 0xc23   : > { %16998 = vmatmul.mubr.msk.bf16.gmra.mrb[52].mxu1 %vm7425_vm4, %v26451_v27 }
 0xc24   : > { %18059 = vmatpush3.bf16.msra.mxu1 %v28893_v13  ;;  %11337 = vmatprep.mubr.bf16.mxu1 %v28856_v61  ;;  %v17888_v46 = vpop.f32.mrb[144].mxu0  ;;  %v28953_v13 = vld [vmem:[#allocation54_spill] sm:$0xff] }
 0xc25   : > { %18060 = vmatprep.subr.bf16.mxu1 %v28950_v36  ;;  %v17889_v48 = vpop.f32.mrb[145].mxu0 }
 0xc26   : > { %v26464_v52 = vadd.f32 %v17889_v48, %v17888_v46  ;;  %v17891_v22 = vpop.f32.mrb[146].mxu0 }
 0xc27   : > { %v17892_v35 = vpop.f32.mrb[147].mxu0 }
 0xc28   : > { %18061 = vmatpush3.bf16.msra.mxu1 %v28952_v38  ;;  %v26472_v7 = vadd.f32 %v17892_v35, %v17891_v22 }
 0xc29   : > { %18062 = vmatprep.subr.bf16.mxu1 %v28953_v13  ;;  %10426 = vmatmul.mubr.bf16.gmra.mrb[76].mxu0 %v26107_v24  ;;  %v26487_v24 = vld [vmem:[%s28607_s4 + $0x260] ss:$12 sps:$4 sm:$0xff]  }
 0xc2a   : > { %10435 = vmatprep.mubr.bf16.mxu0 %v26136_v43  ;;  %28954 = vst [vmem:[#allocation62_spill] sm:$0xff] %v26487_v24 }
 0xc2b   : > { %16999 = vmatmul.mubr.msk.bf16.gmra.mrb[56].mxu1 %vm7425_vm4, %v26469_v41 }
 0xc2c   : > { %18063 = vmatpush3.bf16.msra.mxu1 %v28898_v33  ;;  %11347 = vmatprep.mubr.bf16.mxu1 %v28856_v61  ;;  %v17894_v9 = vpop.f32.mrb[148].mxu0  ;;  %v28955_v33 = vld [vmem:[#allocation5_spill] sm:$0xff] }
 0xc2d   : > { %18064 = vmatprep.subr.bf16.mxu1 %v28899_v10  ;;  %v17895_v40 = vpop.f32.mrb[149].mxu0  ;;  %v7222_v10 = vld [vmem:[%s28609_s6] sm:$0x7]  ;;  %v28956_v55 = vsub.s32 2, %v28955_v33 }
 0xc2e   : > { %v26482_v39 = vadd.f32 %v17895_v40, %v17894_v9  ;;  %v17897_v31 = vpop.f32.mrb[150].mxu0  ;;  %v28958_v9 = vld [vmem:[#allocation6_spill] sm:$0xff] }
 0xc2f   : > { %v17898_v43 = vpop.f32.mrb[151].mxu0  ;;  %v26501_v46 = vrot.slane %v7222_v10, %v28956_v55 }
 0xc30   : > { %18065 = vmatpush3.bf16.msra.mxu1 %v28900_v4  ;;  %v26490_v21 = vadd.f32 %v17898_v43, %v17897_v31 }
 0xc31   : > { %10436 = vmatmul.mubr.bf16.gmra.mrb[80].mxu0 %v26131_v6  ;;  %v19278_v40 = vadd.f32 %v28958_v9, %v26501_v46 }
 0xc32   : > { %10445 = vmatprep.mubr.bf16.mxu0 %v26153_v34  ;;  %v26509_v34 = vld [vmem:[%s28607_s4 + $0x278] ss:$12 sps:$4 sm:$0xff]  }
 0xc33   : > { %17000 = vmatmul.mubr.msk.bf16.gmra.mrb[60].mxu1 %vm7425_vm4, %v26487_v24  ;;  %28957 = vst [vmem:[#allocation7_spill] sm:$0xff] %v26509_v34 }
 0xc34   : > { %11357 = vmatprep.mubr.bf16.mxu1 %v28856_v61  ;;  %v17900_v4 = vpop.f32.mrb[152].mxu0 }
 0xc35   : > { %v17901_v36 = vpop.f32.mrb[153].mxu0 }
 0xc36   : > { %v17968_v48 = vpop.f32.mrb[0].mxu1  ;;  %v26504_v22 = vadd.f32 %v17901_v36, %v17900_v4  ;;  %v17903_v6 = vpop.f32.mrb[154].mxu0  ;;  %v28960_v36 = vld [vmem:[#allocation69_spill] sm:$0xff] }
 0xc37   : > { %v17969_v35 = vpop.f32.mrb[1].mxu1  ;;  %v17904_v38 = vpop.f32.mrb[155].mxu0  ;;  %v19282_v33 = vadd.f32 %v28960_v36, %v26501_v46  ;;  %v28963_v36 = vld [vmem:[#allocation70_spill] sm:$0xff] }
 0xc38   : > { %v17970_v13 = vadd.f32 %v17969_v35, %v17968_v48  ;;  %v17971_v31 = vpop.f32.mrb[2].mxu1  ;;  %v26513_v43 = vadd.f32 %v17904_v38, %v17903_v6 }
 0xc39   : > { %10446 = vmatmul.mubr.bf16.gmra.mrb[84].mxu0 %v26155_v57  ;;  %v17972_v10 = vpop.f32.mrb[3].mxu1 }
 0xc3a   : > { %v26516_v55 = vadd.f32 %v19278_v40, %v17970_v13  ;;  %v17973_v4 = vadd.f32 %v17972_v10, %v17971_v31  ;;  %10486 = vmatprep.mubr.bf16.mxu0 %v28856_v61  ;;  %v26531_v40 = vld [vmem:[%s28607_s4 + $0x290] ss:$12 sps:$4 sm:$0xff]  }
 0xc3b   : > { %17001 = vmatmul.mubr.msk.bf16.gmra.mrb[64].mxu1 %vm7425_vm4, %v26509_v34  ;;  %28962 = vst [vmem:[#allocation11_spill] sm:$0xff] %v26531_v40 }
 0xc3c   : > { %28959 = vst [vmem:[#allocation9_spill] sm:$0xff] %v26516_v55  ;;  %v26523_v48 = vadd.f32 %v19282_v33, %v17973_v4  ;;  %11367 = vmatprep.mubr.bf16.mxu1 %v28856_v61  ;;  %v17906_v6 = vpop.f32.mrb[156].mxu0  ;;  %v19286_v33 = vadd.f32 %v28963_v36, %v26501_v46 }
 0xc3d   : > { %v17907_v35 = vpop.f32.mrb[157].mxu0 }
 0xc3e   : > { %28961 = vst [vmem:[#allocation8_spill] sm:$0xff] %v26523_v48  ;;  %v17974_v38 = vpop.f32.mrb[4].mxu1  ;;  %v26526_v57 = vadd.f32 %v17907_v35, %v17906_v6  ;;  %v17909_v13 = vpop.f32.mrb[158].mxu0  ;;  %v28965_v35 = vld [vmem:[#allocation71_spill] sm:$0xff] }
 0xc3f   : > { %v17975_v9 = vpop.f32.mrb[5].mxu1  ;;  %v17910_v31 = vpop.f32.mrb[159].mxu0  ;;  %v19290_v24 = vadd.f32 %v28965_v35, %v26501_v46 }
 0xc40   : > { %v17976_v10 = vadd.f32 %v17975_v9, %v17974_v38  ;;  %v17977_v4 = vpop.f32.mrb[6].mxu1  ;;  %v26535_v48 = vadd.f32 %v17910_v31, %v17909_v13 }
 0xc41   : > { %v17978_v55 = vpop.f32.mrb[7].mxu1 }
 0xc42   : > { %v26537_v34 = vadd.f32 %v19286_v33, %v17976_v10  ;;  %v17979_v6 = vadd.f32 %v17978_v55, %v17977_v4  ;;  %v26551_v55 = vld [vmem:[%s28607_s4 + $0x2a8] ss:$12 sps:$4 sm:$0xff]  }
 0xc43   : > { %17002 = vmatmul.mubr.msk.bf16.gmra.mrb[68].mxu1 %vm7425_vm4, %v26531_v40  ;;  %28967 = vst [vmem:[#allocation10_spill] sm:$0xff] %v26551_v55  ;;  %v28968_v4 = vld [vmem:[#allocation72_spill] sm:$0xff] }
 0xc44   : > { %28964 = vst [vmem:[#allocation63_spill] sm:$0xff] %v26537_v34  ;;  %v26543_v41 = vadd.f32 %v19290_v24, %v17979_v6  ;;  %11377 = vmatprep.mubr.bf16.mxu1 %v28856_v61  ;;  %v17912_v38 = vpop.f32.mrb[160].mxu0  ;;  %v19294_v24 = vadd.f32 %v28968_v4, %v26501_v46 }
 0xc45   : > { %v17913_v9 = vpop.f32.mrb[161].mxu0 }
 0xc46   : > { %28966 = vst [vmem:[#allocation64_spill] sm:$0xff] %v26543_v41  ;;  %v17980_v36 = vpop.f32.mrb[8].mxu1  ;;  %v26546_v27 = vadd.f32 %v17913_v9, %v17912_v38  ;;  %v17915_v13 = vpop.f32.mrb[162].mxu0  ;;  %v28970_v9 = vld [vmem:[#allocation73_spill] sm:$0xff] }
 0xc47   : > { %v17981_v31 = vpop.f32.mrb[9].mxu1  ;;  %v17916_v10 = vpop.f32.mrb[163].mxu0  ;;  %v19298_v40 = vadd.f32 %v28970_v9, %v26501_v46 }
 0xc48   : > { %v17982_v33 = vadd.f32 %v17981_v31, %v17980_v36  ;;  %v17983_v6 = vpop.f32.mrb[10].mxu1  ;;  %v26555_v35 = vadd.f32 %v17916_v10, %v17915_v13  ;;  %v21745_v13 = vld [vmem:[%s28608_s5 + $0x4b8] ss:$12 sps:$4 sm:$0xff]  }
 0xc49   : > { %v17984_v41 = vpop.f32.mrb[11].mxu1  ;;  %18148 = vmatprep.subr.bf16.mxu1 %v21745_v13  ;;  %v28975_v13 = vld [vmem:[#allocation75_spill] sm:$0xff] }
 0xc4a   : > { %v26557_v34 = vadd.f32 %v19294_v24, %v17982_v33  ;;  %v17985_v38 = vadd.f32 %v17984_v41, %v17983_v6  ;;  %v26574_v24 = vld [vmem:[%s28607_s4 + $0x2c0] ss:$12 sps:$4 sm:$0xff]  }
 0xc4b   : > { %17003 = vmatmul.mubr.msk.bf16.gmra.mrb[72].mxu1 %vm7425_vm4, %v26551_v55  ;;  %28972 = vst [vmem:[#allocation15_spill] sm:$0xff] %v26574_v24 }
 0xc4c   : > { %28969 = vst [vmem:[#allocation13_spill] sm:$0xff] %v26557_v34  ;;  %v26563_v28 = vadd.f32 %v19298_v40, %v17985_v38  ;;  %11387 = vmatprep.mubr.bf16.mxu1 %v28856_v61  ;;  %v17918_v36 = vpop.f32.mrb[164].mxu0  ;;  %v28973_v38 = vld [vmem:[#allocation74_spill] sm:$0xff] }
 0xc4d   : > { %v17919_v31 = vpop.f32.mrb[165].mxu0  ;;  %v19302_v9 = vadd.f32 %v28973_v38, %v26501_v46 }
 0xc4e   : > { %28971 = vst [vmem:[#allocation12_spill] sm:$0xff] %v26563_v28  ;;  %v17986_v10 = vpop.f32.mrb[12].mxu1  ;;  %v26569_v33 = vadd.f32 %v17919_v31, %v17918_v36  ;;  %v17921_v41 = vpop.f32.mrb[166].mxu0  ;;  %v19306_v31 = vadd.f32 %v28975_v13, %v26501_v46 }
 0xc4f   : > { %v17987_v4 = vpop.f32.mrb[13].mxu1  ;;  %v17922_v40 = vpop.f32.mrb[167].mxu0 }
 0xc50   : > { %v17988_v6 = vadd.f32 %v17987_v4, %v17986_v10  ;;  %v17989_v28 = vpop.f32.mrb[14].mxu1  ;;  %v26578_v34 = vadd.f32 %v17922_v40, %v17921_v41 }
 0xc51   : > { %v17990_v55 = vpop.f32.mrb[15].mxu1 }
 0xc52   : > { %v26580_v49 = vadd.f32 %v19302_v9, %v17988_v6  ;;  %v17991_v36 = vadd.f32 %v17990_v55, %v17989_v28  ;;  %v26594_v28 = vld [vmem:[%s28607_s4 + $0x2d8] ss:$12 sps:$4 sm:$0xff]   ;;  %v28978_v9 = vld [vmem:[#allocation76_spill] sm:$0xff] }
 0xc53   : > { %17004 = vmatmul.mubr.msk.bf16.gmra.mrb[76].mxu1 %vm7425_vm4, %v26574_v24  ;;  %28977 = vst [vmem:[#allocation17_spill] sm:$0xff] %v26594_v28 }
 0xc54   : > { %28974 = vst [vmem:[#allocation65_spill] sm:$0xff] %v26580_v49  ;;  %v26586_v56 = vadd.f32 %v19306_v31, %v17991_v36  ;;  %11397 = vmatprep.mubr.bf16.mxu1 %v28856_v61  ;;  %v17924_v10 = vpop.f32.mrb[168].mxu0  ;;  %v19310_v36 = vadd.f32 %v28978_v9, %v26501_v46 }
 0xc55   : > { %v17925_v4 = vpop.f32.mrb[169].mxu0 }
 0xc56   : > { %28976 = vst [vmem:[#allocation14_spill] sm:$0xff] %v26586_v56  ;;  %v17992_v38 = vpop.f32.mrb[16].mxu1  ;;  %v26589_v5 = vadd.f32 %v17925_v4, %v17924_v10  ;;  %v17927_v41 = vpop.f32.mrb[170].mxu0  ;;  %v28980_v4 = vld [vmem:[#allocation77_spill] sm:$0xff] }
 0xc57   : > { %v17993_v40 = vpop.f32.mrb[17].mxu1  ;;  %v17928_v55 = vpop.f32.mrb[171].mxu0  ;;  %v19314_v24 = vadd.f32 %v28980_v4, %v26501_v46 }
 0xc58   : > { %v17994_v6 = vadd.f32 %v17993_v40, %v17992_v38  ;;  %v17995_v13 = vpop.f32.mrb[18].mxu1  ;;  %v26598_v31 = vadd.f32 %v17928_v55, %v17927_v41 }
 0xc59   : > { %v17996_v56 = vpop.f32.mrb[19].mxu1 }
 0xc5a   : > { %v26600_v49 = vadd.f32 %v19310_v36, %v17994_v6  ;;  %v17997_v10 = vadd.f32 %v17996_v56, %v17995_v13  ;;  %v26614_v56 = vld [vmem:[%s28607_s4 + $0x2f0] ss:$0 sps:$4 sm:$0xff]   ;;  %v28982_v13 = vld [vmem:[#allocation78_spill] sm:$0xff] }
 0xc5b   : > { %17005 = vmatmul.mubr.msk.bf16.gmra.mrb[80].mxu1 %vm7425_vm4, %v26594_v28 }
 0xc5c   : > { %28979 = vst [vmem:[#allocation16_spill] sm:$0xff] %v26600_v49  ;;  %v26606_v32 = vadd.f32 %v19314_v24, %v17997_v10  ;;  %v17930_v47 = vpop.f32.mrb[172].mxu0  ;;  %11407 = vmatprep.mubr.bf16.mxu1 %v28856_v61  ;;  %v19318_v24 = vadd.f32 %v28982_v13, %v26501_v46 }
 0xc5d   : > { %v17931_v38 = vpop.f32.mrb[173].mxu0 }
 0xc5e   : > { %28981 = vst [vmem:[#allocation19_spill] sm:$0xff] %v26606_v32  ;;  %v17998_v40 = vpop.f32.mrb[20].mxu1  ;;  %v26609_v9 = vadd.f32 %v17931_v38, %v17930_v47  ;;  %v17933_v41 = vpop.f32.mrb[174].mxu0  ;;  %v28984_v47 = vld [vmem:[#allocation79_spill] sm:$0xff] }
 0xc5f   : > { %v17999_v55 = vpop.f32.mrb[21].mxu1  ;;  %v17934_v6 = vpop.f32.mrb[175].mxu0  ;;  %v19322_v38 = vadd.f32 %v28984_v47, %v26501_v46  ;;  %v28985_v47 = vld [vmem:[#allocation80_spill] sm:$0xff] }
 0xc60   : > { %v18000_v36 = vadd.f32 %v17999_v55, %v17998_v40  ;;  %v18001_v10 = vpop.f32.mrb[22].mxu1 }
 0xc61   : > { %v18002_v4 = vpop.f32.mrb[23].mxu1 }
 0xc62   : > { %v26618_v32 = vadd.f32 %v19318_v24, %v18000_v36  ;;  %v18003_v49 = vadd.f32 %v18002_v4, %v18001_v10 }
 0xc63   : > { %17006 = vmatmul.mubr.msk.bf16.gmra.mrb[84].mxu1 %vm7425_vm4, %v26614_v56 }
 0xc64   : > { %28983 = vst [vmem:[#allocation18_spill] sm:$0xff] %v26618_v32  ;;  %v26624_v41 = vadd.f32 %v19322_v38, %v18003_v49  ;;  %v9740_v6 = vpop.f32.mrb[176].mxu0  ;;  %11448 = vmatprep.mubr.bf16.mxu1 %v26164_v25  ;;  %v19326_v32 = vadd.f32 %v28985_v47, %v26501_v46  ;;  %v21740_v49 = vld [vmem:[%s28608_s5 + $0x380] ss:$12 sps:$4 sm:$0xff]  }
 0xc65   : > { %v9741_v40 = vadd.f32 %v26412_v15, %v9740_v6  ;;  %v18836_v55 = vpop.f32.mrb[177].mxu0 }
 0xc66   : > { %v9743_v13 = vpop.f32.mrb[178].mxu0  ;;  %v18004_v28 = vpop.f32.mrb[24].mxu1  ;;  %v28986_v55 = vld [vmem:[#allocation81_spill] sm:$0xff] }
 0xc67   : > { %v9744_v36 = vadd.f32 %v26419_v30, %v9743_v13  ;;  %v18005_v24 = vpop.f32.mrb[25].mxu1  ;;  %v18837_v10 = vpop.f32.mrb[179].mxu0  ;;  %v19330_v30 = vadd.f32 %v28986_v55, %v26501_v46 }
 0xc68   : > { %v18006_v4 = vadd.f32 %v18005_v24, %v18004_v28  ;;  %v18007_v8 = vpop.f32.mrb[26].mxu1  ;;  %v21746_v28 = vld [vmem:[%s28608_s5 + $0x3f8] ss:$12 sps:$4 sm:$0xff]  }
 0xc69   : > { %v26634_v38 = vpack.c.bf16 %v9744_v36, %v9741_v40  ;;  %v18008_v25 = vpop.f32.mrb[27].mxu1  ;;  %v21747_v40 = vld [vmem:[%s28608_s5 + $0x4d0] ss:$12 sps:$4 sm:$0xff]  }
 0xc6a   : > { %v26636_v15 = vadd.f32 %v19326_v32, %v18006_v4  ;;  %v18009_v6 = vadd.f32 %v18008_v25, %v18007_v8  ;;  %v21741_v8 = vld [vmem:[%s28608_s5 + $0x398] ss:$12 sps:$4 sm:$0xff]   ;;  %v21748_v4 = vld [vmem:[%s28608_s5 + $0x410] ss:$12 sps:$4 sm:$0xff]  }
 0xc6b   : > { %16899 = vmatmul.mubr.msk.bf16.vlgmr.msra.gmra.mrb[44].mxu0 %vm7425_vm4, %v26634_v38  ;;  %11449 = vmatmul.mubr.bf16.vlgmr.msra.gmra.mrb[88].mxu1 %v26184_v60 }
 0xc6c   : > { %v26649_v13 = vadd.f32 %v19330_v30, %v18009_v6  ;;  %v9748_v32 = vpop.f32.mrb[180].mxu0  ;;  %10496 = vmatprep.mubr.bf16.mxu0 %v28856_v61  ;;  %18879 = vmatpush3.bf16.msra.mxu0 %v21740_v49 }
 0xc6d   : > { %v9749_v36 = vadd.f32 %v26428_v59, %v9748_v32  ;;  %v18840_v24 = vpop.f32.mrb[181].mxu0  ;;  %11456 = vmatprep.mubr.bf16.mxu1 %v26192_v0  ;;  %18880 = vmatprep.subr.bf16.mxu0 %v28765_v37  ;;  %v28987_v59 = vld [vmem:[#allocation40_spill] sm:$0xff] }
 0xc6e   : > { %v9751_v60 = vpop.f32.mrb[182].mxu0  ;;  %v18010_v10 = vpop.f32.mrb[28].mxu1  ;;  %18149 = vmatpush3.bf16.msra.mxu1 %v21746_v28  ;;  %v19334_v55 = vadd.f32 %v28987_v59, %v26501_v46  ;;  %v21742_v28 = vld [vmem:[%s28608_s5 + $0x3b0] ss:$12 sps:$4 sm:$0xff]  }
 0xc6f   : > { %v9752_v47 = vadd.f32 %v26436_v44, %v9751_v60  ;;  %v18011_v49 = vpop.f32.mrb[29].mxu1  ;;  %v18841_v25 = vpop.f32.mrb[183].mxu0  ;;  %18150 = vmatprep.subr.bf16.mxu1 %v21747_v40  ;;  %v21749_v44 = vld [vmem:[%s28608_s5 + $0x4e8] ss:$12 sps:$4 sm:$0xff]  }
 0xc70   : > { %v18012_v6 = vadd.f32 %v18011_v49, %v18010_v10  ;;  %v18013_v30 = vpop.f32.mrb[30].mxu1  ;;  %18881 = vmatpush3.bf16.msra.mxu0 %v21741_v8  ;;  %v28988_v60 = vld [vmem:[#allocation49_spill] sm:$0xff] }
 0xc71   : > { %v26664_v0 = vpack.c.bf16 %v9752_v47, %v9749_v36  ;;  %v18014_v32 = vpop.f32.mrb[31].mxu1  ;;  %18882 = vmatprep.subr.bf16.mxu0 %v28765_v37  ;;  %v19338_v10 = vadd.f32 %v28988_v60, %v26501_v46  ;;  %v21750_v8 = vld [vmem:[%s28608_s5 + $0x428] ss:$12 sps:$4 sm:$0xff]   ;;  %v21751_v36 = vld [vmem:[%s28608_s5 + $0x500] ss:$12 sps:$4 sm:$0xff]  }
 0xc72   : > { %v26673_v40 = vadd.f32 %v19334_v55, %v18012_v6  ;;  %v18015_v24 = vadd.f32 %v18014_v32, %v18013_v30  ;;  %18151 = vmatpush3.bf16.msra.mxu1 %v21748_v4  ;;  %v21743_v6 = vld [vmem:[%s28608_s5 + $0x3c8] ss:$12 sps:$4 sm:$0xff]   ;;  %v21752_v55 = vld [vmem:[%s28608_s5 + $0x440] ss:$12 sps:$4 sm:$0xff]  }
 0xc73   : > { %16900 = vmatmul.mubr.msk.bf16.gmra.mrb[48].mxu0 %vm7425_vm4, %v26664_v0  ;;  %11457 = vmatmul.mubr.bf16.gmra.mrb[92].mxu1 %v26214_v23 }
 0xc74   : > { %v26686_v47 = vadd.f32 %v19338_v10, %v18015_v24  ;;  %v9756_v49 = vpop.f32.mrb[184].mxu0  ;;  %10506 = vmatprep.mubr.bf16.mxu0 %v28856_v61  ;;  %11464 = vmatprep.mubr.bf16.mxu1 %v26223_v1 }
 0xc75   : > { %v9757_v4 = vadd.f32 %v26446_v3, %v9756_v49  ;;  %v18844_v25 = vpop.f32.mrb[185].mxu0  ;;  %18883 = vmatpush3.bf16.msra.mxu0 %v21742_v28  ;;  %18152 = vmatprep.subr.bf16.mxu1 %v21749_v44  ;;  %v28989_v28 = vld [vmem:[#allocation41_spill] sm:$0xff] }
 0xc76   : > { %v9759_v23 = vpop.f32.mrb[186].mxu0  ;;  %v18016_v59 = vpop.f32.mrb[32].mxu1  ;;  %18884 = vmatprep.subr.bf16.mxu0 %v28765_v37  ;;  %18153 = vmatpush3.bf16.msra.mxu1 %v21750_v8  ;;  %v19342_v24 = vadd.f32 %v28989_v28, %v26501_v46  ;;  %v21744_v8 = vld [vmem:[%s28608_s5 + $0x3e0] ss:$12 sps:$4 sm:$0xff]   ;;  %v28990_v25 = vld [vmem:[#allocation42_spill] sm:$0xff] }
 0xc77   : > { %v9760_v1 = vadd.f32 %v26454_v26, %v9759_v23  ;;  %v18017_v30 = vpop.f32.mrb[33].mxu1  ;;  %v18845_v3 = vpop.f32.mrb[187].mxu0  ;;  %18154 = vmatprep.subr.bf16.mxu1 %v21751_v36  ;;  %v21753_v26 = vld [vmem:[%s28608_s5 + $0x518] ss:$12 sps:$4 sm:$0xff]   ;;  %v19346_v23 = vadd.f32 %v28990_v25, %v26501_v46  ;;  %v21757_v25 = vld [vmem:[%s28608_s5 + $0x548] ss:$12 sps:$4 sm:$0xff]  }
 0xc78   : > { %v18018_v32 = vadd.f32 %v18017_v30, %v18016_v59  ;;  %v18019_v60 = vpop.f32.mrb[34].mxu1 }
 0xc79   : > { %v26701_v44 = vpack.c.bf16 %v9760_v1, %v9757_v4  ;;  %v18020_v10 = vpop.f32.mrb[35].mxu1  ;;  %18885 = vmatpush3.bf16.msra.mxu0 %v21743_v6  ;;  %v21754_v4 = vld [vmem:[%s28608_s5 + $0x458] ss:$12 sps:$4 sm:$0xff]   ;;  %v21755_v6 = vld [vmem:[%s28608_s5 + $0x530] ss:$12 sps:$4 sm:$0xff]  }
 0xc7a   : > { %v26709_v49 = vadd.f32 %v19342_v24, %v18018_v32  ;;  %v18021_v36 = vadd.f32 %v18020_v10, %v18019_v60  ;;  %18886 = vmatprep.subr.bf16.mxu0 %v28765_v37  ;;  %18155 = vmatpush3.bf16.msra.mxu1 %v21752_v55 }
 0xc7b   : > { %16901 = vmatmul.mubr.msk.bf16.gmra.mrb[52].mxu0 %vm7425_vm4, %v26701_v44  ;;  %11465 = vmatmul.mubr.bf16.gmra.mrb[96].mxu1 %v26246_v63  ;;  %v21756_v63 = vld [vmem:[%s28608_s5 + $0x470] ss:$12 sps:$4 sm:$0xff]  }
 0xc7c   : > { %v26723_v59 = vadd.f32 %v19346_v23, %v18021_v36  ;;  %v9764_v1 = vpop.f32.mrb[188].mxu0  ;;  %10516 = vmatprep.mubr.bf16.mxu0 %v28856_v61  ;;  %11472 = vmatprep.mubr.bf16.mxu1 %v26255_v20 }
 0xc7d   : > { %v9765_v55 = vadd.f32 %v26464_v52, %v9764_v1  ;;  %v18848_v30 = vpop.f32.mrb[189].mxu0  ;;  %18887 = vmatpush3.bf16.msra.mxu0 %v21744_v8  ;;  %18156 = vmatprep.subr.bf16.mxu1 %v21753_v26  ;;  %v28991_v52 = vld [vmem:[#allocation44_spill] sm:$0xff] }
 0xc7e   : > { %v9767_v3 = vpop.f32.mrb[190].mxu0  ;;  %v18022_v32 = vpop.f32.mrb[36].mxu1  ;;  %18932 = vmatprep.subr.bf16.mxu0 %v28765_v37  ;;  %18157 = vmatpush3.bf16.msra.mxu1 %v21754_v4  ;;  %v19350_v10 = vadd.f32 %v28991_v52, %v26501_v46  ;;  %v21759_v1 = vld [vmem:[%s28608_s5 + $0x560] ss:$12 sps:$4 sm:$0xff]  }
 0xc7f   : > { %v9768_v28 = vadd.f32 %v26472_v7, %v9767_v3  ;;  %v18023_v24 = vpop.f32.mrb[37].mxu1  ;;  %v18849_v60 = vpop.f32.mrb[191].mxu0  ;;  %18158 = vmatprep.subr.bf16.mxu1 %v21755_v6  ;;  %v19354_v7 = vadd.f32 %v25923_v51, %v26501_v46  ;;  %v21758_v6 = vld [vmem:[%s28608_s5 + $0x488] ss:$12 sps:$4 sm:$0xff]  }
 0xc80   : > { %v18024_v20 = vadd.f32 %v18023_v24, %v18022_v32  ;;  %v18025_v8 = vpop.f32.mrb[38].mxu1 }
 0xc81   : > { %v26735_v26 = vpack.c.bf16 %v9768_v28, %v9765_v55  ;;  %v18026_v36 = vpop.f32.mrb[39].mxu1 }
 0xc82   : > { %v26740_v23 = vadd.f32 %v19350_v10, %v18024_v20  ;;  %v18027_v4 = vadd.f32 %v18026_v36, %v18025_v8  ;;  %18159 = vmatpush3.bf16.msra.mxu1 %v21756_v63 }
 0xc83   : > { %16902 = vmatmul.mubr.msk.bf16.gmra.mrb[56].mxu0 %vm7425_vm4, %v26735_v26  ;;  %11473 = vmatmul.mubr.bf16.gmra.mrb[100].mxu1 %v26278_v11  ;;  %v21760_v11 = vld [vmem:[%s28608_s5 + $0x4a0] ss:$12 sps:$4 sm:$0xff]  }
 0xc84   : > { %v26753_v55 = vadd.f32 %v19354_v7, %v18027_v4  ;;  %v9772_v30 = vpop.f32.mrb[192].mxu0  ;;  %10526 = vmatprep.mubr.bf16.mxu0 %v28856_v61  ;;  %11480 = vmatprep.mubr.bf16.mxu1 %v26283_v45  ;;  %v19358_v45 = vadd.f32 %v25931_v29, %v26501_v46 }
 0xc85   : > { %v9773_v51 = vadd.f32 %v26482_v39, %v9772_v30  ;;  %v18852_v3 = vpop.f32.mrb[193].mxu0  ;;  %18160 = vmatprep.subr.bf16.mxu1 %v21757_v25 }
 0xc86   : > { %v9775_v32 = vpop.f32.mrb[194].mxu0  ;;  %v18028_v63 = vpop.f32.mrb[40].mxu1  ;;  %18161 = vmatpush3.bf16.msra.mxu1 %v21758_v6 }
 0xc87   : > { %v9776_v28 = vadd.f32 %v26490_v21, %v9775_v32  ;;  %v18029_v24 = vpop.f32.mrb[41].mxu1  ;;  %v18853_v60 = vpop.f32.mrb[195].mxu0  ;;  %18162 = vmatprep.subr.bf16.mxu1 %v21759_v1 }
 0xc88   : > { %v18030_v20 = vadd.f32 %v18029_v24, %v18028_v63  ;;  %v18031_v52 = vpop.f32.mrb[42].mxu1 }
 0xc89   : > { %v26764_v39 = vpack.c.bf16 %v9776_v28, %v9773_v51  ;;  %v18032_v10 = vpop.f32.mrb[43].mxu1 }
 0xc8a   : > { %v26766_v8 = vadd.f32 %v19358_v45, %v18030_v20  ;;  %18163 = vmatpush3.bf16.msra.mxu1 %v21760_v11 }
 0xc8b   : > { %16903 = vmatmul.mubr.msk.bf16.gmra.mrb[60].mxu0 %vm7425_vm4, %v26764_v39  ;;  %11481 = vmatmul.mubr.bf16.gmra.mrb[104].mxu1 %v26294_v17 }
 0xc8c   : > { %v9780_v21 = vpop.f32.mrb[196].mxu0  ;;  %10536 = vmatprep.mubr.bf16.mxu0 %v28856_v61  ;;  %11488 = vmatprep.mubr.bf16.mxu1 %v26299_v54 }
 0xc8d   : > { %v9781_v36 = vadd.f32 %v26504_v22, %v9780_v21  ;;  %v18856_v29 = vpop.f32.mrb[197].mxu0 }
 0xc8e   : > { %v9783_v46 = vpop.f32.mrb[198].mxu0 }
 0xc8f   : > { %v9784_v25 = vadd.f32 %v26513_v43, %v9783_v46  ;;  %v18857_v4 = vpop.f32.mrb[199].mxu0 }
 0xc91   : > { %v26775_v7 = vpack.c.bf16 %v9784_v25, %v9781_v36 }
 0xc93   : > { %16904 = vmatmul.mubr.msk.bf16.gmra.mrb[64].mxu0 %vm7425_vm4, %v26775_v7  ;;  %11489 = vmatmul.mubr.bf16.gmra.mrb[108].mxu1 %v26310_v50 }
 0xc94   : > { %v9788_v17 = vpop.f32.mrb[200].mxu0  ;;  %10546 = vmatprep.mubr.bf16.mxu0 %v28856_v61  ;;  %11496 = vmatprep.mubr.bf16.mxu1 %v26315_v42 }
 0xc95   : > { %v9789_v54 = vadd.f32 %v26526_v57, %v9788_v17  ;;  %v18860_v22 = vpop.f32.mrb[201].mxu0 }
 0xc96   : > { %v9791_v6 = vpop.f32.mrb[202].mxu0 }
 0xc97   : > { %v9792_v1 = vadd.f32 %v26535_v48, %v9791_v6  ;;  %v18861_v43 = vpop.f32.mrb[203].mxu0 }
 0xc99   : > { %v26784_v30 = vpack.c.bf16 %v9792_v1, %v9789_v54 }
 0xc9b   : > { %16905 = vmatmul.mubr.msk.bf16.gmra.mrb[68].mxu0 %vm7425_vm4, %v26784_v30  ;;  %11497 = vmatmul.mubr.bf16.gmra.mrb[112].mxu1 %v26328_v16 }
 0xc9c   : > { %v9796_v50 = vpop.f32.mrb[204].mxu0  ;;  %10556 = vmatprep.mubr.bf16.mxu0 %v28856_v61  ;;  %11504 = vmatprep.mubr.bf16.mxu1 %v26336_v2 }
 0xc9d   : > { %v9797_v42 = vadd.f32 %v26546_v27, %v9796_v50  ;;  %v18864_v57 = vpop.f32.mrb[205].mxu0 }
 0xc9e   : > { %v9799_v51 = vpop.f32.mrb[206].mxu0 }
 0xc9f   : > { %v9800_v3 = vadd.f32 %v26555_v35, %v9799_v51  ;;  %v18865_v48 = vpop.f32.mrb[207].mxu0 }
 0xca1   : > { %v26793_v32 = vpack.c.bf16 %v9800_v3, %v9797_v42 }
 0xca3   : > { %16906 = vmatmul.mubr.msk.bf16.gmra.mrb[72].mxu0 %vm7425_vm4, %v26793_v32  ;;  %11505 = vmatmul.mubr.bf16.gmra.mrb[116].mxu1 %v26354_v14 }
 0xca4   : > { %v9804_v16 = vpop.f32.mrb[208].mxu0  ;;  %10566 = vmatprep.mubr.bf16.mxu0 %v28856_v61  ;;  %11512 = vmatprep.mubr.bf16.mxu1 %v26362_v58 }
 0xca5   : > { %v9805_v2 = vadd.f32 %v26569_v33, %v9804_v16  ;;  %v18868_v27 = vpop.f32.mrb[209].mxu0 }
 0xca6   : > { %v9807_v63 = vpop.f32.mrb[210].mxu0 }
 0xca7   : > { %v9808_v11 = vadd.f32 %v26578_v34, %v9807_v63  ;;  %v18869_v35 = vpop.f32.mrb[211].mxu0 }
 0xca9   : > { %v26802_v28 = vpack.c.bf16 %v9808_v11, %v9805_v2 }
 0xcab   : > { %16907 = vmatmul.mubr.msk.bf16.gmra.mrb[76].mxu0 %vm7425_vm4, %v26802_v28  ;;  %11513 = vmatmul.mubr.bf16.gmra.mrb[120].mxu1 %v26380_v62 }
 0xcac   : > { %v9812_v14 = vpop.f32.mrb[212].mxu0  ;;  %10576 = vmatprep.mubr.bf16.mxu0 %v28856_v61  ;;  %11520 = vmatprep.mubr.bf16.mxu1 %v26385_v18 }
 0xcad   : > { %v9813_v58 = vadd.f32 %v26589_v5, %v9812_v14  ;;  %v18872_v33 = vpop.f32.mrb[213].mxu0 }
 0xcae   : > { %v9815_v24 = vpop.f32.mrb[214].mxu0 }
 0xcaf   : > { %v9816_v60 = vadd.f32 %v26598_v31, %v9815_v24  ;;  %v18873_v34 = vpop.f32.mrb[215].mxu0  ;;  %v28995_v31 = vld [vmem:[#allocation60_spill] sm:$0xff] }
 0xcb1   : > { %v26811_v20 = vpack.c.bf16 %v9816_v60, %v9813_v58 }
 0xcb3   : > { %16908 = vmatmul.mubr.msk.bf16.gmra.mrb[80].mxu0 %vm7425_vm4, %v26811_v20  ;;  %11521 = vmatmul.mubr.bf16.gmra.mrb[124].mxu1 %v26398_v19  ;;  %v28992_v19 = vld [vmem:[#allocation57_spill] sm:$0xff] }
 0xcb4   : > { %v9820_v62 = vpop.f32.mrb[216].mxu0  ;;  %10586 = vmatprep.mubr.bf16.mxu0 %v28856_v61  ;;  %11528 = vmatprep.mubr.bf16.mxu1 %v26400_v12  ;;  %v28993_v12 = vld [vmem:[#allocation58_spill] sm:$0xff] }
 0xcb5   : > { %v9821_v18 = vadd.f32 %v26609_v9, %v9820_v62  ;;  %v18876_v5 = vpop.f32.mrb[217].mxu0  ;;  %v21763_v9 = vld [vmem:[%s28608_s5 + $0x3f4] ss:$12 sps:$4 sm:$0xff]  }
 0xcb6   : > { %v9823_v45 = vpop.f32.mrb[218].mxu0  ;;  %v21761_v5 = vld [vmem:[%s28608_s5 + $0x3f0] ss:$12 sps:$4 sm:$0xff]  }
 0xcb7   : > { %v18877_v52 = vpop.f32.mrb[219].mxu0  ;;  %v26819_v10 = vpack.c.bf16 %v9821_v18, %v9821_v18 }
 0xcb8   : > { %v21766_v52 = vld [vmem:[%s28608_s5 + $0x40c] ss:$12 sps:$4 sm:$0xff]  }
 0xcbb   : > { %16909 = vmatmul.mubr.msk.bf16.gmra.mrb[84].mxu0 %vm7425_vm4, %v26819_v10  ;;  %11529 = vmatmul.mubr.bf16.gmra.mrb[128].mxu1 %v26406_v53  ;;  %v28994_v53 = vld [vmem:[#allocation59_spill] sm:$0xff] }
 0xcbc   : > { %18888 = vmatprep.mubr.msk.bf16.mxu0 %vm22046_vm3, %v28765_v37 }
 0xcc3   : > { %18889 = vmatmul.mubr.msk.bf16.vlgmr.msra.gmra.mrb[88].mxu0 %vm7425_vm4, %v26634_v38  ;;  %v28996_v38 = vld [vmem:[#allocation61_spill] sm:$0xff] }
 0xcc4   : > { %18933 = vmatpush3.bf16.msra.mxu0 %v28992_v19  ;;  %18892 = vmatprep.mubr.msk.bf16.mxu0 %vm22046_vm3, %v28765_v37  ;;  %v21764_v19 = vld [vmem:[%s28608_s5 + $0x408] ss:$12 sps:$4 sm:$0xff]  }
 0xcc5   : > { %18934 = vmatprep.subr.bf16.mxu0 %v28765_v37 }
 0xcc8   : > { %18935 = vmatpush3.bf16.msra.mxu0 %v28993_v12 }
 0xcc9   : > { %18936 = vmatprep.subr.bf16.mxu0 %v28765_v37 }
 0xccb   : > { %18893 = vmatmul.mubr.msk.bf16.gmra.mrb[92].mxu0 %vm7425_vm4, %v26664_v0 }
 0xccc   : > { %18937 = vmatpush3.bf16.msra.mxu0 %v28994_v53  ;;  %18896 = vmatprep.mubr.msk.bf16.mxu0 %vm22046_vm3, %v28765_v37  ;;  %v21769_v53 = vld [vmem:[%s28608_s5 + $0x424] ss:$12 sps:$4 sm:$0xff]  }
 0xccd   : > { %18938 = vmatprep.subr.bf16.mxu0 %v28765_v37 }
 0xcd0   : > { %18939 = vmatpush3.bf16.msra.mxu0 %v28995_v31 }
 0xcd1   : > { %18940 = vmatprep.subr.bf16.mxu0 %v28765_v37 }
 0xcd3   : > { %18897 = vmatmul.mubr.msk.bf16.gmra.mrb[96].mxu0 %vm7425_vm4, %v26701_v44 }
 0xcd4   : > { %18941 = vmatpush3.bf16.msra.mxu0 %v28996_v38  ;;  %18900 = vmatprep.mubr.msk.bf16.mxu0 %vm22046_vm3, %v28765_v37 }
 0xcd5   : > { %12143 = vmatprep.subr.bf16.mxu0 %v21763_v9 }
 0xcdb   : > { %18901 = vmatmul.mubr.msk.bf16.gmra.mrb[100].mxu0 %vm7425_vm4, %v26735_v26 }
 0xcdc   : > { %18904 = vmatprep.mubr.msk.bf16.mxu0 %vm22046_vm3, %v28765_v37 }
 0xce3   : > { %18905 = vmatmul.mubr.msk.bf16.gmra.mrb[104].mxu0 %vm7425_vm4, %v26764_v39 }
 0xce4   : > { %18908 = vmatprep.mubr.msk.bf16.mxu0 %vm22046_vm3, %v28765_v37 }
 0xce6   : > { %v11309_v0 = vpop.f32.mrb[44].mxu1 }
 0xce7   : > { %v11311_v44 = vpop.f32.mrb[45].mxu1 }
 0xce8   : > { %v11313_v21 = vpop.f32.mrb[46].mxu1 }
 0xce9   : > { %v26858_v36 = vpack.c.bf16 %v11313_v21, %v11309_v0  ;;  %v11315_v29 = vpop.f32.mrb[47].mxu1 }
 0xcea   : > { %v26860_v46 = vpack.c.bf16 %v11315_v29, %v11311_v44  ;;  %v21767_v44 = vld [vmem:[%s28608_s5 + $0x420] ss:$12 sps:$4 sm:$0xff]   ;;  %v21772_v29 = vld [vmem:[%s28608_s5 + $0x43c] ss:$12 sps:$4 sm:$0xff]  }
 0xceb   : > { %18909 = vmatmul.mubr.msk.bf16.gmra.mrb[108].mxu0 %vm7425_vm4, %v26775_v7 }
 0xcec   : > { %12457 = vmatprep.mubr.bf16.mxu1 %v26860_v46  ;;  %18912 = vmatprep.mubr.msk.bf16.mxu0 %vm22046_vm3, %v28765_v37 }
 0xced   : > { %12458 = vmatmul.mubr.bf16.vlgmr.msra.gmra.mrb[132].mxu1 %v26858_v36 }
 0xcee   : > { %v11319_v26 = vpop.f32.mrb[48].mxu1 }
 0xcef   : > { %v11321_v39 = vpop.f32.mrb[49].mxu1 }
 0xcf0   : > { %v11323_v25 = vpop.f32.mrb[50].mxu1 }
 0xcf1   : > { %v26868_v4 = vpack.c.bf16 %v11323_v25, %v11319_v26  ;;  %v11325_v17 = vpop.f32.mrb[51].mxu1  ;;  %v28998_v26 = vld [vmem:[#allocation55_spill] sm:$0xff] }
 0xcf2   : > { %v26870_v54 = vpack.c.bf16 %v11325_v17, %v11321_v39  ;;  %v21770_v39 = vld [vmem:[%s28608_s5 + $0x438] ss:$12 sps:$4 sm:$0xff]   ;;  %v21775_v17 = vld [vmem:[%s28608_s5 + $0x454] ss:$12 sps:$4 sm:$0xff]  }
 0xcf3   : > { %18913 = vmatmul.mubr.msk.bf16.gmra.mrb[112].mxu0 %vm7425_vm4, %v26784_v30 }
 0xcf4   : > { %12465 = vmatprep.mubr.bf16.mxu1 %v26870_v54  ;;  %18916 = vmatprep.mubr.msk.bf16.mxu0 %vm22046_vm3, %v28765_v37 }
 0xcf5   : > { %12466 = vmatmul.mubr.bf16.gmra.mrb[136].mxu1 %v26868_v4 }
 0xcf6   : > { %v11329_v7 = vpop.f32.mrb[52].mxu1 }
 0xcf7   : > { %v11331_v22 = vpop.f32.mrb[53].mxu1 }
 0xcf8   : > { %v11333_v6 = vpop.f32.mrb[54].mxu1 }
 0xcf9   : > { %v26878_v1 = vpack.c.bf16 %v11333_v6, %v11329_v7  ;;  %v11335_v43 = vpop.f32.mrb[55].mxu1 }
 0xcfa   : > { %v26880_v50 = vpack.c.bf16 %v11335_v43, %v11331_v22 }
 0xcfb   : > { %18917 = vmatmul.mubr.msk.bf16.gmra.mrb[116].mxu0 %vm7425_vm4, %v26793_v32 }
 0xcfc   : > { %12473 = vmatprep.mubr.bf16.mxu1 %v26880_v50  ;;  %18920 = vmatprep.mubr.msk.bf16.mxu0 %vm22046_vm3, %v28765_v37 }
 0xcfd   : > { %12474 = vmatmul.mubr.bf16.gmra.mrb[140].mxu1 %v26878_v1 }
 0xcfe   : > { %v11339_v30 = vpop.f32.mrb[56].mxu1 }
 0xcff   : > { %v11341_v42 = vpop.f32.mrb[57].mxu1 }
 0xd00   : > { %v11343_v57 = vpop.f32.mrb[58].mxu1 }
 0xd01   : > { %v26888_v51 = vpack.c.bf16 %v11343_v57, %v11339_v30  ;;  %v11345_v3 = vpop.f32.mrb[59].mxu1  ;;  %v21773_v30 = vld [vmem:[%s28608_s5 + $0x450] ss:$12 sps:$4 sm:$0xff]   ;;  %v21778_v57 = vld [vmem:[%s28608_s5 + $0x46c] ss:$12 sps:$4 sm:$0xff]  }
 0xd02   : > { %v26890_v48 = vpack.c.bf16 %v11345_v3, %v11341_v42  ;;  %v28999_v3 = vld [vmem:[#allocation47_spill] sm:$0xff] }
 0xd03   : > { %18921 = vmatmul.mubr.msk.bf16.gmra.mrb[120].mxu0 %vm7425_vm4, %v26802_v28 }
 0xd04   : > { %12481 = vmatprep.mubr.bf16.mxu1 %v26890_v48  ;;  %18924 = vmatprep.mubr.msk.bf16.mxu0 %vm22046_vm3, %v28765_v37 }
 0xd05   : > { %12482 = vmatmul.mubr.bf16.gmra.mrb[144].mxu1 %v26888_v51 }
 0xd06   : > { %v11349_v32 = vpop.f32.mrb[60].mxu1 }
 0xd07   : > { %v11351_v16 = vpop.f32.mrb[61].mxu1 }
 0xd08   : > { %v11353_v2 = vpop.f32.mrb[62].mxu1 }
 0xd09   : > { %v26898_v27 = vpack.c.bf16 %v11353_v2, %v11349_v32  ;;  %v11355_v63 = vpop.f32.mrb[63].mxu1  ;;  %v21776_v32 = vld [vmem:[%s28608_s5 + $0x468] ss:$12 sps:$4 sm:$0xff]   ;;  %v21781_v2 = vld [vmem:[%s28608_s5 + $0x484] ss:$12 sps:$4 sm:$0xff]  }
 0xd0a   : > { %v26900_v11 = vpack.c.bf16 %v11355_v63, %v11351_v16 }
 0xd0b   : > { %18925 = vmatmul.mubr.msk.bf16.gmra.mrb[124].mxu0 %vm7425_vm4, %v26811_v20 }
 0xd0c   : > { %12489 = vmatprep.mubr.bf16.mxu1 %v26900_v11  ;;  %18928 = vmatprep.mubr.msk.bf16.mxu0 %vm22046_vm3, %v28765_v37 }
 0xd0d   : > { %12490 = vmatmul.mubr.bf16.gmra.mrb[148].mxu1 %v26898_v27 }
 0xd0e   : > { %v11359_v35 = vpop.f32.mrb[64].mxu1 }
 0xd0f   : > { %v11361_v28 = vpop.f32.mrb[65].mxu1 }
 0xd10   : > { %v11363_v14 = vpop.f32.mrb[66].mxu1 }
 0xd11   : > { %v26908_v58 = vpack.c.bf16 %v11363_v14, %v11359_v35  ;;  %v11365_v33 = vpop.f32.mrb[67].mxu1 }
 0xd12   : > { %v26910_v24 = vpack.c.bf16 %v11365_v33, %v11361_v28  ;;  %v21779_v33 = vld [vmem:[%s28608_s5 + $0x480] ss:$12 sps:$4 sm:$0xff]  }
 0xd13   : > { %18929 = vmatmul.mubr.msk.bf16.gmra.mrb[128].mxu0 %vm7425_vm4, %v26819_v10  ;;  %v28997_v10 = vld [vmem:[#allocation46_spill] sm:$0xff] }
 0xd14   : > { %12497 = vmatprep.mubr.bf16.mxu1 %v26910_v24  ;;  %18942 = vmatprep.mubr.msk.bf16.mxu0 %vm22046_vm3, %v28765_v37 }
 0xd15   : > { %12498 = vmatmul.mubr.bf16.gmra.mrb[152].mxu1 %v26908_v58 }
 0xd16   : > { %v11369_v60 = vpop.f32.mrb[68].mxu1 }
 0xd17   : > { %v11371_v34 = vpop.f32.mrb[69].mxu1 }
 0xd18   : > { %v11373_v20 = vpop.f32.mrb[70].mxu1 }
 0xd19   : > { %v26918_v62 = vpack.c.bf16 %v11373_v20, %v11369_v60  ;;  %v11375_v18 = vpop.f32.mrb[71].mxu1  ;;  %v29000_v20 = vld [vmem:[#allocation56_spill] sm:$0xff] }
 0xd1a   : > { %v26923_v45 = vpack.c.bf16 %v11375_v18, %v11371_v34  ;;  %v21784_v34 = vld [vmem:[%s28608_s5 + $0x49c] ss:$12 sps:$4 sm:$0xff]   ;;  %v21782_v18 = vld [vmem:[%s28608_s5 + $0x498] ss:$12 sps:$4 sm:$0xff]  }
 0xd1b   : > { %18943 = vmatmul.mubr.msk.bf16.vlgmr.msra.gmra.mrb[220].mxu0 %vm7425_vm4, %v28997_v10 }
 0xd1c   : > { %12505 = vmatprep.mubr.bf16.mxu1 %v26923_v45  ;;  %18946 = vmatprep.mubr.msk.bf16.mxu0 %vm22046_vm3, %v28765_v37 }
 0xd1d   : > { %12506 = vmatmul.mubr.bf16.gmra.mrb[156].mxu1 %v26918_v62  ;;  %12144 = vmatpush1.bf16.msra.mxu0 %v21761_v5 }
 0xd1e   : > { %v11379_v12 = vpop.f32.mrb[72].mxu1  ;;  %12145 = vmatprep.subr.bf16.mxu0 %v21766_v52  ;;  %v21787_v52 = vld [vmem:[%s28608_s5 + $0x4b4] ss:$12 sps:$4 sm:$0xff]  }
 0xd1f   : > { %v11381_v31 = vpop.f32.mrb[73].mxu1 }
 0xd20   : > { %v11383_v9 = vpop.f32.mrb[74].mxu1 }
 0xd21   : > { %v26940_v38 = vpack.c.bf16 %v11383_v9, %v11379_v12  ;;  %v11385_v0 = vpop.f32.mrb[75].mxu1  ;;  %12146 = vmatpush1.bf16.msra.mxu0 %v21764_v19 }
 0xd22   : > { %v26945_v21 = vpack.c.bf16 %v11385_v0, %v11381_v31  ;;  %12147 = vmatprep.subr.bf16.mxu0 %v21769_v53  ;;  %v21785_v31 = vld [vmem:[%s28608_s5 + $0x4b0] ss:$12 sps:$4 sm:$0xff]   ;;  %v21790_v0 = vld [vmem:[%s28608_s5 + $0x4cc] ss:$12 sps:$4 sm:$0xff]  }
 0xd23   : > { %18947 = vmatmul.mubr.msk.bf16.gmra.mrb[224].mxu0 %vm7425_vm4, %v28998_v26  ;;  %v21793_v26 = vld [vmem:[%s28608_s5 + $0x4e4] ss:$12 sps:$4 sm:$0xff]  }
 0xd24   : > { %12513 = vmatprep.mubr.bf16.mxu1 %v26945_v21  ;;  %18950 = vmatprep.mubr.msk.bf16.mxu0 %vm22046_vm3, %v28765_v37 }
 0xd25   : > { %12514 = vmatmul.mubr.bf16.gmra.mrb[160].mxu1 %v26940_v38  ;;  %12148 = vmatpush1.bf16.msra.mxu0 %v21767_v44  ;;  %v29001_v44 = vld [vmem:[#allocation62_spill] sm:$0xff] }
 0xd26   : > { %v11389_v25 = vpop.f32.mrb[76].mxu1  ;;  %12149 = vmatprep.subr.bf16.mxu0 %v21772_v29  ;;  %v21788_v29 = vld [vmem:[%s28608_s5 + $0x4c8] ss:$12 sps:$4 sm:$0xff]  }
 0xd27   : > { %v11391_v7 = vpop.f32.mrb[77].mxu1 }
 0xd28   : > { %v11393_v22 = vpop.f32.mrb[78].mxu1 }
 0xd29   : > { %v26962_v6 = vpack.c.bf16 %v11393_v22, %v11389_v25  ;;  %v11395_v43 = vpop.f32.mrb[79].mxu1  ;;  %12150 = vmatpush1.bf16.msra.mxu0 %v21770_v39  ;;  %v21791_v22 = vld [vmem:[%s28608_s5 + $0x4e0] ss:$12 sps:$4 sm:$0xff]  }
 0xd2a   : > { %v26967_v42 = vpack.c.bf16 %v11395_v43, %v11391_v7  ;;  %12151 = vmatprep.subr.bf16.mxu0 %v21775_v17 }
 0xd2b   : > { %18951 = vmatmul.mubr.msk.bf16.gmra.mrb[228].mxu0 %vm7425_vm4, %v28999_v3  ;;  %v29002_v3 = vld [vmem:[#allocation7_spill] sm:$0xff] }
 0xd2c   : > { %12521 = vmatprep.mubr.bf16.mxu1 %v26967_v42  ;;  %18954 = vmatprep.mubr.msk.bf16.mxu0 %vm22046_vm3, %v28765_v37 }
 0xd2d   : > { %12522 = vmatmul.mubr.bf16.gmra.mrb[164].mxu1 %v26962_v6  ;;  %12152 = vmatpush1.bf16.msra.mxu0 %v21773_v30  ;;  %v21796_v30 = vld [vmem:[%s28608_s5 + $0x4fc] ss:$12 sps:$4 sm:$0xff]  }
 0xd2e   : > { %v11399_v16 = vpop.f32.mrb[80].mxu1  ;;  %12153 = vmatprep.subr.bf16.mxu0 %v21778_v57 }
 0xd2f   : > { %v11401_v63 = vpop.f32.mrb[81].mxu1 }
 0xd30   : > { %v11403_v35 = vpop.f32.mrb[82].mxu1 }
 0xd31   : > { %v26984_v28 = vpack.c.bf16 %v11403_v35, %v11399_v16  ;;  %v11405_v14 = vpop.f32.mrb[83].mxu1  ;;  %12154 = vmatpush1.bf16.msra.mxu0 %v21776_v32  ;;  %v21794_v32 = vld [vmem:[%s28608_s5 + $0x4f8] ss:$12 sps:$4 sm:$0xff]   ;;  %v21799_v16 = vld [vmem:[%s28608_s5 + $0x514] ss:$12 sps:$4 sm:$0xff]  }
 0xd32   : > { %v26989_v60 = vpack.c.bf16 %v11405_v14, %v11401_v63  ;;  %12155 = vmatprep.subr.bf16.mxu0 %v21781_v2 }
 0xd33   : > { %18955 = vmatmul.mubr.msk.bf16.gmra.mrb[232].mxu0 %vm7425_vm4, %v29000_v20  ;;  %v21802_v20 = vld [vmem:[%s28608_s5 + $0x52c] ss:$12 sps:$4 sm:$0xff]  }
 0xd34   : > { %12529 = vmatprep.mubr.bf16.mxu1 %v26989_v60  ;;  %18958 = vmatprep.mubr.msk.bf16.mxu0 %vm22046_vm3, %v28765_v37 }
 0xd35   : > { %12530 = vmatmul.mubr.bf16.gmra.mrb[252].mxu1 %v26984_v28  ;;  %12156 = vmatpush1.bf16.msra.mxu0 %v21779_v33  ;;  %v21797_v33 = vld [vmem:[%s28608_s5 + $0x510] ss:$12 sps:$4 sm:$0xff]  }
 0xd36   : > { %v11409_v5 = vpop.f32.mrb[84].mxu1  ;;  %12157 = vmatprep.subr.bf16.mxu0 %v21784_v34 }
 0xd37   : > { %v11411_v10 = vpop.f32.mrb[85].mxu1  ;;  %v27008_v53 = vpack.c.bf16 %v11409_v5, %v11409_v5  ;;  %v29003_v5 = vld [vmem:[#allocation11_spill] sm:$0xff] }
 0xd38   : > { %v27006_v19 = vpack.c.bf16 %v11411_v10, %v11411_v10  ;;  %v11413_v12 = vpop.f32.mrb[86].mxu1  ;;  %v21805_v10 = vld [vmem:[%s28608_s5 + $0x544] ss:$12 sps:$4 sm:$0xff]  }
 0xd39   : > { %12158 = vmatpush1.bf16.msra.mxu0 %v21782_v18  ;;  %v11414_v9 = vpop.f32.mrb[87].mxu1 }
 0xd3a   : > { %12537 = vmatprep.mubr.bf16.mxu1 %v27006_v19  ;;  %12159 = vmatprep.subr.bf16.mxu0 %v21787_v52  ;;  %v21800_v52 = vld [vmem:[%s28608_s5 + $0x528] ss:$12 sps:$4 sm:$0xff]  }
 0xd3b   : > { %18959 = vmatmul.mubr.msk.bf16.gmra.mrb[236].mxu0 %vm7425_vm4, %v29001_v44  ;;  %v21803_v44 = vld [vmem:[%s28608_s5 + $0x540] ss:$12 sps:$4 sm:$0xff]  }
 0xd3c   : > { %18962 = vmatprep.mubr.msk.bf16.mxu0 %vm22046_vm3, %v28765_v37 }
 0xd3d   : > { %12538 = vmatmul.mubr.bf16.gmra.mrb[168].mxu1 %v27008_v53  ;;  %12160 = vmatpush1.bf16.msra.mxu0 %v21785_v31 }
 0xd3e   : > { %12161 = vmatprep.subr.bf16.mxu0 %v21790_v0  ;;  %v18066_v39 = vpop.f32.mrb[88].mxu1 }
 0xd3f   : > { %v18067_v25 = vpop.f32.mrb[89].mxu1 }
 0xd40   : > { %v27028_v17 = vadd.f32 %v18067_v25, %v18066_v39  ;;  %v18069_v7 = vpop.f32.mrb[90].mxu1  ;;  %v29004_v25 = vld [vmem:[#allocation10_spill] sm:$0xff] }
 0xd41   : > { %12162 = vmatpush1.bf16.msra.mxu0 %v21788_v29  ;;  %v18070_v43 = vpop.f32.mrb[91].mxu1 }
 0xd42   : > { %12163 = vmatprep.subr.bf16.mxu0 %v21793_v26  ;;  %v27036_v57 = vadd.f32 %v18070_v43, %v18069_v7  ;;  %v21808_v26 = vld [vmem:[%s28608_s5 + $0x55c] ss:$12 sps:$4 sm:$0xff]   ;;  %v21806_v7 = vld [vmem:[%s28608_s5 + $0x558] ss:$12 sps:$4 sm:$0xff]   ;;  %v21811_v43 = vld [vmem:[%s28608_s5 + $0x574] ss:$12 sps:$4 sm:$0xff]  }
 0xd43   : > { %18963 = vmatmul.mubr.msk.bf16.gmra.mrb[240].mxu0 %vm7425_vm4, %v29002_v3 }
 0xd44   : > { %18966 = vmatprep.mubr.msk.bf16.mxu0 %vm22046_vm3, %v28765_v37 }
 0xd45   : > { %12164 = vmatpush1.bf16.msra.mxu0 %v21791_v22 }
 0xd46   : > { %12165 = vmatprep.subr.bf16.mxu0 %v21796_v30  ;;  %v18072_v2 = vpop.f32.mrb[92].mxu1 }
 0xd47   : > { %v18073_v63 = vpop.f32.mrb[93].mxu1 }
 0xd48   : > { %v27048_v35 = vadd.f32 %v18073_v63, %v18072_v2  ;;  %v18075_v14 = vpop.f32.mrb[94].mxu1  ;;  %v29005_v63 = vld [vmem:[#allocation15_spill] sm:$0xff] }
 0xd49   : > { %12166 = vmatpush1.bf16.msra.mxu0 %v21794_v32  ;;  %v18076_v34 = vpop.f32.mrb[95].mxu1 }
 0xd4a   : > { %12167 = vmatprep.subr.bf16.mxu0 %v21799_v16  ;;  %v27056_v18 = vadd.f32 %v18076_v34, %v18075_v14 }
 0xd4b   : > { %18967 = vmatmul.mubr.msk.bf16.gmra.mrb[244].mxu0 %vm7425_vm4, %v29003_v5 }
 0xd4c   : > { %18970 = vmatprep.mubr.msk.bf16.mxu0 %vm22046_vm3, %v28765_v37 }
 0xd4d   : > { %12168 = vmatpush1.bf16.msra.mxu0 %v21797_v33 }
 0xd4e   : > { %12169 = vmatprep.subr.bf16.mxu0 %v21802_v20  ;;  %v18078_v12 = vpop.f32.mrb[96].mxu1 }
 0xd4f   : > { %v18079_v31 = vpop.f32.mrb[97].mxu1 }
 0xd50   : > { %v27068_v9 = vadd.f32 %v18079_v31, %v18078_v12  ;;  %v18081_v0 = vpop.f32.mrb[98].mxu1 }
 0xd51   : > { %12170 = vmatpush1.bf16.msra.mxu0 %v21800_v52  ;;  %v18082_v29 = vpop.f32.mrb[99].mxu1 }
 0xd52   : > { %12171 = vmatprep.subr.bf16.mxu0 %v21805_v10  ;;  %v27076_v39 = vadd.f32 %v18082_v29, %v18081_v0  ;;  %v29006_v10 = vld [vmem:[#allocation17_spill] sm:$0xff] }
 0xd53   : > { %18971 = vmatmul.mubr.msk.bf16.gmra.mrb[248].mxu0 %vm7425_vm4, %v29004_v25 }
 0xd54   : > { %18974 = vmatprep.mubr.msk.bf16.mxu0 %vm22046_vm3, %v28765_v37 }
 0xd55   : > { %12172 = vmatpush1.bf16.msra.mxu0 %v21803_v44 }
 0xd56   : > { %12173 = vmatprep.subr.bf16.mxu0 %v21808_v26  ;;  %v18084_v22 = vpop.f32.mrb[100].mxu1 }
 0xd57   : > { %v18085_v30 = vpop.f32.mrb[101].mxu1 }
 0xd58   : > { %v27088_v3 = vadd.f32 %v18085_v30, %v18084_v22  ;;  %v18087_v32 = vpop.f32.mrb[102].mxu1  ;;  %v21809_v30 = vld [vmem:[%s28608_s5 + $0x570] ss:$12 sps:$4 sm:$0xff]  }
 0xd59   : > { %12174 = vmatpush1.bf16.msra.mxu0 %v21806_v7  ;;  %v18088_v16 = vpop.f32.mrb[103].mxu1 }
 0xd5a   : > { %v27090_v2 = vadd.f32 %v18088_v16, %v18087_v32  ;;  %12284 = vmatprep.subr.bf16.mxu0 %v21811_v43  ;;  %v21814_v16 = vld [vmem:[%s28608_s5 + $0x58c] ss:$12 sps:$4 sm:$0xff]  }
 0xd5b   : > { %18975 = vmatmul.mubr.msk.bf16.gmra.mrb[252].mxu0 %vm7425_vm4, %v29005_v63 }
 0xd5c   : > { %18978 = vmatprep.mubr.msk.bf16.mxu0 %vm22046_vm3, %v28765_v37 }
 0xd5e   : > { %v18090_v14 = vpop.f32.mrb[104].mxu1 }
 0xd5f   : > { %v18091_v33 = vpop.f32.mrb[105].mxu1 }
 0xd60   : > { %v27096_v34 = vadd.f32 %v18091_v33, %v18090_v14  ;;  %v18093_v20 = vpop.f32.mrb[106].mxu1 }
 0xd61   : > { %v18094_v5 = vpop.f32.mrb[107].mxu1 }
 0xd62   : > { %v27098_v52 = vadd.f32 %v18094_v5, %v18093_v20 }
 0xd63   : > { %18979 = vmatmul.mubr.msk.bf16.gmra.mrb[0].mxu0 %vm7425_vm4, %v29006_v10  ;;  %v21820_v10 = vld [vmem:[%s28608_s5 + $0x5bc] ss:$12 sps:$4 sm:$0xff]  }
 0xd64   : > { %18982 = vmatprep.mubr.msk.bf16.mxu0 %vm22046_vm3, %v28765_v37 }
 0xd66   : > { %v18096_v12 = vpop.f32.mrb[108].mxu1 }
 0xd67   : > { %v18097_v31 = vpop.f32.mrb[109].mxu1 }
 0xd68   : > { %v27104_v0 = vadd.f32 %v18097_v31, %v18096_v12  ;;  %v18099_v44 = vpop.f32.mrb[110].mxu1  ;;  %v21818_v31 = vld [vmem:[%s28608_s5 + $0x5b8] ss:$12 sps:$4 sm:$0xff]  }
 0xd69   : > { %v18100_v29 = vpop.f32.mrb[111].mxu1 }
 0xd6a   : > { %v27106_v26 = vadd.f32 %v18100_v29, %v18099_v44  ;;  %v21823_v44 = vld [vmem:[%s28608_s5 + $0x5d4] ss:$12 sps:$4 sm:$0xff]  }
 0xd6b   : > { %18983 = vmatmul.mubr.msk.bf16.gmra.mrb[4].mxu0 %vm7425_vm4, %v26614_v56  ;;  %v21812_v56 = vld [vmem:[%s28608_s5 + $0x588] ss:$12 sps:$4 sm:$0xff]  }
 0xd6c   : > { %12175 = vmatprep.mubr.bf16.mxu0 %v26860_v46  ;;  %v21817_v46 = vld [vmem:[%s28608_s5 + $0x5a4] ss:$12 sps:$4 sm:$0xff]  }
 0xd6e   : > { %v18102_v25 = vpop.f32.mrb[112].mxu1 }
 0xd6f   : > { %v18103_v7 = vpop.f32.mrb[113].mxu1 }
 0xd70   : > { %v27111_v22 = vadd.f32 %v18103_v7, %v18102_v25  ;;  %v18105_v43 = vpop.f32.mrb[114].mxu1 }
 0xd71   : > { %v18106_v32 = vpop.f32.mrb[115].mxu1 }
 0xd72   : > { %v27119_v63 = vadd.f32 %v18106_v32, %v18105_v43 }
 0xd73   : > { %12176 = vmatmul.mubr.bf16.vlgmr.msra.gmra.mrb[44].mxu0 %v26858_v36  ;;  %v21815_v36 = vld [vmem:[%s28608_s5 + $0x5a0] ss:$12 sps:$4 sm:$0xff]  }
 0xd74   : > { %12185 = vmatprep.mubr.bf16.mxu0 %v26870_v54  ;;  %12285 = vmatpush1.bf16.msra.mxu0 %v21809_v30 }
 0xd75   : > { %12286 = vmatprep.subr.bf16.mxu0 %v21814_v16 }
 0xd76   : > { %v18108_v14 = vpop.f32.mrb[116].mxu1 }
 0xd77   : > { %v18109_v33 = vpop.f32.mrb[117].mxu1 }
 0xd78   : > { %v27129_v20 = vadd.f32 %v18109_v33, %v18108_v14  ;;  %v18111_v5 = vpop.f32.mrb[118].mxu1  ;;  %12287 = vmatpush1.bf16.msra.mxu0 %v21812_v56 }
 0xd79   : > { %v18112_v54 = vpop.f32.mrb[119].mxu1  ;;  %12288 = vmatprep.subr.bf16.mxu0 %v21817_v46 }
 0xd7a   : > { %v27137_v12 = vadd.f32 %v18112_v54, %v18111_v5 }
 0xd7b   : > { %12186 = vmatmul.mubr.bf16.gmra.mrb[48].mxu0 %v26868_v4  ;;  %v21821_v4 = vld [vmem:[%s28608_s5 + $0x5d0] ss:$12 sps:$4 sm:$0xff]  }
 0xd7c   : > { %12195 = vmatprep.mubr.bf16.mxu0 %v26880_v50  ;;  %12289 = vmatpush1.bf16.msra.mxu0 %v21815_v36 }
 0xd7d   : > { %12290 = vmatprep.subr.bf16.mxu0 %v21820_v10 }
 0xd7e   : > { %v18114_v29 = vpop.f32.mrb[120].mxu1 }
 0xd7f   : > { %v18115_v25 = vpop.f32.mrb[121].mxu1 }
 0xd80   : > { %v27147_v7 = vadd.f32 %v18115_v25, %v18114_v29  ;;  %v18117_v43 = vpop.f32.mrb[122].mxu1  ;;  %12291 = vmatpush1.bf16.msra.mxu0 %v21818_v31 }
 0xd81   : > { %v18118_v50 = vpop.f32.mrb[123].mxu1  ;;  %12292 = vmatprep.subr.bf16.mxu0 %v21823_v44  ;;  %v29009_v44 = vld [vmem:[#allocation63_spill] sm:$0xff] }
 0xd82   : > { %v27152_v30 = vadd.f32 %v18118_v50, %v18117_v43 }
 0xd83   : > { %12196 = vmatmul.mubr.bf16.gmra.mrb[52].mxu0 %v26878_v1 }
 0xd84   : > { %12205 = vmatprep.mubr.bf16.mxu0 %v26890_v48  ;;  %12293 = vmatpush1.bf16.msra.mxu0 %v21821_v4 }
 0xd85   : > { %18986 = vmatprep.subr.bf16.mxu0 %v28765_v37 }
 0xd86   : > { %v18120_v32 = vpop.f32.mrb[124].mxu1 }
 0xd87   : > { %v18121_v16 = vpop.f32.mrb[125].mxu1 }
 0xd88   : > { %v27157_v56 = vadd.f32 %v18121_v16, %v18120_v32  ;;  %v18123_v46 = vpop.f32.mrb[126].mxu1 }
 0xd89   : > { %v18124_v14 = vpop.f32.mrb[127].mxu1 }
 0xd8a   : > { %v27159_v33 = vadd.f32 %v18124_v14, %v18123_v46  ;;  %v29011_v14 = vld [vmem:[#allocation13_spill] sm:$0xff] }
 0xd8b   : > { %12206 = vmatmul.mubr.bf16.gmra.mrb[56].mxu0 %v26888_v51 }
 0xd8c   : > { %12215 = vmatprep.mubr.bf16.mxu0 %v26900_v11 }
 0xd8e   : > { %v18126_v5 = vpop.f32.mrb[128].mxu1 }
 0xd8f   : > { %v18127_v36 = vpop.f32.mrb[129].mxu1 }
 0xd90   : > { %v27163_v1 = vadd.f32 %v18127_v36, %v18126_v5  ;;  %v18129_v48 = vpop.f32.mrb[130].mxu1  ;;  %v29012_v36 = vld [vmem:[#allocation12_spill] sm:$0xff] }
 0xd91   : > { %v18130_v54 = vpop.f32.mrb[131].mxu1 }
 0xd93   : > { %12216 = vmatmul.mubr.bf16.gmra.mrb[60].mxu0 %v26898_v27 }
 0xd94   : > { %12225 = vmatprep.mubr.bf16.mxu0 %v26910_v24 }
 0xd9b   : > { %12226 = vmatmul.mubr.bf16.gmra.mrb[64].mxu0 %v26908_v58 }
 0xd9c   : > { %12235 = vmatprep.mubr.bf16.mxu0 %v26923_v45  ;;  %v29007_v45 = vld [vmem:[#allocation9_spill] sm:$0xff] }
 0xda3   : > { %12236 = vmatmul.mubr.bf16.gmra.mrb[68].mxu0 %v26918_v62 }
 0xda4   : > { %12245 = vmatprep.mubr.bf16.mxu0 %v26945_v21  ;;  %v29008_v21 = vld [vmem:[#allocation8_spill] sm:$0xff] }
 0xdab   : > { %12246 = vmatmul.mubr.bf16.gmra.mrb[72].mxu0 %v26940_v38 }
 0xdac   : > { %12255 = vmatprep.mubr.bf16.mxu0 %v26967_v42 }
 0xdb3   : > { %12256 = vmatmul.mubr.bf16.gmra.mrb[76].mxu0 %v26962_v6 }
 0xdb4   : > { %12265 = vmatprep.mubr.bf16.mxu0 %v26989_v60 }
 0xdbb   : > { %12266 = vmatmul.mubr.bf16.gmra.mrb[80].mxu0 %v26984_v28 }
 0xdbc   : > { %12275 = vmatprep.mubr.bf16.mxu0 %v27006_v19 }
 0xdc0   : > { %v18164_v51 = vpop.f32.mrb[132].mxu1 }
 0xdc1   : > { %v18165_v27 = vpop.f32.mrb[133].mxu1 }
 0xdc2   : > { %v18166_v11 = vadd.f32 %v18165_v27, %v18164_v51  ;;  %v18167_v58 = vpop.f32.mrb[134].mxu1 }
 0xdc3   : > { %12276 = vmatmul.mubr.bf16.gmra.mrb[84].mxu0 %v27008_v53  ;;  %v18168_v24 = vpop.f32.mrb[135].mxu1  ;;  %v29010_v53 = vld [vmem:[#allocation64_spill] sm:$0xff] }
 0xdc4   : > { %v18169_v62 = vadd.f32 %v18168_v24, %v18167_v58  ;;  %12316 = vmatprep.mubr.bf16.mxu0 %v28856_v61  ;;  %v27180_v38 = vadd.f32 %v29007_v45, %v18166_v11 }
 0xdc6   : > { %v27183_v6 = vadd.f32 %v29008_v21, %v18169_v62  ;;  %v29013_v62 = vld [vmem:[#allocation65_spill] sm:$0xff]  ;;  %v29014_v21 = vld [vmem:[#allocation14_spill] sm:$0xff] }
 0xdc8   : > { %v18170_v42 = vpop.f32.mrb[136].mxu1 }
 0xdc9   : > { %v18171_v28 = vpop.f32.mrb[137].mxu1 }
 0xdca   : > { %v18172_v60 = vadd.f32 %v18171_v28, %v18170_v42  ;;  %v18173_v19 = vpop.f32.mrb[138].mxu1 }
 0xdcb   : > { %v18174_v10 = vpop.f32.mrb[139].mxu1 }
 0xdcc   : > { %v18175_v31 = vadd.f32 %v18174_v10, %v18173_v19  ;;  %v27186_v29 = vadd.f32 %v29009_v44, %v18172_v60 }
 0xdce   : > { %v27189_v25 = vadd.f32 %v29010_v53, %v18175_v31  ;;  %v29015_v53 = vld [vmem:[#allocation16_spill] sm:$0xff] }
 0xdd0   : > { %v18176_v43 = vpop.f32.mrb[140].mxu1 }
 0xdd1   : > { %v18177_v4 = vpop.f32.mrb[141].mxu1 }
 0xdd2   : > { %v18178_v50 = vadd.f32 %v18177_v4, %v18176_v43  ;;  %v18179_v32 = vpop.f32.mrb[142].mxu1  ;;  %v29016_v4 = vld [vmem:[#allocation19_spill] sm:$0xff] }
 0xdd3   : > { %v18180_v16 = vpop.f32.mrb[143].mxu1 }
 0xdd4   : > { %v18181_v46 = vadd.f32 %v18180_v16, %v18179_v32  ;;  %v27192_v5 = vadd.f32 %v29011_v14, %v18178_v50 }
 0xdd6   : > { %v27195_v48 = vadd.f32 %v29012_v36, %v18181_v46 }
 0xdd8   : > { %v18182_v54 = vpop.f32.mrb[144].mxu1 }
 0xdd9   : > { %v18183_v51 = vpop.f32.mrb[145].mxu1 }
 0xdda   : > { %v18184_v27 = vadd.f32 %v18183_v51, %v18182_v54  ;;  %v18185_v11 = vpop.f32.mrb[146].mxu1  ;;  %v29017_v51 = vld [vmem:[#allocation18_spill] sm:$0xff] }
 0xddb   : > { %v18186_v58 = vpop.f32.mrb[147].mxu1 }
 0xddc   : > { %v18187_v24 = vadd.f32 %v18186_v58, %v18185_v11  ;;  %v27198_v45 = vadd.f32 %v29013_v62, %v18184_v27 }
 0xdde   : > { %v27201_v42 = vadd.f32 %v29014_v21, %v18187_v24 }
 0xde0   : > { %v18188_v28 = vpop.f32.mrb[148].mxu1 }
 0xde1   : > { %v18189_v60 = vpop.f32.mrb[149].mxu1 }
 0xde2   : > { %v18190_v19 = vadd.f32 %v18189_v60, %v18188_v28  ;;  %v18191_v10 = vpop.f32.mrb[150].mxu1 }
 0xde3   : > { %v18192_v31 = vpop.f32.mrb[151].mxu1 }
 0xde4   : > { %v18193_v44 = vadd.f32 %v18192_v31, %v18191_v10  ;;  %v27204_v43 = vadd.f32 %v29015_v53, %v18190_v19  ;;  %v21824_v53 = vld [vmem:[%s28608_s5 + $0x578] ss:$12 sps:$4 sm:$0xff]  }
 0xde6   : > { %v27207_v50 = vadd.f32 %v29016_v4, %v18193_v44 }
 0xde8   : > { %v18194_v32 = vpop.f32.mrb[152].mxu1 }
 0xde9   : > { %v18195_v16 = vpop.f32.mrb[153].mxu1 }
 0xdea   : > { %v18196_v46 = vadd.f32 %v18195_v16, %v18194_v32  ;;  %v18197_v14 = vpop.f32.mrb[154].mxu1 }
 0xdeb   : > { %v18198_v36 = vpop.f32.mrb[155].mxu1 }
 0xdec   : > { %v18199_v54 = vadd.f32 %v18198_v36, %v18197_v14  ;;  %v27210_v27 = vadd.f32 %v29017_v51, %v18196_v46 }
 0xdee   : > { %v11570_v11 = vpop.f32.mrb[220].mxu0  ;;  %v27213_v58 = vadd.f32 %v26624_v41, %v18199_v54 }
 0xdef   : > { %v11571_v24 = vadd.f32 %v27028_v17, %v11570_v11  ;;  %v18944_v62 = vpop.f32.mrb[221].mxu0 }
 0xdf0   : > { %v11573_v21 = vpop.f32.mrb[222].mxu0  ;;  %v18200_v28 = vpop.f32.mrb[156].mxu1 }
 0xdf1   : > { %v11574_v60 = vadd.f32 %v27036_v57, %v11573_v21  ;;  %v18201_v19 = vpop.f32.mrb[157].mxu1  ;;  %v18945_v10 = vpop.f32.mrb[223].mxu0  ;;  %v21825_v57 = vld [vmem:[%s28608_s5 + $0x590] ss:$12 sps:$4 sm:$0xff]  }
 0xdf2   : > { %v18202_v31 = vadd.f32 %v18201_v19, %v18200_v28  ;;  %v18203_v44 = vpop.f32.mrb[158].mxu1  ;;  %v21826_v28 = vld [vmem:[%s28608_s5 + $0x5a8] ss:$12 sps:$4 sm:$0xff]   ;;  %v21827_v10 = vld [vmem:[%s28608_s5 + $0x5c0] ss:$12 sps:$4 sm:$0xff]  }
 0xdf3   : > { %v27220_v4 = vpack.c.bf16 %v11574_v60, %v11571_v24  ;;  %v18204_v32 = vpop.f32.mrb[159].mxu1 }
 0xdf4   : > { %v18205_v41 = vadd.f32 %v18204_v32, %v18203_v44  ;;  %v27223_v16 = vadd.f32 %v26636_v15, %v18202_v31 }
 0xdf5   : > { %17165 = vmatmul.mubr.msk.bf16.vlgmr.msra.gmra.mrb[44].mxu0 %vm7425_vm4, %v27220_v4 }
 0xdf6   : > { %v11578_v17 = vpop.f32.mrb[224].mxu0  ;;  %12326 = vmatprep.mubr.bf16.mxu0 %v28856_v61  ;;  %18987 = vmatpush3.bf16.msra.mxu0 %v21824_v53  ;;  %v27232_v46 = vadd.f32 %v26649_v13, %v18205_v41 }
 0xdf7   : > { %v11579_v14 = vadd.f32 %v27048_v35, %v11578_v17  ;;  %v18948_v36 = vpop.f32.mrb[225].mxu0  ;;  %18988 = vmatprep.subr.bf16.mxu0 %v28765_v37 }
 0xdf8   : > { %v11581_v15 = vpop.f32.mrb[226].mxu0  ;;  %v18206_v54 = vpop.f32.mrb[160].mxu1 }
 0xdf9   : > { %v11582_v51 = vadd.f32 %v27056_v18, %v11581_v15  ;;  %v18207_v11 = vpop.f32.mrb[161].mxu1  ;;  %v18949_v24 = vpop.f32.mrb[227].mxu0  ;;  %v21828_v15 = vld [vmem:[%s28608_s5 + $0x5d8] ss:$12 sps:$4 sm:$0xff]  }
 0xdfa   : > { %v18208_v62 = vadd.f32 %v18207_v11, %v18206_v54  ;;  %v18209_v21 = vpop.f32.mrb[162].mxu1  ;;  %18989 = vmatpush3.bf16.msra.mxu0 %v21825_v57 }
 0xdfb   : > { %v27240_v13 = vpack.c.bf16 %v11582_v51, %v11579_v14  ;;  %v18210_v60 = vpop.f32.mrb[163].mxu1  ;;  %18990 = vmatprep.subr.bf16.mxu0 %v28765_v37 }
 0xdfc   : > { %v18211_v35 = vadd.f32 %v18210_v60, %v18209_v21  ;;  %v27244_v19 = vadd.f32 %v26673_v40, %v18208_v62 }
 0xdfd   : > { %17166 = vmatmul.mubr.msk.bf16.gmra.mrb[48].mxu0 %vm7425_vm4, %v27240_v13 }
 0xdfe   : > { %v11586_v18 = vpop.f32.mrb[228].mxu0  ;;  %12336 = vmatprep.mubr.bf16.mxu0 %v28856_v61  ;;  %18991 = vmatpush3.bf16.msra.mxu0 %v21826_v28  ;;  %v27253_v31 = vadd.f32 %v26686_v47, %v18211_v35 }
 0xdff   : > { %v11587_v44 = vadd.f32 %v27068_v9, %v11586_v18  ;;  %v18952_v53 = vpop.f32.mrb[229].mxu0  ;;  %18992 = vmatprep.subr.bf16.mxu0 %v28765_v37 }
 0xe00   : > { %v11589_v40 = vpop.f32.mrb[230].mxu0  ;;  %v18212_v32 = vpop.f32.mrb[164].mxu1 }
 0xe01   : > { %v11590_v41 = vadd.f32 %v27076_v39, %v11589_v40  ;;  %v18213_v17 = vpop.f32.mrb[165].mxu1  ;;  %v18953_v57 = vpop.f32.mrb[231].mxu0 }
 0xe02   : > { %v18214_v14 = vadd.f32 %v18213_v17, %v18212_v32  ;;  %v18215_v36 = vpop.f32.mrb[166].mxu1  ;;  %18993 = vmatpush3.bf16.msra.mxu0 %v21827_v10 }
 0xe03   : > { %v27261_v47 = vpack.c.bf16 %v11590_v41, %v11587_v44  ;;  %v18216_v54 = vpop.f32.mrb[167].mxu1  ;;  %18994 = vmatprep.subr.bf16.mxu0 %v28765_v37 }
 0xe04   : > { %v18217_v9 = vadd.f32 %v18216_v54, %v18215_v36  ;;  %v27265_v51 = vadd.f32 %v26709_v49, %v18214_v14 }
 0xe05   : > { %17167 = vmatmul.mubr.msk.bf16.gmra.mrb[52].mxu0 %vm7425_vm4, %v27261_v47 }
 0xe06   : > { %v11594_v39 = vpop.f32.mrb[232].mxu0  ;;  %12346 = vmatprep.mubr.bf16.mxu0 %v28856_v61  ;;  %18995 = vmatpush3.bf16.msra.mxu0 %v21828_v15  ;;  %v27271_v11 = vadd.f32 %v26723_v59, %v18217_v9 }
 0xe07   : > { %v11595_v24 = vadd.f32 %v27088_v3, %v11594_v39  ;;  %v18956_v62 = vpop.f32.mrb[233].mxu0 }
 0xe08   : > { %v11597_v21 = vpop.f32.mrb[234].mxu0  ;;  %v18218_v28 = vpop.f32.mrb[252].mxu1 }
 0xe09   : > { %v11598_v60 = vadd.f32 %v27090_v2, %v11597_v21  ;;  %v18219_v35 = vpop.f32.mrb[253].mxu1  ;;  %v18957_v49 = vpop.f32.mrb[235].mxu0 }
 0xe0a   : > { %v18220_v18 = vadd.f32 %v18219_v35, %v18218_v28  ;;  %v18221_v10 = vpop.f32.mrb[254].mxu1 }
 0xe0b   : > { %v27275_v44 = vpack.c.bf16 %v11598_v60, %v11595_v24  ;;  %v18222_v53 = vpop.f32.mrb[255].mxu1 }
 0xe0c   : > { %v18223_v40 = vadd.f32 %v18222_v53, %v18221_v10  ;;  %v27278_v32 = vadd.f32 %v26740_v23, %v18220_v18 }
 0xe0d   : > { %17168 = vmatmul.mubr.msk.bf16.gmra.mrb[56].mxu0 %vm7425_vm4, %v27275_v44 }
 0xe0e   : > { %29018 = vst [vmem:[#allocation21_spill] sm:$0xff] %v27278_v32  ;;  %v11602_v59 = vpop.f32.mrb[236].mxu0  ;;  %12356 = vmatprep.mubr.bf16.mxu0 %v28856_v61  ;;  %v27284_v3 = vadd.f32 %v26753_v55, %v18223_v40 }
 0xe0f   : > { %v11603_v2 = vadd.f32 %v27096_v34, %v11602_v59  ;;  %v18960_v41 = vpop.f32.mrb[237].mxu0 }
 0xe10   : > { %29019 = vst [vmem:[#allocation20_spill] sm:$0xff] %v27284_v3  ;;  %v11605_v17 = vpop.f32.mrb[238].mxu0  ;;  %v18224_v57 = vpop.f32.mrb[168].mxu1 }
 0xe11   : > { %v11606_v14 = vadd.f32 %v27098_v52, %v11605_v17  ;;  %v18225_v36 = vpop.f32.mrb[169].mxu1  ;;  %v18961_v15 = vpop.f32.mrb[239].mxu0 }
 0xe12   : > { %v18226_v23 = vadd.f32 %v18225_v36, %v18224_v57  ;;  %v18227_v54 = vpop.f32.mrb[170].mxu1 }
 0xe13   : > { %v27288_v9 = vpack.c.bf16 %v11606_v14, %v11603_v2  ;;  %v18228_v39 = vpop.f32.mrb[171].mxu1 }
 0xe14   : > { %v27291_v24 = vadd.f32 %v26766_v8, %v18226_v23 }
 0xe15   : > { %17169 = vmatmul.mubr.msk.bf16.gmra.mrb[60].mxu0 %vm7425_vm4, %v27288_v9 }
 0xe16   : > { %29020 = vst [vmem:[#allocation23_spill] sm:$0xff] %v27291_v24  ;;  %v11610_v55 = vpop.f32.mrb[240].mxu0  ;;  %12366 = vmatprep.mubr.bf16.mxu0 %v28856_v61 }
 0xe17   : > { %v11611_v34 = vadd.f32 %v27104_v0, %v11610_v55  ;;  %v18964_v62 = vpop.f32.mrb[241].mxu0 }
 0xe18   : > { %v11613_v52 = vpop.f32.mrb[242].mxu0 }
 0xe19   : > { %v11614_v21 = vadd.f32 %v27106_v26, %v11613_v52  ;;  %v18965_v28 = vpop.f32.mrb[243].mxu0 }
 0xe1b   : > { %v11673_v60 = vpack.c.bf16 %v11614_v21, %v11611_v34 }
 0xe1d   : > { %17170 = vmatmul.mubr.msk.bf16.gmra.mrb[64].mxu0 %vm7425_vm4, %v11673_v60 }
 0xe1e   : > { %v11618_v35 = vpop.f32.mrb[244].mxu0  ;;  %12376 = vmatprep.mubr.bf16.mxu0 %v28856_v61 }
 0xe1f   : > { %v11619_v8 = vadd.f32 %v27111_v22, %v11618_v35  ;;  %v18968_v49 = vpop.f32.mrb[245].mxu0 }
 0xe20   : > { %v11621_v18 = vpop.f32.mrb[246].mxu0 }
 0xe21   : > { %v11622_v10 = vadd.f32 %v27119_v63, %v11621_v18  ;;  %v18969_v53 = vpop.f32.mrb[247].mxu0 }
 0xe23   : > { %v11676_v40 = vpack.c.bf16 %v11622_v10, %v11619_v8 }
 0xe25   : > { %17171 = vmatmul.mubr.msk.bf16.gmra.mrb[68].mxu0 %vm7425_vm4, %v11676_v40 }
 0xe26   : > { %v11626_v0 = vpop.f32.mrb[248].mxu0  ;;  %12386 = vmatprep.mubr.bf16.mxu0 %v28856_v61 }
 0xe27   : > { %v11627_v26 = vadd.f32 %v27129_v20, %v11626_v0  ;;  %v18972_v59 = vpop.f32.mrb[249].mxu0 }
 0xe28   : > { %v11629_v2 = vpop.f32.mrb[250].mxu0 }
 0xe29   : > { %v11630_v41 = vadd.f32 %v27137_v12, %v11629_v2  ;;  %v18973_v17 = vpop.f32.mrb[251].mxu0 }
 0xe2b   : > { %v11679_v57 = vpack.c.bf16 %v11630_v41, %v11627_v26 }
 0xe2d   : > { %17172 = vmatmul.mubr.msk.bf16.gmra.mrb[72].mxu0 %vm7425_vm4, %v11679_v57 }
 0xe2e   : > { %v11634_v22 = vpop.f32.mrb[252].mxu0  ;;  %12396 = vmatprep.mubr.bf16.mxu0 %v28856_v61 }
 0xe2f   : > { %v11635_v63 = vadd.f32 %v27147_v7, %v11634_v22  ;;  %v18976_v14 = vpop.f32.mrb[253].mxu0 }
 0xe30   : > { %v11637_v36 = vpop.f32.mrb[254].mxu0 }
 0xe31   : > { %v11638_v15 = vadd.f32 %v27152_v30, %v11637_v36  ;;  %v18977_v23 = vpop.f32.mrb[255].mxu0 }
 0xe33   : > { %v11682_v54 = vpack.c.bf16 %v11638_v15, %v11635_v63 }
 0xe35   : > { %17173 = vmatmul.mubr.msk.bf16.gmra.mrb[76].mxu0 %vm7425_vm4, %v11682_v54 }
 0xe36   : > { %v11642_v20 = vpop.f32.mrb[0].mxu0  ;;  %12406 = vmatprep.mubr.bf16.mxu0 %v28856_v61 }
 0xe37   : > { %v11643_v12 = vadd.f32 %v27157_v56, %v11642_v20  ;;  %v18980_v39 = vpop.f32.mrb[1].mxu0  ;;  %v21831_v56 = vld [vmem:[%s28610_s7 + $0x4] ss:$8 sps:$4 sm:$0xff]  }
 0xe38   : > { %v11645_v55 = vpop.f32.mrb[2].mxu0  ;;  %17196 = vmatprep.mubr.msk.bf16.mxu1 %vm13427_vm5, %v21831_v56 }
 0xe39   : > { %v11646_v34 = vadd.f32 %v27159_v33, %v11645_v55  ;;  %v18981_v62 = vpop.f32.mrb[3].mxu0  ;;  %v21978_v33 = vld [vmem:[%s28609_s6] sm:$0x7] }
 0xe3b   : > { %v11685_v52 = vpack.c.bf16 %v11646_v34, %v11643_v12 }
 0xe3d   : > { %17174 = vmatmul.mubr.msk.bf16.gmra.mrb[80].mxu0 %vm7425_vm4, %v11685_v52 }
 0xe3e   : > { %v11650_v7 = vpop.f32.mrb[4].mxu0  ;;  %12416 = vmatprep.mubr.bf16.mxu0 %v28856_v61 }
 0xe3f   : > { %v11651_v30 = vadd.f32 %v27163_v1, %v11650_v7  ;;  %v18984_v21 = vpop.f32.mrb[5].mxu0  ;;  %v29021_v1 = vld [vmem:[#allocation5_spill] sm:$0xff] }
 0xe40   : > { %v11653_v28 = vpop.f32.mrb[6].mxu0 }
 0xe41   : > { %v11688_v35 = vpack.c.bf16 %v11651_v30, %v11651_v30  ;;  %v18985_v8 = vpop.f32.mrb[7].mxu0 }
 0xe45   : > { %17175 = vmatmul.mubr.msk.bf16.gmra.mrb[84].mxu0 %vm7425_vm4, %v11688_v35 }
 0xe46   : > { %18996 = vmatprep.mubr.msk.bf16.mxu0 %vm22046_vm3, %v28765_v37 }
 0xe4d   : > { %18997 = vmatmul.mubr.msk.bf16.vlgmr.msra.gmra.mrb[88].mxu0 %vm7425_vm4, %v27220_v4  ;;  %v29022_v4 = vsub.s32 0, %v29021_v1 }
 0xe4e   : > { %19000 = vmatprep.mubr.msk.bf16.mxu0 %vm22046_vm3, %v28765_v37 }
 0xe55   : > { %19001 = vmatmul.mubr.msk.bf16.gmra.mrb[92].mxu0 %vm7425_vm4, %v27240_v13  ;;  %v27365_v13 = vrot.slane %v21978_v33, %v29022_v4 }
 0xe56   : > { %19004 = vmatprep.mubr.msk.bf16.mxu0 %vm22046_vm3, %v28765_v37 }
 0xe5d   : > { %19005 = vmatmul.mubr.msk.bf16.gmra.mrb[96].mxu0 %vm7425_vm4, %v27261_v47  ;;  %v29023_v47 = vsub.s32 1, %v29021_v1 }
 0xe5e   : > { %19008 = vmatprep.mubr.msk.bf16.mxu0 %vm22046_vm3, %v28765_v37 }
 0xe65   : > { %19009 = vmatmul.mubr.msk.bf16.gmra.mrb[100].mxu0 %vm7425_vm4, %v27275_v44  ;;  %v27369_v44 = vrot.slane %v21978_v33, %v29023_v47 }
 0xe66   : > { %19012 = vmatprep.mubr.msk.bf16.mxu0 %vm22046_vm3, %v28765_v37 }
 0xe6d   : > { %19013 = vmatmul.mubr.msk.bf16.gmra.mrb[104].mxu0 %vm7425_vm4, %v27288_v9 }
 0xe6e   : > { %19016 = vmatprep.mubr.msk.bf16.mxu0 %vm22046_vm3, %v28765_v37 }
 0xe75   : > { %19017 = vmatmul.mubr.msk.bf16.gmra.mrb[108].mxu0 %vm7425_vm4, %v11673_v60 }
 0xe76   : > { %19020 = vmatprep.mubr.msk.bf16.mxu0 %vm22046_vm3, %v28765_v37 }
 0xe7d   : > { %19021 = vmatmul.mubr.msk.bf16.gmra.mrb[112].mxu0 %vm7425_vm4, %v11676_v40 }
 0xe7e   : > { %19024 = vmatprep.mubr.msk.bf16.mxu0 %vm22046_vm3, %v28765_v37 }
 0xe85   : > { %19025 = vmatmul.mubr.msk.bf16.gmra.mrb[116].mxu0 %vm7425_vm4, %v11679_v57 }
 0xe86   : > { %19028 = vmatprep.mubr.msk.bf16.mxu0 %vm22046_vm3, %v28765_v37 }
 0xe8d   : > { %19029 = vmatmul.mubr.msk.bf16.gmra.mrb[120].mxu0 %vm7425_vm4, %v11682_v54 }
 0xe8e   : > { %19032 = vmatprep.mubr.msk.bf16.mxu0 %vm22046_vm3, %v28765_v37 }
 0xe95   : > { %19033 = vmatmul.mubr.msk.bf16.gmra.mrb[124].mxu0 %vm7425_vm4, %v11685_v52 }
 0xe96   : > { %19036 = vmatprep.mubr.msk.bf16.mxu0 %vm22046_vm3, %v28765_v37 }
 0xe9d   : > { %19037 = vmatmul.mubr.msk.bf16.gmra.mrb[128].mxu0 %vm7425_vm4, %v11688_v35 }
 0xec8   : > { %v12318_v9 = vpop.f32.mrb[44].mxu0 }
 0xec9   : > { %v19236_v60 = vadd.f32 %v12318_v9, %v27365_v13  ;;  %v12320_v49 = vpop.f32.mrb[45].mxu0 }
 0xeca   : > { %v19237_v18 = vadd.f32 %v12320_v49, %v27369_v44  ;;  %v12322_v10 = vpop.f32.mrb[46].mxu0 }
 0xecb   : > { %v12728_v53 = vmax.f32 %v19236_v60, 0.0  ;;  %v19238_v40 = vadd.f32 %v12322_v10, %v27365_v13  ;;  %v12324_v0 = vpop.f32.mrb[47].mxu0 }
 0xecc   : > { %v12729_v26 = vmax.f32 %v19237_v18, 0.0  ;;  %v19239_v59 = vadd.f32 %v12324_v0, %v27369_v44 }
 0xecd   : > { %v12731_v2 = vmax.f32 %v19238_v40, 0.0  ;;  %v12855_v17 = vrot.slane %v12728_v53, 1  ;;  %v13105_v57 = vrot.slane %v12728_v53, 2 }
 0xece   : > { %v12732_v41 = vmax.f32 %v19239_v59, 0.0  ;;  %v12858_v14 = vrot.slane %v12729_v26, 1  ;;  %v13108_v36 = vrot.slane %v12729_v26, 2 }
 0xecf   : > { %v12856_v22 = vrot.slane %v12731_v2, 1  ;;  %v13106_v63 = vrot.slane %v12731_v2, 2 }
 0xed0   : > { %v12859_v15 = vrot.slane %v12732_v41, 1  ;;  %v13109_v23 = vrot.slane %v12732_v41, 2  ;;  %v12328_v54 = vpop.f32.mrb[48].mxu0 }
 0xed1   : > { %v12857_v20 = vsel %vm12854_vm6, %v12855_v17, %v12856_v22  ;;  %v13107_v12 = vsel %vm13104_vm7, %v13105_v57, %v13106_v63  ;;  %v19240_v39 = vadd.f32 %v12328_v54, %v27365_v13  ;;  %v12330_v55 = vpop.f32.mrb[49].mxu0 }
 0xed2   : > { %v13041_v34 = vmax.f32 %v12728_v53, %v12857_v20  ;;  %v19241_v62 = vadd.f32 %v12330_v55, %v27369_v44  ;;  %v12332_v52 = vpop.f32.mrb[50].mxu0  ;;  %v12860_v7 = vsel %vm12854_vm6, %v12858_v14, %v12859_v15  ;;  %v13110_v30 = vsel %vm13104_vm7, %v13108_v36, %v13109_v23 }
 0xed3   : > { %v27381_v21 = vmax.f32 %v19240_v39, 0.0  ;;  %v19242_v28 = vadd.f32 %v12332_v52, %v27365_v13  ;;  %v12334_v35 = vpop.f32.mrb[51].mxu0  ;;  %v13042_v8 = vmax.f32 %v12729_v26, %v12860_v7 }
 0xed4   : > { %v27384_v56 = vmax.f32 %v19241_v62, 0.0  ;;  %v19243_v33 = vadd.f32 %v12334_v35, %v27369_v44  ;;  %v13291_v1 = vmax.f32 %v13041_v34, %v13107_v12 }
 0xed5   : > { %v12864_v4 = vrot.slane %v27381_v21, 1  ;;  %v13114_v47 = vrot.slane %v27381_v21, 2  ;;  %v27389_v9 = vmax.f32 %v19242_v28, 0.0  ;;  %v13292_v60 = vmax.f32 %v13042_v8, %v13110_v30 }
 0xed6   : > { %v12866_v49 = vrot.slane %v27384_v56, 1  ;;  %v13116_v18 = vrot.slane %v27384_v56, 2  ;;  %v12738_v10 = vmax.f32 %v19243_v33, 0.0 }
 0xed7   : > { %v12865_v53 = vsel %vm12854_vm6, %v12856_v22, %v12864_v4  ;;  %v13115_v40 = vsel %vm13104_vm7, %v13106_v63, %v13114_v47  ;;  %v12870_v0 = vrot.slane %v27389_v9, 1  ;;  %v13120_v26 = vrot.slane %v27389_v9, 2 }
 0xed8   : > { %v13044_v59 = vmax.f32 %v12731_v2, %v12865_v53  ;;  %v12872_v17 = vrot.slane %v12738_v10, 1  ;;  %v13122_v57 = vrot.slane %v12738_v10, 2  ;;  %v12338_v14 = vpop.f32.mrb[52].mxu0  ;;  %v12867_v36 = vsel %vm12854_vm6, %v12859_v15, %v12866_v49 }
 0xed9   : > { %v12871_v54 = vsel %vm12854_vm6, %v12864_v4, %v12870_v0  ;;  %v13121_v20 = vsel %vm13104_vm7, %v13114_v47, %v13120_v26  ;;  %v19244_v12 = vadd.f32 %v12338_v14, %v27365_v13  ;;  %v12340_v39 = vpop.f32.mrb[53].mxu0  ;;  %v13045_v22 = vmax.f32 %v12732_v41, %v12867_v36 }
 0xeda   : > { %v13047_v63 = vmax.f32 %v27381_v21, %v12871_v54  ;;  %v19245_v55 = vadd.f32 %v12340_v39, %v27369_v44  ;;  %v12342_v34 = vpop.f32.mrb[54].mxu0  ;;  %v13117_v2 = vsel %vm13104_vm7, %v13109_v23, %v13116_v18  ;;  %v13294_v62 = vmax.f32 %v13044_v59, %v13115_v40 }
 0xedb   : > { %v27404_v52 = vmax.f32 %v19244_v12, 0.0  ;;  %v19246_v15 = vadd.f32 %v12342_v34, %v27365_v13  ;;  %v12344_v7 = vpop.f32.mrb[55].mxu0  ;;  %v13295_v30 = vmax.f32 %v13045_v22, %v13117_v2  ;;  %v12873_v28 = vsel %vm12854_vm6, %v12866_v49, %v12872_v17 }
 0xedc   : > { %v27408_v35 = vmax.f32 %v19245_v55, 0.0  ;;  %v19247_v41 = vadd.f32 %v12344_v7, %v27369_v44  ;;  %v13361_v8 = vpack.c.bf16 %v13294_v62, %v13291_v1  ;;  %v13048_v21 = vmax.f32 %v27384_v56, %v12873_v28 }
 0xedd   : > { %v12876_v33 = vrot.slane %v27404_v52, 1  ;;  %v13126_v23 = vrot.slane %v27404_v52, 2  ;;  %v27414_v4 = vmax.f32 %v19246_v15, 0.0  ;;  %v13362_v47 = vpack.c.bf16 %v13295_v30, %v13292_v60 }
 0xede   : > { %v12878_v53 = vrot.slane %v27408_v35, 1  ;;  %v13128_v40 = vrot.slane %v27408_v35, 2  ;;  %v27418_v59 = vmax.f32 %v19247_v41, 0.0  ;;  %v13123_v49 = vsel %vm13104_vm7, %v13116_v18, %v13122_v57 }
 0xedf   : > { %v12877_v14 = vsel %vm12854_vm6, %v12870_v0, %v12876_v33  ;;  %v13127_v1 = vsel %vm13104_vm7, %v13120_v26, %v13126_v23  ;;  %v12882_v56 = vrot.slane %v27414_v4, 1  ;;  %v13132_v36 = vrot.slane %v27414_v4, 2  ;;  %13450 = vmatprep.subr.bf16.mxu1 %v13362_v47 }
 0xee0   : > { %v13050_v54 = vmax.f32 %v27389_v9, %v12877_v14  ;;  %v12884_v60 = vrot.slane %v27418_v59, 1  ;;  %v13134_v12 = vrot.slane %v27418_v59, 2  ;;  %v12348_v39 = vpop.f32.mrb[56].mxu0  ;;  %13451 = vmatpush1.bf16.msra.mxu1 %v13361_v8  ;;  %v12879_v22 = vsel %vm12854_vm6, %v12872_v17, %v12878_v53 }
 0xee1   : > { %v12883_v18 = vsel %vm12854_vm6, %v12876_v33, %v12882_v56  ;;  %v13133_v0 = vsel %vm13104_vm7, %v13126_v23, %v13132_v36  ;;  %v19248_v26 = vadd.f32 %v12348_v39, %v27365_v13  ;;  %v12350_v55 = vpop.f32.mrb[57].mxu0  ;;  %v13051_v34 = vmax.f32 %v12738_v10, %v12879_v22 }
 0xee2   : > { %v13053_v2 = vmax.f32 %v27404_v52, %v12883_v18  ;;  %v19249_v9 = vadd.f32 %v12350_v55, %v27369_v44  ;;  %v12352_v62 = vpop.f32.mrb[58].mxu0  ;;  %v13129_v15 = vsel %vm13104_vm7, %v13122_v57, %v13128_v40  ;;  %v13298_v7 = vmax.f32 %v13048_v21, %v13123_v49 }
 0xee3   : > { %v27435_v30 = vmax.f32 %v19248_v26, 0.0  ;;  %v19250_v17 = vadd.f32 %v12352_v62, %v27365_v13  ;;  %v12354_v28 = vpop.f32.mrb[59].mxu0  ;;  %v13301_v41 = vmax.f32 %v13051_v34, %v13129_v15  ;;  %v13297_v8 = vmax.f32 %v13047_v63, %v13121_v20 }
 0xee4   : > { %v27438_v33 = vmax.f32 %v19249_v9, 0.0  ;;  %v19251_v23 = vadd.f32 %v12354_v28, %v27369_v44  ;;  %v13300_v10 = vmax.f32 %v13050_v54, %v13127_v1  ;;  %v12885_v52 = vsel %vm12854_vm6, %v12878_v53, %v12884_v60 }
 0xee5   : > { %v12888_v47 = vrot.slane %v27435_v30, 1  ;;  %v13138_v14 = vrot.slane %v27435_v30, 2  ;;  %v27444_v57 = vmax.f32 %v19250_v17, 0.0  ;;  %v13365_v21 = vpack.c.bf16 %v13301_v41, %v13298_v7 }
 0xee6   : > { %v12890_v49 = vrot.slane %v27438_v33, 1  ;;  %v13140_v39 = vrot.slane %v27438_v33, 2  ;;  %v27448_v22 = vmax.f32 %v19251_v23, 0.0  ;;  %v13364_v20 = vpack.c.bf16 %v13300_v10, %v13297_v8 }
 0xee7   : > { %v12889_v63 = vsel %vm12854_vm6, %v12882_v56, %v12888_v47  ;;  %v13139_v1 = vsel %vm13104_vm7, %v13132_v36, %v13138_v14  ;;  %v12894_v53 = vrot.slane %v27444_v57, 1  ;;  %v13144_v54 = vrot.slane %v27444_v57, 2  ;;  %13452 = vmatprep.subr.bf16.mxu1 %v13365_v21 }
 0xee8   : > { %v13056_v18 = vmax.f32 %v27414_v4, %v12889_v63  ;;  %v12896_v26 = vrot.slane %v27448_v22, 1  ;;  %v13146_v55 = vrot.slane %v27448_v22, 2  ;;  %v12358_v34 = vpop.f32.mrb[60].mxu0  ;;  %13453 = vmatpush1.bf16.msra.mxu1 %v13364_v20  ;;  %v12891_v9 = vsel %vm12854_vm6, %v12884_v60, %v12890_v49 }
 0xee9   : > { %v27459_v62 = vsel %vm12854_vm6, %v12888_v47, %v12894_v53  ;;  %v27462_v56 = vsel %vm13104_vm7, %v13138_v14, %v13144_v54  ;;  %v19252_v36 = vadd.f32 %v12358_v34, %v27365_v13  ;;  %v12360_v15 = vpop.f32.mrb[61].mxu0  ;;  %v13054_v7 = vmax.f32 %v27408_v35, %v12885_v52 }
 0xeea   : > { %v13059_v4 = vmax.f32 %v27435_v30, %v27459_v62  ;;  %v19253_v17 = vadd.f32 %v12360_v15, %v27369_v44  ;;  %v12362_v28 = vpop.f32.mrb[62].mxu0  ;;  %v13057_v41 = vmax.f32 %v27418_v59, %v12891_v9  ;;  %v13135_v60 = vsel %vm13104_vm7, %v13128_v40, %v13134_v12 }
 0xeeb   : > { %v27471_v8 = vmax.f32 %v19252_v36, 0.0  ;;  %v19254_v23 = vadd.f32 %v12362_v28, %v27365_v13  ;;  %v12364_v10 = vpop.f32.mrb[63].mxu0  ;;  %v13141_v47 = vsel %vm13104_vm7, %v13134_v12, %v13140_v39  ;;  %v13304_v35 = vmax.f32 %v13054_v7, %v13135_v60 }
 0xeec   : > { %v27477_v52 = vmax.f32 %v19253_v17, 0.0  ;;  %v19255_v30 = vadd.f32 %v12364_v10, %v27369_v44  ;;  %v13307_v14 = vmax.f32 %v13057_v41, %v13141_v47  ;;  %v13303_v21 = vmax.f32 %v13053_v2, %v13133_v0 }
 0xeed   : > { %v12900_v59 = vrot.slane %v27471_v8, 1  ;;  %v13150_v40 = vrot.slane %v27471_v8, 2  ;;  %v27482_v20 = vmax.f32 %v19254_v23, 0.0  ;;  %v13306_v63 = vmax.f32 %v13056_v18, %v13139_v1 }
 0xeee   : > { %v12902_v34 = vrot.slane %v27477_v52, 1  ;;  %v13152_v9 = vrot.slane %v27477_v52, 2  ;;  %v27486_v62 = vmax.f32 %v19255_v30, 0.0  ;;  %v13368_v12 = vpack.c.bf16 %v13307_v14, %v13304_v35 }
 0xeef   : > { %v12901_v36 = vsel %vm12854_vm6, %v12894_v53, %v12900_v59  ;;  %v13151_v15 = vsel %vm13104_vm7, %v13144_v54, %v13150_v40  ;;  %v12906_v0 = vrot.slane %v27482_v20, 1  ;;  %v13156_v2 = vrot.slane %v27482_v20, 2 }
 0xef0   : > { %v13062_v7 = vmax.f32 %v27444_v57, %v12901_v36  ;;  %v12908_v17 = vrot.slane %v27486_v62, 1  ;;  %v13158_v1 = vrot.slane %v27486_v62, 2  ;;  %13454 = vmatprep.subr.bf16.mxu1 %v13368_v12  ;;  %v12368_v18 = vpop.f32.mrb[64].mxu0  ;;  %v13367_v28 = vpack.c.bf16 %v13306_v63, %v13303_v21 }
 0xef1   : > { %v27496_v41 = vsel %vm12854_vm6, %v12900_v59, %v12906_v0  ;;  %v27499_v53 = vsel %vm13104_vm7, %v13150_v40, %v13156_v2  ;;  %v19256_v54 = vadd.f32 %v12368_v18, %v27365_v13  ;;  %v12370_v60 = vpop.f32.mrb[65].mxu0  ;;  %v12897_v23 = vsel %vm12854_vm6, %v12890_v49, %v12896_v26 }
 0xef2   : > { %v13065_v57 = vmax.f32 %v27471_v8, %v27496_v41  ;;  %13455 = vmatpush1.bf16.msra.mxu1 %v13367_v28  ;;  %v19257_v10 = vadd.f32 %v12370_v60, %v27369_v44  ;;  %v12372_v47 = vpop.f32.mrb[66].mxu0  ;;  %v12903_v35 = vsel %vm12854_vm6, %v12896_v26, %v12902_v34  ;;  %v13060_v30 = vmax.f32 %v27438_v33, %v12897_v23 }
 0xef3   : > { %v27508_v14 = vmax.f32 %v19256_v54, 0.0  ;;  %v19258_v21 = vadd.f32 %v12372_v47, %v27365_v13  ;;  %v12374_v59 = vpop.f32.mrb[67].mxu0  ;;  %v13063_v40 = vmax.f32 %v27448_v22, %v12903_v35  ;;  %v13147_v49 = vsel %vm13104_vm7, %v13140_v39, %v13146_v55 }
 0xef4   : > { %v27515_v63 = vmax.f32 %v19257_v10, 0.0  ;;  %v19259_v12 = vadd.f32 %v12374_v59, %v27369_v44  ;;  %v13153_v26 = vsel %vm13104_vm7, %v13146_v55, %v13152_v9  ;;  %v13310_v36 = vmax.f32 %v13060_v30, %v13147_v49 }
 0xef5   : > { %v12912_v18 = vrot.slane %v27508_v14, 1  ;;  %v13162_v28 = vrot.slane %v27508_v14, 2  ;;  %v27523_v54 = vmax.f32 %v19258_v21, 0.0  ;;  %v13313_v22 = vmax.f32 %v13063_v40, %v13153_v26 }
 0xef6   : > { %v12914_v33 = vrot.slane %v27515_v63, 1  ;;  %v28753_v39 = vrot.slane %v27515_v63, 2  ;;  %v27527_v60 = vmax.f32 %v19259_v12, 0.0  ;;  %v13309_v23 = vmax.f32 %v13059_v4, %v27462_v56 }
 0xef7   : > { %v12913_v10 = vsel %vm12854_vm6, %v12906_v0, %v12912_v18  ;;  %v13163_v55 = vsel %vm13104_vm7, %v13156_v2, %v13162_v28  ;;  %v12918_v47 = vrot.slane %v27523_v54, 1  ;;  %v13168_v35 = vrot.slane %v27523_v54, 2 }
 0xef8   : > { %v13068_v30 = vmax.f32 %v27482_v20, %v12913_v10  ;;  %v12920_v21 = vrot.slane %v27527_v60, 1  ;;  %v13371_v40 = vpack.c.bf16 %v13313_v22, %v13310_v36  ;;  %v12378_v49 = vpop.f32.mrb[68].mxu0  ;;  %v13312_v0 = vmax.f32 %v13062_v7, %v13151_v15 }
 0xef9   : > { %v27538_v12 = vsel %vm12854_vm6, %v12912_v18, %v12918_v47  ;;  %v27541_v56 = vsel %vm13104_vm7, %v13162_v28, %v13168_v35  ;;  %v19260_v4 = vadd.f32 %v12378_v49, %v27365_v13  ;;  %v12380_v2 = vpop.f32.mrb[69].mxu0  ;;  %v12909_v36 = vsel %vm12854_vm6, %v12902_v34, %v12908_v17 }
 0xefa   : > { %13456 = vmatprep.subr.bf16.mxu1 %v13371_v40  ;;  %v19261_v20 = vadd.f32 %v12380_v2, %v27369_v44  ;;  %v12382_v10 = vpop.f32.mrb[70].mxu0  ;;  %v12915_v18 = vsel %vm12854_vm6, %v12908_v17, %v12914_v33  ;;  %v13370_v28 = vpack.c.bf16 %v13312_v0, %v13309_v23  ;;  %v13066_v7 = vmax.f32 %v27477_v52, %v12909_v36 }
 0xefb   : > { %v27551_v22 = vmax.f32 %v19260_v4, 0.0  ;;  %v19262_v49 = vadd.f32 %v12382_v10, %v27365_v13  ;;  %v12384_v15 = vpop.f32.mrb[71].mxu0  ;;  %v13069_v2 = vmax.f32 %v27486_v62, %v12915_v18  ;;  %v13159_v34 = vsel %vm13104_vm7, %v13152_v9, %v13158_v1 }
 0xefc   : > { %v27555_v59 = vmax.f32 %v19261_v20, 0.0  ;;  %v19263_v40 = vadd.f32 %v12384_v15, %v27369_v44  ;;  %13457 = vmatpush1.bf16.msra.mxu1 %v13370_v28  ;;  %v13165_v0 = vsel %vm13104_vm7, %v13158_v1, %v28753_v39  ;;  %v13316_v9 = vmax.f32 %v13066_v7, %v13159_v34 }
 0xefd   : > { %v12924_v17 = vrot.slane %v27551_v22, 1  ;;  %v13174_v23 = vrot.slane %v27551_v22, 2  ;;  %v27566_v4 = vmax.f32 %v19262_v49, 0.0  ;;  %v13319_v26 = vmax.f32 %v13069_v2, %v13165_v0 }
 0xefe   : > { %v12926_v20 = vrot.slane %v27555_v59, 1  ;;  %v27575_v52 = vmax.f32 %v19263_v40, 0.0  ;;  %v13318_v2 = vmax.f32 %v13068_v30, %v13163_v55 }
 0xeff   : > { %v12925_v36 = vsel %vm12854_vm6, %v12918_v47, %v12924_v17  ;;  %v13175_v18 = vsel %vm13104_vm7, %v13168_v35, %v13174_v23  ;;  %v12930_v28 = vrot.slane %v27566_v4, 1  ;;  %v13180_v49 = vrot.slane %v27566_v4, 2 }
 0xf00   : > { %v13074_v15 = vmax.f32 %v27523_v54, %v12925_v36  ;;  %v12932_v62 = vrot.slane %v27575_v52, 1  ;;  %v12388_v39 = vpop.f32.mrb[72].mxu0  ;;  %v13315_v35 = vmax.f32 %v13065_v57, %v27499_v53  ;;  %v13374_v36 = vpack.c.bf16 %v13319_v26, %v13316_v9 }
 0xf01   : > { %v27585_v40 = vsel %vm12854_vm6, %v12924_v17, %v12930_v28  ;;  %v27588_v7 = vsel %vm13104_vm7, %v13174_v23, %v13180_v49  ;;  %v19264_v47 = vadd.f32 %v12388_v39, %v27365_v13  ;;  %v12390_v54 = vpop.f32.mrb[73].mxu0  ;;  %v12921_v39 = vsel %vm12854_vm6, %v12914_v33, %v12920_v21 }
 0xf02   : > { %v19265_v0 = vadd.f32 %v12390_v54, %v27369_v44  ;;  %v12392_v17 = vpop.f32.mrb[74].mxu0  ;;  %v12927_v8 = vsel %vm12854_vm6, %v12920_v21, %v12926_v20  ;;  %13458 = vmatprep.subr.bf16.mxu1 %v13374_v36  ;;  %v13373_v41 = vpack.c.bf16 %v13318_v2, %v13315_v35  ;;  %v13072_v55 = vmax.f32 %v27515_v63, %v12921_v39 }
 0xf03   : > { %v27598_v1 = vmax.f32 %v19264_v47, 0.0  ;;  %v19266_v23 = vadd.f32 %v12392_v17, %v27365_v13  ;;  %v12394_v10 = vpop.f32.mrb[75].mxu0  ;;  %v13075_v33 = vmax.f32 %v27527_v60, %v12927_v8  ;;  %v29024_v54 = vrot.slane %v27527_v60, 2 }
 0xf04   : > { %v27607_v53 = vmax.f32 %v19265_v0, 0.0  ;;  %v19267_v57 = vadd.f32 %v12394_v10, %v27369_v44  ;;  %13459 = vmatpush1.bf16.msra.mxu1 %v13373_v41  ;;  %v29025_v10 = vrot.slane %v27515_v63, 2  ;;  %v29028_v60 = vmax.f32 %v27508_v14, %v27538_v12 }
 0xf05   : > { %v12936_v30 = vrot.slane %v27598_v1, 1  ;;  %v13186_v26 = vrot.slane %v27598_v1, 2  ;;  %v27613_v9 = vmax.f32 %v19266_v23, 0.0  ;;  %v29027_v63 = vmov %v29024_v54 }
 0xf06   : > { %v27618_v35 = vmax.f32 %v19267_v57, 0.0  ;;  %v13171_v36 = vsel %vm13104_vm7, %v29025_v10, %v29024_v54  ;;  %v29026_v57 = vrot.slane %v27555_v59, 2  ;;  %v29029_v14 = vrot.slane %v27607_v53, 1 }
 0xf07   : > { %v12937_v2 = vsel %vm12854_vm6, %v12930_v28, %v12936_v30  ;;  %v13187_v0 = vsel %vm13104_vm7, %v13180_v49, %v13186_v26  ;;  %v12942_v17 = vrot.slane %v27613_v9, 1  ;;  %v13192_v23 = vrot.slane %v27613_v9, 2 }
 0xf08   : > { %v13080_v39 = vmax.f32 %v27566_v4, %v12937_v2  ;;  %v13177_v54 = vsel %vm13104_vm7, %v29027_v63, %v29026_v57  ;;  %v12398_v10 = vpop.f32.mrb[76].mxu0  ;;  %v13322_v34 = vmax.f32 %v13072_v55, %v13171_v36  ;;  %v13321_v57 = vmax.f32 %v29028_v60, %v27541_v56 }
 0xf09   : > { %v27638_v28 = vsel %vm12854_vm6, %v12936_v30, %v12942_v17  ;;  %v27641_v49 = vsel %vm13104_vm7, %v13186_v26, %v13192_v23  ;;  %v13325_v21 = vmax.f32 %v13075_v33, %v13177_v54  ;;  %v12400_v4 = vpop.f32.mrb[77].mxu0  ;;  %v19268_v41 = vadd.f32 %v12398_v10, %v27365_v13 }
 0xf0a   : > { %v13324_v63 = vmax.f32 %v13074_v15, %v13175_v18  ;;  %v12402_v8 = vpop.f32.mrb[78].mxu0  ;;  %v19269_v47 = vadd.f32 %v12400_v4, %v27369_v44  ;;  %v12933_v33 = vsel %vm12854_vm6, %v12926_v20, %v12932_v62  ;;  %v12939_v12 = vsel %vm12854_vm6, %v12932_v62, %v29029_v14 }
 0xf0b   : > { %v13377_v30 = vpack.c.bf16 %v13325_v21, %v13322_v34  ;;  %v19270_v26 = vadd.f32 %v12402_v8, %v27365_v13  ;;  %v12404_v55 = vpop.f32.mrb[79].mxu0  ;;  %v27655_v36 = vmax.f32 %v19268_v41, 0.0  ;;  %v13078_v15 = vmax.f32 %v27555_v59, %v12933_v33 }
 0xf0c   : > { %v13376_v54 = vpack.c.bf16 %v13324_v63, %v13321_v57  ;;  %v19271_v10 = vadd.f32 %v12404_v55, %v27369_v44  ;;  %v27661_v56 = vmax.f32 %v19269_v47, 0.0  ;;  %v13081_v34 = vmax.f32 %v27575_v52, %v12939_v12 }
 0xf0d   : > { %13460 = vmatprep.subr.bf16.mxu1 %v13377_v30  ;;  %v27663_v18 = vmax.f32 %v19270_v26, 0.0  ;;  %v12948_v20 = vrot.slane %v27655_v36, 1  ;;  %v13198_v21 = vrot.slane %v27655_v36, 2  ;;  %v29030_v41 = vrot.slane %v27575_v52, 2 }
 0xf0e   : > { %13461 = vmatpush1.bf16.msra.mxu1 %v13376_v54  ;;  %v27669_v8 = vmax.f32 %v19271_v10, 0.0  ;;  %v29031_v62 = vrot.slane %v27555_v59, 2  ;;  %v29032_v12 = vrot.slane %v27607_v53, 2  ;;  %v13330_v60 = vmax.f32 %v13080_v39, %v13187_v0 }
 0xf0f   : > { %v12954_v57 = vrot.slane %v27663_v18, 1  ;;  %v13204_v63 = vrot.slane %v27663_v18, 2  ;;  %v12949_v30 = vsel %vm12854_vm6, %v12942_v17, %v12948_v20  ;;  %v13199_v26 = vsel %vm13104_vm7, %v13192_v23, %v13198_v21 }
 0xf10   : > { %v13183_v47 = vsel %vm13104_vm7, %v29031_v62, %v29030_v41  ;;  %v12956_v55 = vrot.slane %v27669_v8, 1  ;;  %v12408_v54 = vpop.f32.mrb[80].mxu0  ;;  %v13086_v59 = vmax.f32 %v27613_v9, %v12949_v30  ;;  %v13189_v17 = vsel %vm13104_vm7, %v29030_v41, %v29032_v12 }
 0xf11   : > { %v27686_v10 = vsel %vm12854_vm6, %v12948_v20, %v12954_v57  ;;  %v27689_v14 = vsel %vm13104_vm7, %v13198_v21, %v13204_v63  ;;  %v12410_v23 = vpop.f32.mrb[81].mxu0  ;;  %v13328_v33 = vmax.f32 %v13078_v15, %v13183_v47  ;;  %v13331_v2 = vmax.f32 %v13081_v34, %v13189_v17 }
 0xf12   : > { %v19272_v9 = vadd.f32 %v12408_v54, %v27365_v13  ;;  %v12412_v30 = vpop.f32.mrb[82].mxu0  ;;  %v29033_v20 = vmax.f32 %v27551_v22, %v27585_v40  ;;  %v19273_v4 = vadd.f32 %v12410_v23, %v27369_v44  ;;  %v29034_v34 = vrot.slane %v27618_v35, 1 }
 0xf13   : > { %v19274_v52 = vadd.f32 %v12412_v30, %v27365_v13  ;;  %v12414_v12 = vpop.f32.mrb[83].mxu0  ;;  %v13380_v41 = vpack.c.bf16 %v13331_v2, %v13328_v33  ;;  %v29035_v47 = vrot.slane %v27607_v53, 1  ;;  %v13336_v3 = vmax.f32 %v13086_v59, %v13199_v26 }
 0xf14   : > { %v13327_v21 = vmax.f32 %v29033_v20, %v27588_v7  ;;  %v27705_v37 = vmax.f32 %v19272_v9, 0.0  ;;  %v19275_v15 = vadd.f32 %v12414_v12, %v27369_v44  ;;  %v27713_v22 = vmax.f32 %v19273_v4, 0.0 }
 0xf15   : > { %v12945_v54 = vsel %vm12854_vm6, %v29035_v47, %v29034_v34  ;;  %v27715_v40 = vmax.f32 %v19274_v52, 0.0  ;;  %v29036_v7 = vrot.slane %v27661_v56, 1  ;;  %v29037_v0 = vmov %v29034_v34  ;;  %13462 = vmatprep.subr.bf16.mxu1 %v13380_v41 }
 0xf16   : > { %v13379_v17 = vpack.c.bf16 %v13330_v60, %v13327_v21  ;;  %v12960_v2 = vrot.slane %v27705_v37, 1  ;;  %v13210_v33 = vrot.slane %v27705_v37, 2  ;;  %v27724_v23 = vmax.f32 %v19275_v15, 0.0 }
 0xf17   : > { %v12951_v39 = vsel %vm12854_vm6, %v29037_v0, %v29036_v7  ;;  %v13084_v9 = vmax.f32 %v27607_v53, %v12945_v54  ;;  %v12962_v4 = vrot.slane %v27713_v22, 1  ;;  %v12966_v30 = vrot.slane %v27715_v40, 1 }
 0xf18   : > { %13463 = vmatpush1.bf16.msra.mxu1 %v13379_v17  ;;  %v13216_v20 = vrot.slane %v27715_v40, 2  ;;  %v12961_v21 = vsel %vm12854_vm6, %v12954_v57, %v12960_v2  ;;  %v13211_v52 = vsel %vm13104_vm7, %v13204_v63, %v13210_v33  ;;  %v12968_v12 = vrot.slane %v27724_v23, 1  ;;  %v12418_v15 = vpop.f32.mrb[84].mxu0 }
 0xf19   : > { %v13218_v41 = vrot.slane %v27724_v23, 2  ;;  %v13092_v34 = vmax.f32 %v27663_v18, %v12961_v21  ;;  %v27737_v47 = vsel %vm12854_vm6, %v12960_v2, %v12966_v30  ;;  %v13087_v17 = vmax.f32 %v27618_v35, %v12951_v39  ;;  %v12420_v7 = vpop.f32.mrb[85].mxu0 }
 0xf1a   : > { %v13217_v54 = vsel %vm13104_vm7, %v13210_v33, %v13216_v20  ;;  %v13095_v57 = vmax.f32 %v27705_v37, %v27737_v47  ;;  %v29038_v63 = vrot.slane %v27618_v35, 2  ;;  %v29039_v0 = vrot.slane %v27607_v53, 2  ;;  %v12422_v21 = vpop.f32.mrb[86].mxu0 }
 0xf1b   : > { %v29040_v60 = vrot.slane %v27661_v56, 2  ;;  %v19276_v33 = vadd.f32 %v12418_v15, %v27365_v13  ;;  %v29042_v37 = vmax.f32 %v27598_v1, %v27638_v28  ;;  %v12423_v53 = vpop.f32.mrb[87].mxu0  ;;  %v29045_v26 = vrot.slane %v27661_v56, 2 }
 0xf1c   : > { %v13195_v62 = vsel %vm13104_vm7, %v29039_v0, %v29038_v63  ;;  %v29041_v18 = vmov %v29038_v63  ;;  %v19277_v63 = vadd.f32 %v12420_v7, %v27369_v44  ;;  %v29043_v0 = vrot.slane %v27661_v56, 1 }
 0xf1d   : > { %v13201_v2 = vsel %vm13104_vm7, %v29041_v18, %v29040_v60  ;;  %v13334_v39 = vmax.f32 %v13084_v9, %v13195_v62  ;;  %v13333_v47 = vmax.f32 %v29042_v37, %v27641_v49  ;;  %v12788_v32 = vmax.f32 %v19276_v33, 0.0 }
 0xf1e   : > { %v13337_v24 = vmax.f32 %v13087_v17, %v13201_v2  ;;  %v12957_v35 = vsel %vm12854_vm6, %v29043_v0, %v12956_v55  ;;  %v12963_v60 = vsel %vm12854_vm6, %v12956_v55, %v12962_v4  ;;  %v12789_v28 = vmax.f32 %v19277_v63, 0.0 }
 0xf1f   : > { %v13382_v15 = vpack.c.bf16 %v13336_v3, %v13333_v47  ;;  %v13090_v62 = vmax.f32 %v27661_v56, %v12957_v35  ;;  %v13093_v9 = vmax.f32 %v27669_v8, %v12963_v60  ;;  %v12972_v17 = vrot.slane %v12788_v32, 1 }
 0xf20   : > { %v13383_v13 = vpack.c.bf16 %v13337_v24, %v13334_v39  ;;  %v13222_v1 = vrot.slane %v12788_v32, 2  ;;  %v29044_v49 = vrot.slane %v27669_v8, 2  ;;  %v29046_v59 = vrot.slane %v27713_v22, 2  ;;  %v12579_v37 = vpop.f32.mrb[88].mxu0 }
 0xf21   : > { %v29048_v7 = vmax.f32 %v27655_v36, %v27686_v10  ;;  %v13342_v2 = vmax.f32 %v13092_v34, %v13211_v52  ;;  %v12973_v33 = vsel %vm12854_vm6, %v12966_v30, %v12972_v17  ;;  %v13101_v21 = vmax.f32 %v12788_v32, %v12972_v17  ;;  %v18998_v0 = vpop.f32.mrb[89].mxu0 }
 0xf22   : > { %v13207_v44 = vsel %vm13104_vm7, %v29045_v26, %v29044_v49  ;;  %13464 = vmatprep.subr.bf16.mxu1 %v13383_v13  ;;  %v29047_v55 = vmov %v29044_v49  ;;  %v13223_v56 = vsel %vm13104_vm7, %v13216_v20, %v13222_v1  ;;  %v12974_v39 = vrot.slane %v12789_v28, 1  ;;  %v12582_v36 = vpop.f32.mrb[90].mxu0 }
 0xf23   : > { %v13213_v3 = vsel %vm13104_vm7, %v29047_v55, %v29046_v59  ;;  %v13340_v24 = vmax.f32 %v13090_v62, %v13207_v44  ;;  %v13339_v18 = vmax.f32 %v29048_v7, %v27689_v14  ;;  %13465 = vmatpush1.bf16.msra.mxu1 %v13382_v15  ;;  %v13098_v47 = vmax.f32 %v27715_v40, %v12973_v33  ;;  %v18999_v52 = vpop.f32.mrb[91].mxu0 }
 0xf24   : > { %v13224_v8 = vrot.slane %v12789_v28, 2  ;;  %v13343_v53 = vmax.f32 %v13093_v9, %v13213_v3  ;;  %v19281_v63 = vadd.f32 %v27180_v38, %v12579_v37  ;;  %v13102_v35 = vmax.f32 %v12789_v28, %v12974_v39 }
 0xf25   : > { %v13385_v60 = vpack.c.bf16 %v13342_v2, %v13339_v18  ;;  %v12969_v10 = vsel %vm12854_vm6, %v12962_v4, %v12968_v12  ;;  %v12975_v14 = vsel %vm12854_vm6, %v12968_v12, %v12974_v39  ;;  %v19285_v20 = vadd.f32 %v27183_v6, %v12582_v36 }
 0xf26   : > { %v13386_v32 = vpack.c.bf16 %v13343_v53, %v13340_v24  ;;  %v12730_v30 = vmax.f32 %v19281_v63, 0.0  ;;  %v13096_v34 = vmax.f32 %v27713_v22, %v12969_v10  ;;  %v13099_v40 = vmax.f32 %v27724_v23, %v12975_v14 }
 0xf27   : > { %v29049_v13 = vmov %v29046_v59  ;;  %v13225_v15 = vsel %vm13104_vm7, %v13218_v41, %v13224_v8  ;;  %v13352_v62 = vmax.f32 %v13102_v35, %v13224_v8  ;;  %v12733_v4 = vmax.f32 %v19285_v20, 0.0  ;;  %v27801_v8 = vld [vmem:[%s28610_s7] ss:$8 sps:$4 sm:$0xff]   ;;  %v27808_v35 = vld [vmem:[%s28610_s7 + $0x14] ss:$8 sps:$4 sm:$0xff]  }
 0xf28   : > { %v13219_v38 = vsel %vm13104_vm7, %v29049_v13, %v13218_v41  ;;  %13466 = vmatprep.subr.bf16.mxu1 %v13386_v32  ;;  %v12861_v12 = vrot.slane %v12730_v30, 1  ;;  %v13349_v17 = vmax.f32 %v13099_v40, %v13225_v15  ;;  %v13345_v28 = vmax.f32 %v13095_v57, %v13217_v54  ;;  %v12587_v55 = vpop.f32.mrb[92].mxu0 }
 0xf29   : > { %v13346_v9 = vmax.f32 %v13096_v34, %v13219_v38  ;;  %13467 = vmatpush1.bf16.msra.mxu1 %v13385_v60  ;;  %v13348_v6 = vmax.f32 %v13098_v47, %v13223_v56  ;;  %v13111_v49 = vrot.slane %v12730_v30, 2  ;;  %v12862_v26 = vrot.slane %v12733_v4, 1  ;;  %v19002_v7 = vpop.f32.mrb[93].mxu0 }
 0xf2a   : > { %v13112_v44 = vrot.slane %v12733_v4, 2  ;;  %v13351_v59 = vmax.f32 %v13101_v21, %v13222_v1  ;;  %v19289_v24 = vadd.f32 %v27186_v29, %v12587_v55  ;;  %v13392_v2 = vpack.c.bf16 %v13352_v62, %v13352_v62  ;;  %v12590_v33 = vpop.f32.mrb[94].mxu0 }
 0xf2b   : > { %v13389_v23 = vpack.c.bf16 %v13349_v17, %v13346_v9  ;;  %v13388_v22 = vpack.c.bf16 %v13348_v6, %v13345_v28  ;;  %v12863_v3 = vsel %vm12854_vm6, %v12861_v12, %v12862_v26  ;;  %v19293_v1 = vadd.f32 %v27189_v25, %v12590_v33  ;;  %v19003_v21 = vpop.f32.mrb[95].mxu0  ;;  %v13360_v33 = vld [vmem:[%s28610_s7 + $0x30] sm:$0xff] }
 0xf2c   : > { %v13113_v41 = vsel %vm13104_vm7, %v13111_v49, %v13112_v44  ;;  %v13043_v18 = vmax.f32 %v12730_v30, %v12863_v3  ;;  %v13391_v54 = vpack.c.bf16 %v13351_v59, %v13351_v59  ;;  %v12736_v57 = vmax.f32 %v19289_v24, 0.0  ;;  %v27829_v49 = vld [vmem:[%s28610_s7 + $0x24] ss:$8 sps:$4 sm:$0xff]  }
 0xf2d   : > { %13468 = vmatprep.subr.bf16.mxu1 %v13389_v23  ;;  %v12739_v47 = vmax.f32 %v19293_v1, 0.0 }
 0xf2e   : > { %13469 = vmatpush1.bf16.msra.mxu1 %v13388_v22  ;;  %v13293_v56 = vmax.f32 %v13043_v18, %v13113_v41  ;;  %v12868_v39 = vrot.slane %v12736_v57, 1  ;;  %v13118_v37 = vrot.slane %v12736_v57, 2  ;;  %v13442_v29 = vsel %vm13440_vm8, %v13391_v54, 0 }
 0xf2f   : > { %17195 = vmatprep.subr.msk.bf16.mxu1 %vm13440_vm8, %v13392_v2  ;;  %v12874_v0 = vrot.slane %v12739_v47, 1  ;;  %v13124_v25 = vrot.slane %v12739_v47, 2 }
 0xf30   : > { %v12869_v53 = vsel %vm12854_vm6, %v12862_v26, %v12868_v39  ;;  %v13119_v63 = vsel %vm13104_vm7, %v13112_v44, %v13118_v37  ;;  %v12595_v36 = vpop.f32.mrb[96].mxu0 }
 0xf31   : > { %v13046_v60 = vmax.f32 %v12733_v4, %v12869_v53  ;;  %v12875_v10 = vsel %vm12854_vm6, %v12868_v39, %v12874_v0  ;;  %v13125_v14 = vsel %vm13104_vm7, %v13118_v37, %v13124_v25  ;;  %v19297_v32 = vadd.f32 %v27192_v5, %v12595_v36  ;;  %v19006_v30 = vpop.f32.mrb[97].mxu0  ;;  %v27821_v5 = vld [vmem:[%s28610_s7 + $0x10] ss:$8 sps:$4 sm:$0xff]  }
 0xf32   : > { %13471 = vmatpush1.bf16.msra.mxu1 %v13442_v29  ;;  %v13049_v20 = vmax.f32 %v12736_v57, %v12875_v10  ;;  %v12598_v52 = vpop.f32.mrb[98].mxu0 }
 0xf33   : > { %13521 = vmatprep.subr.bf16.mxu1 %v28856_v61  ;;  %v13296_v34 = vmax.f32 %v13046_v60, %v13119_v63  ;;  %v12742_v40 = vmax.f32 %v19297_v32, 0.0  ;;  %v19301_v13 = vadd.f32 %v27195_v48, %v12598_v52  ;;  %v19007_v38 = vpop.f32.mrb[99].mxu0 }
 0xf34   : > { %v13299_v62 = vmax.f32 %v13049_v20, %v13125_v14 }
 0xf35   : > { %13483 = vmatmul.mubr.bf16.vlgmr.msra.gmra.mrb[172].mxu1 %v27801_v8  ;;  %v13363_v15 = vpack.c.bf16 %v13296_v34, %v13293_v56  ;;  %v12880_v4 = vrot.slane %v12742_v40, 1  ;;  %v13130_v9 = vrot.slane %v12742_v40, 2  ;;  %v12745_v12 = vmax.f32 %v19301_v13, 0.0  ;;  %v27844_v56 = vld [vmem:[%s28610_s7 + $0x20] ss:$8 sps:$4 sm:$0xff]  }
 0xf36   : > { %17197 = vmatprep.mubr.msk.bf16.mxu1 %vm13427_vm5, %v27808_v35 }
 0xf37   : > { %13522 = vmatpush1.bf16.msra.mxu1 %v13363_v15  ;;  %v12881_v17 = vsel %vm12854_vm6, %v12874_v0, %v12880_v4  ;;  %v13131_v28 = vsel %vm13104_vm7, %v13124_v25, %v13130_v9  ;;  %v12886_v48 = vrot.slane %v12745_v12, 1  ;;  %v13136_v6 = vrot.slane %v12745_v12, 2 }
 0xf38   : > { %13523 = vmatprep.subr.bf16.mxu1 %v28856_v61  ;;  %v13052_v26 = vmax.f32 %v12739_v47, %v12881_v17  ;;  %v12603_v44 = vpop.f32.mrb[100].mxu0 }
 0xf39   : > { %v12887_v59 = vsel %vm12854_vm6, %v12880_v4, %v12886_v48  ;;  %v13137_v23 = vsel %vm13104_vm7, %v13130_v9, %v13136_v6  ;;  %v19305_v55 = vadd.f32 %v27198_v45, %v12603_v44  ;;  %v19010_v22 = vpop.f32.mrb[101].mxu0 }
 0xf3a   : > { %v13055_v3 = vmax.f32 %v12742_v40, %v12887_v59  ;;  %v12606_v41 = vpop.f32.mrb[102].mxu0  ;;  %v13302_v24 = vmax.f32 %v13052_v26, %v13131_v28 }
 0xf3b   : > { %v12748_v7 = vmax.f32 %v19305_v55, 0.0  ;;  %v19309_v18 = vadd.f32 %v27201_v42, %v12606_v41  ;;  %v19011_v2 = vpop.f32.mrb[103].mxu0  ;;  %v27846_v42 = vcombine.high %v13360_v33, %v13360_v33  ;;  %v21979_v41 = vld [vmem:[%s28610_s7 + $0x4] ss:$8 sps:$4 sm:$0xff]  }
 0xf3c   : > { %v13366_v54 = vpack.c.bf16 %v13302_v24, %v13299_v62  ;;  %v13305_v57 = vmax.f32 %v13055_v3, %v13137_v23 }
 0xf3d   : > { %13493 = vmatmul.mubr.bf16.gmra.mrb[176].mxu1 %v27821_v5  ;;  %v12892_v45 = vrot.slane %v12748_v7, 1  ;;  %v13142_v1 = vrot.slane %v12748_v7, 2  ;;  %v12751_v21 = vmax.f32 %v19309_v18, 0.0 }
 0xf3e   : > { %17198 = vmatprep.mubr.msk.bf16.mxu1 %vm13427_vm5, %v27829_v49  ;;  %13524 = vmatpush1.bf16.msra.mxu1 %v13366_v54 }
 0xf3f   : > { %v12893_v39 = vsel %vm12854_vm6, %v12886_v48, %v12892_v45  ;;  %v13143_v37 = vsel %vm13104_vm7, %v13136_v6, %v13142_v1  ;;  %v12898_v47 = vrot.slane %v12751_v21, 1  ;;  %v13148_v29 = vrot.slane %v12751_v21, 2  ;;  %13525 = vmatprep.subr.bf16.mxu1 %v28856_v61 }
 0xf40   : > { %v13058_v53 = vmax.f32 %v12745_v12, %v12893_v39  ;;  %v12611_v63 = vpop.f32.mrb[104].mxu0 }
 0xf41   : > { %v12899_v0 = vsel %vm12854_vm6, %v12892_v45, %v12898_v47  ;;  %v13149_v25 = vsel %vm13104_vm7, %v13142_v1, %v13148_v29  ;;  %v19313_v60 = vadd.f32 %v27204_v43, %v12611_v63  ;;  %v19014_v36 = vpop.f32.mrb[105].mxu0  ;;  %v27858_v43 = vcombine.low %v13360_v33, %v13360_v33 }
 0xf42   : > { %v13061_v10 = vmax.f32 %v12748_v7, %v12899_v0  ;;  %v12614_v14 = vpop.f32.mrb[106].mxu0  ;;  %v13308_v32 = vmax.f32 %v13058_v53, %v13143_v37 }
 0xf43   : > { %v12754_v30 = vmax.f32 %v19313_v60, 0.0  ;;  %v19317_v20 = vadd.f32 %v27207_v50, %v12614_v14  ;;  %v19015_v52 = vpop.f32.mrb[107].mxu0 }
 0xf44   : > { %v13369_v34 = vpack.c.bf16 %v13308_v32, %v13305_v57  ;;  %v13311_v40 = vmax.f32 %v13061_v10, %v13149_v25 }
 0xf45   : > { %13503 = vmatmul.mubr.bf16.gmra.mrb[180].mxu1 %v27844_v56  ;;  %v12904_v13 = vrot.slane %v12754_v30, 1  ;;  %v13154_v38 = vrot.slane %v12754_v30, 2  ;;  %v12757_v15 = vmax.f32 %v19317_v20, 0.0 }
 0xf46   : > { %17199 = vmatprep.mubr.msk.bf16.mxu1 %vm13427_vm5, %v27846_v42  ;;  %13526 = vmatpush1.bf16.msra.mxu1 %v13369_v34 }
 0xf47   : > { %v12905_v62 = vsel %vm12854_vm6, %v12898_v47, %v12904_v13  ;;  %v13155_v4 = vsel %vm13104_vm7, %v13148_v29, %v13154_v38  ;;  %v12910_v9 = vrot.slane %v12757_v15, 1  ;;  %v13160_v12 = vrot.slane %v12757_v15, 2  ;;  %13527 = vmatprep.subr.bf16.mxu1 %v28856_v61 }
 0xf48   : > { %v13064_v50 = vmax.f32 %v12751_v21, %v12905_v62  ;;  %v12619_v17 = vpop.f32.mrb[108].mxu0 }
 0xf49   : > { %v12911_v28 = vsel %vm12854_vm6, %v12904_v13, %v12910_v9  ;;  %v13161_v48 = vsel %vm13104_vm7, %v13154_v38, %v13160_v12  ;;  %v19321_v6 = vadd.f32 %v27210_v27, %v12619_v17  ;;  %v19018_v26 = vpop.f32.mrb[109].mxu0 }
 0xf4a   : > { %v13067_v44 = vmax.f32 %v12754_v30, %v12911_v28  ;;  %v12622_v59 = vpop.f32.mrb[110].mxu0  ;;  %v13314_v23 = vmax.f32 %v13064_v50, %v13155_v4 }
 0xf4b   : > { %v12760_v55 = vmax.f32 %v19321_v6, 0.0  ;;  %v19325_v22 = vadd.f32 %v27213_v58, %v12622_v59  ;;  %v19019_v3 = vpop.f32.mrb[111].mxu0 }
 0xf4c   : > { %v13372_v24 = vpack.c.bf16 %v13314_v23, %v13311_v40  ;;  %v13317_v7 = vmax.f32 %v13067_v44, %v13161_v48 }
 0xf4d   : > { %13513 = vmatmul.mubr.bf16.gmra.mrb[184].mxu1 %v27858_v43  ;;  %v12916_v18 = vrot.slane %v12760_v55, 1  ;;  %v13166_v27 = vrot.slane %v12760_v55, 2  ;;  %v12763_v2 = vmax.f32 %v19325_v22, 0.0 }
 0xf4e   : > { %17200 = vmatprep.mubr.msk.bf16.mxu1 %vm13427_vm5, %v21979_v41  ;;  %13528 = vmatpush1.bf16.msra.mxu1 %v13372_v24 }
 0xf4f   : > { %v12917_v33 = vsel %vm12854_vm6, %v12910_v9, %v12916_v18  ;;  %v13167_v54 = vsel %vm13104_vm7, %v13160_v12, %v13166_v27  ;;  %v12922_v57 = vrot.slane %v12763_v2, 1  ;;  %v13172_v45 = vrot.slane %v12763_v2, 2  ;;  %13529 = vmatprep.subr.bf16.mxu1 %v28856_v61 }
 0xf50   : > { %v13070_v58 = vmax.f32 %v12757_v15, %v12917_v33  ;;  %v12627_v1 = vpop.f32.mrb[112].mxu0 }
 0xf51   : > { %v12923_v21 = vsel %vm12854_vm6, %v12916_v18, %v12922_v57  ;;  %v13173_v39 = vsel %vm13104_vm7, %v13166_v27, %v13172_v45  ;;  %v19329_v37 = vadd.f32 %v27223_v16, %v12627_v1  ;;  %v19022_v47 = vpop.f32.mrb[113].mxu0 }
 0xf52   : > { %v13073_v29 = vmax.f32 %v12760_v55, %v12923_v21  ;;  %v12630_v53 = vpop.f32.mrb[114].mxu0  ;;  %v13320_v63 = vmax.f32 %v13070_v58, %v13167_v54 }
 0xf53   : > { %v12766_v0 = vmax.f32 %v19329_v37, 0.0  ;;  %v19333_v25 = vadd.f32 %v27232_v46, %v12630_v53  ;;  %v19023_v60 = vpop.f32.mrb[115].mxu0 }
 0xf54   : > { %v13375_v36 = vpack.c.bf16 %v13320_v63, %v13317_v7  ;;  %v13323_v10 = vmax.f32 %v13073_v29, %v13173_v39  ;;  %v29050_v60 = vld [vmem:[#allocation21_spill] sm:$0xff] }
 0xf55   : > { %v12928_v14 = vrot.slane %v12766_v0, 1  ;;  %v13178_v32 = vrot.slane %v12766_v0, 2  ;;  %v12769_v30 = vmax.f32 %v19333_v25, 0.0 }
 0xf56   : > { %13530 = vmatpush1.bf16.msra.mxu1 %v13375_v36 }
 0xf57   : > { %v12929_v20 = vsel %vm12854_vm6, %v12922_v57, %v12928_v14  ;;  %v13179_v52 = vsel %vm13104_vm7, %v13172_v45, %v13178_v32  ;;  %v12934_v34 = vrot.slane %v12769_v30, 1  ;;  %v13184_v16 = vrot.slane %v12769_v30, 2  ;;  %13531 = vmatprep.subr.bf16.mxu1 %v28856_v61 }
 0xf58   : > { %v13076_v40 = vmax.f32 %v12763_v2, %v12929_v20  ;;  %v12635_v13 = vpop.f32.mrb[116].mxu0 }
 0xf59   : > { %v12935_v38 = vsel %vm12854_vm6, %v12928_v14, %v12934_v34  ;;  %v13185_v46 = vsel %vm13104_vm7, %v13178_v32, %v13184_v16  ;;  %v19337_v15 = vadd.f32 %v27244_v19, %v12635_v13  ;;  %v19026_v62 = vpop.f32.mrb[117].mxu0 }
 0xf5a   : > { %v13079_v4 = vmax.f32 %v12766_v0, %v12935_v38  ;;  %v12638_v9 = vpop.f32.mrb[118].mxu0  ;;  %v13326_v12 = vmax.f32 %v13076_v40, %v13179_v52  ;;  %v29051_v52 = vld [vmem:[#allocation20_spill] sm:$0xff] }
 0xf5b   : > { %v12772_v50 = vmax.f32 %v19337_v15, 0.0  ;;  %v19341_v17 = vadd.f32 %v27253_v31, %v12638_v9  ;;  %v19027_v28 = vpop.f32.mrb[119].mxu0 }
 0xf5c   : > { %v13378_v48 = vpack.c.bf16 %v13326_v12, %v13323_v10  ;;  %v13329_v6 = vmax.f32 %v13079_v4, %v13185_v46 }
 0xf5d   : > { %v12940_v26 = vrot.slane %v12772_v50, 1  ;;  %v13190_v44 = vrot.slane %v12772_v50, 2  ;;  %v12775_v59 = vmax.f32 %v19341_v17, 0.0 }
 0xf5e   : > { %13532 = vmatpush1.bf16.msra.mxu1 %v13378_v48 }
 0xf5f   : > { %v12941_v23 = vsel %vm12854_vm6, %v12934_v34, %v12940_v26  ;;  %v13191_v55 = vsel %vm13104_vm7, %v13184_v16, %v13190_v44  ;;  %v12946_v22 = vrot.slane %v12775_v59, 1  ;;  %v13196_v19 = vrot.slane %v12775_v59, 2  ;;  %13533 = vmatprep.subr.bf16.mxu1 %v28856_v61 }
 0xf60   : > { %v13082_v3 = vmax.f32 %v12769_v30, %v12941_v23  ;;  %v12643_v41 = vpop.f32.mrb[120].mxu0 }
 0xf61   : > { %v12947_v24 = vsel %vm12854_vm6, %v12940_v26, %v12946_v22  ;;  %v13197_v31 = vsel %vm13104_vm7, %v13190_v44, %v13196_v19  ;;  %v19345_v7 = vadd.f32 %v27265_v51, %v12643_v41  ;;  %v19030_v18 = vpop.f32.mrb[121].mxu0 }
 0xf62   : > { %v13085_v27 = vmax.f32 %v12772_v50, %v12947_v24  ;;  %v12646_v2 = vpop.f32.mrb[122].mxu0  ;;  %v13332_v33 = vmax.f32 %v13082_v3, %v13191_v55 }
 0xf63   : > { %v12778_v54 = vmax.f32 %v19345_v7, 0.0  ;;  %v19349_v57 = vadd.f32 %v27271_v11, %v12646_v2  ;;  %v19031_v45 = vpop.f32.mrb[123].mxu0 }
 0xf64   : > { %v13381_v58 = vpack.c.bf16 %v13332_v33, %v13329_v6  ;;  %v13335_v1 = vmax.f32 %v13085_v27, %v13197_v31  ;;  %v29052_v6 = vld [vmem:[#allocation23_spill] sm:$0xff] }
 0xf65   : > { %v12952_v21 = vrot.slane %v12778_v54, 1  ;;  %v13202_v39 = vrot.slane %v12778_v54, 2  ;;  %v12781_v37 = vmax.f32 %v19349_v57, 0.0 }
 0xf66   : > { %13534 = vmatpush1.bf16.msra.mxu1 %v13381_v58 }
 0xf67   : > { %v12953_v47 = vsel %vm12854_vm6, %v12946_v22, %v12952_v21  ;;  %v13203_v29 = vsel %vm13104_vm7, %v13196_v19, %v13202_v39  ;;  %v12958_v53 = vrot.slane %v12781_v37, 1  ;;  %v13208_v51 = vrot.slane %v12781_v37, 2  ;;  %13535 = vmatprep.subr.bf16.mxu1 %v28856_v61 }
 0xf68   : > { %v13088_v63 = vmax.f32 %v12775_v59, %v12953_v47  ;;  %v12651_v0 = vpop.f32.mrb[124].mxu0 }
 0xf69   : > { %v12959_v25 = vsel %vm12854_vm6, %v12952_v21, %v12958_v53  ;;  %v13209_v11 = vsel %vm13104_vm7, %v13202_v39, %v13208_v51  ;;  %v19353_v36 = vadd.f32 %v29050_v60, %v12651_v0  ;;  %v19034_v10 = vpop.f32.mrb[125].mxu0  ;;  %v21845_v39 = vld [vmem:[%s28611_s8 + $0x10] sm:$0xff]  }
 0xf6a   : > { %v13091_v14 = vmax.f32 %v12778_v54, %v12959_v25  ;;  %v12654_v32 = vpop.f32.mrb[126].mxu0  ;;  %v13338_v30 = vmax.f32 %v13088_v63, %v13203_v29  ;;  %v21848_v63 = vld [vmem:[%s28611_s8 + $0x60] sm:$0xff]  }
 0xf6b   : > { %v12784_v20 = vmax.f32 %v19353_v36, 0.0  ;;  %v19357_v34 = vadd.f32 %v29051_v52, %v12654_v32  ;;  %v19035_v16 = vpop.f32.mrb[127].mxu0 }
 0xf6c   : > { %v13384_v40 = vpack.c.bf16 %v13338_v30, %v13335_v1  ;;  %v13341_v13 = vmax.f32 %v13091_v14, %v13209_v11  ;;  %v21850_v16 = vld [vmem:[%s28611_s8 + $0x68] sm:$0xff]  }
 0xf6d   : > { %v12964_v38 = vrot.slane %v12784_v20, 1  ;;  %v13214_v46 = vrot.slane %v12784_v20, 2  ;;  %v12787_v15 = vmax.f32 %v19357_v34, 0.0  ;;  %v21849_v34 = vld [vmem:[%s28611_s8 + $0x20] sm:$0xff]  }
 0xf6e   : > { %13536 = vmatpush1.bf16.msra.mxu1 %v13384_v40  ;;  %v21851_v40 = vld [vmem:[%s28611_s8 + $0x28] sm:$0xff]  }
 0xf6f   : > { %v12965_v62 = vsel %vm12854_vm6, %v12958_v53, %v12964_v38  ;;  %v13215_v4 = vsel %vm13104_vm7, %v13208_v51, %v13214_v46  ;;  %v12970_v9 = vrot.slane %v12787_v15, 1  ;;  %v13220_v12 = vrot.slane %v12787_v15, 2  ;;  %13537 = vmatprep.subr.bf16.mxu1 %v28856_v61  ;;  %v21847_v53 = vld [vmem:[%s28611_s8 + $0x18] sm:$0xff]  }
 0xf70   : > { %v13094_v50 = vmax.f32 %v12781_v37, %v12965_v62  ;;  %v12659_v17 = vpop.f32.mrb[128].mxu0  ;;  %v21846_v37 = vld [vmem:[%s28611_s8 + $0x58] sm:$0xff]  }
 0xf71   : > { %v12971_v28 = vsel %vm12854_vm6, %v12964_v38, %v12970_v9  ;;  %v13221_v48 = vsel %vm13104_vm7, %v13214_v46, %v13220_v12  ;;  %v19361_v26 = vadd.f32 %v29052_v6, %v12659_v17  ;;  %v19038_v44 = vpop.f32.mrb[129].mxu0  ;;  %v21853_v38 = vld [vmem:[%s28611_s8 + $0x2a0] sm:$0xff]  }
 0xf72   : > { %v13097_v59 = vmax.f32 %v12784_v20, %v12971_v28  ;;  %v12662_v23 = vpop.f32.mrb[130].mxu0  ;;  %v13344_v55 = vmax.f32 %v13094_v50, %v13215_v4  ;;  %18350 = vmatprep.subr.bf16.mxu0 %v21853_v38  ;;  %v21854_v50 = vld [vmem:[%s28611_s8 + $0x30] sm:$0xff]   ;;  %v21855_v17 = vld [vmem:[%s28611_s8 + $0x260] sm:$0xff]   ;;  %v21856_v28 = vld [vmem:[%s28611_s8 + $0x78] sm:$0xff]  }
 0xf73   : > { %v12790_v22 = vmax.f32 %v19361_v26, 0.0  ;;  %v19039_v19 = vpop.f32.mrb[131].mxu0  ;;  %18351 = vmatpush3.bf16.msra.mxu0 %v21855_v17  ;;  %v21858_v26 = vld [vmem:[%s28611_s8 + $0x38] sm:$0xff]   ;;  %v21859_v44 = vld [vmem:[%s28611_s8 + $0x268] sm:$0xff]  }
 0xf74   : > { %v13387_v3 = vpack.c.bf16 %v13344_v55, %v13341_v13  ;;  %v13347_v41 = vmax.f32 %v13097_v59, %v13221_v48  ;;  %v21852_v13 = vld [vmem:[%s28611_s8 + $0x70] sm:$0xff]   ;;  %v21857_v48 = vld [vmem:[%s28611_s8 + $0x2a8] sm:$0xff]  }
 0xf75   : > { %v12976_v24 = vrot.slane %v12790_v22, 1  ;;  %v13226_v31 = vrot.slane %v12790_v22, 2  ;;  %18352 = vmatprep.subr.bf16.mxu0 %v21857_v48  ;;  %v21860_v55 = vld [vmem:[%s28611_s8 + $0x2b0] sm:$0xff]  }
 0xf76   : > { %13538 = vmatpush1.bf16.msra.mxu1 %v13387_v3 }
 0xf77   : > { %v12977_v7 = vsel %vm12854_vm6, %v12970_v9, %v12976_v24  ;;  %v13103_v18 = vmax.f32 %v12790_v22, %v12976_v24  ;;  %v13227_v27 = vsel %vm13104_vm7, %v13220_v12, %v13226_v31  ;;  %13539 = vmatprep.subr.bf16.mxu1 %v28856_v61  ;;  %18353 = vmatpush3.bf16.msra.mxu0 %v21859_v44  ;;  %v29053_v24 = vmov 0.0  }
 0xf78   : > { %v13100_v2 = vmax.f32 %v12787_v15, %v12977_v7  ;;  %18354 = vmatprep.subr.bf16.mxu0 %v21860_v55 }
 0xf79   : > { %v13353_v33 = vmax.f32 %v13103_v18, %v13226_v31  ;;  %v21863_v31 = vld [vmem:[%s28611_s8 + $0x2b8] sm:$0xff]  }
 0xf7a   : > { %v13350_v54 = vmax.f32 %v13100_v2, %v13227_v27  ;;  %v21865_v2 = vld [vmem:[%s28611_s8 + $0x278] sm:$0xff]  }
 0xf7b   : > { %v13393_v45 = vpack.c.bf16 %v13353_v33, %v13353_v33  ;;  %v21866_v33 = vld [vmem:[%s28611_s8 + $0x2c0] sm:$0xff]  }
 0xf7c   : > { %v13390_v57 = vpack.c.bf16 %v13350_v54, %v13347_v41  ;;  %v21862_v41 = vld [vmem:[%s28611_s8 + $0x270] sm:$0xff]  }
 0xf7d   : > { %v13448_v58 = vsel %vm13440_vm8, %v13393_v45, 0  ;;  %18355 = vmatpush3.bf16.msra.mxu0 %v21862_v41 }
 0xf7e   : > { %13540 = vmatpush1.bf16.msra.mxu1 %v13390_v57  ;;  %18356 = vmatprep.subr.bf16.mxu0 %v21863_v31 }
 0xf7f   : > { %13541 = vmatprep.subr.bf16.mxu1 %v28856_v61  ;;  %v21840_v61 = vld [vmem:[%s28611_s8 + $0x40] sm:$0xff]  }
 0xf81   : > { %18357 = vmatpush3.bf16.msra.mxu0 %v21865_v2 }
 0xf82   : > { %13542 = vmatpush1.bf16.msra.mxu1 %v13448_v58  ;;  %v21868_v58 = vld [vmem:[%s28611_s8 + $0x280] sm:$0xff]   ;;  %18358 = vmatprep.subr.bf16.mxu0 %v21866_v33 }
 0xf83   : > { %18246 = vmatprep.subr.bf16.mxu1 %v21840_v61  ;;  %v21870_v61 = vld [vmem:[%s28611_s8 + $0x2c8] sm:$0xff]  }
 0xf85   : > { %13554 = vmatmul.mubr.bf16.vlgmr.msra.gmra.mrb[188].mxu1 %v27801_v8  ;;  %v21841_v8 = vld [vmem:[%s28611_s8] sm:$0xff]   ;;  %18359 = vmatpush3.bf16.msra.mxu0 %v21868_v58 }
 0xf86   : > { %17201 = vmatprep.mubr.msk.bf16.mxu1 %vm13427_vm5, %v27808_v35  ;;  %v21842_v35 = vld [vmem:[%s28611_s8 + $0x48] sm:$0xff]   ;;  %18247 = vmatpush3.bf16.msra.mxu1 %v21841_v8 }
 0xf87   : > { %18248 = vmatprep.subr.bf16.mxu1 %v21842_v35  ;;  %v21872_v35 = vld [vmem:[%s28611_s8 + $0x288] sm:$0xff]   ;;  %18360 = vmatprep.subr.bf16.mxu0 %v21870_v61 }
 0xf89   : > { %18361 = vmatpush3.bf16.msra.mxu0 %v21872_v35 }
 0xf8d   : > { %13562 = vmatmul.mubr.bf16.gmra.mrb[192].mxu1 %v27821_v5 }
 0xf8e   : > { %17202 = vmatprep.mubr.msk.bf16.mxu1 %vm13427_vm5, %v27829_v49 }
 0xf95   : > { %13570 = vmatmul.mubr.bf16.gmra.mrb[196].mxu1 %v27844_v56  ;;  %v21843_v56 = vld [vmem:[%s28611_s8 + $0x8] sm:$0xff]  }
 0xf96   : > { %17203 = vmatprep.mubr.msk.bf16.mxu1 %vm13427_vm5, %v27846_v42  ;;  %18249 = vmatpush3.bf16.msra.mxu1 %v21843_v56 }
 0xf9d   : > { %13578 = vmatmul.mubr.bf16.gmra.mrb[200].mxu1 %v27858_v43  ;;  %v21844_v43 = vld [vmem:[%s28611_s8 + $0x50] sm:$0xff]  }
 0xf9e   : > { %18250 = vmatprep.subr.bf16.mxu1 %v21844_v43  ;;  %v21874_v43 = vld [vmem:[%s28611_s8 + $0x2d0] sm:$0xff]  }
 0xf9f   : > { %18251 = vmatpush3.bf16.msra.mxu1 %v21845_v39  ;;  %18362 = vmatprep.subr.bf16.mxu0 %v21874_v43 }
 0xfa0   : > { %18252 = vmatprep.subr.bf16.mxu1 %v21846_v37 }
 0xfa3   : > { %18253 = vmatpush3.bf16.msra.mxu1 %v21847_v53  ;;  %v21876_v53 = vld [vmem:[%s28611_s8 + $0x290] sm:$0xff]  }
 0xfa4   : > { %18254 = vmatprep.subr.bf16.mxu1 %v21848_v63  ;;  %v21878_v63 = vld [vmem:[%s28611_s8 + $0x2d8] sm:$0xff]   ;;  %18363 = vmatpush3.bf16.msra.mxu0 %v21876_v53 }
 0xfa5   : > { %18364 = vmatprep.subr.bf16.mxu0 %v21878_v63 }
 0xfa7   : > { %18255 = vmatpush3.bf16.msra.mxu1 %v21849_v34 }
 0xfa8   : > { %18256 = vmatprep.subr.bf16.mxu1 %v21850_v16 }
 0xfab   : > { %18257 = vmatpush3.bf16.msra.mxu1 %v21851_v40 }
 0xfac   : > { %18258 = vmatprep.subr.bf16.mxu1 %v21852_v13 }
 0xfaf   : > { %18259 = vmatpush3.bf16.msra.mxu1 %v21854_v50 }
 0xfb0   : > { %18260 = vmatprep.subr.bf16.mxu1 %v21856_v28 }
 0xfb3   : > { %18261 = vmatpush3.bf16.msra.mxu1 %v21858_v26 }
 0xfb4   : > { %19040 = vmatprep.subr.bf16.mxu1 %v29053_v24 }
0x1008   : > { %v27930_v5 = vpop.f32.mrb[172].mxu1 }
0x1009   : > { %v27932_v49 = vpop.f32.mrb[173].mxu1 }
0x100a   : > { %v27937_v42 = vpop.f32.mrb[174].mxu1 }
0x100b   : > { %v20737_v1 = vpack.i.bf16 %v27937_v42, %v27930_v5  ;;  %v27944_v21 = vpop.f32.mrb[175].mxu1 }
0x100d   : > { %20713 = vrot.lane.b32.xlu1 %v20737_v1, %s22047_s28 }
0x1010   : > { %v27953_v47 = vpop.f32.mrb[176].mxu1 }
0x1011   : > { %v27955_v29 = vpop.f32.mrb[177].mxu1 }
0x1012   : > { %v27960_v51 = vpop.f32.mrb[178].mxu1 }
0x1013   : > { %v27967_v0 = vpack.i.bf16 %v27960_v51, %v27953_v47  ;;  %v27969_v25 = vpop.f32.mrb[179].mxu1 }
0x1018   : > { %v27971_v11 = vpop.f32.mrb[180].mxu1 }
0x1019   : > { %v27973_v60 = vpop.f32.mrb[181].mxu1 }
0x101a   : > { %v27975_v36 = vpop.f32.mrb[182].mxu1 }
0x101b   : > { %v27979_v10 = vpack.i.bf16 %v27975_v36, %v27971_v11  ;;  %v27981_v14 = vpop.f32.mrb[183].mxu1 }
0x1020   : > { %v27983_v32 = vpop.f32.mrb[184].mxu1 }
0x1021   : > { %v27985_v30 = vpop.f32.mrb[185].mxu1 }
0x1022   : > { %v13518_v20 = vpop.f32.mrb[186].mxu1 }
0x1023   : > { %v13519_v52 = vpop.f32.mrb[187].mxu1 }
0x1058   : > { %v28002_v46 = vpop.f32.mrb[188].mxu1 }
0x1059   : > { %v20722_v15 = vpack.i.bf16 %v28002_v46, %v27932_v49  ;;  %v13557_v62 = vpop.f32.mrb[189].mxu1 }
0x105a   : > { %v28006_v4 = vpop.f32.mrb[190].mxu1 }
0x105b   : > { %v20732_v9 = vpack.i.bf16 %v28006_v4, %v27944_v21  ;;  %20723 = vrot.lane.b32.xlu1 %v20722_v15, %s22048_s26  ;;  %20718 = vrot.lane.b32.xlu0 %v20722_v15, %s22047_s28  ;;  %v13560_v12 = vpop.f32.mrb[191].mxu1 }
0x105f   : > { %20738 = vrot.lane.b32.xlu1 %v20737_v1, %s22048_s26  ;;  %20728 = vrot.lane.b32.xlu0 %v20732_v9, %s22047_s28 }
0x1060   : > { %v28026_v6 = vpop.f32.mrb[192].mxu1 }
0x1061   : > { %v20752_v59 = vpack.i.bf16 %v28026_v6, %v27955_v29  ;;  %v13565_v23 = vpop.f32.mrb[193].mxu1 }
0x1062   : > { %v28039_v22 = vpop.f32.mrb[194].mxu1 }
0x1063   : > { %20733 = vrot.lane.b32.xlu0 %v20732_v9, %s22048_s26  ;;  %20753 = vrot.lane.b32.xlu1 %v20752_v59, %s22048_s26  ;;  %v20762_v19 = vpack.i.bf16 %v28039_v22, %v27969_v25  ;;  %v13568_v3 = vpop.f32.mrb[195].mxu1 }
0x1067   : > { %20743 = vrot.lane.b32.xlu0 %v27967_v0, %s22047_s28  ;;  %20758 = vrot.lane.b32.xlu1 %v20762_v19, %s22047_s28 }
0x1068   : > { %v28055_v7 = vpop.f32.mrb[196].mxu1 }
0x1069   : > { %v20782_v18 = vpack.i.bf16 %v28055_v7, %v27973_v60  ;;  %v13573_v27 = vpop.f32.mrb[197].mxu1 }
0x106a   : > { %v28065_v54 = vpop.f32.mrb[198].mxu1 }
0x106b   : > { %20748 = vrot.lane.b32.xlu0 %v20752_v59, %s22047_s28  ;;  %20768 = vrot.lane.b32.xlu1 %v27967_v0, %s22048_s26  ;;  %v20792_v57 = vpack.i.bf16 %v28065_v54, %v27981_v14  ;;  %v13576_v45 = vpop.f32.mrb[199].mxu1  ;;  %v21880_v0 = vld [vmem:[%s28611_s8 + $0x298] sm:$0xff]  }
0x106c   : > { %18365 = vmatpush3.bf16.msra.mxu0 %v21880_v0 }
0x106d   : > { %19080 = vmatprep.subr.bf16.mxu0 %v29053_v24 }
0x106f   : > { %20763 = vrot.lane.b32.xlu0 %v20762_v19, %s22048_s26  ;;  %20783 = vrot.lane.b32.xlu1 %v20782_v18, %s22048_s26 }
0x1070   : > { %v28080_v8 = vpop.f32.mrb[200].mxu1 }
0x1071   : > { %v20807_v56 = vpack.i.bf16 %v28080_v8, %v27985_v30  ;;  %v13581_v1 = vpop.f32.mrb[201].mxu1 }
0x1072   : > { %v13582_v39 = vpop.f32.mrb[202].mxu1 }
0x1073   : > { %20773 = vrot.lane.b32.xlu0 %v27979_v10, %s22047_s28  ;;  %20788 = vrot.lane.b32.xlu1 %v20792_v57, %s22047_s28  ;;  %v13583_v37 = vpop.f32.mrb[203].mxu1 }
0x1077   : > { %20778 = vrot.lane.b32.xlu0 %v20782_v18, %s22047_s28  ;;  %20798 = vrot.lane.b32.xlu1 %v27979_v10, %s22048_s26 }
0x107b   : > { %20793 = vrot.lane.b32.xlu0 %v20792_v57, %s22048_s26  ;;  %13642 = vrot.lane.b32.xlu1 %v27983_v32, %s22047_s28 }
0x107f   : > { %13741 = vrot.lane.b32.xlu1 %v27983_v32, %s22048_s26  ;;  %20803 = vrot.lane.b32.xlu0 %v20807_v56, %s22047_s28  ;;  %v20714_v10 = vpop.permute.xlu1 %20713 }
0x1080   : > { %v20715_v38 = vunpack.i.l.bf16 %v20714_v10  ;;  %v20716_v12 = vunpack.i.h.bf16 %v20714_v10 }
0x1083   : > { %20808 = vrot.lane.b32.xlu0 %v20807_v56, %s22048_s26 }
0x10cd   : > { %v20724_v20 = vpop.permute.xlu1 %20723  ;;  %v20719_v52 = vpop.permute.xlu0 %20718 }
0x10ce   : > { %v20721_v34 = vunpack.i.h.bf16 %v20719_v52  ;;  %v20720_v16 = vunpack.i.l.bf16 %v20719_v52  ;;  %v20726_v50 = vunpack.i.h.bf16 %v20724_v20  ;;  %v20725_v17 = vunpack.i.l.bf16 %v20724_v20 }
0x10d0   : > { %v13650_v15 = vsel %vm13648_vm9, %v20720_v16, %v20721_v34  ;;  %v13686_v48 = vmax.f32 %v28002_v46, %v20721_v34  ;;  %v13649_v26 = vsel %vm13648_vm9, %v20715_v38, %v20720_v16  ;;  %v13749_v2 = vsel %vm13747_vm10, %v20725_v17, %v20726_v50 }
0x10d1   : > { %v20739_v40 = vpop.permute.xlu1 %20738  ;;  %v20729_v13 = vpop.permute.xlu0 %20728  ;;  %v13685_v44 = vmax.f32 %v27932_v49, %v13650_v15  ;;  %v13684_v46 = vmax.f32 %v27930_v5, %v13649_v26 }
0x10d2   : > { %v20740_v62 = vunpack.i.l.bf16 %v20739_v40  ;;  %v20731_v9 = vunpack.i.h.bf16 %v20729_v13  ;;  %v20730_v28 = vunpack.i.l.bf16 %v20729_v13  ;;  %v20741_v59 = vunpack.i.h.bf16 %v20739_v40 }
0x10d3   : > { %v13785_v57 = vmax.f32 %v13686_v48, %v20726_v50  ;;  %v13784_v1 = vmax.f32 %v13685_v44, %v13749_v2 }
0x10d4   : > { %v13651_v23 = vsel %vm13648_vm9, %v20716_v12, %v20730_v28  ;;  %v13652_v55 = vsel %vm13648_vm9, %v20730_v28, %v20731_v9  ;;  %v13748_v41 = vsel %vm13747_vm10, %v20740_v62, %v20725_v17  ;;  %v13689_v31 = vmax.f32 %v28006_v4, %v20731_v9  ;;  %v21864_v9 = vld [vmem:[%s28611_s8 + $0x88] sm:$0xff]  }
0x10d5   : > { %v20734_v19 = vpop.permute.xlu0 %20733  ;;  %v20754_v3 = vpop.permute.xlu1 %20753  ;;  %v13687_v33 = vmax.f32 %v27937_v42, %v13651_v23  ;;  %v13688_v49 = vmax.f32 %v27944_v21, %v13652_v55  ;;  %v13783_v35 = vmax.f32 %v13684_v46, %v13748_v41  ;;  %v21861_v21 = vld [vmem:[%s28611_s8 + $0x80] sm:$0xff]  }
0x10d6   : > { %v20736_v18 = vunpack.i.h.bf16 %v20734_v19  ;;  %v20735_v27 = vunpack.i.l.bf16 %v20734_v19  ;;  %v20756_v38 = vunpack.i.h.bf16 %v20754_v3  ;;  %v20755_v15 = vunpack.i.l.bf16 %v20754_v3 }
0x10d8   : > { %v13750_v45 = vsel %vm13747_vm10, %v20741_v59, %v20735_v27  ;;  %v13751_v58 = vsel %vm13747_vm10, %v20735_v27, %v20736_v18  ;;  %v13788_v61 = vmax.f32 %v13689_v31, %v20736_v18  ;;  %v13753_v3 = vsel %vm13747_vm10, %v20755_v15, %v20756_v38 }
0x10d9   : > { %v13786_v56 = vmax.f32 %v13687_v33, %v13750_v45  ;;  %v20744_v43 = vpop.permute.xlu0 %20743  ;;  %v20759_v4 = vpop.permute.xlu1 %20758  ;;  %v13787_v39 = vmax.f32 %v13688_v49, %v13751_v58 }
0x10da   : > { %v28127_v37 = vpack.c.bf16 %v13788_v61, %v13785_v57  ;;  %v20746_v53 = vunpack.i.h.bf16 %v20744_v43  ;;  %v20760_v42 = vunpack.i.l.bf16 %v20759_v4  ;;  %v20761_v0 = vunpack.i.h.bf16 %v20759_v4 }
0x10db   : > { %v28129_v5 = vpack.c.bf16 %v13786_v56, %v13783_v35  ;;  %v28131_v63 = vpack.c.bf16 %v13787_v39, %v13784_v1  ;;  %v20745_v34 = vunpack.i.l.bf16 %v20744_v43  ;;  %v21871_v56 = vld [vmem:[%s28611_s8 + $0x98] sm:$0xff]   ;;  %v21873_v1 = vld [vmem:[%s28611_s8 + $0xe0] sm:$0xff]  }
0x10dc   : > { %v13655_v10 = vsel %vm13648_vm9, %v20746_v53, %v20760_v42  ;;  %v13656_v12 = vsel %vm13648_vm9, %v20760_v42, %v20761_v0  ;;  %v13695_v23 = vmax.f32 %v28039_v22, %v20761_v0  ;;  %v21869_v22 = vld [vmem:[%s28611_s8 + $0xd8] sm:$0xff]  }
0x10dd   : > { %14005 = vmatprep.mubr.bf16.mxu1 %v28131_v63  ;;  %v20749_v20 = vpop.permute.xlu0 %20748  ;;  %v20769_v52 = vpop.permute.xlu1 %20768  ;;  %v13693_v16 = vmax.f32 %v27960_v51, %v13655_v10  ;;  %v13694_v41 = vmax.f32 %v27969_v25, %v13656_v12  ;;  %v14103_v42 = vrot.slane %v28131_v63, 4 }
0x10de   : > { %v20751_v40 = vunpack.i.h.bf16 %v20749_v20  ;;  %v20750_v13 = vunpack.i.l.bf16 %v20749_v20  ;;  %14006 = vmatmul.mubr.bf16.vlgmr.msra.gmra.mrb[204].mxu1 %v28129_v5  ;;  %v20770_v62 = vunpack.i.l.bf16 %v20769_v52  ;;  %v20771_v55 = vunpack.i.h.bf16 %v20769_v52 }
0x10df   : > { %19041 = vmatpush3.bf16.msra.mxu1 %v21861_v21  ;;  %19046 = vmatprep.mubr.msk.bf16.mxu1 %vm22046_vm3, %v29053_v24 }
0x10e0   : > { %v13692_v50 = vmax.f32 %v28026_v6, %v20751_v40  ;;  %v13653_v51 = vsel %vm13648_vm9, %v20745_v34, %v20750_v13  ;;  %v13654_v17 = vsel %vm13648_vm9, %v20750_v13, %v20751_v40  ;;  %19042 = vmatprep.subr.bf16.mxu1 %v29053_v24  ;;  %v13752_v26 = vsel %vm13747_vm10, %v20770_v62, %v20755_v15  ;;  %v21875_v40 = vld [vmem:[%s28611_s8 + $0xa0] sm:$0xff]   ;;  %v21877_v62 = vld [vmem:[%s28611_s8 + $0xe8] sm:$0xff]  }
0x10e1   : > { %v13690_v28 = vmax.f32 %v27953_v47, %v13653_v51  ;;  %v13691_v48 = vmax.f32 %v27955_v29, %v13654_v17  ;;  %v20764_v44 = vpop.permute.xlu0 %20763  ;;  %v28153_v59 = vpop.permute.xlu1 %20783  ;;  %v21867_v47 = vld [vmem:[%s28611_s8 + $0x90] sm:$0xff]  }
0x10e2   : > { %v20766_v19 = vunpack.i.h.bf16 %v20764_v44  ;;  %v20765_v6 = vunpack.i.l.bf16 %v20764_v44  ;;  %v13791_v29 = vmax.f32 %v13692_v50, %v20756_v38  ;;  %v20786_v20 = vunpack.i.h.bf16 %v28153_v59 }
0x10e3   : > { %v13789_v31 = vmax.f32 %v13690_v28, %v13752_v26  ;;  %19043 = vmatpush3.bf16.msra.mxu1 %v21864_v9  ;;  %v13790_v49 = vmax.f32 %v13691_v48, %v13753_v3  ;;  %v20785_v52 = vunpack.i.l.bf16 %v28153_v59 }
0x10e4   : > { %v13754_v18 = vsel %vm13747_vm10, %v20771_v55, %v20765_v6  ;;  %v13755_v27 = vsel %vm13747_vm10, %v20765_v6, %v20766_v19  ;;  %v13794_v2 = vmax.f32 %v13695_v23, %v20766_v19  ;;  %19044 = vmatprep.subr.bf16.mxu1 %v29053_v24 }
0x10e5   : > { %v13792_v46 = vmax.f32 %v13693_v16, %v13754_v18  ;;  %v20774_v25 = vpop.permute.xlu0 %20773  ;;  %v20789_v33 = vpop.permute.xlu1 %20788  ;;  %v13793_v57 = vmax.f32 %v13694_v41, %v13755_v27 }
0x10e6   : > { %v28167_v45 = vpack.c.bf16 %v13794_v2, %v13791_v29  ;;  %v20776_v61 = vunpack.i.h.bf16 %v20774_v25  ;;  %v20790_v35 = vunpack.i.l.bf16 %v20789_v33  ;;  %v20791_v4 = vunpack.i.h.bf16 %v20789_v33 }
0x10e7   : > { %v28169_v58 = vpack.c.bf16 %v13792_v46, %v13789_v31  ;;  %19045 = vmatpush3.bf16.msra.mxu1 %v21867_v47  ;;  %v28174_v43 = vpack.c.bf16 %v13793_v57, %v13790_v49  ;;  %v20775_v21 = vunpack.i.l.bf16 %v20774_v25  ;;  %v21883_v46 = vld [vmem:[%s28611_s8 + $0x2e0] sm:$0xff]   ;;  %v21884_v49 = vld [vmem:[%s28611_s8 + $0xf8] sm:$0xff]  }
0x10e8   : > { %18272 = vmatprep.subr.bf16.mxu1 %v21869_v22  ;;  %v13659_v34 = vsel %vm13648_vm9, %v20776_v61, %v20790_v35  ;;  %v13660_v63 = vsel %vm13648_vm9, %v20790_v35, %v20791_v4  ;;  %v13701_v51 = vmax.f32 %v28065_v54, %v20791_v4  ;;  %v21882_v22 = vld [vmem:[%s28611_s8 + $0xb0] sm:$0xff]  }
0x10e9   : > { %v20779_v39 = vpop.permute.xlu0 %20778  ;;  %v20799_v53 = vpop.permute.xlu1 %20798  ;;  %v13699_v26 = vmax.f32 %v27975_v36, %v13659_v34  ;;  %v13700_v44 = vmax.f32 %v27981_v14, %v13660_v63  ;;  %v21881_v36 = vld [vmem:[%s28611_s8 + $0xf0] sm:$0xff]   ;;  %v21892_v63 = vld [vmem:[%s28611_s8 + $0xc8] sm:$0xff]  }
0x10ea   : > { %19047 = vmatmul.mubr.msk.bf16.vlgmr.msra.gmra.mrb[208].mxu1 %vm13969_vm11, %v28127_v37  ;;  %v20781_v0 = vunpack.i.h.bf16 %v20779_v39  ;;  %v20780_v10 = vunpack.i.l.bf16 %v20779_v39  ;;  %v20800_v16 = vunpack.i.l.bf16 %v20799_v53  ;;  %v20801_v17 = vunpack.i.h.bf16 %v20799_v53  ;;  %v21887_v53 = vld [vmem:[%s28611_s8 + $0x100] sm:$0xff]   ;;  %v21891_v34 = vld [vmem:[%s28611_s8 + $0x3d0] sm:$0xff]  }
0x10eb   : > { %18273 = vmatpush3.bf16.msra.mxu1 %v21871_v56  ;;  %14256 = vmatprep.mubr.bf16.mxu1 %v14103_v42 }
0x10ec   : > { %v13698_v13 = vmax.f32 %v28055_v7, %v20781_v0  ;;  %v13657_v38 = vsel %vm13648_vm9, %v20775_v21, %v20780_v10  ;;  %v13658_v15 = vsel %vm13648_vm9, %v20780_v10, %v20781_v0  ;;  %18274 = vmatprep.subr.bf16.mxu1 %v21873_v1  ;;  %v13757_v7 = vsel %vm13747_vm10, %v20785_v52, %v20786_v20  ;;  %v21886_v1 = vld [vmem:[%s28611_s8 + $0x2e8] sm:$0xff]   ;;  %v21888_v0 = vld [vmem:[%s28611_s8 + $0xc0] sm:$0xff]   ;;  %v21889_v10 = vld [vmem:[%s28611_s8 + $0x2f0] sm:$0xff]  }
0x10ed   : > { %v13696_v9 = vmax.f32 %v27971_v11, %v13657_v38  ;;  %v13697_v12 = vmax.f32 %v27973_v60, %v13658_v15  ;;  %v20794_v50 = vpop.permute.xlu0 %20793  ;;  %v13756_v59 = vsel %vm13747_vm10, %v20800_v16, %v20785_v52  ;;  %v21879_v11 = vld [vmem:[%s28611_s8 + $0xa8] sm:$0xff]   ;;  %v13643_v6 = vpop.permute.xlu1 %13642  ;;  %v21894_v38 = vld [vmem:[%s28611_s8 + $0x110] sm:$0xff]  }
0x10ee   : > { %v20796_v28 = vunpack.i.h.bf16 %v20794_v50  ;;  %v20795_v48 = vunpack.i.l.bf16 %v20794_v50  ;;  %v13797_v60 = vmax.f32 %v13698_v13, %v20786_v20  ;;  %v21890_v52 = vld [vmem:[%s28611_s8 + $0x108] sm:$0xff]   ;;  %v21893_v13 = vld [vmem:[%s28611_s8 + $0x390] sm:$0xff]   ;;  %v21899_v50 = vld [vmem:[%s28611_s8 + $0x118] sm:$0xff]  }
0x10ef   : > { %18275 = vmatpush3.bf16.msra.mxu1 %v21875_v40  ;;  %v13795_v19 = vmax.f32 %v13696_v9, %v13756_v59  ;;  %v13796_v41 = vmax.f32 %v13697_v12, %v13757_v7  ;;  %v21897_v9 = vld [vmem:[%s28611_s8 + $0x398] sm:$0xff]   ;;  %v21898_v12 = vld [vmem:[%s28611_s8 + $0x3e0] sm:$0xff]   ;;  %v21903_v7 = vld [vmem:[%s28611_s8 + $0x3a8] sm:$0xff]  }
0x10f0   : > { %v13758_v23 = vsel %vm13747_vm10, %v20801_v17, %v20795_v48  ;;  %v13759_v54 = vsel %vm13747_vm10, %v20795_v48, %v20796_v28  ;;  %v13800_v55 = vmax.f32 %v13701_v51, %v20796_v28  ;;  %18276 = vmatprep.subr.bf16.mxu1 %v21877_v62  ;;  %v21896_v62 = vld [vmem:[%s28611_s8 + $0xd0] sm:$0xff]   ;;  %v21900_v51 = vld [vmem:[%s28611_s8 + $0x3a0] sm:$0xff]   ;;  %v14102_v17 = vrot.slane %v28129_v5, 4  ;;  %v21901_v28 = vld [vmem:[%s28611_s8 + $0x3e8] sm:$0xff]  }
0x10f1   : > { %v13798_v14 = vmax.f32 %v13699_v26, %v13758_v23  ;;  %v20804_v3 = vpop.permute.xlu0 %20803  ;;  %v13799_v31 = vmax.f32 %v13700_v44, %v13759_v54  ;;  %v13742_v4 = vpop.permute.xlu1 %13741  ;;  %v21902_v48 = vld [vmem:[%s28611_s8 + $0x120] sm:$0xff]   ;;  %v21904_v5 = vld [vmem:[%s28611_s8 + $0x3f0] sm:$0xff]   ;;  %v21905_v26 = vld [vmem:[%s28611_s8 + $0x128] sm:$0xff]   ;;  %v14104_v23 = vrot.slane %v28127_v37, 4 }
0x10f2   : > { %v28210_v47 = vpack.c.bf16 %v13800_v55, %v13797_v60  ;;  %v20806_v29 = vunpack.i.h.bf16 %v20804_v3  ;;  %v20805_v18 = vunpack.i.l.bf16 %v20804_v3  ;;  %v21906_v44 = vld [vmem:[%s28611_s8 + $0x3b0] sm:$0xff]   ;;  %v21910_v54 = vld [vmem:[%s28611_s8 + $0x3b8] sm:$0xff]   ;;  %v21917_v3 = vld [vmem:[%s28611_s8 + $0x140] sm:$0xff]  }
0x10f3   : > { %v28212_v27 = vpack.c.bf16 %v13798_v14, %v13795_v19  ;;  %18277 = vmatpush3.bf16.msra.mxu1 %v21879_v11  ;;  %v28214_v2 = vpack.c.bf16 %v13799_v31, %v13796_v41  ;;  %v21907_v59 = vld [vmem:[%s28611_s8 + $0x170] sm:$0xff]   ;;  %v21908_v11 = vld [vmem:[%s28611_s8 + $0x3f8] sm:$0xff]   ;;  %v21914_v19 = vld [vmem:[%s28611_s8 + $0x3c0] sm:$0xff]  }
0x10f4   : > { %v13704_v25 = vmax.f32 %v28080_v8, %v20806_v29  ;;  %v13661_v33 = vsel %vm13648_vm9, %v13643_v6, %v20805_v18  ;;  %18278 = vmatprep.subr.bf16.mxu1 %v21881_v36  ;;  %v21885_v8 = vld [vmem:[%s28611_s8 + $0xb8] sm:$0xff]   ;;  %v13662_v42 = vsel %vm13648_vm9, %v20805_v18, %v20806_v29  ;;  %v21909_v60 = vld [vmem:[%s28611_s8 + $0x130] sm:$0xff]   ;;  %v21912_v36 = vld [vmem:[%s28611_s8 + $0x400] sm:$0xff]  }
0x10f5   : > { %v13702_v57 = vmax.f32 %v27983_v32, %v13661_v33  ;;  %14975 = vmatprep.mubr.bf16.mxu0 %v28214_v2  ;;  %v20809_v61 = vpop.permute.xlu0 %20808  ;;  %v13703_v16 = vmax.f32 %v27985_v30, %v13662_v42  ;;  %v21895_v30 = vld [vmem:[%s28611_s8 + $0x3d8] sm:$0xff]   ;;  %v21915_v14 = vld [vmem:[%s28611_s8 + $0x180] sm:$0xff]   ;;  %v21916_v6 = vld [vmem:[%s28611_s8 + $0x408] sm:$0xff]   ;;  %v14585_v42 = vrot.slane %v28174_v43, 4 }
0x10f6   : > { %v20811_v35 = vunpack.i.h.bf16 %v20809_v61  ;;  %v20810_v56 = vunpack.i.l.bf16 %v20809_v61  ;;  %14976 = vmatmul.mubr.bf16.vlgmr.msra.gmra.mrb[8].mxu0 %v28212_v27  ;;  %v21911_v55 = vld [vmem:[%s28611_s8 + $0x178] sm:$0xff]   ;;  %v21918_v41 = vld [vmem:[%s28611_s8 + $0x3c8] sm:$0xff]   ;;  %v21921_v18 = vld [vmem:[%s28611_s8 + $0x190] sm:$0xff]  }
0x10f7   : > { %18279 = vmatpush3.bf16.msra.mxu1 %v21882_v22  ;;  %19081 = vmatpush3.bf16.msra.mxu0 %v21883_v46  ;;  %v21913_v37 = vld [vmem:[%s28611_s8 + $0x138] sm:$0xff]   ;;  %v21919_v31 = vld [vmem:[%s28611_s8 + $0x188] sm:$0xff]   ;;  %v21922_v46 = vld [vmem:[%s28611_s8 + $0x150] sm:$0xff]  }
0x10f8   : > { %v13760_v32 = vsel %vm13747_vm10, %v13742_v4, %v20810_v56  ;;  %v28237_v39 = vmax.f32 %v13704_v25, %v20811_v35  ;;  %18280 = vmatprep.subr.bf16.mxu1 %v21884_v49  ;;  %19082 = vmatprep.subr.bf16.mxu0 %v29053_v24  ;;  %v13761_v20 = vsel %vm13747_vm10, %v20810_v56, %v20811_v35  ;;  %v21920_v29 = vld [vmem:[%s28611_s8 + $0x148] sm:$0xff]   ;;  %v21923_v25 = vld [vmem:[%s28611_s8 + $0x198] sm:$0xff]   ;;  %v21925_v49 = vld [vmem:[%s28611_s8 + $0x1a0] sm:$0xff]  }
0x10f9   : > { %v28244_v21 = vmax.f32 %v13702_v57, %v13760_v32  ;;  %19086 = vmatprep.mubr.msk.bf16.mxu0 %vm22046_vm3, %v29053_v24  ;;  %v13802_v40 = vmax.f32 %v13703_v16, %v13761_v20  ;;  %v21924_v33 = vld [vmem:[%s28611_s8 + $0x158] sm:$0xff]   ;;  %v21926_v57 = vld [vmem:[%s28611_s8 + $0x160] sm:$0xff]   ;;  %v21927_v61 = vld [vmem:[%s28611_s8 + $0x1a8] sm:$0xff]  }
0x10fa   : > { %v21928_v35 = vld [vmem:[%s28611_s8 + $0x168] sm:$0xff]   ;;  %v21929_v56 = vld [vmem:[%s28611_s8 + $0x1b0] sm:$0xff]   ;;  %v21930_v4 = vld [vmem:[%s28611_s8 + $0x1b8] sm:$0xff]  }
0x10fb   : > { %18281 = vmatpush3.bf16.msra.mxu1 %v21885_v8  ;;  %19083 = vmatpush3.bf16.msra.mxu0 %v21886_v1  ;;  %v13814_v15 = vpack.c.bf16 %v13802_v40, %v13802_v40  ;;  %v13813_v22 = vpack.c.bf16 %v28244_v21, %v28244_v21  ;;  %v21931_v8 = vld [vmem:[%s28611_s8 + $0x1c0] sm:$0xff]   ;;  %v21932_v1 = vld [vmem:[%s28611_s8 + $0x208] sm:$0xff]   ;;  %v21935_v21 = vld [vmem:[%s28611_s8 + $0x1d0] sm:$0xff]  }
0x10fc   : > { %18282 = vmatprep.subr.bf16.mxu1 %v21887_v53  ;;  %19084 = vmatprep.subr.bf16.mxu0 %v29053_v24  ;;  %v21933_v32 = vld [vmem:[%s28611_s8 + $0x1c8] sm:$0xff]   ;;  %v21934_v53 = vld [vmem:[%s28611_s8 + $0x210] sm:$0xff]   ;;  %v21939_v20 = vld [vmem:[%s28611_s8 + $0x1e0] sm:$0xff]  }
0x10fd   : > { %v21942_v16 = vld [vmem:[%s28611_s8 + $0x230] sm:$0xff]  }
0x10fe   : > { %v21943_v40 = vld [vmem:[%s28611_s8 + $0x1f0] sm:$0xff]  }
0x10ff   : > { %18283 = vmatpush3.bf16.msra.mxu1 %v21888_v0  ;;  %19085 = vmatpush3.bf16.msra.mxu0 %v21889_v10  ;;  %v21936_v0 = vld [vmem:[%s28611_s8 + $0x218] sm:$0xff]  }
0x1100   : > { %18284 = vmatprep.subr.bf16.mxu1 %v21890_v52  ;;  %18402 = vmatprep.subr.bf16.mxu0 %v21891_v34  ;;  %v21937_v10 = vld [vmem:[%s28611_s8 + $0x1d8] sm:$0xff]   ;;  %v21940_v52 = vld [vmem:[%s28611_s8 + $0x228] sm:$0xff]  }
0x1101   : > { %v21941_v34 = vld [vmem:[%s28611_s8 + $0x1e8] sm:$0xff]  }
0x1102   : > { %19087 = vmatmul.mubr.msk.bf16.vlgmr.msra.gmra.mrb[12].mxu0 %vm13969_vm11, %v28210_v47 }
0x1103   : > { %18285 = vmatpush3.bf16.msra.mxu1 %v21892_v63  ;;  %18403 = vmatpush3.bf16.msra.mxu0 %v21893_v13  ;;  %v21944_v63 = vld [vmem:[%s28611_s8 + $0x238] sm:$0xff]  }
0x1104   : > { %15457 = vmatprep.mubr.bf16.mxu0 %v13814_v15  ;;  %18286 = vmatprep.subr.bf16.mxu1 %v21894_v38  ;;  %v21945_v13 = vld [vmem:[%s28611_s8 + $0x1f8] sm:$0xff]   ;;  %v21946_v38 = vld [vmem:[%s28611_s8 + $0x240] sm:$0xff]   ;;  %v21948_v15 = vld [vmem:[%s28611_s8 + $0x248] sm:$0xff]  }
0x1105   : > { %18404 = vmatprep.subr.bf16.mxu0 %v21895_v30  ;;  %v21947_v30 = vld [vmem:[%s28611_s8 + $0x200] sm:$0xff]  }
0x1107   : > { %18287 = vmatpush3.bf16.msra.mxu1 %v21896_v62  ;;  %18405 = vmatpush3.bf16.msra.mxu0 %v21897_v9  ;;  %v14584_v62 = vrot.slane %v28169_v58, 4  ;;  %v21949_v9 = vld [vmem:[%s28611_s8 + $0x250] sm:$0xff]  }
0x1108   : > { %19050 = vmatprep.subr.bf16.mxu1 %v29053_v24  ;;  %18406 = vmatprep.subr.bf16.mxu0 %v21898_v12  ;;  %v21950_v12 = vld [vmem:[%s28611_s8 + $0x258] sm:$0xff]  }
0x110a   : > { %14257 = vmatmul.mubr.bf16.vlgmr.msra.gmra.mrb[212].mxu1 %v14102_v17  ;;  %v21953_v17 = vld [vmem:[%s28611_s8 + $0x340] sm:$0xff]  }
0x110b   : > { %19051 = vmatpush3.bf16.msra.mxu1 %v21899_v50  ;;  %18407 = vmatpush3.bf16.msra.mxu0 %v21900_v51  ;;  %v21952_v50 = vld [vmem:[%s28611_s8 + $0x2f8] sm:$0xff]   ;;  %v14586_v51 = vrot.slane %v28167_v45, 4 }
0x110c   : > { %19052 = vmatprep.subr.bf16.mxu1 %v29053_v24  ;;  %18408 = vmatprep.subr.bf16.mxu0 %v21901_v28  ;;  %v15067_v28 = vrot.slane %v28214_v2, 4  ;;  %v21957_v2 = vld [vmem:[%s28611_s8 + $0x350] sm:$0xff]  }
0x110d   : > { %19056 = vmatprep.mubr.msk.bf16.mxu1 %vm22046_vm3, %v29053_v24 }
0x110f   : > { %19053 = vmatpush3.bf16.msra.mxu1 %v21902_v48  ;;  %18409 = vmatpush3.bf16.msra.mxu0 %v21903_v7  ;;  %v21954_v48 = vld [vmem:[%s28611_s8 + $0x300] sm:$0xff]   ;;  %v21956_v7 = vld [vmem:[%s28611_s8 + $0x308] sm:$0xff]  }
0x1110   : > { %19054 = vmatprep.subr.bf16.mxu1 %v29053_v24  ;;  %18410 = vmatprep.subr.bf16.mxu0 %v21904_v5  ;;  %v21958_v5 = vld [vmem:[%s28611_s8 + $0x310] sm:$0xff]  }
0x1113   : > { %19055 = vmatpush3.bf16.msra.mxu1 %v21905_v26  ;;  %18411 = vmatpush3.bf16.msra.mxu0 %v21906_v44  ;;  %v21959_v26 = vld [vmem:[%s28611_s8 + $0x358] sm:$0xff]  }
0x1114   : > { %18298 = vmatprep.subr.bf16.mxu1 %v21907_v59  ;;  %18412 = vmatprep.subr.bf16.mxu0 %v21908_v11  ;;  %v21960_v44 = vld [vmem:[%s28611_s8 + $0x318] sm:$0xff]   ;;  %v21961_v59 = vld [vmem:[%s28611_s8 + $0x360] sm:$0xff]  }
0x1115   : > { %v21962_v11 = vld [vmem:[%s28611_s8 + $0x320] sm:$0xff]  }
0x1116   : > { %19057 = vmatmul.mubr.msk.bf16.vlgmr.msra.gmra.mrb[208].mxu1 %vm13969_vm11, %v14104_v23  ;;  %v21964_v23 = vld [vmem:[%s28611_s8 + $0x328] sm:$0xff]  }
0x1117   : > { %18299 = vmatpush3.bf16.msra.mxu1 %v21909_v60  ;;  %14493 = vmatprep.mubr.bf16.mxu1 %v28174_v43  ;;  %v21938_v43 = vld [vmem:[%s28611_s8 + $0x220] sm:$0xff]   ;;  %v21963_v60 = vld [vmem:[%s28611_s8 + $0x368] sm:$0xff]  }
0x1118   : > { %18413 = vmatpush3.bf16.msra.mxu0 %v21910_v54  ;;  %18300 = vmatprep.subr.bf16.mxu1 %v21911_v55  ;;  %v21965_v54 = vld [vmem:[%s28611_s8 + $0x370] sm:$0xff]  }
0x1119   : > { %18414 = vmatprep.subr.bf16.mxu0 %v21912_v36  ;;  %v21966_v55 = vld [vmem:[%s28611_s8 + $0x330] sm:$0xff]   ;;  %v21967_v36 = vld [vmem:[%s28611_s8 + $0x378] sm:$0xff]  }
0x111b   : > { %18301 = vmatpush3.bf16.msra.mxu1 %v21913_v37  ;;  %v15066_v37 = vrot.slane %v28212_v27, 4  ;;  %v21970_v27 = vld [vmem:[%s28611_s8 + $0x410] sm:$0xff]  }
0x111c   : > { %18415 = vmatpush3.bf16.msra.mxu0 %v21914_v19  ;;  %18302 = vmatprep.subr.bf16.mxu1 %v21915_v14  ;;  %v21968_v19 = vld [vmem:[%s28611_s8 + $0x380] sm:$0xff]   ;;  %v21969_v14 = vld [vmem:[%s28611_s8 + $0x388] sm:$0xff]  }
0x111d   : > { %18416 = vmatprep.subr.bf16.mxu0 %v21916_v6  ;;  %v15068_v6 = vrot.slane %v28210_v47, 4  ;;  %v13815_v47 = vpack.c.bf16 %v28237_v39, %v28237_v39  ;;  %v17224_v39 = vld [vmem:[%s28612_s9] ss:$0 sm:$0xff] }
0x111f   : > { %18303 = vmatpush3.bf16.msra.mxu1 %v21917_v3  ;;  %v21971_v3 = vld [vmem:[%s28611_s8 + $0x418] sm:$0xff]  }
0x1120   : > { %18417 = vmatpush3.bf16.msra.mxu0 %v21918_v41  ;;  %18304 = vmatprep.subr.bf16.mxu1 %v21919_v31  ;;  %v21972_v41 = vld [vmem:[%s28611_s8 + $0x420] sm:$0xff]  }
0x1123   : > { %15458 = vmatmul.mubr.bf16.vlgmr.msra.gmra.mrb[16].mxu0 %v13813_v22  ;;  %18305 = vmatpush3.bf16.msra.mxu1 %v21920_v29 }
0x1124   : > { %18306 = vmatprep.subr.bf16.mxu1 %v21921_v18 }
0x1127   : > { %18307 = vmatpush3.bf16.msra.mxu1 %v21922_v46 }
0x1128   : > { %18308 = vmatprep.subr.bf16.mxu1 %v21923_v25 }
0x112b   : > { %18309 = vmatpush3.bf16.msra.mxu1 %v21924_v33 }
0x112c   : > { %18310 = vmatprep.subr.bf16.mxu1 %v21925_v49 }
0x112f   : > { %18311 = vmatpush3.bf16.msra.mxu1 %v21926_v57 }
0x1130   : > { %18312 = vmatprep.subr.bf16.mxu1 %v21927_v61 }
0x1133   : > { %18313 = vmatpush3.bf16.msra.mxu1 %v21928_v35 }
0x1134   : > { %19060 = vmatprep.subr.bf16.mxu1 %v29053_v24 }
0x1136   : > { %14494 = vmatmul.mubr.bf16.vlgmr.msra.gmra.mrb[216].mxu1 %v28169_v58  ;;  %v21951_v58 = vld [vmem:[%s28611_s8 + $0x338] sm:$0xff]  }
0x1137   : > { %19061 = vmatpush3.bf16.msra.mxu1 %v21929_v56  ;;  %19066 = vmatprep.mubr.msk.bf16.mxu1 %vm22046_vm3, %v29053_v24 }
0x1138   : > { %19062 = vmatprep.subr.bf16.mxu1 %v29053_v24 }
0x113b   : > { %19063 = vmatpush3.bf16.msra.mxu1 %v21930_v4 }
0x113c   : > { %19064 = vmatprep.subr.bf16.mxu1 %v29053_v24 }
0x113f   : > { %19065 = vmatpush3.bf16.msra.mxu1 %v21931_v8 }
0x1140   : > { %18324 = vmatprep.subr.bf16.mxu1 %v21932_v1 }
0x1142   : > { %19067 = vmatmul.mubr.msk.bf16.vlgmr.msra.gmra.mrb[208].mxu1 %vm13969_vm11, %v28167_v45  ;;  %v21955_v45 = vld [vmem:[%s28611_s8 + $0x348] sm:$0xff]  }
0x1143   : > { %18325 = vmatpush3.bf16.msra.mxu1 %v21933_v32  ;;  %14738 = vmatprep.mubr.bf16.mxu1 %v14585_v42 }
0x1144   : > { %18326 = vmatprep.subr.bf16.mxu1 %v21934_v53 }
0x1147   : > { %18327 = vmatpush3.bf16.msra.mxu1 %v21935_v21 }
0x1148   : > { %18328 = vmatprep.subr.bf16.mxu1 %v21936_v0 }
0x114b   : > { %18329 = vmatpush3.bf16.msra.mxu1 %v21937_v10 }
0x114c   : > { %18330 = vmatprep.subr.bf16.mxu1 %v21938_v43 }
0x114f   : > { %18331 = vmatpush3.bf16.msra.mxu1 %v21939_v20 }
0x1150   : > { %18332 = vmatprep.subr.bf16.mxu1 %v21940_v52 }
0x1153   : > { %18333 = vmatpush3.bf16.msra.mxu1 %v21941_v34 }
0x1154   : > { %18334 = vmatprep.subr.bf16.mxu1 %v21942_v16 }
0x1157   : > { %18335 = vmatpush3.bf16.msra.mxu1 %v21943_v40 }
0x1158   : > { %18336 = vmatprep.subr.bf16.mxu1 %v21944_v63 }
0x115b   : > { %18337 = vmatpush3.bf16.msra.mxu1 %v21945_v13 }
0x115c   : > { %18338 = vmatprep.subr.bf16.mxu1 %v21946_v38 }
0x115f   : > { %18339 = vmatpush3.bf16.msra.mxu1 %v21947_v30 }
0x1160   : > { %19070 = vmatprep.subr.bf16.mxu1 %v29053_v24 }
0x1162   : > { %14739 = vmatmul.mubr.bf16.vlgmr.msra.gmra.mrb[220].mxu1 %v14584_v62 }
0x1163   : > { %19071 = vmatpush3.bf16.msra.mxu1 %v21948_v15  ;;  %19076 = vmatprep.mubr.msk.bf16.mxu1 %vm22046_vm3, %v29053_v24 }
0x1164   : > { %19072 = vmatprep.subr.bf16.mxu1 %v29053_v24 }
0x1167   : > { %19073 = vmatpush3.bf16.msra.mxu1 %v21949_v9 }
0x1168   : > { %19074 = vmatprep.subr.bf16.mxu1 %v29053_v24 }
0x116b   : > { %19075 = vmatpush3.bf16.msra.mxu1 %v21950_v12 }
0x116c   : > { %18376 = vmatprep.subr.bf16.mxu1 %v21951_v58 }
0x116e   : > { %19077 = vmatmul.mubr.msk.bf16.vlgmr.msra.gmra.mrb[208].mxu1 %vm13969_vm11, %v14586_v51 }
0x116f   : > { %18377 = vmatpush3.bf16.msra.mxu1 %v21952_v50  ;;  %15220 = vmatprep.mubr.bf16.mxu1 %v15067_v28 }
0x1170   : > { %18378 = vmatprep.subr.bf16.mxu1 %v21953_v17 }
0x1173   : > { %18379 = vmatpush3.bf16.msra.mxu1 %v21954_v48 }
0x1174   : > { %18380 = vmatprep.subr.bf16.mxu1 %v21955_v45 }
0x1177   : > { %18381 = vmatpush3.bf16.msra.mxu1 %v21956_v7 }
0x1178   : > { %18382 = vmatprep.subr.bf16.mxu1 %v21957_v2 }
0x117b   : > { %18383 = vmatpush3.bf16.msra.mxu1 %v21958_v5 }
0x117c   : > { %18384 = vmatprep.subr.bf16.mxu1 %v21959_v26 }
0x117f   : > { %18385 = vmatpush3.bf16.msra.mxu1 %v21960_v44 }
0x1180   : > { %18386 = vmatprep.subr.bf16.mxu1 %v21961_v59 }
0x1183   : > { %18387 = vmatpush3.bf16.msra.mxu1 %v21962_v11 }
0x1184   : > { %18388 = vmatprep.subr.bf16.mxu1 %v21963_v60 }
0x1187   : > { %18389 = vmatpush3.bf16.msra.mxu1 %v21964_v23 }
0x1188   : > { %18390 = vmatprep.subr.bf16.mxu1 %v21965_v54 }
0x118b   : > { %18391 = vmatpush3.bf16.msra.mxu1 %v21966_v55 }
0x118c   : > { %19090 = vmatprep.subr.bf16.mxu1 %v29053_v24 }
0x118e   : > { %15221 = vmatmul.mubr.bf16.vlgmr.msra.gmra.mrb[224].mxu1 %v15066_v37 }
0x118f   : > { %19091 = vmatpush3.bf16.msra.mxu1 %v21967_v36  ;;  %19096 = vmatprep.mubr.msk.bf16.mxu1 %vm22046_vm3, %v29053_v24 }
0x1190   : > { %19092 = vmatprep.subr.bf16.mxu1 %v29053_v24 }
0x1193   : > { %19093 = vmatpush3.bf16.msra.mxu1 %v21968_v19 }
0x1194   : > { %19094 = vmatprep.subr.bf16.mxu1 %v29053_v24 }
0x1197   : > { %19095 = vmatpush3.bf16.msra.mxu1 %v21969_v14 }
0x1198   : > { %19100 = vmatprep.subr.bf16.mxu1 %v29053_v24 }
0x119a   : > { %19097 = vmatmul.mubr.msk.bf16.vlgmr.msra.gmra.mrb[228].mxu1 %vm13969_vm11, %v15068_v6 }
0x119b   : > { %19101 = vmatpush3.bf16.msra.mxu1 %v21970_v27  ;;  %19106 = vmatprep.mubr.msk.bf16.mxu1 %vm22046_vm3, %v29053_v24 }
0x119c   : > { %19102 = vmatprep.subr.bf16.mxu1 %v29053_v24 }
0x119f   : > { %19103 = vmatpush3.bf16.msra.mxu1 %v21971_v3 }
0x11a0   : > { %19104 = vmatprep.subr.bf16.mxu1 %v29053_v24 }
0x11a3   : > { %19105 = vmatpush3.bf16.msra.mxu1 %v21972_v41 }
0x11a6   : > { %19107 = vmatmul.mubr.msk.bf16.vlgmr.msra.gmra.mrb[228].mxu1 %vm13969_vm11, %v13815_v47 }
0x11b1   : > { %v18262_v31 = vpop.f32.mrb[204].mxu1 }
0x11b2   : > { %v18263_v29 = vpop.f32.mrb[205].mxu1 }
0x11b3   : > { %v18264_v18 = vadd.f32 %v18263_v29, %v18262_v31  ;;  %v18265_v22 = vpop.f32.mrb[206].mxu1 }
0x11b4   : > { %v18266_v46 = vpop.f32.mrb[207].mxu1 }
0x11b5   : > { %v19362_v32 = vadd.f32 %v18264_v18, %v17224_v39 }
0x11c9   : > { %v18366_v25 = vpop.f32.mrb[8].mxu0 }
0x11ca   : > { %v18367_v33 = vpop.f32.mrb[9].mxu0 }
0x11cb   : > { %v18368_v49 = vadd.f32 %v18367_v33, %v18366_v25  ;;  %v18369_v57 = vpop.f32.mrb[10].mxu0 }
0x11cc   : > { %v18370_v61 = vpop.f32.mrb[11].mxu0 }
0x11d5   : > { %v15017_v35 = vpop.f32.mrb[12].mxu0 }
0x11d6   : > { %v19088_v56 = vpop.f32.mrb[13].mxu0 }
0x11d7   : > { %v15020_v4 = vpop.f32.mrb[14].mxu0 }
0x11d8   : > { %v19089_v24 = vpop.f32.mrb[15].mxu0 }
0x11dd   : > { %v18288_v8 = vpop.f32.mrb[212].mxu1 }
0x11de   : > { %v18289_v1 = vpop.f32.mrb[213].mxu1 }
0x11df   : > { %v18290_v53 = vadd.f32 %v18289_v1, %v18288_v8  ;;  %v18291_v42 = vpop.f32.mrb[214].mxu1 }
0x11e0   : > { %v18292_v21 = vpop.f32.mrb[215].mxu1 }
0x11e1   : > { %v19363_v0 = vadd.f32 %v19362_v32, %v18290_v53 }
0x11f6   : > { %v18418_v10 = vpop.f32.mrb[16].mxu0 }
0x11f7   : > { %v18419_v43 = vpop.f32.mrb[17].mxu0 }
0x11f8   : > { %v18420_v20 = vadd.f32 %v18419_v43, %v18418_v10  ;;  %v18421_v52 = vpop.f32.mrb[18].mxu0 }
0x11f9   : > { %v18422_v34 = vpop.f32.mrb[19].mxu0 }
0x1209   : > { %v18314_v16 = vpop.f32.mrb[216].mxu1 }
0x120a   : > { %v18315_v40 = vpop.f32.mrb[217].mxu1 }
0x120b   : > { %v18316_v63 = vadd.f32 %v18315_v40, %v18314_v16  ;;  %v18317_v13 = vpop.f32.mrb[218].mxu1 }
0x120c   : > { %v18318_v38 = vpop.f32.mrb[219].mxu1 }
0x120d   : > { %v19364_v30 = vadd.f32 %v19363_v0, %v18316_v63 }
0x1235   : > { %v18340_v15 = vpop.f32.mrb[220].mxu1 }
0x1236   : > { %v18341_v62 = vpop.f32.mrb[221].mxu1 }
0x1237   : > { %v18342_v9 = vadd.f32 %v18341_v62, %v18340_v15  ;;  %v18343_v12 = vpop.f32.mrb[222].mxu1 }
0x1238   : > { %v18344_v58 = vpop.f32.mrb[223].mxu1 }
0x1239   : > { %v19365_v50 = vadd.f32 %v19364_v30, %v18342_v9 }
0x1241   : > { %v14780_v51 = vpop.f32.mrb[208].mxu1 }
0x1242   : > { %v19366_v17 = vadd.f32 %v19365_v50, %v14780_v51  ;;  %v19078_v28 = vpop.f32.mrb[209].mxu1 }
0x1243   : > { %v14783_v48 = vpop.f32.mrb[210].mxu1 }
0x1244   : > { %v19367_v45 = vadd.f32 %v19366_v17, %v18368_v49  ;;  %v19079_v7 = vpop.f32.mrb[211].mxu1 }
0x1246   : > { %v19368_v2 = vadd.f32 %v19367_v45, %v15017_v35 }
0x1261   : > { %v18392_v5 = vpop.f32.mrb[224].mxu1 }
0x1262   : > { %v18393_v26 = vpop.f32.mrb[225].mxu1 }
0x1263   : > { %v18394_v44 = vadd.f32 %v18393_v26, %v18392_v5  ;;  %v18395_v59 = vpop.f32.mrb[226].mxu1 }
0x1264   : > { %v18396_v11 = vpop.f32.mrb[227].mxu1 }
0x1265   : > { %v19369_v60 = vadd.f32 %v19368_v2, %v18394_v44 }
0x1267   : > { %v19370_v23 = vadd.f32 %v19369_v60, %v18420_v20 }
0x1279   : > { %v15499_v54 = vpop.f32.mrb[228].mxu1 }
0x127a   : > { %v19371_v55 = vadd.f32 %v19370_v23, %v15499_v54  ;;  %v19108_v36 = vpop.f32.mrb[229].mxu1 }
0x127b   : > { %v15502_v37 = vpop.f32.mrb[230].mxu1 }
0x127c   : > { %v19109_v19 = vpop.f32.mrb[231].mxu1  ;;  %15506 = vmax.xlane.f32.xlu0 %v19371_v55 }
0x1309   : > { %v15507_v14 = vpop.xlane.xlu0 %15506 }
0x130a   : > { %v15508_v27 = vsub.f32 %v19371_v55, %v15507_v14 }
0x130c   : > { %v15509_v6 = vmul.f32 1.442695, %v15508_v27 }
0x130e   : > { %21973 = vpow2.f32 %v15509_v6 }
0x1318   : > { %v21974_v3 = vpop.eup %21973 }
0x1319   : > { %15511 = vadd.xlane.f32.xlu1 %v21974_v3 }
0x13a6   : > { %v15512_v41 = vpop.xlane.xlu1 %15511 }
0x13a7   : > { %21975 = vrcp.f32 %v15512_v41 }
0x13b1   : > { %v21976_v47 = vpop.eup %21975 }
0x13b2   : > { %v15514_v31 = vmul.f32 %v21976_v47, %v21974_v3 }
0x13b4   : > { %15515 = vst [vmem:[%s353_s21] sm:$0xff] %v15514_v31 }
0x13b5   : > { %21993 = shalt.err (!%p21990_p3)
}
0x13b6   : > { %s21994_s12 = scalar_lea.hbm %s28561_s27, 128  ;;  %s21998_s28 = scalar_lea.hbm %s28613_s10, 256 }
0x13b7   : > { %p21995_p4 = scmp.ne.s32.totalorder %s28561_s27, %s21994_s12  ;;  %p21999_p9 = scmp.lt.u32.totalorder %s28561_s27, %s28613_s10 }
0x13b8   : > { %p22000_p10 = scmp.lt.u32.totalorder %s21998_s28, %s21994_s12  ;;  %p22002_p12 = scmp.lt.u32.totalorder %s21994_s12, %s28561_s27 }
0x13b9   : > { %p21996_p7 = pnand %p21995_p4, %p22143_p5 }
0x13ba   : > { %p22001_p11 = por %p22000_p10, %p21999_p9 }
0x13bb   : > { %p21997_p8 = pneg %p21996_p7 }
0x13bc   : > { %p22003_p13 = por %p22002_p12, %p22001_p11 }
0x13be   : > { %p22004_p0 = pnand %p22003_p13, %p21997_p8 }
0x13c0   : > { %22007 = shalt.err (!%p22004_p0)
}
0x13c1   : > { %20668 = dma.vmem_to_hbm [thread:$0]  (%p22143_p5), %s28563_s25, 128, %s28561_s27, %s15517_s11  }
0x13c2 PF: > { %p20674_p1 = scmp.ge.s32.totalorder %s22042_s16, 2  ;;  %s15542_s29 = sand.u32 1, %s22030_s13  }
0x13c3   : > { %s15543_s30 = scalar_lea.sflag [#allocation3], %s15542_s29 }
0x13c4   : > { %p20671_p2 = pnand %p20674_p1, %p22147_p6 }
0x13c6   : > { %22025 = dma.done.wait (!%p20671_p2), %s15543_s30, 128  }
0x13c7   : > { %22027 = vsyncadd (!%p20671_p2), %s15543_s30, 4294967168  ;;  %p20_p3 = scmp.ge.s32.totalorder %s22130_s19, 4   ;;  %s29054_s13 = smov %s22034_s14 }
0x13c8   : > { %s29055_s14 = smov %s22038_s15  ;;  %s29056_s15 = smov %s22141_s22 }
0x13c9   : > { %s29057_s16 = smov %s22130_s19  ;;  %22 = sbr.rel (!%p20_p3) target bundleno = 3 (0x3), region = 109 }
0x13d0   :  { %15548 = vsyncpa [#allocation3], 1 }
0x13d1   :  { %15550 = vsyncpa [#allocation3 + $0x1], 1 }

</bundles_post_ra>
